<compile_context>
chip_gen: v5e
topology: v5e:2x2
jax: 0.10.0
libtpu: 0.0.40
codegen_flags: <defaults>
</compile_context>

<pallas_src>
import functools

import jax
import jax.numpy as jnp
from jax.experimental import pallas as pl
from jax.experimental.pallas import tpu as pltpu


def _mm(a, w_bf16):
    """MXU matmul: activation cast to bf16 (weight already stored bf16), f32 accumulate."""
    return jnp.dot(a.astype(jnp.bfloat16), w_bf16, preferred_element_type=jnp.float32)


# ----------------------------------------------------------------------------
# Kernel 1 (hoisted precompute, once per sequence of decode steps):
#   ctx_all  = att @ [w_ctx_0 | ... | w_ctx_{L-1}]  + (b_ctx + b_h) per layer
#   fc_feats = att.mean(axis=1)
# ----------------------------------------------------------------------------
def _precompute_kernel(att_ref, w_ctx_ref, b_ctx_ref, ctx_ref, fc_ref):
    att = att_ref[...]                                   # (bt, L, R) f32
    bt, L, R = att.shape
    ctx = _mm(att.reshape(bt * L, R), w_ctx_ref[...])    # one wide bf16 MXU matmul
    ctx_ref[...] = (ctx + b_ctx_ref[...]).reshape(bt, L, -1)
    fc_ref[...] = jnp.mean(att, axis=1)                  # (bt, R)


def precompute_ctx(att_feats, w_ctx_all, b_ctx_all, *, batch_tile, vmem_limit):
    B, L, R = att_feats.shape
    NLA = w_ctx_all.shape[-1]
    assert B % batch_tile == 0
    nb = B // batch_tile
    return pl.pallas_call(
        _precompute_kernel,
        grid=(nb,),
        in_specs=[
            pl.BlockSpec((batch_tile, L, R), lambda b: (b, 0, 0)),
            pl.BlockSpec((R, NLA), lambda b: (0, 0)),        # resident bf16 weight
            pl.BlockSpec((1, NLA), lambda b: (0, 0)),
        ],
        out_specs=(
            pl.BlockSpec((batch_tile, L, NLA), lambda b: (b, 0, 0)),
            pl.BlockSpec((batch_tile, R), lambda b: (b, 0)),
        ),
        out_shape=(jax.ShapeDtypeStruct((B, L, NLA), jnp.float32),
                   jax.ShapeDtypeStruct((B, R), jnp.float32)),
        compiler_params=pltpu.CompilerParams(
            dimension_semantics=("parallel",),
            vmem_limit_bytes=vmem_limit),
    )(att_feats, w_ctx_all, b_ctx_all)


# ----------------------------------------------------------------------------
# Kernel 2 (one per decode step, fully fused):
#   grid = (batch tiles [parallel], vocab tiles [arbitrary])
#   ov==0   : soft attention + P parallel LSTM cells for every layer (state resident)
#   every ov: vocab-tiled proj / proj_weight matmuls + online log-sum-exp
#   last ov : write normalized log-softmax (full lane-dense slab)
# ----------------------------------------------------------------------------
def _step_kernel(x_ref, c_ref, h_ref, att_ref, ctx_ref, fc_ref,
                 w_h_ref, w_alpha_ref, w_big_ref, b_big_ref,
                 wp_ref, bp_ref, wpw_ref, bpw_ref,
                 nc_ref, nh_ref, logsoft_ref, projw_ref,
                 z_scr, m_scr, l_scr,
                 *, num_layers, num_parallels, rnn_size, att_size, input_size,
                 tile_o):
    ov = pl.program_id(1)
    n_ov = pl.num_programs(1)
    R, I, P, A = rnn_size, input_size, num_parallels, att_size
    PR = P * R

    # ---------- phase 1 (once per batch tile): attention + stacked parallel LSTMs ----------
    @pl.when(ov == 0)
    def _():
        x = x_ref[...]
        att = att_ref[...]
        prev_top_h = None
        for i in range(num_layers):                       # static unroll over layers
            prev_c = c_ref[i]
            prev_h = h_ref[i]
            xt = x if i == 0 else x + prev_top_h

            # soft attention; ctx (+ folded b_ctx+b_h) was precomputed & hoisted.
            hp = _mm(prev_h, w_h_ref[i])                                  # (bt, A)
            pre = jnp.tanh(ctx_ref[:, :, i * A:(i + 1) * A] + hp[:, None, :])
            # alpha_net bias dropped: a constant added to all logits cancels in softmax.
            scores = jnp.sum(pre * w_alpha_ref[i], axis=-1)               # (bt, L)
            scores = scores - jnp.max(scores, axis=-1, keepdims=True)
            e = jnp.exp(scores)
            # NOTE: once VALU-bound at production L, the divide can move to the EUP
            # via pl.reciprocal(sum, approx=True); exact divide kept for numerics.
            wsm = e / jnp.sum(e, axis=-1, keepdims=True)
            # NOTE: at production L (~196) this weighted sum should become a bf16
            # MXU batched matvec; at L=16 the f32 VPU multiply+reduce is cheaper.
            att_res = jnp.sum(wsm[:, :, None] * att, axis=1)              # (bt, R)

            # P parallel LSTM cells: three accumulating matmuls against row blocks
            # of the fused gate-type-major weight (no activation concat / relayout).
            wb = w_big_ref[i]                                             # (I+2R, 4PR) bf16
            sums = (_mm(xt, wb[:I])
                    + _mm(prev_h, wb[I:I + R])
                    + _mm(att_res, wb[I + R:])
                    + b_big_ref[i])                                       # (bt, 4PR) f32
            bsz = sums.shape[0]
            sig = jax.nn.sigmoid(sums[:, :3 * PR])                        # all sigmoid gates
            i_g = sig[:, 0 * PR:1 * PR].reshape(bsz, P, R)
            f_g = sig[:, 1 * PR:2 * PR].reshape(bsz, P, R)
            o_g = sig[:, 2 * PR:3 * PR].reshape(bsz, P, R)
            g_g = jnp.tanh(sums[:, 3 * PR:]).reshape(bsz, P, R)
            nc_all = f_g * prev_c[:, None, :] + i_g * g_g                 # broadcast prev_c
            nh_all = o_g * jnp.tanh(nc_all)
            inv_p = 1.0 / P
            next_c = jnp.sum(nc_all, axis=1) * inv_p                      # reduce over P
            next_h = jnp.sum(nh_all, axis=1) * inv_p
            nc_ref[i] = next_c
            nh_ref[i] = next_h
            prev_top_h = next_h

        # init the online log-sum-exp state for this batch tile
        m_scr[...] = jnp.full(m_scr.shape, -jnp.inf, m_scr.dtype)
        l_scr[...] = jnp.zeros(l_scr.shape, l_scr.dtype)

    # ---------- phase 2 (every vocab tile): projection + online log-sum-exp ----------
    top_h = nh_ref[num_layers - 1]                         # resident VMEM output block
    pw = jax.nn.sigmoid(_mm(x_ref[...] + fc_ref[...], wpw_ref[...]) + bpw_ref[...])
    z = (_mm(top_h, wp_ref[...]) + bp_ref[...]) * pw       # (bt, tile_o) raw scaled logits
    projw_ref[...] = pw
    z_scr[ov] = z                                          # stash raw logits for this tile

    m_prev = m_scr[...]
    m_new = jnp.maximum(m_prev, jnp.max(z, axis=-1, keepdims=True))
    l_scr[...] = l_scr[...] * jnp.exp(m_prev - m_new) + jnp.sum(
        jnp.exp(z - m_new), axis=-1, keepdims=True)
    m_scr[...] = m_new

    @pl.when(ov == n_ov - 1)
    def _():
        norm = m_scr[...] + jnp.log(l_scr[...])
        for j in range(z_scr.shape[0]):                    # static, lane-aligned stores
            logsoft_ref[:, j * tile_o:(j + 1) * tile_o] = z_scr[j] - norm


def lstm_att_step(x, prev_c_all, prev_h_all, att_feats, ctx_all, fc_feats, params,
                  *, num_layers, num_parallels, rnn_size, att_size,
                  batch_tile, tile_o, vmem_limit):
    B, I = x.shape
    NL, _, R = prev_c_all.shape
    L = att_feats.shape[1]
    A = att_size
    NLA = NL * A
    O = params["wp"].shape[-1]
    assert B % batch_tile == 0 and O % tile_o == 0
    nb = B // batch_tile
    n_ov = O // tile_o

    kernel = functools.partial(
        _step_kernel, num_layers=num_layers, num_parallels=num_parallels,
        rnn_size=rnn_size, att_size=att_size, input_size=I, tile_o=tile_o)

    batch2 = lambda b, ov: (b, 0)
    const3 = lambda b, ov: (0, 0, 0)

    return pl.pallas_call(
        kernel,
        grid=(nb, n_ov),
        in_specs=[
            pl.BlockSpec((batch_tile, I), batch2),                          # x
            pl.BlockSpec((NL, batch_tile, R), lambda b, ov: (0, b, 0)),     # prev_c (all layers)
            pl.BlockSpec((NL, batch_tile, R), lambda b, ov: (0, b, 0)),     # prev_h (all layers)
            pl.BlockSpec((batch_tile, L, R), lambda b, ov: (b, 0, 0)),      # att_feats
            pl.BlockSpec((batch_tile, L, NLA), lambda b, ov: (b, 0, 0)),    # precomputed ctx
            pl.BlockSpec((batch_tile, R), batch2),                          # fc_feats
            pl.BlockSpec((NL, R, A), const3),                               # w_h_all   (bf16, resident)
            pl.BlockSpec((NL, 1, A), const3),                               # w_alpha_all (f32)
            pl.BlockSpec((NL, I + 2 * R, 4 * num_parallels * R), const3),   # w_big_all (bf16, resident)
            pl.BlockSpec((NL, 1, 4 * num_parallels * R), const3),           # b_big_all (f32)
            pl.BlockSpec((R, tile_o), lambda b, ov: (0, ov)),               # wp  (bf16, vocab-streamed)
            pl.BlockSpec((1, tile_o), lambda b, ov: (0, ov)),               # bp
            pl.BlockSpec((R, tile_o), lambda b, ov: (0, ov)),               # wpw (bf16, vocab-streamed)
            pl.BlockSpec((1, tile_o), lambda b, ov: (0, ov)),               # bpw
        ],
        out_specs=(
            pl.BlockSpec((NL, batch_tile, R), lambda b, ov: (0, b, 0)),     # next_c (aliased)
            pl.BlockSpec((NL, batch_tile, R), lambda b, ov: (0, b, 0)),     # next_h (aliased)
            pl.BlockSpec((batch_tile, O), batch2),                          # logsoft (resident over ov)
            pl.BlockSpec((batch_tile, tile_o), lambda b, ov: (b, ov)),      # proj_w
        ),
        out_shape=(
            jax.ShapeDtypeStruct((NL, B, R), jnp.float32),
            jax.ShapeDtypeStruct((NL, B, R), jnp.float32),
            jax.ShapeDtypeStruct((B, O), jnp.float32),
            jax.ShapeDtypeStruct((B, O), jnp.float32),
        ),
        scratch_shapes=[
            pltpu.VMEM((n_ov, batch_tile, tile_o), jnp.float32),   # raw logits per vocab tile
            pltpu.VMEM((batch_tile, 1), jnp.float32),              # running max
            pltpu.VMEM((batch_tile, 1), jnp.float32),              # running sum-exp
        ],
        input_output_aliases={1: 0, 2: 1},   # decode state updated in place
        compiler_params=pltpu.CompilerParams(
            dimension_semantics=("parallel", "arbitrary"),
            vmem_limit_bytes=vmem_limit),
    )(x, prev_c_all, prev_h_all, att_feats, ctx_all, fc_feats,
      params["w_h_all"], params["w_alpha_all"], params["w_big_all"],
      params["b_big_all"], params["wp"], params["bp"], params["wpw"], params["bpw"])


# ----------------------------------------------------------------------------
# Full forward: 1 precompute call (per sequence) + 1 fused call (per decode step).
# ----------------------------------------------------------------------------
def forward(x, att_feats, inputs, params, *, num_layers, num_parallels,
            rnn_size, att_size, dropout=0.0,
            batch_tile=8, tile_o=128, vmem_limit=32 * 1024 * 1024):
    # TODO(synk): dropout > 0 path (F.dropout on top_h) not implemented; the example
    # uses dropout=0.0 so it is a no-op.
    # TODO(synk): for a full generation loop, extend the step kernel's grid with a
    # time axis so weights/att stay VMEM-resident across decode steps as well.
    ctx_all, fc_feats = precompute_ctx(att_feats, params["w_ctx_all"],
                                       params["b_ctx_all"],
                                       batch_tile=batch_tile, vmem_limit=vmem_limit)
    prev_c_all = jnp.stack(inputs[0::2])   # (NL, B, R)
    prev_h_all = jnp.stack(inputs[1::2])   # (NL, B, R)
    nc_all, nh_all, logsoft, proj_w = lstm_att_step(
        x, prev_c_all, prev_h_all, att_feats, ctx_all, fc_feats, params,
        num_layers=num_layers, num_parallels=num_parallels,
        rnn_size=rnn_size, att_size=att_size,
        batch_tile=batch_tile, tile_o=tile_o, vmem_limit=vmem_limit)
    outputs = []
    for i in range(num_layers):
        outputs.append(nc_all[i])
        outputs.append(nh_all[i])
    return outputs, logsoft, proj_w


# ----------------------------------------------------------------------------
# Deterministic parameter init. Torch-layout f32 weights are kept for the
# reference; fused bf16 kernel weights are derived from them (same bits after cast).
# ----------------------------------------------------------------------------
def init_params(key, *, input_size, output_size, num_layers, num_parallels,
                rnn_size, att_size):
    keys = iter(jax.random.split(key, 256))

    def lin(k, fan_in, fan_out):
        return jax.random.normal(k, (fan_in, fan_out), jnp.float32) / jnp.sqrt(fan_in)

    R, A, P, I = rnn_size, att_size, num_parallels, input_size
    params = {"att": [], "core": []}
    w_ctx_cols, b_ctx_cols = [], []
    w_h_l, w_alpha_l, w_big_l, b_big_l = [], [], [], []

    for _ in range(num_layers):
        att_p = {
            "w_ctx": lin(next(keys), R, A),
            "b_ctx": jnp.full((1, A), 0.01, jnp.float32),
            "w_h": lin(next(keys), R, A),
            "b_h": jnp.full((1, A), 0.02, jnp.float32),
            "w_alpha": lin(next(keys), 1, A),
            "b_alpha": jnp.full((1, 1), 0.03, jnp.float32),   # cancels in softmax
        }
        params["att"].append(att_p)
        w_ctx_cols.append(att_p["w_ctx"])
        b_ctx_cols.append(att_p["b_ctx"] + att_p["b_h"])       # fold pre-tanh biases

        core_p = {
            "wi": jnp.stack([lin(next(keys), I, 4 * R) for _ in range(P)]),
            "wh": jnp.stack([lin(next(keys), R, 4 * R) for _ in range(P)]),
            "wa": jnp.stack([lin(next(keys), R, 4 * R) for _ in range(P)]),
            "b": jnp.stack([0.05 * jax.random.normal(next(keys), (1, 4 * R), jnp.float32)
                            for _ in range(P)]),
        }
        params["core"].append(core_p)

        # fused gate-type-major layout: [i_0..i_{P-1} | f_* | o_* | g_*], each R wide
        w_cols, b_cols = [], []
        for g in range(4):
            for j in range(P):
                sl = slice(g * R, (g + 1) * R)
                w_cols.append(jnp.concatenate(
                    [core_p["wi"][j][:, sl], core_p["wh"][j][:, sl],
                     core_p["wa"][j][:, sl]], axis=0))          # (I+2R, R)
                b_cols.append(core_p["b"][j][:, sl])
        w_h_l.append(att_p["w_h"])
        w_alpha_l.append(att_p["w_alpha"])
        w_big_l.append(jnp.concatenate(w_cols, axis=1))          # (I+2R, 4PR)
        b_big_l.append(jnp.concatenate(b_cols, axis=1))          # (1, 4PR)

    # kernel weights: bf16 in HBM for matmul operands, f32 for biases / VPU operands
    params["w_ctx_all"] = jnp.concatenate(w_ctx_cols, axis=1).astype(jnp.bfloat16)
    params["b_ctx_all"] = jnp.concatenate(b_ctx_cols, axis=1)
    params["w_h_all"] = jnp.stack(w_h_l).astype(jnp.bfloat16)    # (NL, R, A)
    params["w_alpha_all"] = jnp.stack(w_alpha_l)                  # (NL, 1, A) f32
    params["w_big_all"] = jnp.stack(w_big_l).astype(jnp.bfloat16)  # (NL, I+2R, 4PR)
    params["b_big_all"] = jnp.stack(b_big_l)                      # (NL, 1, 4PR) f32

    wp_f32 = lin(next(keys), R, output_size)
    bp_f32 = 0.05 * jax.random.normal(next(keys), (1, output_size), jnp.float32)
    wpw_f32 = lin(next(keys), R, output_size)
    bpw_f32 = 0.05 * jax.random.normal(next(keys), (1, output_size), jnp.float32)
    params["proj_f32"] = {"wp": wp_f32, "bp": bp_f32, "wpw": wpw_f32, "bpw": bpw_f32}
    params["wp"] = wp_f32.astype(jnp.bfloat16)
    params["bp"] = bp_f32
    params["wpw"] = wpw_f32.astype(jnp.bfloat16)
    params["bpw"] = bpw_f32
    return params


# ----------------------------------------------------------------------------
# Pure-JAX reference (same bf16-matmul / f32-accumulate policy) for self-check.
# ----------------------------------------------------------------------------
def _dot16_ref(a, b):
    return jnp.dot(a.astype(jnp.bfloat16), b.astype(jnp.bfloat16),
                   preferred_element_type=jnp.float32)


def _ref_attention(att, h, p):
    ctx = jnp.einsum("blr,ra->bla", att.astype(jnp.bfloat16),
                     p["w_ctx"].astype(jnp.bfloat16),
                     preferred_element_type=jnp.float32) + p["b_ctx"]
    hp = _dot16_ref(h, p["w_h"]) + p["b_h"]
    pre = jnp.tanh(ctx + hp[:, None, :])
    scores = jnp.sum(pre * p["w_alpha"], axis=-1) + p["b_alpha"][0, 0]
    w = jax.nn.softmax(scores, axis=-1)
    return jnp.sum(w[:, :, None] * att, axis=1)


def _ref_lstm(xt, c, h, a, p, R):
    ncs, nhs = [], []
    for j in range(p["wi"].shape[0]):
        s = (_dot16_ref(xt, p["wi"][j]) + _dot16_ref(h, p["wh"][j])
             + _dot16_ref(a, p["wa"][j]) + p["b"][j])
        i_g = jax.nn.sigmoid(s[:, :R])
        f_g = jax.nn.sigmoid(s[:, R:2 * R])
        o_g = jax.nn.sigmoid(s[:, 2 * R:3 * R])
        g = jnp.tanh(s[:, 3 * R:])
        nc = f_g * c + i_g * g
        nh = o_g * jnp.tanh(nc)
        ncs.append(nc)
        nhs.append(nh)
    return jnp.mean(jnp.stack(ncs, 1), 1), jnp.mean(jnp.stack(nhs, 1), 1)


def ref_forward(x, att, inputs, params, *, num_layers, rnn_size):
    outputs = []
    for i in range(num_layers):
        prev_c, prev_h = inputs[2 * i], inputs[2 * i + 1]
        xt = x if i == 0 else x + outputs[-1]
        a = _ref_attention(att, prev_h, params["att"][i])
        nc, nh = _ref_lstm(xt, prev_c, prev_h, a, params["core"][i], rnn_size)
        outputs += [nc, nh]
    top_h = outputs[-1]
    fc_feats = jnp.mean(att, axis=1)
    pj = params["proj_f32"]
    pw = jax.nn.sigmoid(_dot16_ref(fc_feats + x, pj["wpw"]) + pj["bpw"])
    pr = _dot16_ref(top_h, pj["wp"]) + pj["bp"]
    logsoft = jax.nn.log_softmax(pr * pw, axis=-1)
    return outputs, logsoft, pw


if __name__ == "__main__":
    # Small but lane-aligned synthetic configuration (input_size must equal rnn_size
    # because the torch module computes proj_weight(att.mean(1).view_as(x) + x)).
    B, L = 16, 16
    input_size = rnn_size = 128
    att_size = 128
    output_size = 256          # "vocab", tiled in 128-wide blocks with online LSE
    num_layers = 2
    num_parallels = 2
    dropout = 0.0

    key = jax.random.PRNGKey(0)
    kx, ka, kh, kp = jax.random.split(key, 4)
    x = jax.random.normal(kx, (B, input_size), jnp.float32)
    att_feats = jax.random.normal(ka, (B, L, rnn_size), jnp.float32)
    state_keys = jax.random.split(kh, 2 * num_layers)
    inputs = [0.1 * jax.random.normal(state_keys[i], (B, rnn_size), jnp.float32)
              for i in range(2 * num_layers)]

    params = init_params(kp, input_size=input_size, output_size=output_size,
                         num_layers=num_layers, num_parallels=num_parallels,
                         rnn_size=rnn_size, att_size=att_size)

    fwd = jax.jit(functools.partial(
        forward, num_layers=num_layers, num_parallels=num_parallels,
        rnn_size=rnn_size, att_size=att_size, dropout=dropout,
        batch_tile=8, tile_o=128))
    outputs, logsoft, proj_w = fwd(x, att_feats, inputs, params)
    jax.block_until_ready((outputs, logsoft, proj_w))

    # Self-check against a pure-JAX reference with the same precision policy.
    r_outputs, r_logsoft, r_proj_w = ref_forward(
        x, att_feats, inputs, params, num_layers=num_layers, rnn_size=rnn_size)
    for got, want in zip(outputs, r_outputs):
        assert jnp.allclose(got, want, atol=2e-3, rtol=2e-3), "state mismatch"
    assert jnp.allclose(logsoft, r_logsoft, atol=2e-3, rtol=2e-3), "logsoft mismatch"
    assert jnp.allclose(proj_w, r_proj_w, atol=2e-3, rtol=2e-3), "proj_w mismatch"

    print("KERNEL_OK")
</pallas_src>

<mosaic_0001>
module attributes {stable_mosaic.version = 11 : i64} {
  func.func @_step_kernel(%arg0: i32, %arg1: i32, %arg2: memref<8x128xf32, #tpu.memory_space<vmem>>, %arg3: memref<2x8x128xf32, #tpu.memory_space<vmem>>, %arg4: memref<2x8x128xf32, #tpu.memory_space<vmem>>, %arg5: memref<8x16x128xf32, #tpu.memory_space<vmem>>, %arg6: memref<8x16x256xf32, #tpu.memory_space<vmem>>, %arg7: memref<8x128xf32, #tpu.memory_space<vmem>>, %arg8: memref<2x128x128xbf16, #tpu.memory_space<vmem>>, %arg9: memref<2x1x128xf32, #tpu.memory_space<vmem>>, %arg10: memref<2x384x1024xbf16, #tpu.memory_space<vmem>>, %arg11: memref<2x1x1024xf32, #tpu.memory_space<vmem>>, %arg12: memref<128x128xbf16, #tpu.memory_space<vmem>>, %arg13: memref<1x128xf32, #tpu.memory_space<vmem>>, %arg14: memref<128x128xbf16, #tpu.memory_space<vmem>>, %arg15: memref<1x128xf32, #tpu.memory_space<vmem>>, %arg16: memref<2x8x128xf32, #tpu.memory_space<vmem>>, %arg17: memref<2x8x128xf32, #tpu.memory_space<vmem>>, %arg18: memref<8x256xf32, #tpu.memory_space<vmem>>, %arg19: memref<8x128xf32, #tpu.memory_space<vmem>>, %arg20: memref<2x8x128xf32, #tpu.memory_space<vmem>>, %arg21: memref<8x1xf32, #tpu.memory_space<vmem>>, %arg22: memref<8x1xf32, #tpu.memory_space<vmem>>) attributes {dimension_semantics = [#tpu.dimension_semantics<parallel>, #tpu.dimension_semantics<arbitrary>], iteration_bounds = array<i64: 2, 2>, scalar_prefetch = 0 : i64, scratch_operands = 3 : i64, tpu.core_type = #tpu.core_type<tc>, window_params = [{transform_indices = @transform_0, window_bounds = array<i64: 8, 128>}, {transform_indices = @transform_1, window_bounds = array<i64: 2, 8, 128>}, {transform_indices = @transform_2, window_bounds = array<i64: 2, 8, 128>}, {transform_indices = @transform_3, window_bounds = array<i64: 8, 16, 128>}, {transform_indices = @transform_4, window_bounds = array<i64: 8, 16, 256>}, {transform_indices = @transform_5, window_bounds = array<i64: 8, 128>}, {pipeline_mode = #tpu.pipeline_mode<synchronous>, transform_indices = @transform_6, window_bounds = array<i64: 2, 128, 128>}, {pipeline_mode = #tpu.pipeline_mode<synchronous>, transform_indices = @transform_7, window_bounds = array<i64: 2, 1, 128>}, {pipeline_mode = #tpu.pipeline_mode<synchronous>, transform_indices = @transform_8, window_bounds = array<i64: 2, 384, 1024>}, {pipeline_mode = #tpu.pipeline_mode<synchronous>, transform_indices = @transform_9, window_bounds = array<i64: 2, 1, 1024>}, {transform_indices = @transform_10, window_bounds = array<i64: 128, 128>}, {transform_indices = @transform_11, window_bounds = array<i64: 1, 128>}, {transform_indices = @transform_12, window_bounds = array<i64: 128, 128>}, {transform_indices = @transform_13, window_bounds = array<i64: 1, 128>}, {transform_indices = @transform_14, window_bounds = array<i64: 2, 8, 128>}, {transform_indices = @transform_15, window_bounds = array<i64: 2, 8, 128>}, {transform_indices = @transform_16, window_bounds = array<i64: 8, 256>}, {transform_indices = @transform_17, window_bounds = array<i64: 8, 128>}]} {
    %c0_i32 = arith.constant 0 : i32
    %0 = arith.cmpi eq, %arg1, %c0_i32 : i32
    %1 = arith.extui %0 : i1 to i32
    %c0_i32_0 = arith.constant 0 : i32
    %2 = arith.cmpi ne, %1, %c0_i32_0 : i32
    scf.if %2 {
      %c0_31 = arith.constant 0 : index
      %c0_32 = arith.constant 0 : index
      %50 = vector.load %arg2[%c0_31, %c0_32] : memref<8x128xf32, #tpu.memory_space<vmem>>, vector<8x128xf32>
      %c0_33 = arith.constant 0 : index
      %c0_34 = arith.constant 0 : index
      %c0_35 = arith.constant 0 : index
      %51 = vector.load %arg5[%c0_33, %c0_34, %c0_35] : memref<8x16x128xf32, #tpu.memory_space<vmem>>, vector<8x16x128xf32>
      %c0_36 = arith.constant 0 : index
      %c0_37 = arith.constant 0 : index
      %c0_38 = arith.constant 0 : index
      %52 = vector.load %arg3[%c0_36, %c0_37, %c0_38] : memref<2x8x128xf32, #tpu.memory_space<vmem>>, vector<1x8x128xf32>
      %53 = vector.shape_cast %52 : vector<1x8x128xf32> to vector<8x128xf32>
      %c0_39 = arith.constant 0 : index
      %c0_40 = arith.constant 0 : index
      %c0_41 = arith.constant 0 : index
      %54 = vector.load %arg4[%c0_39, %c0_40, %c0_41] : memref<2x8x128xf32, #tpu.memory_space<vmem>>, vector<1x8x128xf32>
      %55 = vector.shape_cast %54 : vector<1x8x128xf32> to vector<8x128xf32>
      %c0_42 = arith.constant 0 : index
      %c0_43 = arith.constant 0 : index
      %c0_44 = arith.constant 0 : index
      %56 = vector.load %arg8[%c0_42, %c0_43, %c0_44] : memref<2x128x128xbf16, #tpu.memory_space<vmem>>, vector<1x128x128xbf16>
      %57 = vector.shape_cast %56 : vector<1x128x128xbf16> to vector<128x128xbf16>
      %58 = arith.truncf %55 : vector<8x128xf32> to vector<8x128xbf16>
      %cst_45 = arith.constant dense<0.000000e+00> : vector<8x128xf32>
      %59 = tpu.matmul %58, %57, %cst_45 {dimension_numbers = #tpu.dot_dimension_numbers<[1], [0], [0], [1], [0, 0, 1, 1], [], []>} : vector<8x128xbf16>, vector<128x128xbf16>, vector<8x128xf32> -> vector<8x128xf32>
      %c0_46 = arith.constant 0 : index
      %c0_47 = arith.constant 0 : index
      %c0_48 = arith.constant 0 : index
      %60 = vector.load %arg6[%c0_46, %c0_47, %c0_48] : memref<8x16x256xf32, #tpu.memory_space<vmem>>, vector<8x16x128xf32>
      %61 = vector.shape_cast %59 : vector<8x128xf32> to vector<8x1x128xf32>
      %62 = vector.broadcast %61 : vector<8x1x128xf32> to vector<8x16x128xf32>
      %63 = arith.addf %60, %62 : vector<8x16x128xf32>
      %64 = math.tanh %63 : vector<8x16x128xf32>
      %c0_49 = arith.constant 0 : index
      %c0_50 = arith.constant 0 : index
      %c0_51 = arith.constant 0 : index
      %65 = vector.load %arg9[%c0_49, %c0_50, %c0_51] : memref<2x1x128xf32, #tpu.memory_space<vmem>>, vector<1x1x128xf32>
      %66 = vector.shape_cast %65 : vector<1x1x128xf32> to vector<1x128xf32>
      %67 = vector.shape_cast %66 : vector<1x128xf32> to vector<1x1x128xf32>
      %68 = vector.broadcast %67 : vector<1x1x128xf32> to vector<8x16x128xf32>
      %69 = arith.mulf %64, %68 : vector<8x16x128xf32>
      %cst_52 = arith.constant dense<0.000000e+00> : vector<8x16xf32>
      %70 = vector.multi_reduction <add>, %69, %cst_52 [2] : vector<8x16x128xf32> to vector<8x16xf32>
      %cst_53 = arith.constant dense<0xFF800000> : vector<8xf32>
      %71 = vector.multi_reduction <maximumf>, %70, %cst_53 [1] : vector<8x16xf32> to vector<8xf32>
      %72 = vector.shape_cast %71 : vector<8xf32> to vector<8x1xf32>
      %73 = vector.broadcast %72 : vector<8x1xf32> to vector<8x16xf32>
      %74 = arith.subf %70, %73 : vector<8x16xf32>
      %75 = math.exp %74 : vector<8x16xf32>
      %cst_54 = arith.constant dense<0.000000e+00> : vector<8xf32>
      %76 = vector.multi_reduction <add>, %75, %cst_54 [1] : vector<8x16xf32> to vector<8xf32>
      %77 = vector.shape_cast %76 : vector<8xf32> to vector<8x1xf32>
      %78 = vector.broadcast %77 : vector<8x1xf32> to vector<8x16xf32>
      %79 = arith.divf %75, %78 : vector<8x16xf32>
      %80 = vector.shape_cast %79 : vector<8x16xf32> to vector<8x16x1xf32>
      %81 = vector.broadcast %80 : vector<8x16x1xf32> to vector<8x16x128xf32>
      %82 = arith.mulf %81, %51 : vector<8x16x128xf32>
      %cst_55 = arith.constant dense<0.000000e+00> : vector<8x128xf32>
      %83 = vector.multi_reduction <add>, %82, %cst_55 [1] : vector<8x16x128xf32> to vector<8x128xf32>
      %c0_56 = arith.constant 0 : index
      %c0_57 = arith.constant 0 : index
      %c0_58 = arith.constant 0 : index
      %84 = vector.load %arg10[%c0_56, %c0_57, %c0_58] : memref<2x384x1024xbf16, #tpu.memory_space<vmem>>, vector<1x384x1024xbf16>
      %85 = vector.shape_cast %84 : vector<1x384x1024xbf16> to vector<384x1024xbf16>
      %86 = vector.extract_strided_slice %85 {offsets = [0, 0], sizes = [128, 1024], strides = [1, 1]} : vector<384x1024xbf16> to vector<128x1024xbf16>
      %87 = arith.truncf %50 : vector<8x128xf32> to vector<8x128xbf16>
      %cst_59 = arith.constant dense<0.000000e+00> : vector<8x1024xf32>
      %88 = tpu.matmul %87, %86, %cst_59 {dimension_numbers = #tpu.dot_dimension_numbers<[1], [0], [0], [1], [0, 0, 1, 1], [], []>} : vector<8x128xbf16>, vector<128x1024xbf16>, vector<8x1024xf32> -> vector<8x1024xf32>
      %89 = vector.extract_strided_slice %85 {offsets = [128, 0], sizes = [128, 1024], strides = [1, 1]} : vector<384x1024xbf16> to vector<128x1024xbf16>
      %90 = arith.truncf %55 : vector<8x128xf32> to vector<8x128xbf16>
      %cst_60 = arith.constant dense<0.000000e+00> : vector<8x1024xf32>
      %91 = tpu.matmul %90, %89, %cst_60 {dimension_numbers = #tpu.dot_dimension_numbers<[1], [0], [0], [1], [0, 0, 1, 1], [], []>} : vector<8x128xbf16>, vector<128x1024xbf16>, vector<8x1024xf32> -> vector<8x1024xf32>
      %92 = arith.addf %88, %91 : vector<8x1024xf32>
      %93 = vector.extract_strided_slice %85 {offsets = [256, 0], sizes = [128, 1024], strides = [1, 1]} : vector<384x1024xbf16> to vector<128x1024xbf16>
      %94 = arith.truncf %83 : vector<8x128xf32> to vector<8x128xbf16>
      %cst_61 = arith.constant dense<0.000000e+00> : vector<8x1024xf32>
      %95 = tpu.matmul %94, %93, %cst_61 {dimension_numbers = #tpu.dot_dimension_numbers<[1], [0], [0], [1], [0, 0, 1, 1], [], []>} : vector<8x128xbf16>, vector<128x1024xbf16>, vector<8x1024xf32> -> vector<8x1024xf32>
      %96 = arith.addf %92, %95 : vector<8x1024xf32>
      %c0_62 = arith.constant 0 : index
      %c0_63 = arith.constant 0 : index
      %c0_64 = arith.constant 0 : index
      %97 = vector.load %arg11[%c0_62, %c0_63, %c0_64] : memref<2x1x1024xf32, #tpu.memory_space<vmem>>, vector<1x1x1024xf32>
      %98 = vector.shape_cast %97 : vector<1x1x1024xf32> to vector<1x1024xf32>
      %99 = vector.broadcast %98 : vector<1x1024xf32> to vector<8x1024xf32>
      %100 = arith.addf %96, %99 : vector<8x1024xf32>
      %101 = vector.extract_strided_slice %100 {offsets = [0, 0], sizes = [8, 768], strides = [1, 1]} : vector<8x1024xf32> to vector<8x768xf32>
      %102 = arith.negf %101 : vector<8x768xf32>
      %103 = math.exp %102 : vector<8x768xf32>
      %cst_65 = arith.constant 1.000000e+00 : f32
      %104 = vector.broadcast %cst_65 : f32 to vector<8x768xf32>
      %105 = arith.addf %104, %103 : vector<8x768xf32>
      %106 = arith.divf %104, %105 : vector<8x768xf32>
      %107 = vector.extract_strided_slice %106 {offsets = [0, 0], sizes = [8, 256], strides = [1, 1]} : vector<8x768xf32> to vector<8x256xf32>
      %108 = vector.shape_cast %107 : vector<8x256xf32> to vector<8x2x128xf32>
      %109 = vector.extract_strided_slice %106 {offsets = [0, 256], sizes = [8, 256], strides = [1, 1]} : vector<8x768xf32> to vector<8x256xf32>
      %110 = vector.shape_cast %109 : vector<8x256xf32> to vector<8x2x128xf32>
      %111 = vector.extract_strided_slice %106 {offsets = [0, 512], sizes = [8, 256], strides = [1, 1]} : vector<8x768xf32> to vector<8x256xf32>
      %112 = vector.shape_cast %111 : vector<8x256xf32> to vector<8x2x128xf32>
      %113 = vector.extract_strided_slice %100 {offsets = [0, 768], sizes = [8, 256], strides = [1, 1]} : vector<8x1024xf32> to vector<8x256xf32>
      %114 = math.tanh %113 : vector<8x256xf32>
      %115 = vector.shape_cast %114 : vector<8x256xf32> to vector<8x2x128xf32>
      %116 = vector.shape_cast %53 : vector<8x128xf32> to vector<8x1x128xf32>
      %117 = vector.broadcast %116 : vector<8x1x128xf32> to vector<8x2x128xf32>
      %118 = arith.mulf %110, %117 : vector<8x2x128xf32>
      %119 = arith.mulf %108, %115 : vector<8x2x128xf32>
      %120 = arith.addf %118, %119 : vector<8x2x128xf32>
      %121 = math.tanh %120 : vector<8x2x128xf32>
      %122 = arith.mulf %112, %121 : vector<8x2x128xf32>
      %cst_66 = arith.constant dense<0.000000e+00> : vector<8x128xf32>
      %123 = vector.multi_reduction <add>, %120, %cst_66 [1] : vector<8x2x128xf32> to vector<8x128xf32>
      %cst_67 = arith.constant 5.000000e-01 : f32
      %124 = vector.broadcast %cst_67 : f32 to vector<8x128xf32>
      %125 = arith.mulf %123, %124 : vector<8x128xf32>
      %cst_68 = arith.constant dense<0.000000e+00> : vector<8x128xf32>
      %126 = vector.multi_reduction <add>, %122, %cst_68 [1] : vector<8x2x128xf32> to vector<8x128xf32>
      %cst_69 = arith.constant 5.000000e-01 : f32
      %127 = vector.broadcast %cst_69 : f32 to vector<8x128xf32>
      %128 = arith.mulf %126, %127 : vector<8x128xf32>
      %c0_70 = arith.constant 0 : index
      %c0_71 = arith.constant 0 : index
      %c0_72 = arith.constant 0 : index
      %129 = vector.load %arg16[%c0_70, %c0_71, %c0_72] : memref<2x8x128xf32, #tpu.memory_space<vmem>>, vector<1x8x128xf32>
      %130 = vector.shape_cast %129 : vector<1x8x128xf32> to vector<8x128xf32>
      %131 = vector.shape_cast %125 : vector<8x128xf32> to vector<1x8x128xf32>
      tpu.vector_store %arg16[%c0_70, %c0_71, %c0_72], %131 {strides = array<i32>} : memref<2x8x128xf32, #tpu.memory_space<vmem>>, vector<1x8x128xf32>,
      %c0_73 = arith.constant 0 : index
      %c0_74 = arith.constant 0 : index
      %c0_75 = arith.constant 0 : index
      %132 = vector.load %arg17[%c0_73, %c0_74, %c0_75] : memref<2x8x128xf32, #tpu.memory_space<vmem>>, vector<1x8x128xf32>
      %133 = vector.shape_cast %132 : vector<1x8x128xf32> to vector<8x128xf32>
      %134 = vector.shape_cast %128 : vector<8x128xf32> to vector<1x8x128xf32>
      tpu.vector_store %arg17[%c0_73, %c0_74, %c0_75], %134 {strides = array<i32>} : memref<2x8x128xf32, #tpu.memory_space<vmem>>, vector<1x8x128xf32>,
      %c1_76 = arith.constant 1 : index
      %c0_77 = arith.constant 0 : index
      %c0_78 = arith.constant 0 : index
      %135 = vector.load %arg3[%c1_76, %c0_77, %c0_78] : memref<2x8x128xf32, #tpu.memory_space<vmem>>, vector<1x8x128xf32>
      %136 = vector.shape_cast %135 : vector<1x8x128xf32> to vector<8x128xf32>
      %c1_79 = arith.constant 1 : index
      %c0_80 = arith.constant 0 : index
      %c0_81 = arith.constant 0 : index
      %137 = vector.load %arg4[%c1_79, %c0_80, %c0_81] : memref<2x8x128xf32, #tpu.memory_space<vmem>>, vector<1x8x128xf32>
      %138 = vector.shape_cast %137 : vector<1x8x128xf32> to vector<8x128xf32>
      %139 = arith.addf %50, %128 : vector<8x128xf32>
      %c1_82 = arith.constant 1 : index
      %c0_83 = arith.constant 0 : index
      %c0_84 = arith.constant 0 : index
      %140 = vector.load %arg8[%c1_82, %c0_83, %c0_84] : memref<2x128x128xbf16, #tpu.memory_space<vmem>>, vector<1x128x128xbf16>
      %141 = vector.shape_cast %140 : vector<1x128x128xbf16> to vector<128x128xbf16>
      %142 = arith.truncf %138 : vector<8x128xf32> to vector<8x128xbf16>
      %cst_85 = arith.constant dense<0.000000e+00> : vector<8x128xf32>
      %143 = tpu.matmul %142, %141, %cst_85 {dimension_numbers = #tpu.dot_dimension_numbers<[1], [0], [0], [1], [0, 0, 1, 1], [], []>} : vector<8x128xbf16>, vector<128x128xbf16>, vector<8x128xf32> -> vector<8x128xf32>
      %c0_86 = arith.constant 0 : index
      %c0_87 = arith.constant 0 : index
      %c128 = arith.constant 128 : index
      %144 = vector.load %arg6[%c0_86, %c0_87, %c128] : memref<8x16x256xf32, #tpu.memory_space<vmem>>, vector<8x16x128xf32>
      %145 = vector.shape_cast %143 : vector<8x128xf32> to vector<8x1x128xf32>
      %146 = vector.broadcast %145 : vector<8x1x128xf32> to vector<8x16x128xf32>
      %147 = arith.addf %144, %146 : vector<8x16x128xf32>
      %148 = math.tanh %147 : vector<8x16x128xf32>
      %c1_88 = arith.constant 1 : index
      %c0_89 = arith.constant 0 : index
      %c0_90 = arith.constant 0 : index
      %149 = vector.load %arg9[%c1_88, %c0_89, %c0_90] : memref<2x1x128xf32, #tpu.memory_space<vmem>>, vector<1x1x128xf32>
      %150 = vector.shape_cast %149 : vector<1x1x128xf32> to vector<1x128xf32>
      %151 = vector.shape_cast %150 : vector<1x128xf32> to vector<1x1x128xf32>
      %152 = vector.broadcast %151 : vector<1x1x128xf32> to vector<8x16x128xf32>
      %153 = arith.mulf %148, %152 : vector<8x16x128xf32>
      %cst_91 = arith.constant dense<0.000000e+00> : vector<8x16xf32>
      %154 = vector.multi_reduction <add>, %153, %cst_91 [2] : vector<8x16x128xf32> to vector<8x16xf32>
      %cst_92 = arith.constant dense<0xFF800000> : vector<8xf32>
      %155 = vector.multi_reduction <maximumf>, %154, %cst_92 [1] : vector<8x16xf32> to vector<8xf32>
      %156 = vector.shape_cast %155 : vector<8xf32> to vector<8x1xf32>
      %157 = vector.broadcast %156 : vector<8x1xf32> to vector<8x16xf32>
      %158 = arith.subf %154, %157 : vector<8x16xf32>
      %159 = math.exp %158 : vector<8x16xf32>
      %cst_93 = arith.constant dense<0.000000e+00> : vector<8xf32>
      %160 = vector.multi_reduction <add>, %159, %cst_93 [1] : vector<8x16xf32> to vector<8xf32>
      %161 = vector.shape_cast %160 : vector<8xf32> to vector<8x1xf32>
      %162 = vector.broadcast %161 : vector<8x1xf32> to vector<8x16xf32>
      %163 = arith.divf %159, %162 : vector<8x16xf32>
      %164 = vector.shape_cast %163 : vector<8x16xf32> to vector<8x16x1xf32>
      %165 = vector.broadcast %164 : vector<8x16x1xf32> to vector<8x16x128xf32>
      %166 = arith.mulf %165, %51 : vector<8x16x128xf32>
      %cst_94 = arith.constant dense<0.000000e+00> : vector<8x128xf32>
      %167 = vector.multi_reduction <add>, %166, %cst_94 [1] : vector<8x16x128xf32> to vector<8x128xf32>
      %c1_95 = arith.constant 1 : index
      %c0_96 = arith.constant 0 : index
      %c0_97 = arith.constant 0 : index
      %168 = vector.load %arg10[%c1_95, %c0_96, %c0_97] : memref<2x384x1024xbf16, #tpu.memory_space<vmem>>, vector<1x384x1024xbf16>
      %169 = vector.shape_cast %168 : vector<1x384x1024xbf16> to vector<384x1024xbf16>
      %170 = vector.extract_strided_slice %169 {offsets = [0, 0], sizes = [128, 1024], strides = [1, 1]} : vector<384x1024xbf16> to vector<128x1024xbf16>
      %171 = arith.truncf %139 : vector<8x128xf32> to vector<8x128xbf16>
      %cst_98 = arith.constant dense<0.000000e+00> : vector<8x1024xf32>
      %172 = tpu.matmul %171, %170, %cst_98 {dimension_numbers = #tpu.dot_dimension_numbers<[1], [0], [0], [1], [0, 0, 1, 1], [], []>} : vector<8x128xbf16>, vector<128x1024xbf16>, vector<8x1024xf32> -> vector<8x1024xf32>
      %173 = vector.extract_strided_slice %169 {offsets = [128, 0], sizes = [128, 1024], strides = [1, 1]} : vector<384x1024xbf16> to vector<128x1024xbf16>
      %174 = arith.truncf %138 : vector<8x128xf32> to vector<8x128xbf16>
      %cst_99 = arith.constant dense<0.000000e+00> : vector<8x1024xf32>
      %175 = tpu.matmul %174, %173, %cst_99 {dimension_numbers = #tpu.dot_dimension_numbers<[1], [0], [0], [1], [0, 0, 1, 1], [], []>} : vector<8x128xbf16>, vector<128x1024xbf16>, vector<8x1024xf32> -> vector<8x1024xf32>
      %176 = arith.addf %172, %175 : vector<8x1024xf32>
      %177 = vector.extract_strided_slice %169 {offsets = [256, 0], sizes = [128, 1024], strides = [1, 1]} : vector<384x1024xbf16> to vector<128x1024xbf16>
      %178 = arith.truncf %167 : vector<8x128xf32> to vector<8x128xbf16>
      %cst_100 = arith.constant dense<0.000000e+00> : vector<8x1024xf32>
      %179 = tpu.matmul %178, %177, %cst_100 {dimension_numbers = #tpu.dot_dimension_numbers<[1], [0], [0], [1], [0, 0, 1, 1], [], []>} : vector<8x128xbf16>, vector<128x1024xbf16>, vector<8x1024xf32> -> vector<8x1024xf32>
      %180 = arith.addf %176, %179 : vector<8x1024xf32>
      %c1_101 = arith.constant 1 : index
      %c0_102 = arith.constant 0 : index
      %c0_103 = arith.constant 0 : index
      %181 = vector.load %arg11[%c1_101, %c0_102, %c0_103] : memref<2x1x1024xf32, #tpu.memory_space<vmem>>, vector<1x1x1024xf32>
      %182 = vector.shape_cast %181 : vector<1x1x1024xf32> to vector<1x1024xf32>
      %183 = vector.broadcast %182 : vector<1x1024xf32> to vector<8x1024xf32>
      %184 = arith.addf %180, %183 : vector<8x1024xf32>
      %185 = vector.extract_strided_slice %184 {offsets = [0, 0], sizes = [8, 768], strides = [1, 1]} : vector<8x1024xf32> to vector<8x768xf32>
      %186 = arith.negf %185 : vector<8x768xf32>
      %187 = math.exp %186 : vector<8x768xf32>
      %cst_104 = arith.constant 1.000000e+00 : f32
      %188 = vector.broadcast %cst_104 : f32 to vector<8x768xf32>
      %189 = arith.addf %188, %187 : vector<8x768xf32>
      %190 = arith.divf %188, %189 : vector<8x768xf32>
      %191 = vector.extract_strided_slice %190 {offsets = [0, 0], sizes = [8, 256], strides = [1, 1]} : vector<8x768xf32> to vector<8x256xf32>
      %192 = vector.shape_cast %191 : vector<8x256xf32> to vector<8x2x128xf32>
      %193 = vector.extract_strided_slice %190 {offsets = [0, 256], sizes = [8, 256], strides = [1, 1]} : vector<8x768xf32> to vector<8x256xf32>
      %194 = vector.shape_cast %193 : vector<8x256xf32> to vector<8x2x128xf32>
      %195 = vector.extract_strided_slice %190 {offsets = [0, 512], sizes = [8, 256], strides = [1, 1]} : vector<8x768xf32> to vector<8x256xf32>
      %196 = vector.shape_cast %195 : vector<8x256xf32> to vector<8x2x128xf32>
      %197 = vector.extract_strided_slice %184 {offsets = [0, 768], sizes = [8, 256], strides = [1, 1]} : vector<8x1024xf32> to vector<8x256xf32>
      %198 = math.tanh %197 : vector<8x256xf32>
      %199 = vector.shape_cast %198 : vector<8x256xf32> to vector<8x2x128xf32>
      %200 = vector.shape_cast %136 : vector<8x128xf32> to vector<8x1x128xf32>
      %201 = vector.broadcast %200 : vector<8x1x128xf32> to vector<8x2x128xf32>
      %202 = arith.mulf %194, %201 : vector<8x2x128xf32>
      %203 = arith.mulf %192, %199 : vector<8x2x128xf32>
      %204 = arith.addf %202, %203 : vector<8x2x128xf32>
      %205 = math.tanh %204 : vector<8x2x128xf32>
      %206 = arith.mulf %196, %205 : vector<8x2x128xf32>
      %cst_105 = arith.constant dense<0.000000e+00> : vector<8x128xf32>
      %207 = vector.multi_reduction <add>, %204, %cst_105 [1] : vector<8x2x128xf32> to vector<8x128xf32>
      %cst_106 = arith.constant 5.000000e-01 : f32
      %208 = vector.broadcast %cst_106 : f32 to vector<8x128xf32>
      %209 = arith.mulf %207, %208 : vector<8x128xf32>
      %cst_107 = arith.constant dense<0.000000e+00> : vector<8x128xf32>
      %210 = vector.multi_reduction <add>, %206, %cst_107 [1] : vector<8x2x128xf32> to vector<8x128xf32>
      %cst_108 = arith.constant 5.000000e-01 : f32
      %211 = vector.broadcast %cst_108 : f32 to vector<8x128xf32>
      %212 = arith.mulf %210, %211 : vector<8x128xf32>
      %c1_109 = arith.constant 1 : index
      %c0_110 = arith.constant 0 : index
      %c0_111 = arith.constant 0 : index
      %213 = vector.load %arg16[%c1_109, %c0_110, %c0_111] : memref<2x8x128xf32, #tpu.memory_space<vmem>>, vector<1x8x128xf32>
      %214 = vector.shape_cast %213 : vector<1x8x128xf32> to vector<8x128xf32>
      %215 = vector.shape_cast %209 : vector<8x128xf32> to vector<1x8x128xf32>
      tpu.vector_store %arg16[%c1_109, %c0_110, %c0_111], %215 {strides = array<i32>} : memref<2x8x128xf32, #tpu.memory_space<vmem>>, vector<1x8x128xf32>,
      %c1_112 = arith.constant 1 : index
      %c0_113 = arith.constant 0 : index
      %c0_114 = arith.constant 0 : index
      %216 = vector.load %arg17[%c1_112, %c0_113, %c0_114] : memref<2x8x128xf32, #tpu.memory_space<vmem>>, vector<1x8x128xf32>
      %217 = vector.shape_cast %216 : vector<1x8x128xf32> to vector<8x128xf32>
      %218 = vector.shape_cast %212 : vector<8x128xf32> to vector<1x8x128xf32>
      tpu.vector_store %arg17[%c1_112, %c0_113, %c0_114], %218 {strides = array<i32>} : memref<2x8x128xf32, #tpu.memory_space<vmem>>, vector<1x8x128xf32>,
      %cst_115 = arith.constant 0xFF800000 : f32
      %219 = vector.broadcast %cst_115 : f32 to vector<8x1xf32>
      %c0_116 = arith.constant 0 : index
      %c0_117 = arith.constant 0 : index
      %220 = vector.load %arg21[%c0_116, %c0_117] : memref<8x1xf32, #tpu.memory_space<vmem>>, vector<8x1xf32>
      tpu.vector_store %arg21[%c0_116, %c0_117], %219 {strides = array<i32>} : memref<8x1xf32, #tpu.memory_space<vmem>>, vector<8x1xf32>,
      %cst_118 = arith.constant 0.000000e+00 : f32
      %221 = vector.broadcast %cst_118 : f32 to vector<8x1xf32>
      %c0_119 = arith.constant 0 : index
      %c0_120 = arith.constant 0 : index
      %222 = vector.load %arg22[%c0_119, %c0_120] : memref<8x1xf32, #tpu.memory_space<vmem>>, vector<8x1xf32>
      tpu.vector_store %arg22[%c0_119, %c0_120], %221 {strides = array<i32>} : memref<8x1xf32, #tpu.memory_space<vmem>>, vector<8x1xf32>,
    } else {
    }
    %c1 = arith.constant 1 : index
    %c0 = arith.constant 0 : index
    %c0_1 = arith.constant 0 : index
    %3 = vector.load %arg17[%c1, %c0, %c0_1] : memref<2x8x128xf32, #tpu.memory_space<vmem>>, vector<1x8x128xf32>
    %4 = vector.shape_cast %3 : vector<1x8x128xf32> to vector<8x128xf32>
    %c0_2 = arith.constant 0 : index
    %c0_3 = arith.constant 0 : index
    %5 = vector.load %arg2[%c0_2, %c0_3] : memref<8x128xf32, #tpu.memory_space<vmem>>, vector<8x128xf32>
    %c0_4 = arith.constant 0 : index
    %c0_5 = arith.constant 0 : index
    %6 = vector.load %arg7[%c0_4, %c0_5] : memref<8x128xf32, #tpu.memory_space<vmem>>, vector<8x128xf32>
    %7 = arith.addf %5, %6 : vector<8x128xf32>
    %c0_6 = arith.constant 0 : index
    %c0_7 = arith.constant 0 : index
    %8 = vector.load %arg14[%c0_6, %c0_7] : memref<128x128xbf16, #tpu.memory_space<vmem>>, vector<128x128xbf16>
    %9 = arith.truncf %7 : vector<8x128xf32> to vector<8x128xbf16>
    %cst = arith.constant dense<0.000000e+00> : vector<8x128xf32>
    %10 = tpu.matmul %9, %8, %cst {dimension_numbers = #tpu.dot_dimension_numbers<[1], [0], [0], [1], [0, 0, 1, 1], [], []>} : vector<8x128xbf16>, vector<128x128xbf16>, vector<8x128xf32> -> vector<8x128xf32>
    %c0_8 = arith.constant 0 : index
    %c0_9 = arith.constant 0 : index
    %11 = vector.load %arg15[%c0_8, %c0_9] : memref<1x128xf32, #tpu.memory_space<vmem>>, vector<1x128xf32>
    %12 = vector.broadcast %11 : vector<1x128xf32> to vector<8x128xf32>
    %13 = arith.addf %10, %12 : vector<8x128xf32>
    %14 = arith.negf %13 : vector<8x128xf32>
    %15 = math.exp %14 : vector<8x128xf32>
    %cst_10 = arith.constant 1.000000e+00 : f32
    %16 = vector.broadcast %cst_10 : f32 to vector<8x128xf32>
    %17 = arith.addf %16, %15 : vector<8x128xf32>
    %18 = arith.divf %16, %17 : vector<8x128xf32>
    %c0_11 = arith.constant 0 : index
    %c0_12 = arith.constant 0 : index
    %19 = vector.load %arg12[%c0_11, %c0_12] : memref<128x128xbf16, #tpu.memory_space<vmem>>, vector<128x128xbf16>
    %20 = arith.truncf %4 : vector<8x128xf32> to vector<8x128xbf16>
    %cst_13 = arith.constant dense<0.000000e+00> : vector<8x128xf32>
    %21 = tpu.matmul %20, %19, %cst_13 {dimension_numbers = #tpu.dot_dimension_numbers<[1], [0], [0], [1], [0, 0, 1, 1], [], []>} : vector<8x128xbf16>, vector<128x128xbf16>, vector<8x128xf32> -> vector<8x128xf32>
    %c0_14 = arith.constant 0 : index
    %c0_15 = arith.constant 0 : index
    %22 = vector.load %arg13[%c0_14, %c0_15] : memref<1x128xf32, #tpu.memory_space<vmem>>, vector<1x128xf32>
    %23 = vector.broadcast %22 : vector<1x128xf32> to vector<8x128xf32>
    %24 = arith.addf %21, %23 : vector<8x128xf32>
    %25 = arith.mulf %24, %18 : vector<8x128xf32>
    %c0_16 = arith.constant 0 : index
    %c0_17 = arith.constant 0 : index
    %26 = vector.load %arg19[%c0_16, %c0_17] : memref<8x128xf32, #tpu.memory_space<vmem>>, vector<8x128xf32>
    tpu.vector_store %arg19[%c0_16, %c0_17], %18 {strides = array<i32>} : memref<8x128xf32, #tpu.memory_space<vmem>>, vector<8x128xf32>,
    %27 = arith.index_cast %arg1 : i32 to index
    %c0_18 = arith.constant 0 : index
    %c0_19 = arith.constant 0 : index
    %28 = vector.load %arg20[%27, %c0_18, %c0_19] : memref<2x8x128xf32, #tpu.memory_space<vmem>>, vector<1x8x128xf32>
    %29 = vector.shape_cast %28 : vector<1x8x128xf32> to vector<8x128xf32>
    %30 = vector.shape_cast %25 : vector<8x128xf32> to vector<1x8x128xf32>
    tpu.vector_store %arg20[%27, %c0_18, %c0_19], %30 {strides = array<i32>} : memref<2x8x128xf32, #tpu.memory_space<vmem>>, vector<1x8x128xf32>,
    %c0_20 = arith.constant 0 : index
    %c0_21 = arith.constant 0 : index
    %31 = vector.load %arg21[%c0_20, %c0_21] : memref<8x1xf32, #tpu.memory_space<vmem>>, vector<8x1xf32>
    %cst_22 = arith.constant dense<0xFF800000> : vector<8xf32>
    %32 = vector.multi_reduction <maximumf>, %25, %cst_22 [1] : vector<8x128xf32> to vector<8xf32>
    %33 = vector.shape_cast %32 : vector<8xf32> to vector<8x1xf32>
    %34 = arith.maximumf %31, %33 : vector<8x1xf32>
    %c0_23 = arith.constant 0 : index
    %c0_24 = arith.constant 0 : index
    %35 = vector.load %arg22[%c0_23, %c0_24] : memref<8x1xf32, #tpu.memory_space<vmem>>, vector<8x1xf32>
    %36 = arith.subf %31, %34 : vector<8x1xf32>
    %37 = math.exp %36 : vector<8x1xf32>
    %38 = arith.mulf %35, %37 : vector<8x1xf32>
    %39 = vector.broadcast %34 : vector<8x1xf32> to vector<8x128xf32>
    %40 = arith.subf %25, %39 : vector<8x128xf32>
    %41 = math.exp %40 : vector<8x128xf32>
    %cst_25 = arith.constant dense<0.000000e+00> : vector<8xf32>
    %42 = vector.multi_reduction <add>, %41, %cst_25 [1] : vector<8x128xf32> to vector<8xf32>
    %43 = vector.shape_cast %42 : vector<8xf32> to vector<8x1xf32>
    %44 = arith.addf %38, %43 : vector<8x1xf32>
    %c0_26 = arith.constant 0 : index
    %c0_27 = arith.constant 0 : index
    %45 = vector.load %arg22[%c0_26, %c0_27] : memref<8x1xf32, #tpu.memory_space<vmem>>, vector<8x1xf32>
    tpu.vector_store %arg22[%c0_26, %c0_27], %44 {strides = array<i32>} : memref<8x1xf32, #tpu.memory_space<vmem>>, vector<8x1xf32>,
    %c0_28 = arith.constant 0 : index
    %c0_29 = arith.constant 0 : index
    %46 = vector.load %arg21[%c0_28, %c0_29] : memref<8x1xf32, #tpu.memory_space<vmem>>, vector<8x1xf32>
    tpu.vector_store %arg21[%c0_28, %c0_29], %34 {strides = array<i32>} : memref<8x1xf32, #tpu.memory_space<vmem>>, vector<8x1xf32>,
    %c1_i32 = arith.constant 1 : i32
    %47 = arith.cmpi eq, %arg1, %c1_i32 : i32
    %48 = arith.extui %47 : i1 to i32
    %c0_i32_30 = arith.constant 0 : i32
    %49 = arith.cmpi ne, %48, %c0_i32_30 : i32
    scf.if %49 {
      %c0_31 = arith.constant 0 : index
      %c0_32 = arith.constant 0 : index
      %50 = vector.load %arg21[%c0_31, %c0_32] : memref<8x1xf32, #tpu.memory_space<vmem>>, vector<8x1xf32>
      %c0_33 = arith.constant 0 : index
      %c0_34 = arith.constant 0 : index
      %51 = vector.load %arg22[%c0_33, %c0_34] : memref<8x1xf32, #tpu.memory_space<vmem>>, vector<8x1xf32>
      %52 = math.log %51 : vector<8x1xf32>
      %53 = arith.addf %50, %52 : vector<8x1xf32>
      %c0_35 = arith.constant 0 : index
      %c0_36 = arith.constant 0 : index
      %c0_37 = arith.constant 0 : index
      %54 = vector.load %arg20[%c0_35, %c0_36, %c0_37] : memref<2x8x128xf32, #tpu.memory_space<vmem>>, vector<1x8x128xf32>
      %55 = vector.shape_cast %54 : vector<1x8x128xf32> to vector<8x128xf32>
      %56 = vector.broadcast %53 : vector<8x1xf32> to vector<8x128xf32>
      %57 = arith.subf %55, %56 : vector<8x128xf32>
      %c0_38 = arith.constant 0 : index
      %c0_39 = arith.constant 0 : index
      %58 = vector.load %arg18[%c0_38, %c0_39] : memref<8x256xf32, #tpu.memory_space<vmem>>, vector<8x128xf32>
      tpu.vector_store %arg18[%c0_38, %c0_39], %57 {strides = array<i32>} : memref<8x256xf32, #tpu.memory_space<vmem>>, vector<8x128xf32>,
      %c1_40 = arith.constant 1 : index
      %c0_41 = arith.constant 0 : index
      %c0_42 = arith.constant 0 : index
      %59 = vector.load %arg20[%c1_40, %c0_41, %c0_42] : memref<2x8x128xf32, #tpu.memory_space<vmem>>, vector<1x8x128xf32>
      %60 = vector.shape_cast %59 : vector<1x8x128xf32> to vector<8x128xf32>
      %61 = vector.broadcast %53 : vector<8x1xf32> to vector<8x128xf32>
      %62 = arith.subf %60, %61 : vector<8x128xf32>
      %c0_43 = arith.constant 0 : index
      %c128 = arith.constant 128 : index
      %63 = vector.load %arg18[%c0_43, %c128] : memref<8x256xf32, #tpu.memory_space<vmem>>, vector<8x128xf32>
      tpu.vector_store %arg18[%c0_43, %c128], %62 {strides = array<i32>} : memref<8x256xf32, #tpu.memory_space<vmem>>, vector<8x128xf32>,
    } else {
    }
    return
  }
  func.func @transform_0(%arg0: i32, %arg1: i32) -> (i32, i32) {
    %c0_i32 = arith.constant 0 : i32
    %c0_i32_0 = arith.constant 0 : i32
    return %arg0, %c0_i32 : i32, i32
  }
  func.func @transform_1(%arg0: i32, %arg1: i32) -> (i32, i32, i32) {
    %c0_i32 = arith.constant 0 : i32
    %c0_i32_0 = arith.constant 0 : i32
    %c0_i32_1 = arith.constant 0 : i32
    return %c0_i32, %arg0, %c0_i32_0 : i32, i32, i32
  }
  func.func @transform_2(%arg0: i32, %arg1: i32) -> (i32, i32, i32) {
    %c0_i32 = arith.constant 0 : i32
    %c0_i32_0 = arith.constant 0 : i32
    %c0_i32_1 = arith.constant 0 : i32
    return %c0_i32, %arg0, %c0_i32_0 : i32, i32, i32
  }
  func.func @transform_3(%arg0: i32, %arg1: i32) -> (i32, i32, i32) {
    %c0_i32 = arith.constant 0 : i32
    %c0_i32_0 = arith.constant 0 : i32
    %c0_i32_1 = arith.constant 0 : i32
    return %arg0, %c0_i32, %c0_i32_0 : i32, i32, i32
  }
  func.func @transform_4(%arg0: i32, %arg1: i32) -> (i32, i32, i32) {
    %c0_i32 = arith.constant 0 : i32
    %c0_i32_0 = arith.constant 0 : i32
    %c0_i32_1 = arith.constant 0 : i32
    return %arg0, %c0_i32, %c0_i32_0 : i32, i32, i32
  }
  func.func @transform_5(%arg0: i32, %arg1: i32) -> (i32, i32) {
    %c0_i32 = arith.constant 0 : i32
    %c0_i32_0 = arith.constant 0 : i32
    return %arg0, %c0_i32 : i32, i32
  }
  func.func @transform_6(%arg0: i32, %arg1: i32) -> (i32, i32, i32) {
    %c0_i32 = arith.constant 0 : i32
    %c0_i32_0 = arith.constant 0 : i32
    %c0_i32_1 = arith.constant 0 : i32
    %c0_i32_2 = arith.constant 0 : i32
    return %c0_i32, %c0_i32_0, %c0_i32_1 : i32, i32, i32
  }
  func.func @transform_7(%arg0: i32, %arg1: i32) -> (i32, i32, i32) {
    %c0_i32 = arith.constant 0 : i32
    %c0_i32_0 = arith.constant 0 : i32
    %c0_i32_1 = arith.constant 0 : i32
    %c0_i32_2 = arith.constant 0 : i32
    return %c0_i32, %c0_i32_0, %c0_i32_1 : i32, i32, i32
  }
  func.func @transform_8(%arg0: i32, %arg1: i32) -> (i32, i32, i32) {
    %c0_i32 = arith.constant 0 : i32
    %c0_i32_0 = arith.constant 0 : i32
    %c0_i32_1 = arith.constant 0 : i32
    %c0_i32_2 = arith.constant 0 : i32
    return %c0_i32, %c0_i32_0, %c0_i32_1 : i32, i32, i32
  }
  func.func @transform_9(%arg0: i32, %arg1: i32) -> (i32, i32, i32) {
    %c0_i32 = arith.constant 0 : i32
    %c0_i32_0 = arith.constant 0 : i32
    %c0_i32_1 = arith.constant 0 : i32
    %c0_i32_2 = arith.constant 0 : i32
    return %c0_i32, %c0_i32_0, %c0_i32_1 : i32, i32, i32
  }
  func.func @transform_10(%arg0: i32, %arg1: i32) -> (i32, i32) {
    %c0_i32 = arith.constant 0 : i32
    %c0_i32_0 = arith.constant 0 : i32
    return %c0_i32, %arg1 : i32, i32
  }
  func.func @transform_11(%arg0: i32, %arg1: i32) -> (i32, i32) {
    %c0_i32 = arith.constant 0 : i32
    %c0_i32_0 = arith.constant 0 : i32
    return %c0_i32, %arg1 : i32, i32
  }
  func.func @transform_12(%arg0: i32, %arg1: i32) -> (i32, i32) {
    %c0_i32 = arith.constant 0 : i32
    %c0_i32_0 = arith.constant 0 : i32
    return %c0_i32, %arg1 : i32, i32
  }
  func.func @transform_13(%arg0: i32, %arg1: i32) -> (i32, i32) {
    %c0_i32 = arith.constant 0 : i32
    %c0_i32_0 = arith.constant 0 : i32
    return %c0_i32, %arg1 : i32, i32
  }
  func.func @transform_14(%arg0: i32, %arg1: i32) -> (i32, i32, i32) {
    %c0_i32 = arith.constant 0 : i32
    %c0_i32_0 = arith.constant 0 : i32
    %c0_i32_1 = arith.constant 0 : i32
    return %c0_i32, %arg0, %c0_i32_0 : i32, i32, i32
  }
  func.func @transform_15(%arg0: i32, %arg1: i32) -> (i32, i32, i32) {
    %c0_i32 = arith.constant 0 : i32
    %c0_i32_0 = arith.constant 0 : i32
    %c0_i32_1 = arith.constant 0 : i32
    return %c0_i32, %arg0, %c0_i32_0 : i32, i32, i32
  }
  func.func @transform_16(%arg0: i32, %arg1: i32) -> (i32, i32) {
    %c0_i32 = arith.constant 0 : i32
    %c0_i32_0 = arith.constant 0 : i32
    return %arg0, %c0_i32 : i32, i32
  }
  func.func @transform_17(%arg0: i32, %arg1: i32) -> (i32, i32) {
    %c0_i32 = arith.constant 0 : i32
    return %arg0, %arg1 : i32, i32
  }
}

module attributes {stable_mosaic.version = 11 : i64} {
  func.func @_precompute_kernel(%arg0: i32, %arg1: memref<8x16x128xf32, #tpu.memory_space<vmem>>, %arg2: memref<128x256xbf16, #tpu.memory_space<vmem>>, %arg3: memref<1x256xf32, #tpu.memory_space<vmem>>, %arg4: memref<8x16x256xf32, #tpu.memory_space<vmem>>, %arg5: memref<8x128xf32, #tpu.memory_space<vmem>>) attributes {dimension_semantics = [#tpu.dimension_semantics<parallel>], iteration_bounds = array<i64: 2>, scalar_prefetch = 0 : i64, scratch_operands = 0 : i64, tpu.core_type = #tpu.core_type<tc>, window_params = [{transform_indices = @transform_0, window_bounds = array<i64: 8, 16, 128>}, {pipeline_mode = #tpu.pipeline_mode<synchronous>, transform_indices = @transform_1, window_bounds = array<i64: 128, 256>}, {pipeline_mode = #tpu.pipeline_mode<synchronous>, transform_indices = @transform_2, window_bounds = array<i64: 1, 256>}, {transform_indices = @transform_3, window_bounds = array<i64: 8, 16, 256>}, {transform_indices = @transform_4, window_bounds = array<i64: 8, 128>}]} {
    %c0 = arith.constant 0 : index
    %c0_0 = arith.constant 0 : index
    %c0_1 = arith.constant 0 : index
    %0 = vector.load %arg1[%c0, %c0_0, %c0_1] : memref<8x16x128xf32, #tpu.memory_space<vmem>>, vector<8x16x128xf32>
    %1 = vector.shape_cast %0 : vector<8x16x128xf32> to vector<128x128xf32>
    %c0_2 = arith.constant 0 : index
    %c0_3 = arith.constant 0 : index
    %2 = vector.load %arg2[%c0_2, %c0_3] : memref<128x256xbf16, #tpu.memory_space<vmem>>, vector<128x256xbf16>
    %3 = arith.truncf %1 : vector<128x128xf32> to vector<128x128xbf16>
    %cst = arith.constant dense<0.000000e+00> : vector<128x256xf32>
    %4 = tpu.matmul %3, %2, %cst {dimension_numbers = #tpu.dot_dimension_numbers<[1], [0], [0], [1], [0, 0, 1, 1], [], []>} : vector<128x128xbf16>, vector<128x256xbf16>, vector<128x256xf32> -> vector<128x256xf32>
    %c0_4 = arith.constant 0 : index
    %c0_5 = arith.constant 0 : index
    %5 = vector.load %arg3[%c0_4, %c0_5] : memref<1x256xf32, #tpu.memory_space<vmem>>, vector<1x256xf32>
    %6 = vector.broadcast %5 : vector<1x256xf32> to vector<128x256xf32>
    %7 = arith.addf %4, %6 : vector<128x256xf32>
    %8 = vector.shape_cast %7 : vector<128x256xf32> to vector<8x16x256xf32>
    %c0_6 = arith.constant 0 : index
    %c0_7 = arith.constant 0 : index
    %c0_8 = arith.constant 0 : index
    %9 = vector.load %arg4[%c0_6, %c0_7, %c0_8] : memref<8x16x256xf32, #tpu.memory_space<vmem>>, vector<8x16x256xf32>
    tpu.vector_store %arg4[%c0_6, %c0_7, %c0_8], %8 {strides = array<i32>} : memref<8x16x256xf32, #tpu.memory_space<vmem>>, vector<8x16x256xf32>,
    %cst_9 = arith.constant dense<0.000000e+00> : vector<8x128xf32>
    %10 = vector.multi_reduction <add>, %0, %cst_9 [1] : vector<8x16x128xf32> to vector<8x128xf32>
    %cst_10 = arith.constant 1.600000e+01 : f32
    %11 = vector.broadcast %cst_10 : f32 to vector<8x128xf32>
    %12 = arith.divf %10, %11 : vector<8x128xf32>
    %c0_11 = arith.constant 0 : index
    %c0_12 = arith.constant 0 : index
    %13 = vector.load %arg5[%c0_11, %c0_12] : memref<8x128xf32, #tpu.memory_space<vmem>>, vector<8x128xf32>
    tpu.vector_store %arg5[%c0_11, %c0_12], %12 {strides = array<i32>} : memref<8x128xf32, #tpu.memory_space<vmem>>, vector<8x128xf32>,
    return
  }
  func.func @transform_0(%arg0: i32) -> (i32, i32, i32) {
    %c0_i32 = arith.constant 0 : i32
    %c0_i32_0 = arith.constant 0 : i32
    %c0_i32_1 = arith.constant 0 : i32
    return %arg0, %c0_i32, %c0_i32_0 : i32, i32, i32
  }
  func.func @transform_1(%arg0: i32) -> (i32, i32) {
    %c0_i32 = arith.constant 0 : i32
    %c0_i32_0 = arith.constant 0 : i32
    %c0_i32_1 = arith.constant 0 : i32
    return %c0_i32, %c0_i32_0 : i32, i32
  }
  func.func @transform_2(%arg0: i32) -> (i32, i32) {
    %c0_i32 = arith.constant 0 : i32
    %c0_i32_0 = arith.constant 0 : i32
    %c0_i32_1 = arith.constant 0 : i32
    return %c0_i32, %c0_i32_0 : i32, i32
  }
  func.func @transform_3(%arg0: i32) -> (i32, i32, i32) {
    %c0_i32 = arith.constant 0 : i32
    %c0_i32_0 = arith.constant 0 : i32
    %c0_i32_1 = arith.constant 0 : i32
    return %arg0, %c0_i32, %c0_i32_0 : i32, i32, i32
  }
  func.func @transform_4(%arg0: i32) -> (i32, i32) {
    %c0_i32 = arith.constant 0 : i32
    %c0_i32_0 = arith.constant 0 : i32
    return %arg0, %c0_i32 : i32, i32
  }
}

</mosaic_0001>

<bundles_post_ra>
// kernel: forward.2
= control target key start
LH: loop header
LB: loop body
LE: loop exit
PB: predicated region body
PF: predicated region fallthrough
CT: control target
= control target key end

     0   :  { %10 = vsyncpa [#allocation3], 0  ;;  %s1317_s0 = inlined_call_operand.hbm [shape: f32[16,16,128], index: 0, kind: input, shape index: {}]   ;;  %s1318_s1 = inlined_call_operand.hbm [shape: bf16[128,256], index: 1, kind: input, shape index: {}]   ;;  %s1319_s2 = inlined_call_operand.hbm [shape: f32[1,256], index: 2, kind: input, shape index: {}]   ;;  %s1320_s3 = inlined_call_operand.vmem [shape: f32[16,16,256], index: 3, kind: output, shape index: {0}]   ;;  %s1321_s4 = inlined_call_operand.vmem [shape: f32[16,128], index: 4, kind: output, shape index: {1}]  }
   0x1   :  { %12 = vsyncpa [#allocation3 + $0x1], 0 }
   0x2   :  { %13 = vsyncpa [#allocation5], 0  ;;  %s1081_s15 = smov 0   ;;  %s1083_s16 = smov 0  }
   0x3   :  { %s1085_s17 = smov 0   ;;  %s1087_s18 = smov 0  }
   0x4 LB: > { %s1100_s19 = sadd.s32 4294967295, %s1049_s18   ;;  %p39_p0 = scmp.ne.s32.totalorder %s1041_s16, %s1037_s15  ;;  %s1049_s18 = sphi %s1087_s18, %s1328_s18   ;;  %s1045_s17 = sphi %s1085_s17, %s1327_s17   ;;  %s1041_s16 = sphi %s1083_s16, %s1326_s16   ;;  %s1037_s15 = sphi %s1081_s15, %s1325_s15  }
   0x5   : > { %p40_p1 = scmp.eq.s32.totalorder %s1100_s19, 0  ;;  %p739_p2 = scmp.ge.s32.totalorder %s1049_s18, 1 }
   0x6   : > { %p144_p3 = scmp.lt.s32.totalorder %s1049_s18, 3  ;;  %s155_s23 = sshll.u32 %s1318_s1, 4  ;;  %s156_s23 = int_to_ptr.hbm [resolvable:$true] %s155_s23 }
   0x7   : > { %p1108_p4 = por %p40_p1, %p39_p0  ;;  %s1051_s25 = smov [#allocation4]  }
   0x8   : > { %p1115_p5 = pnand %p739_p2, %p144_p3  ;;  %s157_s26 = sshll.u32 %s1051_s25, 4  ;;  %s158_s26 = int_to_ptr.vmem [resolvable:$true] %s157_s26 }
   0x9   : > { %s170_s29 = sshll.u32 %s1319_s2, 4  ;;  %s1052_s30 = smov 128   ;;  %s171_s29 = int_to_ptr.hbm [resolvable:$true] %s170_s29 }
   0xa   : > { %p866_p6 = pneg %p1115_p5  ;;  %s1053_s5 = smov 8  }
   0xb   : > { %s1054_s6 = smov [#allocation6]   ;;  %s1130_s8 = sadd.s32 1, %s1049_s18  }
   0xc   : > { %p867_p7 = pnand %p866_p6, %p40_p1  ;;  %s172_s7 = sshll.u32 %s1054_s6, 4  ;;  %s173_s7 = int_to_ptr.vmem [resolvable:$true] %s172_s7 }
   0xd   : > { %s26_s9 = sadd.s32 1, %s1045_s17  ;;  %s23_s10 = ssub.s32 %s1049_s18, %s1130_s8 }
   0xe   : > { %869 = dma.hbm_to_vmem [thread:$0]  (!%p867_p7), %s156_s23, 2048, %s158_s26, [#allocation5], %s1052_s30, %s1052_s30, %s1053_s5  }
   0xf   : > { %872 = dma.hbm_to_vmem [thread:$0]  (!%p867_p7), %s171_s29, 32, %s173_s7, [#allocation5]  }
  0x10   : > { %p33_p8 = scmp.ne.s32.totalorder %s1045_s17, %s1041_s16  ;;  %p24_p9 = scmp.eq.s32.totalorder %s23_s10, 0 }
  0x11   : > { %p34_p10 = scmp.eq.s32.totalorder %s1049_s18, 0  ;;  %s183_s11 = sand.u32 1, %s1045_s17  }
  0x12   : > { %s1140_s12 = scalar_select %p24_p9, %s1045_s17, %s26_s9  }
  0x13   : > { %p35_p11 = por %p34_p10, %p33_p8  ;;  %p879_p12 = scmp.lt.s32.totalorder %s1049_s18, 2 }
  0x14   : > { %s743_s13 = sshll.u32 %s183_s11, 7  ;;  %s822_s14 = sshll.u32 %s1049_s18, 7 }
  0x15   : > { %s193_s22 = scalar_lea.hbm %s1317_s0, %s822_s14  ;;  %s187_s25 = scalar_lea.vmem [#allocation2], %s743_s13 }
  0x16   : > { %s194_s23 = sshll.u32 %s193_s22, 4  ;;  %s196_s26 = sshll.u32 %s187_s25, 4  ;;  %s195_s23 = int_to_ptr.hbm [resolvable:$true] %s194_s23  ;;  %s197_s26 = int_to_ptr.vmem [resolvable:$true] %s196_s26 }
  0x17   : > { %p1147_p13 = pnand %p879_p12, %p35_p11  ;;  %s184_s28 = scalar_lea.sflag [#allocation3], %s183_s11 }
  0x18   : > { %s981_s29 = sshra.s32 %s195_s23, 4  ;;  %s988_s9 = scalar_lea.hbm %s1317_s0, 256  ;;  %s982_s29 = int_to_ptr.hbm [resolvable:$true] %s981_s29 }
  0x19   : > { %s983_s6 = scalar_lea.hbm %s982_s29, 128  ;;  %p985_p2 = pneg %p1147_p13 }
  0x1a   : > { %p984_p0 = scmp.ne.s32.totalorder %s982_s29, %s983_s6  ;;  %p989_p7 = scmp.lt.s32.totalorder %s982_s29, %s1317_s0 }
  0x1b   : > { %p990_p8 = scmp.lt.s32.totalorder %s988_s9, %s983_s6 }
  0x1c   : > { %p986_p3 = pnand %p985_p2, %p984_p0 }
  0x1d   : > { %p991_p9 = por %p990_p8, %p989_p7 }
  0x1e   : > { %p987_p6 = pneg %p986_p3 }
  0x20   : > { %p992_p10 = pnand %p991_p9, %p987_p6 }
  0x22   : > { %995 = shalt.err (!%p992_p10)
}
  0x23   : > { %876 = dma.hbm_to_vmem [thread:$0]  (!%p1147_p13), %s195_s23, 2048, %s197_s26, %s184_s28, %s1052_s30, %s1052_s30, %s1053_s5  }
  0x24   : > { %208 = sbr.rel (%p1115_p5) target bundleno = 270 (0x10e), region = 32  ;;  %s210_s11 = sand.u32 (!%p1115_p5), 1, %s1041_s16  }
  0x25   : > { %s748_s14 = sshll.u32 (!%p1115_p5), %s210_s11, 7  ;;  %s211_s15 = scalar_lea.sflag (!%p1115_p5), [#allocation3], %s210_s11 }
  0x26   : > { %s1167_s21 = scalar_lea.vmem (!%p1115_p5), [#allocation2], %s748_s14 }
  0x29   : > { %1028 = dma.done.wait (%p1108_p4), %s211_s15, 2048  }
  0x2a   : > { %1030 = vsyncadd (%p1108_p4), %s211_s15, 4294965248 }
  0x2b   : > { %1032 = dma.done.wait (%p40_p1), [#allocation5], 2080  }
  0x2c   : > { %1034 = vsyncadd (%p40_p1), [#allocation5], 4294965216  ;;  %v813_v0 = vld [vmem:[#allocation4 + $0x70] sm:$0xf]  ;;  %v839_v1 = vld [vmem:[#allocation4 + $0x74] sm:$0xf0] }
  0x2d   : > { %v838_v2 = vld [vmem:[#allocation4 + $0x74] sm:$0xf]  ;;  %v814_v3 = vor.u32 %v839_v1, %v813_v0  ;;  %v815_v4 = vld [vmem:[#allocation4 + $0x78] sm:$0xf0]  ;;  %v805_v5 = vld [vmem:[#allocation4 + $0x60] sm:$0xf] }
  0x2e   : > { %v837_v6 = vld [vmem:[#allocation4 + $0x64] sm:$0xf0]  ;;  %v818_v7 = vor.u32 %v838_v2, %v815_v4  ;;  %v836_v8 = vld [vmem:[#allocation4 + $0x64] sm:$0xf]  ;;  %v807_v9 = vld [vmem:[#allocation4 + $0x68] sm:$0xf0] }
  0x2f   : > { %393 = vmatpush.bf16.msra.mxu0 %v814_v3  ;;  %840 = vmatpush.bf16.msra.mxu2 %v814_v3  ;;  %v806_v10 = vor.u32 %v837_v6, %v805_v5  ;;  %v810_v11 = vor.u32 %v836_v8, %v807_v9  ;;  %v797_v12 = vld [vmem:[#allocation4 + $0x50] sm:$0xf]  ;;  %v835_v13 = vld [vmem:[#allocation4 + $0x54] sm:$0xf0]  ;;  %v834_v14 = vld [vmem:[#allocation4 + $0x54] sm:$0xf] }
  0x30   : > { %442 = vmatpush.bf16.msra.mxu1 %v818_v7  ;;  %848 = vmatpush.bf16.msra.mxu3 %v818_v7  ;;  %v799_v15 = vld [vmem:[#allocation4 + $0x58] sm:$0xf0]  ;;  %v798_v16 = vor.u32 %v835_v13, %v797_v12  ;;  %v789_v18 = vld [vmem:[#allocation4 + $0x40] sm:$0xf]  ;;  %v833_v19 = vld [vmem:[#allocation4 + $0x44] sm:$0xf0] }
  0x31   : > { %v802_v17 = vor.u32 %v834_v14, %v799_v15  ;;  %v832_v20 = vld [vmem:[#allocation4 + $0x44] sm:$0xf]  ;;  %v791_v21 = vld [vmem:[#allocation4 + $0x48] sm:$0xf0]  ;;  %v790_v22 = vor.u32 %v833_v19, %v789_v18  ;;  %v781_v24 = vld [vmem:[#allocation4 + $0x30] sm:$0xf] }
  0x32   : > { %v794_v23 = vor.u32 %v832_v20, %v791_v21  ;;  %v831_v25 = vld [vmem:[#allocation4 + $0x34] sm:$0xf0]  ;;  %v830_v26 = vld [vmem:[#allocation4 + $0x34] sm:$0xf]  ;;  %v783_v27 = vld [vmem:[#allocation4 + $0x38] sm:$0xf0] }
  0x33   : > { %394 = vmatpush.bf16.msra.mxu0 %v806_v10  ;;  %841 = vmatpush.bf16.msra.mxu2 %v806_v10  ;;  %v782_v28 = vor.u32 %v831_v25, %v781_v24  ;;  %v786_v29 = vor.u32 %v830_v26, %v783_v27  ;;  %v773_v30 = vld [vmem:[#allocation4 + $0x20] sm:$0xf]  ;;  %v829_v31 = vld [vmem:[#allocation4 + $0x24] sm:$0xf0]  ;;  %v828_v32 = vld [vmem:[#allocation4 + $0x24] sm:$0xf] }
  0x34   : > { %443 = vmatpush.bf16.msra.mxu1 %v810_v11  ;;  %849 = vmatpush.bf16.msra.mxu3 %v810_v11  ;;  %v775_v33 = vld [vmem:[#allocation4 + $0x28] sm:$0xf0]  ;;  %v774_v34 = vor.u32 %v829_v31, %v773_v30  ;;  %v765_v36 = vld [vmem:[#allocation4 + $0x10] sm:$0xf]  ;;  %v827_v37 = vld [vmem:[#allocation4 + $0x14] sm:$0xf0] }
  0x35   : > { %v778_v35 = vor.u32 %v828_v32, %v775_v33  ;;  %v826_v38 = vld [vmem:[#allocation4 + $0x14] sm:$0xf]  ;;  %v767_v39 = vld [vmem:[#allocation4 + $0x18] sm:$0xf0]  ;;  %v766_v40 = vor.u32 %v827_v37, %v765_v36  ;;  %v757_v42 = vld [vmem:[#allocation4] sm:$0xf] }
  0x36   : > { %v770_v41 = vor.u32 %v826_v38, %v767_v39  ;;  %v825_v43 = vld [vmem:[#allocation4 + $0x4] sm:$0xf0]  ;;  %v824_v44 = vld [vmem:[#allocation4 + $0x4] sm:$0xf]  ;;  %v759_v45 = vld [vmem:[#allocation4 + $0x8] sm:$0xf0] }
  0x37   : > { %395 = vmatpush.bf16.msra.mxu0 %v798_v16  ;;  %842 = vmatpush.bf16.msra.mxu2 %v798_v16  ;;  %v267_v46 = vld [vmem:[%s1167_s21] sm:$0xff]  ;;  %v268_v47 = vld [vmem:[%s1167_s21 + $0x8] sm:$0xff]  ;;  %v758_v49 = vor.u32 %v825_v43, %v757_v42  ;;  %v269_v51 = vld [vmem:[%s1167_s21 + $0x10] sm:$0xff]  ;;  %v762_v53 = vor.u32 %v824_v44, %v759_v45  ;;  %v1055_v55 = vmov 16.0   ;;  %vm602_vm1 = vcmask 1041409   ;;  %p263_p1 = scmp.lt.s32.totalorder %s1100_s19, 1 }
  0x38   : > { %444 = vmatpush.bf16.msra.mxu1 %v802_v17  ;;  %850 = vmatpush.bf16.msra.mxu3 %v802_v17  ;;  %v275_v48 = vld [vmem:[%s1167_s21 + $0x40] sm:$0xff]  ;;  %v276_v50 = vld [vmem:[%s1167_s21 + $0x48] sm:$0xff]  ;;  %v270_v52 = vld [vmem:[%s1167_s21 + $0x18] sm:$0xff]  ;;  %v523_v54 = vadd.f32 %v268_v47, %v267_v46  ;;  %919 = vrcp.f32 %v1055_v55  ;;  %v299_v57 = vpack.c.bf16 %v268_v47, %v267_v46  ;;  %vm604_vm2 = vcmask 1042434   ;;  %s751_s23 = sshll.u32 %s1100_s19, 3 }
  0x39   : > { %v530_v56 = vadd.f32 %v270_v52, %v269_v51  ;;  %v303_v58 = vpack.c.bf16 %v276_v50, %v275_v48  ;;  %v1184_v61 = vld [vmem:[%s1167_s21 + $0x20] sm:$0xff]  ;;  %v1187_v62 = vld [vmem:[%s1167_s21 + $0x28] sm:$0xff]  ;;  %v551_v1 = vadd.f32 %v276_v50, %v275_v48  ;;  %v277_v2 = vld [vmem:[%s1167_s21 + $0x50] sm:$0xff]  ;;  %v300_v26 = vpack.c.bf16 %v270_v52, %v269_v51  ;;  %s264_s20 = scalar_select %p263_p1, %s1100_s19, 1 }
  0x3a   : > { %v524_v59 = vrot.slane %v523_v54, 4  ;;  %v537_v0 = vadd.f32 %v1187_v62, %v1184_v61  ;;  %v278_v3 = vld [vmem:[%s1167_s21 + $0x58] sm:$0xff]  ;;  %v1194_v8 = vld [vmem:[%s1167_s21 + $0x60] sm:$0xff]  ;;  %v1197_v9 = vld [vmem:[%s1167_s21 + $0x68] sm:$0xff]  ;;  %vm606_vm3 = vcmask 1043459   ;;  %vm608_vm4 = vcmask 1044484  }
  0x3b   : > { %396 = vmatpush.bf16.msra.mxu0 %v790_v22  ;;  %843 = vmatpush.bf16.msra.mxu2 %v790_v22  ;;  %v531_v60 = vrot.slane %v530_v56, 4  ;;  %v558_v6 = vadd.f32 %v278_v3, %v277_v2  ;;  %v565_v11 = vadd.f32 %v1197_v9, %v1194_v8  ;;  %v552_v12 = vrot.slane %v551_v1, 4  ;;  %v1205_v36 = vld [vmem:[%s1167_s21 + $0x38] sm:$0xff]  ;;  %v1210_v38 = vld [vmem:[%s1167_s21 + $0x70] sm:$0xff]  ;;  %s754_s24 = sshll.u32 %s264_s20, 3  ;;  %p257_p4 = scmp.lt.s32.totalorder %s751_s23, 15 }
  0x3c   : > { %445 = vmatpush.bf16.msra.mxu1 %v794_v23  ;;  %851 = vmatpush.bf16.msra.mxu3 %v794_v23  ;;  %v525_v4 = vadd.f32 %v524_v59, %v523_v54  ;;  %v538_v7 = vrot.slane %v537_v0, 4  ;;  %v304_v27 = vpack.c.bf16 %v278_v3, %v277_v2  ;;  %v1213_v39 = vld [vmem:[%s1167_s21 + $0x78] sm:$0xff]  ;;  %vm610_vm5 = vcmask 1045509   ;;  %s266_s22 = scalar_lea.vmem %s1321_s4, %s754_s24 }
  0x3d   : > { %v532_v5 = vadd.f32 %v531_v60, %v530_v56  ;;  %v559_v16 = vrot.slane %v558_v6, 4  ;;  %v566_v18 = vrot.slane %v565_v11, 4  ;;  %v553_v19 = vadd.f32 %v552_v12, %v551_v1  ;;  %s1330_s23 = smov (!%p257_p4, %s751_s23), 15 }
  0x3e   : > { %v920_v63 = vpop.eup %919  ;;  %v539_v13 = vadd.f32 %v538_v7, %v537_v0  ;;  %v526_v14 = vrot.slane %v525_v4, 2  ;;  %v572_v42 = vadd.f32 %v1213_v39, %v1210_v38  ;;  %v301_v7 = vpack.c.bf16 %v1187_v62, %v1184_v61  ;;  %s823_s25 = sshll.u32 %s1330_s23, 5 }
  0x3f   : > { %397 = vmatpush.bf16.msra.mxu0 %v782_v28  ;;  %844 = vmatpush.bf16.msra.mxu2 %v782_v28  ;;  %v580_v10 = vmul.f32 16.0, %v920_v63  ;;  %v533_v15 = vrot.slane %v532_v5, 2  ;;  %v560_v23 = vadd.f32 %v559_v16, %v558_v6  ;;  %v567_v25 = vadd.f32 %v566_v18, %v565_v11  ;;  %s1238_s28 = scalar_lea.vmem %s1320_s3, %s823_s25 }
  0x40   : > { %446 = vmatpush.bf16.msra.mxu1 %v786_v29  ;;  %852 = vmatpush.bf16.msra.mxu3 %v786_v29  ;;  %v540_v20 = vrot.slane %v539_v13, 2  ;;  %v527_v21 = vadd.f32 %v526_v14, %v525_v4  ;;  %v554_v28 = vrot.slane %v553_v19, 2  ;;  %vm584_vm0 = vweird.f32 %v920_v63 }
  0x41   : > { %v581_v17 = vsub.f32 1.0, %v580_v10  ;;  %v534_v22 = vadd.f32 %v533_v15, %v532_v5  ;;  %v561_v32 = vrot.slane %v560_v23, 2  ;;  %v305_v10 = vpack.c.bf16 %v1197_v9, %v1194_v8 }
  0x42   : > { %v541_v29 = vadd.f32 %v540_v20, %v539_v13  ;;  %v528_v30 = vrot.slane %v527_v21, 1  ;;  %vm612_vm6 = vcmask 1046534   ;;  %vm614_vm7 = vcmask 1047559  }
  0x43   : > { %398 = vmatpush.bf16.msra.mxu0 %v774_v34  ;;  %845 = vmatpush.bf16.msra.mxu2 %v774_v34  ;;  %v582_v24 = vmul.f32 %v920_v63, %v581_v17  ;;  %v535_v31 = vrot.slane %v534_v22, 1  ;;  %v568_v34 = vrot.slane %v567_v25, 2  ;;  %v562_v45 = vadd.f32 %v561_v32, %v560_v23 }
  0x44   : > { %447 = vmatpush.bf16.msra.mxu1 %v778_v35  ;;  %853 = vmatpush.bf16.msra.mxu3 %v778_v35  ;;  %v1202_v35 = vld [vmem:[%s1167_s21 + $0x30] sm:$0xff]  ;;  %v529_v43 = vadd.f32 %v528_v30, %v527_v21  ;;  %v306_v21 = vpack.c.bf16 %v1213_v39, %v1210_v38 }
  0x45   : > { %v583_v33 = vadd.f32 %v920_v63, %v582_v24  ;;  %v544_v37 = vadd.f32 %v1205_v36, %v1202_v35  ;;  %v536_v44 = vadd.f32 %v535_v31, %v534_v22  ;;  %v569_v48 = vadd.f32 %v568_v34, %v567_v25  ;;  %v307_v22 = vld [vmem:[#allocation6] sm:$0x3] }
  0x46   : > { %v563_v56 = vrot.slane %v562_v45, 1  ;;  %v302_v20 = vpack.c.bf16 %v1205_v36, %v1202_v35  ;;  %v1231_v23 = vperm.slane %v307_v22, 0  ;;  %v1233_v24 = vperm.slane %v307_v22, 1 }
  0x47   : > { %399 = vmatpush.bf16.msra.mxu0 %v766_v40  ;;  %846 = vmatpush.bf16.msra.mxu2 %v766_v40  ;;  %v555_v40 = vadd.f32 %v554_v28, %v553_v19  ;;  %v545_v46 = vrot.slane %v544_v37, 4  ;;  %v585_v47 = vsel %vm584_vm0, %v920_v63, %v583_v33 }
  0x48   : > { %448 = vmatpush.bf16.msra.mxu1 %v770_v41  ;;  %854 = vmatpush.bf16.msra.mxu3 %v770_v41  ;;  %v542_v41 = vrot.slane %v541_v29, 1  ;;  %v586_v54 = vmul.f32 %v585_v47, %v529_v43  ;;  %v587_v55 = vmul.f32 %v585_v47, %v536_v44  ;;  %v564_v3 = vadd.f32 %v563_v56, %v562_v45 }
  0x49   : > { %v546_v50 = vadd.f32 %v545_v46, %v544_v37  ;;  %v556_v51 = vrot.slane %v555_v40, 1 }
  0x4a   : > { %v543_v52 = vadd.f32 %v542_v41, %v541_v29  ;;  %v603_v63 = vsel %vm602_vm1, %v587_v55, %v586_v54  ;;  %v591_v15 = vmul.f32 %v585_v47, %v564_v3 }
  0x4b   : > { %400 = vmatpush.bf16.msra.mxu0 %v758_v49  ;;  %847 = vmatpush.bf16.msra.mxu2 %v758_v49  ;;  %v573_v49 = vrot.slane %v572_v42, 4  ;;  %v557_v0 = vadd.f32 %v556_v51, %v555_v40 }
  0x4c   : > { %449 = vmatpush.bf16.msra.mxu1 %v762_v53  ;;  %855 = vmatpush.bf16.msra.mxu3 %v762_v53  ;;  %v588_v1 = vmul.f32 %v585_v47, %v543_v52 }
  0x4d   : > { %v574_v53 = vadd.f32 %v573_v49, %v572_v42  ;;  %v590_v12 = vmul.f32 %v585_v47, %v557_v0 }
  0x4e   : > { %401 = vmatmul.bf16.vlgmr.msra.gmra.mxu0 %v299_v57  ;;  %421 = vmatmul.bf16.vlgmr.msra.gmra.mxu2 %v303_v58  ;;  %v605_v13 = vsel %vm604_vm2, %v588_v1, %v603_v63 }
  0x4f   : > { %450 = vmatmul.bf16.vlgmr.msra.gmra.mxu1 %v299_v57  ;;  %470 = vmatmul.bf16.vlgmr.msra.gmra.mxu3 %v303_v58  ;;  %v547_v57 = vrot.slane %v546_v50, 2  ;;  %v570_v58 = vrot.slane %v569_v48, 1  ;;  %v575_v59 = vrot.slane %v574_v53, 2 }
  0x51   : > { %v548_v60 = vadd.f32 %v547_v57, %v546_v50  ;;  %v576_v2 = vadd.f32 %v575_v59, %v574_v53  ;;  %v571_v5 = vadd.f32 %v570_v58, %v569_v48 }
  0x53   : > { %v549_v4 = vrot.slane %v548_v60, 1  ;;  %v577_v6 = vrot.slane %v576_v2, 1  ;;  %v592_v17 = vmul.f32 %v585_v47, %v571_v5 }
  0x55   : > { %v550_v11 = vadd.f32 %v549_v4, %v548_v60  ;;  %v578_v14 = vadd.f32 %v577_v6, %v576_v2 }
  0x57   : > { %v589_v16 = vmul.f32 %v585_v47, %v550_v11  ;;  %v593_v19 = vmul.f32 %v585_v47, %v578_v14 }
  0x59   : > { %v607_v18 = vsel %vm606_vm3, %v589_v16, %v605_v13 }
  0x5a   : > { %v609_v61 = vsel %vm608_vm4, %v590_v12, %v607_v18 }
  0x5b   : > { %v611_v62 = vsel %vm610_vm5, %v591_v15, %v609_v61 }
  0x5c   : > { %v613_v8 = vsel %vm612_vm6, %v592_v17, %v611_v62 }
  0x5d   : > { %v615_v9 = vsel %vm614_vm7, %v593_v19, %v613_v8 }
  0x5e   : > { %406 = vmatmul.bf16.gmra.mxu0 %v300_v26  ;;  %426 = vmatmul.bf16.gmra.mxu2 %v304_v27  ;;  %617 = vst [vmem:[%s266_s22] sm:$0xff] %v615_v9 }
  0x5f   : > { %455 = vmatmul.bf16.gmra.mxu1 %v300_v26  ;;  %475 = vmatmul.bf16.gmra.mxu3 %v304_v27 }
  0x6e   : > { %411 = vmatmul.bf16.gmra.mxu0 %v301_v7  ;;  %431 = vmatmul.bf16.gmra.mxu2 %v305_v10 }
  0x6f   : > { %460 = vmatmul.bf16.gmra.mxu1 %v301_v7  ;;  %480 = vmatmul.bf16.gmra.mxu3 %v305_v10 }
  0x7e   : > { %416 = vmatmul.bf16.gmra.mxu0 %v302_v20  ;;  %436 = vmatmul.bf16.gmra.mxu2 %v306_v21 }
  0x7f   : > { %465 = vmatmul.bf16.gmra.mxu1 %v302_v20  ;;  %485 = vmatmul.bf16.gmra.mxu3 %v306_v21 }
  0xcb   : > { %v402_v25 = vpop.f32.mrf.mxu0 }
  0xcc   : > { %v403_v26 = vadd.f32 %v402_v25, %v1231_v23  ;;  %v451_v27 = vpop.f32.mrf.mxu1 }
  0xcd   : > { %v452_v28 = vadd.f32 %v451_v27, %v1233_v24 }
  0xce   : > { %491 = vst [vmem:[%s1238_s28] sm:$0xff] %v403_v26 }
  0xcf   : > { %492 = vst [vmem:[%s1238_s28 + $0x8] sm:$0xff] %v452_v28 }
  0xd1   : > { %v422_v29 = vpop.f32.mrf.mxu2 }
  0xd2   : > { %v423_v30 = vadd.f32 %v422_v29, %v1231_v23  ;;  %v471_v31 = vpop.f32.mrf.mxu3 }
  0xd3   : > { %v472_v32 = vadd.f32 %v471_v31, %v1233_v24  ;;  %v404_v33 = vpop.f32.mrf.mxu0 }
  0xd4   : > { %507 = vst [vmem:[%s1238_s28 + $0x80] sm:$0xff] %v423_v30  ;;  %v405_v34 = vadd.f32 %v404_v33, %v1231_v23  ;;  %v453_v35 = vpop.f32.mrf.mxu1 }
  0xd5   : > { %508 = vst [vmem:[%s1238_s28 + $0x88] sm:$0xff] %v472_v32  ;;  %v454_v36 = vadd.f32 %v453_v35, %v1233_v24 }
  0xd6   : > { %493 = vst [vmem:[%s1238_s28 + $0x10] sm:$0xff] %v405_v34 }
  0xd7   : > { %494 = vst [vmem:[%s1238_s28 + $0x18] sm:$0xff] %v454_v36 }
  0xd9   : > { %v424_v37 = vpop.f32.mrf.mxu2 }
  0xda   : > { %v425_v38 = vadd.f32 %v424_v37, %v1231_v23  ;;  %v473_v39 = vpop.f32.mrf.mxu3 }
  0xdb   : > { %v474_v40 = vadd.f32 %v473_v39, %v1233_v24  ;;  %v407_v41 = vpop.f32.mrf.mxu0 }
  0xdc   : > { %509 = vst [vmem:[%s1238_s28 + $0x90] sm:$0xff] %v425_v38  ;;  %v408_v42 = vadd.f32 %v407_v41, %v1231_v23  ;;  %v456_v43 = vpop.f32.mrf.mxu1 }
  0xdd   : > { %510 = vst [vmem:[%s1238_s28 + $0x98] sm:$0xff] %v474_v40  ;;  %v457_v44 = vadd.f32 %v456_v43, %v1233_v24 }
  0xde   : > { %495 = vst [vmem:[%s1238_s28 + $0x20] sm:$0xff] %v408_v42 }
  0xdf   : > { %496 = vst [vmem:[%s1238_s28 + $0x28] sm:$0xff] %v457_v44 }
  0xe1   : > { %v427_v45 = vpop.f32.mrf.mxu2 }
  0xe2   : > { %v428_v46 = vadd.f32 %v427_v45, %v1231_v23  ;;  %v476_v47 = vpop.f32.mrf.mxu3 }
  0xe3   : > { %v477_v48 = vadd.f32 %v476_v47, %v1233_v24  ;;  %v409_v49 = vpop.f32.mrf.mxu0 }
  0xe4   : > { %511 = vst [vmem:[%s1238_s28 + $0xa0] sm:$0xff] %v428_v46  ;;  %v410_v50 = vadd.f32 %v409_v49, %v1231_v23  ;;  %v458_v51 = vpop.f32.mrf.mxu1 }
  0xe5   : > { %512 = vst [vmem:[%s1238_s28 + $0xa8] sm:$0xff] %v477_v48  ;;  %v459_v52 = vadd.f32 %v458_v51, %v1233_v24 }
  0xe6   : > { %497 = vst [vmem:[%s1238_s28 + $0x30] sm:$0xff] %v410_v50 }
  0xe7   : > { %498 = vst [vmem:[%s1238_s28 + $0x38] sm:$0xff] %v459_v52 }
  0xe9   : > { %v429_v53 = vpop.f32.mrf.mxu2 }
  0xea   : > { %v430_v54 = vadd.f32 %v429_v53, %v1231_v23  ;;  %v478_v55 = vpop.f32.mrf.mxu3 }
  0xeb   : > { %v479_v56 = vadd.f32 %v478_v55, %v1233_v24  ;;  %v412_v57 = vpop.f32.mrf.mxu0 }
  0xec   : > { %513 = vst [vmem:[%s1238_s28 + $0xb0] sm:$0xff] %v430_v54  ;;  %v413_v58 = vadd.f32 %v412_v57, %v1231_v23  ;;  %v461_v59 = vpop.f32.mrf.mxu1 }
  0xed   : > { %514 = vst [vmem:[%s1238_s28 + $0xb8] sm:$0xff] %v479_v56  ;;  %v462_v60 = vadd.f32 %v461_v59, %v1233_v24 }
  0xee   : > { %499 = vst [vmem:[%s1238_s28 + $0x40] sm:$0xff] %v413_v58 }
  0xef   : > { %500 = vst [vmem:[%s1238_s28 + $0x48] sm:$0xff] %v462_v60 }
  0xf1   : > { %v432_v0 = vpop.f32.mrf.mxu2 }
  0xf2   : > { %v433_v1 = vadd.f32 %v432_v0, %v1231_v23  ;;  %v481_v2 = vpop.f32.mrf.mxu3 }
  0xf3   : > { %v482_v63 = vadd.f32 %v481_v2, %v1233_v24  ;;  %v414_v3 = vpop.f32.mrf.mxu0 }
  0xf4   : > { %515 = vst [vmem:[%s1238_s28 + $0xc0] sm:$0xff] %v433_v1  ;;  %v415_v4 = vadd.f32 %v414_v3, %v1231_v23  ;;  %v463_v5 = vpop.f32.mrf.mxu1 }
  0xf5   : > { %516 = vst [vmem:[%s1238_s28 + $0xc8] sm:$0xff] %v482_v63  ;;  %v464_v6 = vadd.f32 %v463_v5, %v1233_v24 }
  0xf6   : > { %501 = vst [vmem:[%s1238_s28 + $0x50] sm:$0xff] %v415_v4 }
  0xf7   : > { %502 = vst [vmem:[%s1238_s28 + $0x58] sm:$0xff] %v464_v6 }
  0xf9   : > { %v434_v7 = vpop.f32.mrf.mxu2 }
  0xfa   : > { %v435_v10 = vadd.f32 %v434_v7, %v1231_v23  ;;  %v483_v11 = vpop.f32.mrf.mxu3 }
  0xfb   : > { %v484_v12 = vadd.f32 %v483_v11, %v1233_v24  ;;  %v417_v13 = vpop.f32.mrf.mxu0 }
  0xfc   : > { %517 = vst [vmem:[%s1238_s28 + $0xd0] sm:$0xff] %v435_v10  ;;  %v418_v14 = vadd.f32 %v417_v13, %v1231_v23  ;;  %v466_v15 = vpop.f32.mrf.mxu1 }
  0xfd   : > { %518 = vst [vmem:[%s1238_s28 + $0xd8] sm:$0xff] %v484_v12  ;;  %v467_v16 = vadd.f32 %v466_v15, %v1233_v24 }
  0xfe   : > { %503 = vst [vmem:[%s1238_s28 + $0x60] sm:$0xff] %v418_v14 }
  0xff   : > { %504 = vst [vmem:[%s1238_s28 + $0x68] sm:$0xff] %v467_v16 }
 0x101   : > { %v437_v17 = vpop.f32.mrf.mxu2 }
 0x102   : > { %v438_v18 = vadd.f32 %v437_v17, %v1231_v23  ;;  %v486_v19 = vpop.f32.mrf.mxu3 }
 0x103   : > { %v487_v61 = vadd.f32 %v486_v19, %v1233_v24  ;;  %v419_v62 = vpop.f32.mrf.mxu0 }
 0x104   : > { %519 = vst [vmem:[%s1238_s28 + $0xe0] sm:$0xff] %v438_v18  ;;  %v420_v8 = vadd.f32 %v419_v62, %v1231_v23  ;;  %v468_v9 = vpop.f32.mrf.mxu1 }
 0x105   : > { %520 = vst [vmem:[%s1238_s28 + $0xe8] sm:$0xff] %v487_v61  ;;  %v469_v20 = vadd.f32 %v468_v9, %v1233_v24 }
 0x106   : > { %505 = vst [vmem:[%s1238_s28 + $0x70] sm:$0xff] %v420_v8 }
 0x107   : > { %506 = vst [vmem:[%s1238_s28 + $0x78] sm:$0xff] %v469_v20 }
 0x109   : > { %v439_v21 = vpop.f32.mrf.mxu2 }
 0x10a   : > { %v440_v22 = vadd.f32 %v439_v21, %v1231_v23  ;;  %v488_v25 = vpop.f32.mrf.mxu3 }
 0x10b   : > { %v489_v26 = vadd.f32 %v488_v25, %v1233_v24 }
 0x10c   : > { %521 = vst [vmem:[%s1238_s28 + $0xf0] sm:$0xff] %v440_v22 }
 0x10d   : > { %522 = vst [vmem:[%s1238_s28 + $0xf8] sm:$0xff] %v489_v26 }
 0x10e PF: > { %p16_p5 = scmp.ge.s32.totalorder %s1130_s8, 4   ;;  %s1325_s15 = smov %s1041_s16 }
 0x10f   : > { %s1326_s16 = smov %s1045_s17  ;;  %s1327_s17 = smov %s1140_s12 }
 0x110   : > { %s1328_s18 = smov %s1130_s8  ;;  %18 = sbr.rel (!%p16_p5) target bundleno = 4 (0x4), region = 92 }
 0x115   :  { %656 = vsyncpa [#allocation3], 1 }
 0x116   :  { %658 = vsyncpa [#allocation3 + $0x1], 1 }
 0x117   :  { %659 = vsyncpa [#allocation5], 1 }

// kernel: forward.3
= control target key start
LH: loop header
LB: loop body
LE: loop exit
PB: predicated region body
PF: predicated region fallthrough
CT: control target
= control target key end

     0   :  { %s12863_s0 = inlined_call_operand.hbm [shape: f32[16,128], index: 0, kind: input, shape index: {}]   ;;  %s12864_s1 = inlined_call_operand.vmem [shape: f32[2,16,128], index: 1, kind: input, shape index: {}, may-alias: {1,14}]   ;;  %s12865_s2 = inlined_call_operand.vmem [shape: f32[2,16,128], index: 2, kind: input, shape index: {}, may-alias: {2,15}]   ;;  %s12866_s3 = inlined_call_operand.hbm [shape: f32[16,16,128], index: 3, kind: input, shape index: {}]   ;;  %s12867_s4 = inlined_call_operand.vmem [shape: f32[16,16,256], index: 4, kind: input, shape index: {}]   ;;  %s12868_s5 = inlined_call_operand.vmem [shape: f32[16,128], index: 5, kind: input, shape index: {}]   ;;  %s12869_s6 = inlined_call_operand.hbm [shape: bf16[2,128,128], index: 6, kind: input, shape index: {}]   ;;  %s12870_s7 = inlined_call_operand.hbm [shape: f32[2,1,128], index: 7, kind: input, shape index: {}]   ;;  %s12871_s8 = inlined_call_operand.hbm [shape: bf16[2,384,1024], index: 8, kind: input, shape index: {}]   ;;  %s12872_s9 = inlined_call_operand.hbm [shape: f32[2,1,1024], index: 9, kind: input, shape index: {}]   ;;  %s12873_s10 = inlined_call_operand.hbm [shape: bf16[128,256], index: 10, kind: input, shape index: {}]   ;;  %s12874_s11 = inlined_call_operand.hbm [shape: f32[1,256], index: 11, kind: input, shape index: {}]   ;;  %s12875_s12 = inlined_call_operand.hbm [shape: bf16[128,256], index: 12, kind: input, shape index: {}]   ;;  %s12876_s13 = inlined_call_operand.hbm [shape: f32[1,256], index: 13, kind: input, shape index: {}]   ;;  %s12877_s14 = inlined_call_operand.vmem [shape: f32[2,16,128], index: 14, kind: output, shape index: {0}, may-alias: {1,14}]   ;;  %s12878_s15 = inlined_call_operand.vmem [shape: f32[2,16,128], index: 15, kind: output, shape index: {1}, may-alias: {2,15}]   ;;  %s12879_s16 = inlined_call_operand.hbm [shape: f32[16,256], index: 16, kind: output, shape index: {2}]   ;;  %s12880_s17 = inlined_call_operand.hbm [shape: f32[16,256], index: 17, kind: output, shape index: {3}]  }
   0x1   :  { %12919 = sst [smem:[#allocation58_spill]] %s12863_s0 }
   0x2   :  { %12920 = sst [smem:[#allocation59_spill]] %s12864_s1 }
   0x3   :  { %12921 = sst [smem:[#allocation60_spill]] %s12865_s2 }
   0x4   :  { %12922 = sst [smem:[#allocation61_spill]] %s12866_s3 }
   0x5   :  { %12923 = sst [smem:[#allocation62_spill]] %s12867_s4 }
   0x6   :  { %12924 = sst [smem:[#allocation63_spill]] %s12868_s5 }
   0x7   :  { %12925 = sst [smem:[#allocation64_spill]] %s12869_s6 }
   0x8   :  { %12926 = sst [smem:[#allocation65_spill]] %s12870_s7 }
   0x9   :  { %12927 = sst [smem:[#allocation66_spill]] %s12871_s8 }
   0xa   :  { %12928 = sst [smem:[#allocation67_spill]] %s12872_s9 }
   0xb   :  { %12929 = sst [smem:[#allocation68_spill]] %s12873_s10 }
   0xc   :  { %12930 = sst [smem:[#allocation69_spill]] %s12874_s11 }
   0xd   :  { %12931 = sst [smem:[#allocation70_spill]] %s12875_s12 }
   0xe   :  { %12932 = sst [smem:[#allocation71_spill]] %s12876_s13 }
   0xf   :  { %12933 = sst [smem:[#allocation72_spill]] %s12877_s14 }
  0x10   :  { %12934 = sst [smem:[#allocation73_spill]] %s12878_s15 }
  0x11   :  { %12935 = sst [smem:[#allocation74_spill]] %s12879_s16 }
  0x12   :  { %12936 = sst [smem:[#allocation75_spill]] %s12880_s17 }
  0x13   :  { %23 = vsyncpa [#allocation6], 0 }
  0x14   :  { %25 = vsyncpa [#allocation6 + $0x1], 0 }
  0x15   :  { %26 = vsyncpa [#allocation11], 0 }
  0x16   :  { %28 = vsyncpa [#allocation11 + $0x1], 0 }
  0x17   :  { %29 = vsyncpa [#allocation14], 0 }
  0x18   :  { %30 = vsyncpa [#allocation17], 0 }
  0x19   :  { %31 = vsyncpa [#allocation7], 0 }
  0x1a   :  { %33 = vsyncpa [#allocation7 + $0x1], 0 }
  0x1b   :  { %34 = vsyncpa [#allocation26], 0 }
  0x1c   :  { %36 = vsyncpa [#allocation26 + $0x1], 0  ;;  %s10641_s24 = smov 0   ;;  %s10643_s25 = smov 0  }
  0x1d   :  { %s10645_s26 = smov 0   ;;  %s10647_s27 = smov 0  }
  0x1e   :  { %s10649_s28 = smov 0   ;;  %s10651_s29 = smov 0  }
  0x1f   :  { %s10653_s0 = smov 0   ;;  %s10655_s30 = smov 0  }
  0x20   :  { %s10657_s18 = smov 0   ;;  %s10659_s19 = smov 0  }
  0x21   :  { %s10661_s1 = smov 0   ;;  %s10663_s20 = smov 0  }
  0x22   :  { %s10665_s21 = smov 0   ;;  %s10667_s22 = smov 0  }
  0x23 LB: > { %12937 = sst [smem:[#allocation38_spill]] %s10474_s24  ;;  %s10712_s23 = sadd.s32 4294967295, %s10526_s22   ;;  %s10526_s22 = sphi %s10667_s22, %s42_s22   ;;  %s10522_s21 = sphi %s10665_s21, %s13096_s21   ;;  %s10518_s20 = sphi %s10663_s20, %s13103_s20   ;;  %s10514_s1 = sphi %s10661_s1, %s13102_s1   ;;  %s10510_s19 = sphi %s10659_s19, %s13101_s19   ;;  %s10506_s18 = sphi %s10657_s18, %s13093_s18   ;;  %s10502_s30 = sphi %s10655_s30, %s13100_s30   ;;  %s10498_s0 = sphi %s10653_s0, %s13099_s0   ;;  %s10494_s29 = sphi %s10651_s29, %s13091_s29   ;;  %s10490_s28 = sphi %s10649_s28, %s13098_s28   ;;  %s10486_s27 = sphi %s10647_s27, %s13097_s27   ;;  %s10482_s26 = sphi %s10645_s26, %s13089_s26   ;;  %s10478_s25 = sphi %s10643_s25, %s13088_s25   ;;  %s10474_s24 = sphi %s10641_s24, %s13087_s24  }
  0x24   : > { %12938 = sst [smem:[#allocation39_spill]] %s10478_s25  ;;  %s7391_s17 = sadd.s32 4294967294, %s10526_s22  }
  0x25   : > { %12939 = sst [smem:[#allocation40_spill]] %s10482_s26  ;;  %s51_s16 = sadd.s32 1, %s10518_s20 }
  0x26   : > { %12940 = sst [smem:[#allocation41_spill]] %s10494_s29  ;;  %s54_s15 = sadd.s32 1, %s10522_s21 }
  0x27   : > { %12941 = sst [smem:[#allocation42_spill]] %s10498_s0  ;;  %p52_p0 = scmp.ge.s32.totalorder %s51_s16, 2 }
  0x28   : > { %12942 = sst [smem:[#allocation43_spill]] %s10506_s18  ;;  %s61_s14 = sadd.s32 1, %s10506_s18 }
  0x29   : > { %12943 = sst [smem:[#allocation44_spill]] %s10510_s19  ;;  %p68_p1 = scmp.ne.s32.totalorder %s10506_s18, %s10502_s30 }
  0x2a   : > { %12944 = sst [smem:[#allocation45_spill]] %s10514_s1  ;;  %p69_p2 = scmp.eq.s32.totalorder %s10526_s22, 0 }
  0x2b   : > { %12945 = sst [smem:[#allocation46_spill]] %s10522_s21  ;;  %s13105_s16 = smov (%p52_p0, %s51_s16), 0 }
  0x2c   : > { %12946 = sst [smem:[#allocation47_spill]] %s13105_s16  ;;  %s13107_s15 = smov (!%p52_p0, %s54_s15), %s10522_s21 }
  0x2d   : > { %p10729_p3 = por %p69_p2, %p68_p1  ;;  %p74_p4 = scmp.ne.s32.totalorder %s10502_s30, %s10498_s0 }
  0x2e   : > { %p56_p5 = scmp.ge.s32.totalorder %s13107_s15, 2  ;;  %p12890_p6 = scmp.eq.s32.totalorder %s10712_s23, 0 }
  0x2f   : > { %s298_s5 = ssub.s32 %s10518_s20, %s13105_s16  ;;  %s301_s4 = sadd.s32 1, %s10494_s29 }
  0x30   : > { %s13109_s15 = smov (%p56_p5, %s13107_s15), 0  ;;  %p10746_p7 = por %p12890_p6, %p74_p4 }
  0x31   : > { %12948 = sst [smem:[#allocation48_spill]] %s13109_s15  ;;  %p299_p8 = scmp.eq.s32.totalorder %s298_s5, 0 }
  0x32   : > { %s12949_s1 = scalar_select %p10746_p7, 1, 0 }
  0x33   : > { %s58_s13 = ssub.s32 %s10522_s21, %s13109_s15  ;;  %p308_p9 = scmp.ne.s32.totalorder %s10494_s29, %s10490_s28 }
  0x34   : > { %12950 = sst [smem:[#allocation49_spill]] %s12949_s1  ;;  %p59_p10 = scmp.eq.s32.totalorder %s58_s13, 0 }
  0x35   : > { %p314_p11 = scmp.ne.s32.totalorder %s10490_s28, %s10486_s27  ;;  %p10764_p12 = por %p308_p9, %p69_p2 }
  0x36   : > { %s10757_s16 = scalar_select %p299_p8, %s10494_s29, %s301_s4  }
  0x37   : > { %s10760_s11 = scalar_select %p59_p10, %s10506_s18, %s61_s14  }
  0x38   : > { %12951 = sst [smem:[#allocation50_spill]] %s10757_s16  ;;  %p10770_p13 = por %p314_p11, %p12890_p6 }
  0x39   : > { %12952 = sst [smem:[#allocation51_spill]] %s10760_s11  ;;  %p416_p0 = scmp.eq.s32.totalorder %s10712_s23, 3 }
  0x3a   : > { %s12954_s15 = scalar_select %p10770_p13, 1, 0 }
  0x3b   : > { %p474_p5 = scmp.eq.s32.totalorder %s7391_s17, 3  ;;  %s482_s1 = sor.u32 %s298_s5, %s58_s13 }
  0x3c   : > { %12955 = sst [smem:[#allocation52_spill]] %s12954_s15  ;;  %s485_s10 = sadd.s32 1, %s10482_s26 }
  0x3d   : > { %p10779_p8 = por %p416_p0, %p68_p1  ;;  %p10786_p10 = por %p474_p5, %p74_p4 }
  0x3e   : > { %p483_p2 = scmp.eq.s32.totalorder %s482_s1, 0  ;;  %p495_p9 = scmp.ne.s32.totalorder %s10482_s26, %s10478_s25 }
  0x3f   : > { %s12956_s4 = scalar_select %p10779_p8, 1, 0 }
  0x40   : > { %s12958_s14 = scalar_select %p10786_p10, 1, 0 }
  0x41   : > { %12957 = sst [smem:[#allocation53_spill]] %s12956_s4  ;;  %p501_p11 = scmp.ne.s32.totalorder %s10478_s25, %s10474_s24 }
  0x42   : > { %12959 = sst [smem:[#allocation54_spill]] %s12958_s14  ;;  %p7392_p6 = scmp.ge.s32.totalorder %s10526_s22, 1 }
  0x43   : > { %s10796_s27 = scalar_select %p483_p2, %s10482_s26, %s485_s10  }
  0x44   : > { %p10798_p13 = por %p495_p9, %p416_p0  ;;  %p10802_p1 = por %p501_p11, %p474_p5 }
  0x45   : > { %12960 = sst [smem:[#allocation55_spill]] %s10796_s27  ;;  %p509_p8 = scmp.lt.s32.totalorder %s10526_s22, 5 }
  0x46   : > { %s12961_s5 = scalar_select %p10798_p13, 1, 0 }
  0x47   : > { %s12963_s13 = scalar_select %p10802_p1, 1, 0 }
  0x48   : > { %12962 = sst [smem:[#allocation56_spill]] %s12961_s5  ;;  %p10810_p4 = pnand %p7392_p6, %p509_p8 }
  0x49   : > { %12964 = sst [smem:[#allocation57_spill]] %s12963_s13  ;;  %s10528_s10 = smov [#allocation13]  }
  0x4a   : > { %s12965_s7 = sld [smem:[#allocation65_spill]]  ;;  %s536_s27 = sshll.u32 %s10528_s10, 4  ;;  %s537_s27 = int_to_ptr.vmem [resolvable:$true] %s536_s27 }
  0x4b   : > { %p9580_p0 = pneg %p10810_p4  ;;  %p12967_p5 = scmp.eq.s32.totalorder %s10712_s23, 0 }
  0x4c   : > { %s12969_s6 = sld [smem:[#allocation64_spill]]  ;;  %s10529_s17 = smov 16  }
  0x4d   : > { %p10818_p2 = pnand %p9580_p0, %p12967_p5  ;;  %s10531_s10 = smov [#allocation12]  }
  0x4e   : > { %s522_s14 = sshll.u32 %s10531_s10, 4  ;;  %s10532_s0 = smov 64   ;;  %s523_s14 = int_to_ptr.vmem [resolvable:$true] %s522_s14 }
  0x4f   : > { %s10533_s5 = smov 4   ;;  %s12970_s8 = sld [smem:[#allocation66_spill]] }
  0x50   : > { %s534_s16 = sshll.u32 %s12965_s7, 4  ;;  %s10530_s7 = smov 1   ;;  %s535_s16 = int_to_ptr.hbm [resolvable:$true] %s534_s16 }
  0x51   : > { %9586 = dma.hbm_to_vmem [thread:$0]  (!%p10818_p2), %s535_s16, 32, %s537_s27, [#allocation14], %s10529_s17, %s10529_s17, %s10530_s7  }
  0x52   : > { %s520_s11 = sshll.u32 %s12969_s6, 4  ;;  %s10534_s13 = smov [#allocation15]   ;;  %s521_s11 = int_to_ptr.hbm [resolvable:$true] %s520_s11 }
  0x53   : > { %9583 = dma.hbm_to_vmem [thread:$0]  (!%p10818_p2), %s521_s11, 2048, %s523_s14, [#allocation11], %s10532_s0, %s10532_s0, %s10533_s5  }
  0x54   : > { %s550_s6 = sshll.u32 %s10534_s13, 4  ;;  %s12971_s9 = sld [smem:[#allocation67_spill]]  ;;  %s551_s6 = int_to_ptr.vmem [resolvable:$true] %s550_s6 }
  0x55   : > { %s548_s24 = sshll.u32 %s12970_s8, 4  ;;  %s10535_s27 = smov 512   ;;  %s549_s24 = int_to_ptr.hbm [resolvable:$true] %s548_s24 }
  0x56   : > { %s10536_s17 = smov 32   ;;  %s10537_s10 = smov [#allocation16]  }
  0x57   : > { %9589 = dma.hbm_to_vmem [thread:$0]  (!%p10818_p2), %s549_s24, 49152, %s551_s6, [#allocation14], %s10535_s27, %s10535_s27, %s10536_s17  }
  0x58   : > { %s564_s0 = sshll.u32 %s10537_s10, 4  ;;  %s10538_s14 = smov 128   ;;  %s565_s0 = int_to_ptr.vmem [resolvable:$true] %s564_s0 }
  0x59   : > { %s10539_s25 = smov 8   ;;  %p7397_p6 = scmp.ge.s32.totalorder %s10526_s22, 4 }
  0x5a   : > { %s562_s16 = sshll.u32 %s12971_s9, 4  ;;  %s578_s15 = sand.u32 (!%p7397_p6), 1, %s10526_s22   ;;  %s563_s16 = int_to_ptr.hbm [resolvable:$true] %s562_s16 }
  0x5b   : > { %9592 = dma.hbm_to_vmem [thread:$0]  (!%p10818_p2), %s563_s16, 256, %s565_s0, [#allocation17], %s10538_s14, %s10538_s14, %s10539_s25  }
  0x5c   : > { %574 = sbr.rel (%p7397_p6) target bundleno = 144 (0x90), region = 32  ;;  %s10842_s4 = sand.u32 (!%p7397_p6), 1, %s10506_s18  }
  0x5d   : > { %s7398_s6 = sshll.u32 (!%p7397_p6), %s10842_s4, 3  ;;  %s7399_s5 = sshll.u32 (!%p7397_p6), %s10522_s21, 3 }
  0x5e   : > { %s12972_s13 = sld [smem:[#allocation58_spill]] (!%p7397_p6)  ;;  %s582_s26 = scalar_lea.vmem (!%p7397_p6), [#allocation5], %s7398_s6 }
  0x5f   : > { %s590_s16 = sshll.u32 (!%p7397_p6), %s582_s26, 4  ;;  %s10851_s17 = scalar_lea.sflag (!%p7397_p6), [#allocation6], %s578_s15  ;;  %s591_s16 = int_to_ptr.vmem [resolvable:$true] %s590_s16 }
  0x61   : > { %s7400_s10 = sshll.u32 (%p10729_p3), %s10842_s4, 4  ;;  %s12973_s25 = sld [smem:[#allocation59_spill]] (%p10729_p3) }
  0x62   : > { %596 = sbr.rel (!%p10729_p3) target bundleno = 107 (0x6b), region = 40  ;;  %s600_s6 = scalar_lea.vmem (%p10729_p3), [#allocation8], %s7400_s10 }
  0x64   : > { %s586_s7 = scalar_lea.hbm %s12972_s13, %s7399_s5 }
  0x65   : > { %s588_s27 = sshll.u32 %s586_s7, 4  ;;  %s589_s27 = int_to_ptr.hbm [resolvable:$true] %s588_s27 }
  0x66   : > { %9556 = dma.hbm_to_vmem [thread:$0]  (%p10729_p3), %s589_s27, 128, %s591_s16, %s10851_s17  }
  0x67   : > { %s602_s11 = scalar_lea.vmem %s12973_s25, %s7399_s5 }
  0x68   : > { %v633_v0 = vld [vmem:[%s602_s11] sm:$0xff]  ;;  %v635_v1 = vld [vmem:[%s602_s11 + $0x10] sm:$0xff] }
  0x69   : > { %634 = vst [vmem:[%s600_s6] sm:$0xff] %v633_v0 }
  0x6a   : > { %636 = vst [vmem:[%s600_s6 + $0x8] sm:$0xff] %v635_v1 }
  0x6b PF: > { %642 = sbr.rel (!%p10729_p3) target bundleno = 118 (0x76), region = 78  ;;  %s7402_s24 = sshll.u32 (%p10729_p3), %s10842_s4, 4 }
  0x6c   : > { %s12974_s2 = sld [smem:[#allocation60_spill]] (%p10729_p3)  ;;  %s646_s16 = scalar_lea.vmem (%p10729_p3), [#allocation9], %s7402_s24 }
  0x72   : > { %s648_s26 = scalar_lea.vmem %s12974_s2, %s7399_s5 }
  0x73   : > { %v679_v2 = vld [vmem:[%s648_s26] sm:$0xff]  ;;  %v681_v3 = vld [vmem:[%s648_s26 + $0x10] sm:$0xff] }
  0x74   : > { %680 = vst [vmem:[%s646_s16] sm:$0xff] %v679_v2 }
  0x75   : > { %682 = vst [vmem:[%s646_s16 + $0x8] sm:$0xff] %v681_v3 }
  0x76 PF: > { %s7404_s27 = sshll.u32 %s10842_s4, 7  ;;  %s9129_s10 = sshll.u32 %s10522_s21, 7 }
  0x77   : > { %s12975_s3 = sld [smem:[#allocation61_spill]]  ;;  %s693_s11 = scalar_lea.vmem [#allocation10], %s7404_s27 }
  0x78   : > { %s702_s5 = sshll.u32 %s693_s11, 4  ;;  %s10874_s24 = sand.u32 1, %s10494_s29   ;;  %s703_s5 = int_to_ptr.vmem [resolvable:$true] %s702_s5 }
  0x79   : > { %s10878_s13 = scalar_lea.sflag [#allocation11], %s578_s15  ;;  %s10540_s4 = smov 128  }
  0x7a   : > { %s10541_s7 = smov 8   ;;  %s7408_s26 = sshll.u32 %s10874_s24, 6 }
  0x7b   : > { %s7409_s16 = sshll.u32 %s10518_s20, 2  ;;  %s12976_s0 = sld [smem:[#allocation68_spill]] }
  0x7c   : > { %s733_s11 = scalar_lea.vmem [#allocation18], %s7408_s26  ;;  %s10542_s15 = smov 64  }
  0x7d   : > { %s699_s25 = scalar_lea.hbm %s12975_s3, %s9129_s10  ;;  %s740_s2 = sshll.u32 %s733_s11, 4  ;;  %s741_s2 = int_to_ptr.vmem [resolvable:$true] %s740_s2 }
  0x7e   : > { %s700_s6 = sshll.u32 %s699_s25, 4  ;;  %s10543_s19 = smov 4   ;;  %s701_s6 = int_to_ptr.hbm [resolvable:$true] %s700_s6 }
  0x7f   : > { %9557 = dma.hbm_to_vmem [thread:$0]  (%p10729_p3), %s701_s6, 2048, %s703_s5, %s10878_s13, %s10540_s4, %s10540_s4, %s10541_s7  }
  0x80   : > { %s12977_s7 = sld [smem:[#allocation70_spill]]  ;;  %s753_s18 = scalar_lea.vmem [#allocation19], %s10874_s24 }
  0x81   : > { %s737_s14 = scalar_lea.hbm %s12976_s0, %s7409_s16  ;;  %s771_s0 = scalar_lea.vmem [#allocation20], %s7408_s26 }
  0x82   : > { %s738_s25 = sshll.u32 %s737_s14, 4  ;;  %s778_s14 = sshll.u32 %s771_s0, 4  ;;  %s739_s25 = int_to_ptr.hbm [resolvable:$true] %s738_s25  ;;  %s779_s14 = int_to_ptr.vmem [resolvable:$true] %s778_s14 }
  0x83   : > { %9558 = dma.hbm_to_vmem [thread:$0]  (%p10764_p12), %s739_s25, 1024, %s741_s2, %s10851_s17, %s10540_s4, %s10542_s15, %s10543_s19  }
  0x84   : > { %s12978_s8 = sld [smem:[#allocation69_spill]]  ;;  %s760_s29 = sshll.u32 %s753_s18, 4  ;;  %s761_s29 = int_to_ptr.vmem [resolvable:$true] %s760_s29 }
  0x86   : > { %s775_s27 = scalar_lea.hbm %s12977_s7, %s7409_s16  ;;  %s12979_s16 = sld [smem:[#allocation71_spill]] }
  0x87   : > { %s776_s10 = sshll.u32 %s775_s27, 4  ;;  %s777_s10 = int_to_ptr.hbm [resolvable:$true] %s776_s10 }
  0x88   : > { %9560 = dma.hbm_to_vmem [thread:$0]  (%p10764_p12), %s777_s10, 1024, %s779_s14, %s10851_s17, %s10540_s4, %s10542_s15, %s10543_s19  }
  0x8a   : > { %s756_s9 = scalar_lea.hbm %s12978_s8, %s10518_s20  ;;  %s791_s8 = scalar_lea.vmem [#allocation21], %s10874_s24 }
  0x8b   : > { %s758_s21 = sshll.u32 %s756_s9, 4  ;;  %s798_s5 = sshll.u32 %s791_s8, 4  ;;  %s759_s21 = int_to_ptr.hbm [resolvable:$true] %s758_s21  ;;  %s799_s5 = int_to_ptr.vmem [resolvable:$true] %s798_s5 }
  0x8c   : > { %9559 = dma.hbm_to_vmem [thread:$0]  (%p10764_p12), %s759_s21, 16, %s761_s29, %s10878_s13  }
  0x8d   : > { %s794_s25 = scalar_lea.hbm %s12979_s16, %s10518_s20 }
  0x8e   : > { %s796_s3 = sshll.u32 %s794_s25, 4  ;;  %s797_s3 = int_to_ptr.hbm [resolvable:$true] %s796_s3 }
  0x8f   : > { %9561 = dma.hbm_to_vmem [thread:$0]  (%p10764_p12), %s797_s3, 16, %s799_s5, %s10878_s13  }
  0x90 PF: > { %807 = sbr.rel (%p10810_p4) target bundleno = 3223 (0xc97), region = 144  ;;  %s809_s29 = sand.u32 (!%p10810_p4), 1, %s10712_s23  }
  0x91   : > { %s10921_s18 = sand.u32 (!%p10810_p4), 1, %s10502_s30   ;;  %s810_s17 = scalar_lea.sflag (!%p10810_p4), [#allocation6], %s809_s29 }
  0x92   : > { %s7413_s21 = sshll.u32 (!%p10810_p4), %s10921_s18, 3 }
  0x93   : > { %s10924_s4 = scalar_lea.vmem (!%p10810_p4), [#allocation5], %s7413_s21 }
  0x95   : > { %10429 = dma.done.wait (%p10746_p7), %s810_s17, 128  }
  0x96   : > { %10431 = vsyncadd (%p10746_p7), %s810_s17, 4294967168  ;;  %s10931_s12 = sshll.u32 %s10921_s18, 4  ;;  %s7416_s1 = sshll.u32 %s10921_s18, 7 }
  0x97   : > { %s829_s13 = scalar_lea.vmem [#allocation9], %s10931_s12  ;;  %s834_s15 = scalar_lea.sflag [#allocation11], %s809_s29 }
  0x98   : > { %s10936_s19 = scalar_lea.vmem [#allocation10], %s7416_s1 }
  0x99   : > { %10433 = dma.done.wait (%p10746_p7), %s834_s15, 2048  }
  0x9a   : > { %10435 = vsyncadd (%p10746_p7), %s834_s15, 4294965248  ;;  %p12981_p3 = scmp.eq.s32.totalorder %s10712_s23, 0 }
  0x9c   : > { %10437 = dma.done.wait (%p12981_p3), [#allocation11], 2048   ;;  %p12982_p12 = pmov %p12981_p3 }
  0x9d   : > { %p12983_p8 = pmov %p12981_p3 }
  0x9e   : > { %10439 = vsyncadd (%p12982_p12), [#allocation11], 4294965248 }
  0x9f   : > { %10441 = dma.done.wait (%p12983_p8), [#allocation14], 49184   ;;  %p12984_p9 = pmov %p12981_p3 }
  0xa0   : > { %p12985_p11 = pmov %p12981_p3 }
  0xa1   : > { %10443 = vsyncadd (%p12984_p9), [#allocation14], 4294918112 }
  0xa2   : > { %10445 = dma.done.wait (%p12985_p11), [#allocation17], 256   ;;  %p12986_p4 = pmov %p12981_p3 }
  0xa3   : > { %s12987_s6 = sld [smem:[#allocation52_spill]]  ;;  %s10955_s7 = sand.u32 1, %s10490_s28  }
  0xa4   : > { %10447 = vsyncadd (%p12986_p4), [#allocation17], 4294967040  ;;  %s7421_s27 = sshll.u32 %s10955_s7, 6 }
  0xa5   : > { %s10958_s10 = scalar_lea.vmem [#allocation18], %s7421_s27 }
  0xa9   : > { %p12988_p7 = scmp.ne.s32.totalorder %s12987_s6, 0 }
  0xab   : > { %10449 = dma.done.wait (%p12988_p7), %s810_s17, 1024  }
  0xac   : > { %10451 = vsyncadd (%p12988_p7), %s810_s17, 4294966272 }
  0xad   : > { %10453 = dma.done.wait (%p12988_p7), %s834_s15, 16  }
  0xae   : > { %10455 = vsyncadd (%p12988_p7), %s834_s15, 4294967280  ;;  %s10969_s23 = scalar_lea.vmem [#allocation20], %s7421_s27 }
  0xaf   : > { %10457 = dma.done.wait (%p12988_p7), %s810_s17, 1024  }
  0xb0   : > { %10459 = vsyncadd (%p12988_p7), %s810_s17, 4294966272 }
  0xb1   : > { %10461 = dma.done.wait (%p12988_p7), %s834_s15, 16  }
  0xb2   : > { %10463 = vsyncadd (%p12988_p7), %s834_s15, 4294967280  ;;  %s12989_s11 = sld [smem:[#allocation39_spill]]  ;;  %s11009_s0 = scalar_lea.vmem [#allocation24], %s10931_s12 }
  0xb3   : > { %s12990_s2 = sld [smem:[#allocation45_spill]] }
  0xb4   : > { %s12991_s29 = sld [smem:[#allocation62_spill]] }
  0xb5   : > { %s12992_s6 = sld [smem:[#allocation63_spill]] }
  0xb6   : > { %s12993_s24 = sld [smem:[#allocation44_spill]] }
  0xb8   : > { %s12909_s26 = sand.u32 1, %s12989_s11   ;;  %s11003_s11 = scalar_lea.vmem [#allocation22], %s10931_s12 }
  0xb9   : > { %s10983_s16 = sshll.u32 %s12909_s26, 3  ;;  %s10986_s25 = sshll.u32 %s12990_s2, 3 }
  0xba   : > { %p1003_p0 = scmp.lt.s32.totalorder %s10986_s25, 15  ;;  %p1009_p5 = scmp.lt.s32.totalorder %s12990_s2, 1 }
  0xbb   : > { %s11006_s26 = scalar_lea.vmem [#allocation23], %s10931_s12  ;;  %s1000_s14 = scalar_lea.vmem [#allocation25], %s10983_s16 }
  0xbc   : > { %s1004_s3 = scalar_select %p1003_p0, %s10986_s25, 15 }
  0xbd   : > { %s13111_s2 = smov (!%p1009_p5, %s12990_s2), 1  ;;  %p7431_p2 = scmp.ne.s32.totalorder %s12993_s24, 0 }
  0xbe   : > { %s9130_s8 = sshll.u32 %s1004_s3, 5  ;;  %s7430_s17 = sshll.u32 %s13111_s2, 3 }
  0xbf   : > { %s10995_s21 = scalar_lea.vmem %s12991_s29, %s9130_s8  ;;  %s11000_s27 = scalar_lea.vmem %s12992_s6, %s7430_s17 }
  0xc0   : > { %1016 = sbr.rel (%p7431_p2) target bundleno = 2456 (0x998), region = 196  ;;  %s13024_s24 = scalar_lea.vmem (!%p7431_p2), [#allocation8], %s10931_s12 }
  0xc5   : > { %v9138_v4 = vld [vmem:[#allocation12 + $0x38] sm:$0xff]  ;;  %v9137_v5 = vld [vmem:[#allocation12 + $0x30] sm:$0xff]  ;;  %v9136_v6 = vld [vmem:[#allocation12 + $0x28] sm:$0xff]  ;;  %vm12911_vm0 = vcmask 130112   ;;  %vm12918_vm1 = vcmask 1041409   ;;  %vm12917_vm2 = vcmask 1042434  }
  0xc6   : > { %1101 = vmatpush.bf16.msra.mxu0 %v9138_v4  ;;  %v9135_v7 = vld [vmem:[#allocation12 + $0x20] sm:$0xff]  ;;  %v9134_v8 = vld [vmem:[#allocation12 + $0x18] sm:$0xff]  ;;  %v9133_v9 = vld [vmem:[#allocation12 + $0x10] sm:$0xff]  ;;  %vm12916_vm3 = vcmask 1043459   ;;  %vm12915_vm4 = vcmask 1044484   ;;  %vm12914_vm5 = vcmask 1045509  }
  0xc7   : > { %v9132_v10 = vld [vmem:[#allocation12 + $0x8] sm:$0xff]  ;;  %v9131_v11 = vld [vmem:[#allocation12] sm:$0xff]  ;;  %v1114_v15 = vld [vmem:[%s10995_s21] sm:$0xff]  ;;  %vm12913_vm6 = vcmask 1046534   ;;  %vm12912_vm7 = vcmask 1047559   ;;  %vm12910_vm8 = vcmask 130048  }
  0xc8   : > { %v1035_v12 = vld [vmem:[%s829_s13] sm:$0xff] }
  0xc9   : > { %v11015_v13 = vpack.c.bf16 %v1035_v12, %v1035_v12  ;;  %v1118_v19 = vld [vmem:[%s10995_s21 + $0x40] sm:$0xff]  ;;  %v1115_v24 = vld [vmem:[%s10995_s21 + $0x10] sm:$0xff] }
  0xca   : > { %1102 = vmatpush.bf16.msra.mxu0 %v9137_v5  ;;  %v1116_v20 = vld [vmem:[%s10995_s21 + $0x20] sm:$0xff]  ;;  %v1119_v27 = vld [vmem:[%s10995_s21 + $0x50] sm:$0xff] }
  0xcb   : > { %v1117_v29 = vld [vmem:[%s10995_s21 + $0x30] sm:$0xff]  ;;  %v1120_v39 = vld [vmem:[%s10995_s21 + $0x60] sm:$0xff] }
  0xcc   : > { %v11030_v32 = vld [vmem:[#allocation13] ss:$0 sm:$0xff]  ;;  %v1122_v44 = vld [vmem:[%s10995_s21 + $0x80] sm:$0xff] }
  0xcd   : > { %v1121_v47 = vld [vmem:[%s10995_s21 + $0x70] sm:$0xff]  ;;  %v1124_v61 = vld [vmem:[%s10995_s21 + $0xa0] sm:$0xff] }
  0xce   : > { %1103 = vmatpush.bf16.msra.mxu0 %v9136_v6  ;;  %v1123_v55 = vld [vmem:[%s10995_s21 + $0x90] sm:$0xff] }
  0xcf   : > { %v1125_v58 = vld [vmem:[%s10995_s21 + $0xb0] sm:$0xff] }
  0xd2   : > { %1104 = vmatpush.bf16.msra.mxu0 %v9135_v7  ;;  %v1126_v7 = vld [vmem:[%s10995_s21 + $0xc0] sm:$0xff] }
  0xd6   : > { %1105 = vmatpush.bf16.msra.mxu0 %v9134_v8 }
  0xda   : > { %1106 = vmatpush.bf16.msra.mxu0 %v9133_v9 }
  0xde   : > { %1107 = vmatpush.bf16.msra.mxu0 %v9132_v10  ;;  %v1128_v10 = vld [vmem:[%s10995_s21 + $0xe0] sm:$0xff] }
  0xe2   : > { %1108 = vmatpush.bf16.msra.mxu0 %v9131_v11 }
  0xe5   : > { %1109 = vmatmul.bf16.vlgmr.msra.gmra.mxu0 %v11015_v13 }
 0x162   : > { %v11018_v14 = vpop.f32.mrf.mxu0 }
 0x163   : > { %v1138_v16 = vperm.slane %v11018_v14, 0  ;;  %v1132_v17 = vrot.slane %v11018_v14, 2  ;;  %v1131_v18 = vrot.slane %v11018_v14, 1  ;;  %v1133_v30 = vrot.slane %v11018_v14, 3 }
 0x164   : > { %v1134_v34 = vrot.slane %v11018_v14, 4  ;;  %v1135_v50 = vrot.slane %v11018_v14, 5  ;;  %v1136_v62 = vrot.slane %v11018_v14, 6  ;;  %v1137_v1 = vrot.slane %v11018_v14, 7  ;;  %v1127_v14 = vld [vmem:[%s10995_s21 + $0xd0] sm:$0xff] }
 0x165   : > { %v1154_v21 = vadd.f32 %v1138_v16, %v1114_v15  ;;  %v1140_v22 = vperm.slane %v1132_v17, 0  ;;  %v1139_v23 = vperm.slane %v1131_v18, 0  ;;  %v1155_v28 = vadd.f32 %v1138_v16, %v1115_v24 }
 0x166   : > { %v1141_v37 = vperm.slane %v1133_v30, 0  ;;  %v1142_v41 = vperm.slane %v1134_v34, 0  ;;  %v1143_v56 = vperm.slane %v1135_v50, 0  ;;  %v1144_v4 = vperm.slane %v1136_v62, 0 }
 0x167   : > { %9749 = vtanh.f32 %v1154_v21  ;;  %v1158_v25 = vadd.f32 %v1140_v22, %v1118_v19  ;;  %v1156_v26 = vadd.f32 %v1139_v23, %v1116_v20  ;;  %v1159_v33 = vadd.f32 %v1140_v22, %v1119_v27  ;;  %v1129_v21 = vld [vmem:[%s10995_s21 + $0xf0] sm:$0xff] }
 0x168   : > { %v1157_v35 = vadd.f32 %v1139_v23, %v1117_v29  ;;  %v1160_v46 = vadd.f32 %v1141_v37, %v1120_v39  ;;  %v1162_v49 = vadd.f32 %v1142_v41, %v1122_v44  ;;  %v1161_v51 = vadd.f32 %v1141_v37, %v1121_v47 }
 0x169   : > { %9751 = vtanh.f32 %v1158_v25  ;;  %v1163_v60 = vadd.f32 %v1142_v41, %v1123_v55  ;;  %v1165_v0 = vadd.f32 %v1143_v56, %v1125_v58  ;;  %v1164_v2 = vadd.f32 %v1143_v56, %v1124_v61 }
 0x16a   : > { %v1112_v31 = vpop.f32.mrf.mxu0  ;;  %9753 = vtanh.f32 %v1156_v26  ;;  %v1145_v8 = vperm.slane %v1137_v1, 0  ;;  %v1166_v12 = vadd.f32 %v1144_v4, %v1126_v7  ;;  %v1167_v17 = vadd.f32 %v1144_v4, %v1127_v14 }
 0x16b   : > { %9755 = vtanh.f32 %v1155_v28 }
 0x16c   : > { %9757 = vtanh.f32 %v1159_v33  ;;  %v1168_v16 = vadd.f32 %v1145_v8, %v1128_v10  ;;  %v1169_v24 = vadd.f32 %v1145_v8, %v1129_v21  ;;  %v10544_v21 = vmov 0  }
 0x16d   : > { %v9750_v36 = vpop.eup %9749  ;;  %9759 = vtanh.f32 %v1157_v35  ;;  %9746 = vset.pattern.permute.xlu1 %v10544_v21  ;;  %9745 = vset.pattern.permute.xlu0 %v10544_v21 }
 0x16e   : > { %v1190_v38 = vmul.f32 %v9750_v36, %v11030_v32  ;;  %9761 = vtanh.f32 %v1160_v46  ;;  %9744 = vset.pattern.permute.xlu2 %v10544_v21 }
 0x16f   : > { %v9752_v40 = vpop.eup %9751  ;;  %9763 = vtanh.f32 %v1162_v49 }
 0x170   : > { %v9754_v42 = vpop.eup %9753  ;;  %1206 = vadd.xlane.f32.xlu0 %v1190_v38  ;;  %v1194_v43 = vmul.f32 %v9752_v40, %v11030_v32  ;;  %9765 = vtanh.f32 %v1161_v51 }
 0x171   : > { %v1192_v45 = vmul.f32 %v9754_v42, %v11030_v32  ;;  %v9756_v48 = vpop.eup %9755  ;;  %9767 = vtanh.f32 %v1163_v60  ;;  %v1254_v42 = vlaneseq }
 0x172   : > { %1214 = vadd.xlane.f32.xlu2 %v1194_v43  ;;  %v9758_v52 = vpop.eup %9757  ;;  %v1191_v54 = vmul.f32 %v9756_v48, %v11030_v32  ;;  %9769 = vtanh.f32 %v1165_v0 }
 0x173   : > { %1210 = vadd.xlane.f32.xlu1 %v1192_v45  ;;  %v9760_v53 = vpop.eup %9759  ;;  %v1195_v57 = vmul.f32 %v9758_v52, %v11030_v32  ;;  %9771 = vtanh.f32 %v1164_v2 }
 0x174   : > { %v1193_v59 = vmul.f32 %v9760_v53, %v11030_v32  ;;  %v9762_v63 = vpop.eup %9761  ;;  %9773 = vtanh.f32 %v1166_v12 }
 0x175   : > { %v9764_v3 = vpop.eup %9763  ;;  %v1196_v6 = vmul.f32 %v9762_v63, %v11030_v32  ;;  %9775 = vtanh.f32 %v1168_v16 }
 0x176   : > { %v9766_v5 = vpop.eup %9765  ;;  %v1198_v9 = vmul.f32 %v9764_v3, %v11030_v32  ;;  %9777 = vtanh.f32 %v1167_v17 }
 0x177   : > { %v1197_v11 = vmul.f32 %v9766_v5, %v11030_v32  ;;  %v9768_v15 = vpop.eup %9767  ;;  %9779 = vtanh.f32 %v1169_v24 }
 0x178   : > { %1208 = vadd.xlane.f32.xlu0 %v1191_v54  ;;  %v9770_v18 = vpop.eup %9769  ;;  %v1199_v20 = vmul.f32 %v9768_v15, %v11030_v32 }
 0x179   : > { %v9772_v19 = vpop.eup %9771  ;;  %v1201_v22 = vmul.f32 %v9770_v18, %v11030_v32 }
 0x17a   : > { %1216 = vadd.xlane.f32.xlu2 %v1195_v57  ;;  %v1200_v23 = vmul.f32 %v9772_v19, %v11030_v32  ;;  %v9774_v25 = vpop.eup %9773 }
 0x17b   : > { %1212 = vadd.xlane.f32.xlu1 %v1193_v59  ;;  %v9776_v26 = vpop.eup %9775  ;;  %v1202_v28 = vmul.f32 %v9774_v25, %v11030_v32 }
 0x17c   : > { %v9778_v27 = vpop.eup %9777  ;;  %v1204_v29 = vmul.f32 %v9776_v26, %v11030_v32 }
 0x17d   : > { %v1203_v30 = vmul.f32 %v9778_v27, %v11030_v32  ;;  %v9780_v31 = vpop.eup %9779 }
 0x17e   : > { %v1205_v33 = vmul.f32 %v9780_v31, %v11030_v32  ;;  %v11080_v32 = vand.u32 127, %v1254_v42 }
 0x180   : > { %1218 = vadd.xlane.f32.xlu0 %v1196_v6  ;;  %v11085_v45 = vadd.s32 4294967288, %v11080_v32 }
 0x182   : > { %1222 = vadd.xlane.f32.xlu2 %v1198_v9 }
 0x183   : > { %1220 = vadd.xlane.f32.xlu1 %v1197_v11 }
 0x188   : > { %1224 = vadd.xlane.f32.xlu0 %v1199_v20 }
 0x18a   : > { %1228 = vadd.xlane.f32.xlu2 %v1201_v22 }
 0x18b   : > { %1226 = vadd.xlane.f32.xlu1 %v1200_v23 }
 0x190   : > { %1230 = vadd.xlane.f32.xlu0 %v1202_v28 }
 0x192   : > { %1234 = vadd.xlane.f32.xlu2 %v1204_v29 }
 0x193   : > { %1232 = vadd.xlane.f32.xlu1 %v1203_v30 }
 0x198   : > { %1236 = vadd.xlane.f32.xlu0 %v1205_v33 }
 0x1e3   : > { %v11062_v34 = vpop.xlane.xlu0 %1206 }
 0x1e4   : > { %v1256_v52 = vperm.slane %v11062_v34, %v11080_v32 }
 0x1e5   : > { %v11064_v35 = vpop.xlane.xlu2 %1214 }
 0x1e6   : > { %v11066_v36 = vpop.xlane.xlu1 %1210  ;;  %v1264_v55 = vperm.slane %v11064_v35, %v11080_v32 }
 0x1e7   : > { %v1261_v49 = vperm.slane %v11066_v36, %v11080_v32 }
 0x1eb   : > { %v11068_v37 = vpop.xlane.xlu0 %1208 }
 0x1ec   : > { %v1258_v50 = vperm.slane %v11068_v37, %v11085_v45 }
 0x1ed   : > { %v11070_v38 = vpop.xlane.xlu2 %1216 }
 0x1ee   : > { %v11072_v39 = vpop.xlane.xlu1 %1212  ;;  %v1265_v51 = vperm.slane %v11070_v38, %v11085_v45  ;;  %v1260_v58 = vsel %vm12911_vm0, %v1258_v50, %v1256_v52 }
 0x1ef   : > { %v1262_v46 = vperm.slane %v11072_v39, %v11085_v45 }
 0x1f0   : > { %v1266_v60 = vsel %vm12911_vm0, %v1265_v51, %v1264_v55 }
 0x1f1   : > { %v1263_v53 = vsel %vm12911_vm0, %v1262_v46, %v1261_v49 }
 0x1f2   : > { %v1283_v61 = vsel %vm12918_vm1, %v1263_v53, %v1260_v58 }
 0x1f3   : > { %v11074_v40 = vpop.xlane.xlu0 %1218  ;;  %v1285_v5 = vsel %vm12917_vm2, %v1266_v60, %v1283_v61 }
 0x1f4   : > { %v1267_v59 = vperm.slane %v11074_v40, %v11080_v32 }
 0x1f5   : > { %v11076_v41 = vpop.xlane.xlu2 %1222 }
 0x1f6   : > { %v11078_v43 = vpop.xlane.xlu1 %1220  ;;  %v1270_v62 = vperm.slane %v11076_v41, %v11080_v32 }
 0x1f7   : > { %v1268_v54 = vperm.slane %v11078_v43, %v11085_v45 }
 0x1f9   : > { %v1269_v63 = vsel %vm12911_vm0, %v1268_v54, %v1267_v59 }
 0x1fa   : > { %v1287_v6 = vsel %vm12916_vm3, %v1269_v63, %v1285_v5 }
 0x1fb   : > { %v11082_v44 = vpop.xlane.xlu0 %1224 }
 0x1fc   : > { %v1271_v56 = vperm.slane %v11082_v44, %v11085_v45 }
 0x1fd   : > { %v11091_v48 = vpop.xlane.xlu2 %1228 }
 0x1fe   : > { %v11089_v47 = vpop.xlane.xlu1 %1226  ;;  %v1274_v0 = vperm.slane %v11091_v48, %v11085_v45  ;;  %v1272_v3 = vsel %vm12911_vm0, %v1271_v56, %v1270_v62 }
 0x1ff   : > { %v1273_v1 = vperm.slane %v11089_v47, %v11080_v32  ;;  %v1289_v10 = vsel %vm12915_vm4, %v1272_v3, %v1287_v6 }
 0x201   : > { %v1275_v9 = vsel %vm12911_vm0, %v1274_v0, %v1273_v1 }
 0x202   : > { %v1291_v16 = vsel %vm12914_vm5, %v1275_v9, %v1289_v10 }
 0x203   : > { %v11108_v57 = vpop.xlane.xlu0 %1230 }
 0x204   : > { %v1276_v7 = vperm.slane %v11108_v57, %v11080_v32 }
 0x205   : > { %v11131_v8 = vpop.xlane.xlu2 %1234 }
 0x206   : > { %v11122_v2 = vpop.xlane.xlu1 %1232  ;;  %v1279_v14 = vperm.slane %v11131_v8, %v11080_v32 }
 0x207   : > { %v1277_v4 = vperm.slane %v11122_v2, %v11085_v45 }
 0x209   : > { %v1278_v12 = vsel %vm12911_vm0, %v1277_v4, %v1276_v7 }
 0x20a   : > { %v1293_v18 = vsel %vm12913_vm6, %v1278_v12, %v1291_v16 }
 0x20b   : > { %v11135_v11 = vpop.xlane.xlu0 %1236 }
 0x20c   : > { %v1280_v15 = vperm.slane %v11135_v11, %v11085_v45 }
 0x20e   : > { %v1281_v17 = vsel %vm12911_vm0, %v1280_v15, %v1279_v14 }
 0x20f   : > { %v1295_v19 = vsel %vm12912_vm7, %v1281_v17, %v1293_v18 }
 0x210   : > { %v1298_v20 = vsel %vm12910_vm8, %v1295_v19, -inf }
 0x211   : > { %1299 = vmax.xlane.f32.xlu1 %v1298_v20 }
 0x284   : > { %v11147_v22 = vpop.xlane.xlu1 %1299 }
 0x285   : > { %v1303_v23 = vperm.slane %v11147_v22, 1  ;;  %v1302_v24 = vperm.slane %v11147_v22, 0  ;;  %v1304_v28 = vperm.slane %v11147_v22, 2  ;;  %v1306_v29 = vperm.slane %v11147_v22, 4 }
 0x286   : > { %v1307_v50 = vperm.slane %v11147_v22, 5  ;;  %v1309_v58 = vperm.slane %v11147_v22, 7  ;;  %v1308_v0 = vperm.slane %v11147_v22, 6 }
 0x287   : > { %v1320_v25 = vsub.f32 %v11066_v36, %v1303_v23  ;;  %v1319_v26 = vsub.f32 %v11068_v37, %v1302_v24  ;;  %v1318_v27 = vsub.f32 %v11062_v34, %v1302_v24  ;;  %v1323_v42 = vsub.f32 %v11070_v38, %v1304_v28 }
 0x288   : > { %v1326_v46 = vsub.f32 %v11076_v41, %v1306_v29  ;;  %v1321_v36 = vsub.f32 %v11072_v39, %v1303_v23  ;;  %v1305_v37 = vperm.slane %v11147_v22, 3  ;;  %v1329_v41 = vsub.f32 %v11091_v48, %v1307_v50 }
 0x289   : > { %v1338_v30 = vmul.f32 1.442695, %v1320_v25  ;;  %v1336_v31 = vmul.f32 1.442695, %v1319_v26  ;;  %v1334_v33 = vmul.f32 1.442695, %v1318_v27  ;;  %v1322_v54 = vsub.f32 %v11064_v35, %v1304_v28 }
 0x28a   : > { %v1344_v49 = vmul.f32 1.442695, %v1323_v42  ;;  %v1350_v34 = vmul.f32 1.442695, %v1326_v46  ;;  %v1340_v52 = vmul.f32 1.442695, %v1321_v36  ;;  %v1325_v39 = vsub.f32 %v11078_v43, %v1305_v37 }
 0x28b   : > { %9781 = vpow2.f32 %v1338_v30  ;;  %v1356_v56 = vmul.f32 1.442695, %v1329_v41  ;;  %v1342_v60 = vmul.f32 1.442695, %v1322_v54  ;;  %v1328_v48 = vsub.f32 %v11089_v47, %v1307_v50 }
 0x28c   : > { %9783 = vpow2.f32 %v1336_v31  ;;  %v1348_v55 = vmul.f32 1.442695, %v1325_v39  ;;  %v1332_v35 = vsub.f32 %v11131_v8, %v1309_v58  ;;  %v1324_v62 = vsub.f32 %v11074_v40, %v1305_v37 }
 0x28d   : > { %9785 = vpow2.f32 %v1334_v33  ;;  %v1354_v63 = vmul.f32 1.442695, %v1328_v48  ;;  %v1331_v6 = vsub.f32 %v11122_v2, %v1308_v0  ;;  %v1327_v40 = vsub.f32 %v11082_v44, %v1306_v29 }
 0x28e   : > { %9787 = vpow2.f32 %v1344_v49  ;;  %v1362_v1 = vmul.f32 1.442695, %v1332_v35  ;;  %v1346_v4 = vmul.f32 1.442695, %v1324_v62  ;;  %v1330_v2 = vsub.f32 %v11108_v57, %v1308_v0 }
 0x28f   : > { %9789 = vpow2.f32 %v1350_v34  ;;  %v1360_v7 = vmul.f32 1.442695, %v1331_v6  ;;  %v1352_v9 = vmul.f32 1.442695, %v1327_v40  ;;  %v1333_v16 = vsub.f32 %v11135_v11, %v1309_v58 }
 0x290   : > { %9791 = vpow2.f32 %v1340_v52  ;;  %v1358_v44 = vmul.f32 1.442695, %v1330_v2 }
 0x291   : > { %v11161_v51 = vpop.eup %9781  ;;  %9793 = vpow2.f32 %v1348_v55  ;;  %v1364_v17 = vmul.f32 1.442695, %v1333_v16 }
 0x292   : > { %v11163_v53 = vpop.eup %9783  ;;  %1389 = vperm.xlu1 %9746, %v11161_v51   ;;  %9795 = vpow2.f32 %v1356_v56 }
 0x293   : > { %v11166_v38 = vpop.eup %9785  ;;  %1386 = vperm.xlu0 %9745, %v11163_v53   ;;  %9797 = vpow2.f32 %v1342_v60 }
 0x294   : > { %1383 = vperm.xlu2 %9744, %v11166_v38   ;;  %v11174_v59 = vpop.eup %9787  ;;  %9799 = vpow2.f32 %v1354_v63 }
 0x295   : > { %v11176_v61 = vpop.eup %9789  ;;  %9801 = vpow2.f32 %v1362_v1 }
 0x296   : > { %v11179_v43 = vpop.eup %9791  ;;  %9803 = vpow2.f32 %v1346_v4 }
 0x297   : > { %v11187_v3 = vpop.eup %9793  ;;  %9805 = vpow2.f32 %v1360_v7 }
 0x298   : > { %v11189_v5 = vpop.eup %9795  ;;  %9807 = vpow2.f32 %v1352_v9 }
 0x299   : > { %v11192_v47 = vpop.eup %9797  ;;  %9809 = vpow2.f32 %v1358_v44 }
 0x29a   : > { %1398 = vperm.xlu1 %9746, %v11174_v59   ;;  %v11198_v8 = vpop.eup %9799  ;;  %9811 = vpow2.f32 %v1364_v17 }
 0x29b   : > { %1407 = vperm.xlu0 %9745, %v11176_v61   ;;  %v11200_v10 = vpop.eup %9801 }
 0x29c   : > { %1392 = vperm.xlu2 %9744, %v11179_v43   ;;  %v11203_v12 = vpop.eup %9803 }
 0x29d   : > { %v11208_v14 = vpop.eup %9805 }
 0x29e   : > { %v11211_v15 = vpop.eup %9807 }
 0x29f   : > { %v11215_v18 = vpop.eup %9809 }
 0x2a0   : > { %v11218_v19 = vpop.eup %9811 }
 0x2a2   : > { %1404 = vperm.xlu1 %9746, %v11187_v3  }
 0x2a3   : > { %1416 = vperm.xlu0 %9745, %v11189_v5  }
 0x2a4   : > { %1395 = vperm.xlu2 %9744, %v11192_v47  }
 0x2aa   : > { %1413 = vperm.xlu1 %9746, %v11198_v8  }
 0x2ab   : > { %1425 = vperm.xlu0 %9745, %v11200_v10  }
 0x2ac   : > { %1401 = vperm.xlu2 %9744, %v11203_v12  }
 0x2b2   : > { %1422 = vperm.xlu1 %9746, %v11208_v14  }
 0x2b4   : > { %1410 = vperm.xlu2 %9744, %v11211_v15  }
 0x2bc   : > { %1419 = vperm.xlu2 %9744, %v11215_v18  }
 0x2c4   : > { %1428 = vperm.xlu2 %9744, %v11218_v19  }
 0x2ee   : > { %v1384_v57 = vpop.permute.xlu2 %1383 }
 0x2ef   : > { %v1430_v42 = vperm.slane %v1384_v57, %v11080_v32 }
 0x2f6   : > { %v1393_v20 = vpop.permute.xlu2 %1392 }
 0x2f7   : > { %v1434_v46 = vperm.slane %v1393_v20, %v11085_v45 }
 0x2fe   : > { %v1396_v21 = vpop.permute.xlu2 %1395 }
 0x2ff   : > { %v1436_v37 = vperm.slane %v1396_v21, %v11080_v32 }
 0x304   : > { %v1390_v22 = vpop.permute.xlu1 %1389 }
 0x305   : > { %v1387_v23 = vpop.permute.xlu0 %1386  ;;  %v1433_v30 = vperm.slane %v1390_v22, %v11080_v32  ;;  %v7690_v22 = vld [vmem:[#allocation15 + $0x3c0] sm:$0xf] }
 0x306   : > { %v1402_v24 = vpop.permute.xlu2 %1401  ;;  %v1431_v31 = vperm.slane %v1387_v23, %v11085_v45  ;;  %v9263_v23 = vld [vmem:[#allocation15 + $0x3dc] sm:$0xf0] }
 0x307   : > { %v1435_v34 = vsel %vm12911_vm0, %v1434_v46, %v1433_v30  ;;  %v1439_v52 = vperm.slane %v1402_v24, %v11080_v32  ;;  %v7658_v24 = vld [vmem:[#allocation15 + $0x380] sm:$0xf] }
 0x308   : > { %v1432_v50 = vsel %vm12911_vm0, %v1431_v31, %v1430_v42  ;;  %v7594_v30 = vld [vmem:[#allocation15 + $0x300] sm:$0xf] }
 0x309   : > { %v1454_v55 = vsel %vm12918_vm1, %v1435_v34, %v1432_v50  ;;  %v9239_v31 = vld [vmem:[#allocation15 + $0x31c] sm:$0xf0] }
 0x30a   : > { %v7595_v42 = vor.u32 %v9239_v31, %v7594_v30  ;;  %v9231_v46 = vld [vmem:[#allocation15 + $0x2dc] sm:$0xf0] }
 0x30c   : > { %v1399_v25 = vpop.permute.xlu1 %1398 }
 0x30d   : > { %v1408_v26 = vpop.permute.xlu0 %1407  ;;  %v1437_v33 = vperm.slane %v1399_v25, %v11085_v45  ;;  %v7691_v25 = vor.u32 %v9263_v23, %v7690_v22 }
 0x30e   : > { %v1411_v27 = vpop.permute.xlu2 %1410  ;;  %v1442_v56 = vperm.slane %v1408_v26, %v11080_v32  ;;  %v9255_v26 = vld [vmem:[#allocation15 + $0x39c] sm:$0xf0] }
 0x30f   : > { %v1438_v39 = vsel %vm12911_vm0, %v1437_v33, %v1436_v37  ;;  %v1443_v58 = vperm.slane %v1411_v27, %v11085_v45  ;;  %2275 = vmatpush.bf16.msra.mxu1 %v7691_v25  ;;  %v7659_v27 = vor.u32 %v9255_v26, %v7658_v24  ;;  %v7562_v33 = vld [vmem:[#allocation15 + $0x2c0] sm:$0xf] }
 0x310   : > { %v1455_v35 = vsel %vm12917_vm2, %v1438_v39, %v1454_v55  ;;  %v9223_v37 = vld [vmem:[#allocation15 + $0x29c] sm:$0xf0] }
 0x311   : > { %v1444_v40 = vsel %vm12911_vm0, %v1443_v58, %v1442_v56  ;;  %v9215_v55 = vld [vmem:[#allocation15 + $0x25c] sm:$0xf0] }
 0x313   : > { %2276 = vmatpush.bf16.msra.mxu1 %v7659_v27 }
 0x314   : > { %v1405_v11 = vpop.permute.xlu1 %1404 }
 0x315   : > { %v1417_v28 = vpop.permute.xlu0 %1416  ;;  %v1440_v36 = vperm.slane %v1405_v11, %v11085_v45  ;;  %v7626_v11 = vld [vmem:[#allocation15 + $0x340] sm:$0xf] }
 0x316   : > { %v1420_v29 = vpop.permute.xlu2 %1419  ;;  %v1446_v62 = vperm.slane %v1417_v28, %v11085_v45  ;;  %v9247_v28 = vld [vmem:[#allocation15 + $0x35c] sm:$0xf0] }
 0x317   : > { %v1441_v41 = vsel %vm12911_vm0, %v1440_v36, %v1439_v52  ;;  %v1448_v7 = vperm.slane %v1420_v29, %v11080_v32  ;;  %v7627_v29 = vor.u32 %v9247_v28, %v7626_v11  ;;  %v7563_v36 = vor.u32 %v9231_v46, %v7562_v33  ;;  %v9264_v11 = vld [vmem:[#allocation15 + $0x3e4] sm:$0xf0] }
 0x318   : > { %v1456_v63 = vsel %vm12916_vm3, %v1441_v41, %v1455_v35  ;;  %v9207_v35 = vld [vmem:[#allocation15 + $0x21c] sm:$0xf0] }
 0x319   : > { %v1457_v2 = vsel %vm12915_vm4, %v1444_v40, %v1456_v63  ;;  %2277 = vmatpush.bf16.msra.mxu1 %v7627_v29  ;;  %v9265_v63 = vld [vmem:[#allocation15 + $0x3ec] sm:$0xf0] }
 0x31c   : > { %v1414_v49 = vpop.permute.xlu1 %1413 }
 0x31d   : > { %v1445_v54 = vperm.slane %v1414_v49, %v11080_v32  ;;  %v1426_v60 = vpop.permute.xlu0 %1425  ;;  %2278 = vmatpush.bf16.msra.mxu1 %v7595_v42  ;;  %v7530_v49 = vld [vmem:[#allocation15 + $0x280] sm:$0xf] }
 0x31e   : > { %v1429_v48 = vpop.permute.xlu2 %1428  ;;  %v1451_v1 = vperm.slane %v1426_v60, %v11080_v32  ;;  %v7531_v41 = vor.u32 %v9223_v37, %v7530_v49  ;;  %v7642_v49 = vld [vmem:[#allocation15 + $0x350] sm:$0xf] }
 0x31f   : > { %v1447_v0 = vsel %vm12911_vm0, %v1446_v62, %v1445_v54  ;;  %v1452_v4 = vperm.slane %v1429_v48, %v11085_v45  ;;  %v7498_v54 = vld [vmem:[#allocation15 + $0x240] sm:$0xf]  ;;  %v7706_v62 = vld [vmem:[#allocation15 + $0x3d0] sm:$0xf] }
 0x320   : > { %v1458_v16 = vsel %vm12914_vm5, %v1447_v0, %v1457_v2  ;;  %v7499_v60 = vor.u32 %v9215_v55, %v7498_v54  ;;  %v7466_v48 = vld [vmem:[#allocation15 + $0x200] sm:$0xf]  ;;  %v9249_v37 = vld [vmem:[#allocation15 + $0x36c] sm:$0xf0] }
 0x321   : > { %v1453_v17 = vsel %vm12911_vm0, %v1452_v4, %v1451_v1  ;;  %2279 = vmatpush.bf16.msra.mxu1 %v7563_v36 }
 0x324   : > { %v1423_v6 = vpop.permute.xlu1 %1422 }
 0x325   : > { %v1449_v9 = vperm.slane %v1423_v6, %v11085_v45  ;;  %2280 = vmatpush.bf16.msra.mxu1 %v7531_v41 }
 0x327   : > { %v1450_v44 = vsel %vm12911_vm0, %v1449_v9, %v1448_v7  ;;  %v7467_v7 = vor.u32 %v9207_v35, %v7466_v48 }
 0x328   : > { %v1459_v57 = vsel %vm12913_vm6, %v1450_v44, %v1458_v16  ;;  %v7707_v44 = vor.u32 %v9265_v63, %v7706_v62  ;;  %v7643_v63 = vor.u32 %v9249_v37, %v7642_v49  ;;  %v9233_v37 = vld [vmem:[#allocation15 + $0x2ec] sm:$0xf0] }
 0x329   : > { %v1460_v20 = vsel %vm12912_vm7, %v1453_v17, %v1459_v57  ;;  %2281 = vmatpush.bf16.msra.mxu1 %v7499_v60 }
 0x32a   : > { %v1462_v21 = vsel %vm12910_vm8, %v1460_v20, 0.0  ;;  %v7674_v20 = vld [vmem:[#allocation15 + $0x390] sm:$0xf] }
 0x32b   : > { %1463 = vadd.xlane.f32.xlu1 %v1462_v21  ;;  %v9257_v21 = vld [vmem:[#allocation15 + $0x3ac] sm:$0xf0] }
 0x32c   : > { %v7675_v42 = vor.u32 %v9257_v21, %v7674_v20  ;;  %v9259_v20 = vld [vmem:[#allocation15 + $0x3c4] sm:$0xf] }
 0x32d   : > { %2282 = vmatpush.bf16.msra.mxu1 %v7467_v7  ;;  %v7610_v7 = vld [vmem:[#allocation15 + $0x310] sm:$0xf]  ;;  %v7692_v21 = vld [vmem:[#allocation15 + $0x3e0] sm:$0xf0] }
 0x32e   : > { %v7695_v49 = vor.u32 %v9259_v20, %v7692_v21  ;;  %v7628_v20 = vld [vmem:[#allocation15 + $0x360] sm:$0xf0]  ;;  %v7634_v21 = vld [vmem:[#allocation15 + $0x348] sm:$0xf] }
 0x330   : > { %2283 = vmatmul.bf16.vlgmr.msra.gmra.mxu1 %v11015_v13  ;;  %2288 = vmatpush.bf16.msra.mxu2 %v7695_v49 }
 0x331   : > { %2327 = vmatpush.bf16.msrb.mxu1 %v7707_v44 }
 0x335   : > { %2328 = vmatpush.bf16.msrb.mxu1 %v7675_v42  ;;  %v7700_v42 = vld [vmem:[#allocation15 + $0x3e8] sm:$0xf0] }
 0x339   : > { %2329 = vmatpush.bf16.msrb.mxu1 %v7643_v63 }
 0x39e   : > { %v11253_v34 = vpop.xlane.xlu1 %1463 }
 0x39f   : > { %v1466_v50 = vperm.slane %v11253_v34, 0  ;;  %v11257_v52 = vperm.slane %v11253_v34, 1  ;;  %v11260_v39 = vperm.slane %v11253_v34, 2  ;;  %v11263_v56 = vperm.slane %v11253_v34, 5 }
 0x3a0   : > { %v11267_v58 = vperm.slane %v11253_v34, 3  ;;  %v11279_v16 = vperm.slane %v11253_v34, 4  ;;  %v11284_v22 = vperm.slane %v11253_v34, 6 }
 0x3a1   : > { %9813 = vrcp.f32 %v1466_v50  ;;  %v1491_v6 = vand.u32 2147483647, %v1466_v50  ;;  %v1493_v40 = vand.u32 2147483648, %v1466_v50  ;;  %v1571_v23 = vand.u32 2147483647, %v11263_v56 }
 0x3a2   : > { %9815 = vrcp.f32 %v11257_v52  ;;  %v1573_v24 = vand.u32 2147483648, %v11263_v56  ;;  %vm1487_vm11 = vweird.f32 %v1466_v50  ;;  %vm1503_vm12 = vweird.f32 %v11257_v52 }
 0x3a3   : > { %9817 = vrcp.f32 %v11260_v39  ;;  %vm11288_vm10 = vcmp.eq.f32.partialorder %v1491_v6, 8.507059e+37  ;;  %v1494_v28 = vor.u32 1.1754944e-38, %v1493_v40  ;;  %v1507_v36 = vand.u32 2147483647, %v11257_v52 }
 0x3a4   : > { %9819 = vrcp.f32 %v11263_v56  ;;  %v11368_v40 = vperm.slane %v11253_v34, 7 }
 0x3a5   : > { %9821 = vrcp.f32 %v11267_v58 }
 0x3a6   : > { %9823 = vrcp.f32 %v11279_v16 }
 0x3a7   : > { %v9814_v0 = vpop.eup %9813  ;;  %9825 = vrcp.f32 %v11284_v22 }
 0x3a8   : > { %v11272_v1 = vpop.eup %9815  ;;  %v1483_v4 = vmul.f32 %v9814_v0, %v1466_v50  ;;  %vm1488_vm9 = vweird.f32 %v9814_v0  ;;  %v1509_v50 = vand.u32 2147483648, %v11257_v52  ;;  %9827 = vrcp.f32 %v11368_v40 }
 0x3a9   : > { %v11274_v9 = vpop.eup %9817  ;;  %v1499_v2 = vmul.f32 %v11272_v1, %v11257_v52  ;;  %vm1489_vm13 = vmor %vm1487_vm11, %vm1488_vm9  ;;  %vm1504_vm14 = vweird.f32 %v11272_v1  ;;  %vm1567_vm9 = vweird.f32 %v11263_v56  ;;  %vm11310_vm11 = vcmp.eq.f32.partialorder %v1571_v23, 8.507059e+37 }
 0x3aa   : > { %v1484_v17 = vsub.f32 1.0, %v1483_v4  ;;  %v1515_v57 = vmul.f32 %v11274_v9, %v11260_v39  ;;  %v9820_v26 = vpop.eup %9819  ;;  %v1510_v52 = vor.u32 1.1754944e-38, %v1509_v50  ;;  %v9256_v4 = vld [vmem:[#allocation15 + $0x3a4] sm:$0xf0] }
 0x3ab   : > { %v1500_v25 = vsub.f32 1.0, %v1499_v2  ;;  %v11292_v29 = vpop.eup %9821  ;;  %v1563_v30 = vmul.f32 %v9820_v26, %v11263_v56  ;;  %vm1568_vm15 = vweird.f32 %v9820_v26  ;;  %v9241_v2 = vld [vmem:[#allocation15 + $0x32c] sm:$0xf0]  ;;  %v1574_v56 = vor.u32 1.1754944e-38, %v1573_v24 }
 0x3ac   : > { %v1485_v27 = vmul.f32 %v9814_v0, %v1484_v17  ;;  %v1516_v33 = vsub.f32 1.0, %v1515_v57  ;;  %v1531_v60 = vmul.f32 %v11292_v29, %v11267_v58  ;;  %vm11332_vm8 = vmor %vm1567_vm9, %vm1568_vm15  ;;  %v11336_v23 = vpop.eup %9823  ;;  %vm1536_vm15 = vweird.f32 %v11292_v29 }
 0x3ad   : > { %v1501_v31 = vmul.f32 %v11272_v1, %v1500_v25  ;;  %v1564_v41 = vsub.f32 1.0, %v1563_v30  ;;  %v7611_v25 = vor.u32 %v9241_v2, %v7610_v7  ;;  %v1547_v50 = vmul.f32 %v11336_v23, %v11279_v16 }
 0x3ae   : > { %v1486_v46 = vadd.f32 %v9814_v0, %v1485_v27  ;;  %v1517_v62 = vmul.f32 %v11274_v9, %v1516_v33  ;;  %v1532_v57 = vsub.f32 1.0, %v1531_v60  ;;  %v7698_v27 = vld [vmem:[#allocation15 + $0x3c8] sm:$0xf]  ;;  %v1523_v33 = vand.u32 2147483647, %v11260_v39 }
 0x3af   : > { %v1502_v54 = vadd.f32 %v11272_v1, %v1501_v31  ;;  %v1565_v48 = vmul.f32 %v9820_v26, %v1564_v41  ;;  %v9251_v41 = vld [vmem:[#allocation15 + $0x384] sm:$0xf]  ;;  %v7699_v60 = vor.u32 %v9264_v11, %v7698_v27  ;;  %2330 = vmatpush.bf16.msrb.mxu1 %v7611_v25  ;;  %v1548_v34 = vsub.f32 1.0, %v1547_v50 }
 0x3b0   : > { %v1490_v55 = vsel %vm1489_vm13, %v9814_v0, %v1486_v46  ;;  %vm11320_vm13 = vmor %vm1503_vm12, %vm1504_vm14  ;;  %v1518_v24 = vadd.f32 %v11274_v9, %v1517_v62  ;;  %vm1520_vm12 = vweird.f32 %v11274_v9  ;;  %vm1524_vm9 = vcmp.eq.f32.partialorder %v1523_v33, 8.507059e+37  ;;  %v11383_v33 = vpop.eup %9825 }
 0x3b1   : > { %v1495_v35 = vsel %vm11288_vm10, %v1494_v28, %v1490_v55  ;;  %v1566_v44 = vadd.f32 %v9820_v26, %v1565_v48  ;;  %v1506_v17 = vsel %vm11320_vm13, %v11272_v1, %v1502_v54  ;;  %vm11327_vm10 = vcmp.eq.f32.partialorder %v1507_v36, 8.507059e+37  ;;  %v9260_v28 = vld [vmem:[#allocation15 + $0x3cc] sm:$0xf]  ;;  %v7660_v48 = vld [vmem:[#allocation15 + $0x3a0] sm:$0xf0]  ;;  %2301 = vmatpush.bf16.msra.mxu3 %v7699_v60 }
 0x3b2   : > { %v1497_v0 = vmul.f32 %v11163_v53, %v1495_v35  ;;  %v1496_v6 = vmul.f32 %v11166_v38, %v1495_v35  ;;  %v1511_v31 = vsel %vm11327_vm10, %v1510_v52, %v1506_v17  ;;  %v1525_v36 = vand.u32 2147483648, %v11260_v39  ;;  %v7666_v35 = vld [vmem:[#allocation15 + $0x388] sm:$0xf]  ;;  %v9243_v38 = vld [vmem:[#allocation15 + $0x344] sm:$0xf] }
 0x3b3   : > { %v1570_v1 = vsel %vm11332_vm8, %v9820_v26, %v1566_v44  ;;  %v7578_v26 = vld [vmem:[#allocation15 + $0x2d0] sm:$0xf]  ;;  %vm1519_vm8 = vweird.f32 %v11260_v39  ;;  %v1533_v55 = vmul.f32 %v11292_v29, %v1532_v57  ;;  %v1513_v39 = vmul.f32 %v11179_v43, %v1511_v31  ;;  %v9240_v54 = vld [vmem:[#allocation15 + $0x324] sm:$0xf0] }
 0x3b4   : > { %1617 = vperm.xlu2 %9744, %v1497_v0   ;;  %1612 = vperm.xlu0 %9745, %v1496_v6   ;;  %v11344_v30 = vsel %vm11310_vm11, %v1574_v56, %v1570_v1  ;;  %vm11355_vm14 = vmor %vm1519_vm8, %vm1520_vm12  ;;  %v7579_v63 = vor.u32 %v9233_v37, %v7578_v26  ;;  %v9252_v0 = vld [vmem:[#allocation15 + $0x38c] sm:$0xf]  ;;  %v1512_v7 = vmul.f32 %v11161_v51, %v1511_v31  ;;  %v7546_v56 = vld [vmem:[#allocation15 + $0x290] sm:$0xf]  ;;  %v1526_v17 = vor.u32 1.1754944e-38, %v1525_v36 }
 0x3b5   : > { %v1576_v46 = vmul.f32 %v11198_v8, %v11344_v30  ;;  %v7703_v8 = vor.u32 %v9260_v28, %v7700_v42  ;;  %v1522_v62 = vsel %vm11355_vm14, %v11274_v9, %v1518_v24  ;;  %v7668_v6 = vld [vmem:[#allocation15 + $0x3a8] sm:$0xf0]  ;;  %v7663_v2 = vor.u32 %v9251_v41, %v7660_v48  ;;  %v9225_v43 = vld [vmem:[#allocation15 + $0x2ac] sm:$0xf0]  ;;  %v9248_v1 = vld [vmem:[#allocation15 + $0x364] sm:$0xf0] }
 0x3b6   : > { %v7667_v44 = vor.u32 %v9256_v4, %v7666_v35  ;;  %v7671_v9 = vor.u32 %v9252_v0, %v7668_v6  ;;  %v1539_v53 = vand.u32 2147483647, %v11267_v58  ;;  %v1527_v52 = vsel %vm1524_vm9, %v1526_v17, %v1522_v62  ;;  %2331 = vmatpush.bf16.msrb.mxu1 %v7579_v63  ;;  %v9244_v28 = vld [vmem:[#allocation15 + $0x34c] sm:$0xf]  ;;  %v7514_v26 = vld [vmem:[#allocation15 + $0x250] sm:$0xf]  ;;  %v11394_v6 = vpop.eup %9827 }
 0x3b7   : > { %1662 = vperm.xlu1 %9746, %v1576_v46   ;;  %2314 = vmatpush.bf16.msrb.mxu0 %v7703_v8  ;;  %v1534_v51 = vadd.f32 %v11292_v29, %v1533_v55  ;;  %vm1535_vm11 = vweird.f32 %v11267_v58  ;;  %v7547_v57 = vor.u32 %v9225_v43, %v7546_v56  ;;  %v1541_v25 = vand.u32 2147483648, %v11267_v58  ;;  %v7636_v31 = vld [vmem:[#allocation15 + $0x368] sm:$0xf0]  ;;  %v9217_v46 = vld [vmem:[#allocation15 + $0x26c] sm:$0xf0] }
 0x3b8   : > { %vm11378_vm13 = vmor %vm1535_vm11, %vm1536_vm15  ;;  %2289 = vmatpush.bf16.msra.mxu2 %v7663_v2  ;;  %2302 = vmatpush.bf16.msra.mxu3 %v7667_v44  ;;  %v7631_v27 = vor.u32 %v9243_v38, %v7628_v20  ;;  %v7635_v11 = vor.u32 %v9248_v1, %v7634_v21  ;;  %v7639_v42 = vor.u32 %v9244_v28, %v7636_v31  ;;  %v9235_v36 = vld [vmem:[#allocation15 + $0x304] sm:$0xf]  ;;  %v7602_v41 = vld [vmem:[#allocation15 + $0x308] sm:$0xf]  ;;  %vm1552_vm10 = vweird.f32 %v11336_v23 }
 0x3b9   : > { %v1529_v49 = vmul.f32 %v11174_v59, %v1527_v52  ;;  %v7596_v37 = vld [vmem:[#allocation15 + $0x320] sm:$0xf0]  ;;  %v1528_v58 = vmul.f32 %v11192_v47, %v1527_v52  ;;  %v1538_v55 = vsel %vm11378_vm13, %v11292_v29, %v1534_v51  ;;  %v1549_v50 = vmul.f32 %v11336_v23, %v1548_v34  ;;  %v9236_v8 = vld [vmem:[#allocation15 + $0x30c] sm:$0xf]  ;;  %v7482_v62 = vld [vmem:[#allocation15 + $0x210] sm:$0xf] }
 0x3ba   : > { %2332 = vmatpush.bf16.msrb.mxu1 %v7547_v57  ;;  %v7515_v60 = vor.u32 %v9217_v46, %v7514_v26  ;;  %v7604_v48 = vld [vmem:[#allocation15 + $0x328] sm:$0xf0]  ;;  %v1579_v35 = vmul.f32 %v11383_v33, %v11284_v22  ;;  %v7599_v59 = vor.u32 %v9235_v36, %v7596_v37  ;;  %v9209_v63 = vld [vmem:[#allocation15 + $0x22c] sm:$0xf0]  ;;  %v1542_v47 = vor.u32 1.1754944e-38, %v1541_v25 }
 0x3bb   : > { %2315 = vmatpush.bf16.msrb.mxu0 %v7671_v9  ;;  %v7607_v29 = vor.u32 %v9236_v8, %v7604_v48  ;;  %v7946_v4 = vld [vmem:[#allocation15 + $0x1c0] sm:$0xf]  ;;  %vm1540_vm12 = vcmp.eq.f32.partialorder %v1539_v53, 8.507059e+37  ;;  %v1557_v2 = vand.u32 2147483648, %v11279_v16  ;;  %v9227_v44 = vld [vmem:[#allocation15 + $0x2c4] sm:$0xf]  ;;  %v1550_v43 = vadd.f32 %v11336_v23, %v1549_v50 }
 0x3bc   : > { %1627 = vperm.xlu2 %9744, %v1513_v39   ;;  %1622 = vperm.xlu0 %9745, %v1512_v7   ;;  %v7603_v39 = vor.u32 %v9240_v54, %v7602_v41  ;;  %v9199_v0 = vld [vmem:[#allocation15 + $0x1dc] sm:$0xf0]  ;;  %v1555_v7 = vand.u32 2147483647, %v11279_v16  ;;  %v1543_v56 = vsel %vm1540_vm12, %v1542_v47, %v1538_v55  ;;  %vm1551_vm8 = vweird.f32 %v11279_v16  ;;  %v7564_v9 = vld [vmem:[#allocation15 + $0x2e0] sm:$0xf0] }
 0x3bd   : > { %2290 = vmatpush.bf16.msra.mxu2 %v7631_v27  ;;  %2303 = vmatpush.bf16.msra.mxu3 %v7635_v11  ;;  %v7483_v17 = vor.u32 %v9209_v63, %v7482_v62  ;;  %v7570_v34 = vld [vmem:[#allocation15 + $0x2c8] sm:$0xf]  ;;  %vm11402_vm14 = vmor %vm1551_vm8, %vm1552_vm10  ;;  %v1580_v53 = vsub.f32 1.0, %v1579_v35  ;;  %v7947_v51 = vor.u32 %v9199_v0, %v7946_v4  ;;  %v7567_v57 = vor.u32 %v9227_v44, %v7564_v9  ;;  %v9228_v20 = vld [vmem:[#allocation15 + $0x2cc] sm:$0xf] }
 0x3be   : > { %2333 = vmatpush.bf16.msrb.mxu1 %v7515_v60  ;;  %v9232_v38 = vld [vmem:[#allocation15 + $0x2e4] sm:$0xf0]  ;;  %v7572_v21 = vld [vmem:[#allocation15 + $0x2e8] sm:$0xf0]  ;;  %v11408_v16 = vmul.f32 %v11394_v6, %v11368_v40  ;;  %v7914_v25 = vld [vmem:[#allocation15 + $0x180] sm:$0xf]  ;;  %v1545_v28 = vmul.f32 %v11187_v3, %v1543_v56  ;;  %v1544_v46 = vmul.f32 %v11203_v12, %v1543_v56  ;;  %v1554_v36 = vsel %vm11402_vm14, %v11336_v23, %v1550_v43 }
 0x3bf   : > { %2316 = vmatpush.bf16.msrb.mxu0 %v7639_v42  ;;  %v7571_v1 = vor.u32 %v9232_v38, %v7570_v34  ;;  %v7575_v24 = vor.u32 %v9228_v20, %v7572_v21  ;;  %v9191_v27 = vld [vmem:[#allocation15 + $0x19c] sm:$0xf0]  ;;  %v9219_v11 = vld [vmem:[#allocation15 + $0x284] sm:$0xf]  ;;  %v7538_v42 = vld [vmem:[#allocation15 + $0x288] sm:$0xf]  ;;  %v1581_v50 = vmul.f32 %v11383_v33, %v1580_v53  ;;  %vm1584_vm9 = vweird.f32 %v11383_v33 }
 0x3c0   : > { %v7532_v31 = vld [vmem:[#allocation15 + $0x2a0] sm:$0xf0]  ;;  %v9224_v26 = vld [vmem:[#allocation15 + $0x2a4] sm:$0xf0]  ;;  %vm11415_vm15 = vcmp.eq.f32.partialorder %v1555_v7, 8.507059e+37  ;;  %v1558_v37 = vor.u32 1.1754944e-38, %v1557_v2  ;;  %v7915_v55 = vor.u32 %v9191_v27, %v7914_v25  ;;  %vm1583_vm11 = vweird.f32 %v11284_v22 }
 0x3c1   : > { %2291 = vmatpush.bf16.msra.mxu2 %v7599_v59  ;;  %2304 = vmatpush.bf16.msra.mxu3 %v7603_v39  ;;  %v9220_v41 = vld [vmem:[#allocation15 + $0x28c] sm:$0xf]  ;;  %v1589_v3 = vand.u32 2147483648, %v11284_v22  ;;  %v7535_v12 = vor.u32 %v9219_v11, %v7532_v31  ;;  %v1596_v23 = vsub.f32 1.0, %v11408_v16  ;;  %v7539_v60 = vor.u32 %v9224_v26, %v7538_v42  ;;  %v7882_v48 = vld [vmem:[#allocation15 + $0x140] sm:$0xf]  ;;  %vm11433_vm13 = vmor %vm1583_vm11, %vm1584_vm9 }
 0x3c2   : > { %2334 = vmatpush.bf16.msrb.mxu1 %v7483_v17  ;;  %v7540_v54 = vld [vmem:[#allocation15 + $0x2a8] sm:$0xf0]  ;;  %v9183_v35 = vld [vmem:[#allocation15 + $0x15c] sm:$0xf0]  ;;  %v9211_v59 = vld [vmem:[#allocation15 + $0x244] sm:$0xf]  ;;  %v1559_v4 = vsel %vm11415_vm15, %v1558_v37, %v1554_v36  ;;  %v1582_v43 = vadd.f32 %v11383_v33, %v1581_v50  ;;  %vm1600_vm12 = vweird.f32 %v11394_v6  ;;  %vm1599_vm8 = vweird.f32 %v11368_v40 }
 0x3c3   : > { %2317 = vmatpush.bf16.msrb.mxu0 %v7607_v29  ;;  %v7543_v8 = vor.u32 %v9220_v41, %v7540_v54  ;;  %v7500_v39 = vld [vmem:[#allocation15 + $0x260] sm:$0xf0]  ;;  %v7506_v62 = vld [vmem:[#allocation15 + $0x248] sm:$0xf]  ;;  %v9212_v47 = vld [vmem:[#allocation15 + $0x24c] sm:$0xf]  ;;  %v7883_v0 = vor.u32 %v9183_v35, %v7882_v48  ;;  %v1561_v20 = vmul.f32 %v11211_v15, %v1559_v4  ;;  %v1597_v36 = vmul.f32 %v11394_v6, %v1596_v23 }
 0x3c4   : > { %1637 = vperm.xlu2 %9744, %v1529_v49   ;;  %1632 = vperm.xlu0 %9745, %v1528_v58   ;;  %v1587_v58 = vand.u32 2147483647, %v11284_v22  ;;  %v9216_v63 = vld [vmem:[#allocation15 + $0x264] sm:$0xf0]  ;;  %v7508_v29 = vld [vmem:[#allocation15 + $0x268] sm:$0xf0]  ;;  %v7503_v7 = vor.u32 %v9211_v59, %v7500_v39  ;;  %v1586_v15 = vsel %vm11433_vm13, %v11383_v33, %v1582_v43  ;;  %v1577_v59 = vmul.f32 %v11189_v5, %v11344_v30  ;;  %vm11453_vm14 = vmor %vm1599_vm8, %vm1600_vm12 }
 0x3c5   : > { %2292 = vmatpush.bf16.msra.mxu2 %v7567_v57  ;;  %2305 = vmatpush.bf16.msra.mxu3 %v7571_v1  ;;  %v7850_v2 = vld [vmem:[#allocation15 + $0x100] sm:$0xf]  ;;  %v9203_v56 = vld [vmem:[#allocation15 + $0x204] sm:$0xf]  ;;  %v7507_v17 = vor.u32 %v9216_v63, %v7506_v62  ;;  %v7511_v9 = vor.u32 %v9212_v47, %v7508_v29  ;;  %v7474_v38 = vld [vmem:[#allocation15 + $0x208] sm:$0xf]  ;;  %v1598_v22 = vadd.f32 %v11394_v6, %v1597_v36 }
 0x3c6   : > { %2699 = vmatpush.bf16.msra.mxu1 %v7947_v51  ;;  %v9175_v44 = vld [vmem:[#allocation15 + $0x11c] sm:$0xf0]  ;;  %v7468_v34 = vld [vmem:[#allocation15 + $0x220] sm:$0xf0]  ;;  %v9208_v52 = vld [vmem:[#allocation15 + $0x224] sm:$0xf0] }
 0x3c7   : > { %2318 = vmatpush.bf16.msrb.mxu0 %v7575_v24  ;;  %2335 = vmatmul.bf16.vlgmr.msrb.gmra.mxu1 %v11015_v13  ;;  %v9204_v53 = vld [vmem:[#allocation15 + $0x20c] sm:$0xf]  ;;  %v9261_v57 = vld [vmem:[#allocation15 + $0x3d4] sm:$0xf]  ;;  %v7714_v16 = vld [vmem:[#allocation15 + $0x3d8] sm:$0xf]  ;;  %v1560_v24 = vmul.f32 %v11176_v61, %v1559_v4  ;;  %v7851_v27 = vor.u32 %v9175_v44, %v7850_v2  ;;  %v7471_v11 = vor.u32 %v9203_v56, %v7468_v34 }
 0x3c8   : > { %v7476_v51 = vld [vmem:[#allocation15 + $0x228] sm:$0xf0]  ;;  %v7708_v21 = vld [vmem:[#allocation15 + $0x3f0] sm:$0xf0]  ;;  %v9266_v1 = vld [vmem:[#allocation15 + $0x3f4] sm:$0xf0]  ;;  %v7475_v42 = vor.u32 %v9208_v52, %v7474_v38 }
 0x3c9   : > { %2293 = vmatpush.bf16.msra.mxu2 %v7535_v12  ;;  %2306 = vmatpush.bf16.msra.mxu3 %v7539_v60  ;;  %v7716_v31 = vld [vmem:[#allocation15 + $0x3f8] sm:$0xf0]  ;;  %v7479_v61 = vor.u32 %v9204_v53, %v7476_v51  ;;  %v7818_v26 = vld [vmem:[#allocation15 + $0xc0] sm:$0xf]  ;;  %v7711_v49 = vor.u32 %v9261_v57, %v7708_v21  ;;  %v7715_v37 = vor.u32 %v9266_v1, %v7714_v16  ;;  %vm1588_vm10 = vcmp.eq.f32.partialorder %v1587_v58, 8.507059e+37 }
 0x3ca   : > { %2700 = vmatpush.bf16.msra.mxu1 %v7915_v55  ;;  %v1590_v41 = vor.u32 1.1754944e-38, %v1589_v3  ;;  %v9253_v33 = vld [vmem:[#allocation15 + $0x394] sm:$0xf]  ;;  %v7682_v50 = vld [vmem:[#allocation15 + $0x398] sm:$0xf]  ;;  %v1605_v62 = vand.u32 2147483648, %v11368_v40 }
 0x3cb   : > { %2319 = vmatpush.bf16.msrb.mxu0 %v7543_v8  ;;  %v7676_v55 = vld [vmem:[#allocation15 + $0x3b0] sm:$0xf0]  ;;  %v9258_v60 = vld [vmem:[#allocation15 + $0x3b4] sm:$0xf0]  ;;  %v9254_v8 = vld [vmem:[#allocation15 + $0x39c] sm:$0xf] }
 0x3cc   : > { %1647 = vperm.xlu2 %9744, %v1545_v28   ;;  %1642 = vperm.xlu0 %9745, %v1544_v46   ;;  %v9262_v28 = vld [vmem:[#allocation15 + $0x3dc] sm:$0xf]  ;;  %v9167_v46 = vld [vmem:[#allocation15 + $0xdc] sm:$0xf0]  ;;  %v1591_v23 = vsel %vm1588_vm10, %v1590_v41, %v1586_v15  ;;  %v1603_v3 = vand.u32 2147483647, %v11368_v40  ;;  %v7679_v63 = vor.u32 %v9253_v33, %v7676_v55  ;;  %v7683_v47 = vor.u32 %v9258_v60, %v7682_v50 }
 0x3cd   : > { %2294 = vmatpush.bf16.msra.mxu2 %v7503_v7  ;;  %2307 = vmatpush.bf16.msra.mxu3 %v7507_v17  ;;  %v7719_v54 = vor.u32 %v9262_v28, %v7716_v31  ;;  %v7819_v12 = vor.u32 %v9167_v46, %v7818_v26  ;;  %v7684_v48 = vld [vmem:[#allocation15 + $0x3b8] sm:$0xf0]  ;;  %v7786_v35 = vld [vmem:[#allocation15 + $0x80] sm:$0xf]  ;;  %v9245_v29 = vld [vmem:[#allocation15 + $0x354] sm:$0xf]  ;;  %v1602_v17 = vsel %vm11453_vm14, %v11394_v6, %v1598_v22 }
 0x3ce   : > { %2701 = vmatpush.bf16.msra.mxu1 %v7883_v0  ;;  %v9159_v58 = vld [vmem:[#allocation15 + $0x9c] sm:$0xf0]  ;;  %v7644_v4 = vld [vmem:[#allocation15 + $0x370] sm:$0xf0]  ;;  %v1592_v0 = vmul.f32 %v11215_v18, %v1591_v23  ;;  %v7687_v7 = vor.u32 %v9254_v8, %v7684_v48  ;;  %v7650_v30 = vld [vmem:[#allocation15 + $0x358] sm:$0xf] }
 0x3cf   : > { %2320 = vmatpush.bf16.msrb.mxu0 %v7511_v9  ;;  %v7787_v5 = vor.u32 %v9159_v58, %v7786_v35  ;;  %v9250_v2 = vld [vmem:[#allocation15 + $0x374] sm:$0xf0]  ;;  %v9246_v44 = vld [vmem:[#allocation15 + $0x35c] sm:$0xf]  ;;  %v7754_v43 = vld [vmem:[#allocation15 + $0x40] sm:$0xf]  ;;  %v7647_v9 = vor.u32 %v9245_v29, %v7644_v4 }
 0x3d0   : > { %v7652_v56 = vld [vmem:[#allocation15 + $0x378] sm:$0xf0]  ;;  %v9151_v40 = vld [vmem:[#allocation15 + $0x5c] sm:$0xf0]  ;;  %vm1604_vm15 = vcmp.eq.f32.partialorder %v1603_v3, 8.507059e+37  ;;  %v1606_v18 = vor.u32 1.1754944e-38, %v1605_v62  ;;  %v7651_v34 = vor.u32 %v9250_v2, %v7650_v30 }
 0x3d1   : > { %2295 = vmatpush.bf16.msra.mxu2 %v7471_v11  ;;  %2308 = vmatpush.bf16.msra.mxu3 %v7475_v42  ;;  %v9237_v38 = vld [vmem:[#allocation15 + $0x314] sm:$0xf]  ;;  %v7655_v53 = vor.u32 %v9246_v44, %v7652_v56  ;;  %v7755_v51 = vor.u32 %v9151_v40, %v7754_v43  ;;  %v7618_v57 = vld [vmem:[#allocation15 + $0x318] sm:$0xf]  ;;  %v9238_v21 = vld [vmem:[#allocation15 + $0x31c] sm:$0xf]  ;;  %v1593_v11 = vmul.f32 %v11208_v14, %v1591_v23 }
 0x3d2   : > { %2702 = vmatpush.bf16.msra.mxu1 %v7851_v27  ;;  %v7612_v52 = vld [vmem:[#allocation15 + $0x330] sm:$0xf0]  ;;  %v1607_v16 = vsel %vm1604_vm15, %v1606_v18, %v1602_v17  ;;  %v7620_v1 = vld [vmem:[#allocation15 + $0x338] sm:$0xf0]  ;;  %v9143_v25 = vld [vmem:[#allocation15 + $0x1c] sm:$0xf0] }
 0x3d3   : > { %2321 = vmatpush.bf16.msrb.mxu0 %v7479_v61  ;;  %v7962_v6 = vld [vmem:[#allocation15 + $0x1d0] sm:$0xf]  ;;  %v7615_v28 = vor.u32 %v9237_v38, %v7612_v52  ;;  %v9229_v15 = vld [vmem:[#allocation15 + $0x2d4] sm:$0xf]  ;;  %v1608_v42 = vmul.f32 %v11200_v10, %v1607_v16  ;;  %v7623_v61 = vor.u32 %v9238_v21, %v7620_v1  ;;  %v7586_v36 = vld [vmem:[#allocation15 + $0x2d8] sm:$0xf]  ;;  %v1609_v29 = vmul.f32 %v11218_v19, %v1607_v16 }
 0x3d4   : > { %1657 = vperm.xlu2 %9744, %v1561_v20   ;;  %1652 = vperm.xlu0 %9745, %v1560_v24   ;;  %v9242_v20 = vld [vmem:[#allocation15 + $0x334] sm:$0xf0]  ;;  %v7722_v24 = vld [vmem:[#allocation15] sm:$0xf]  ;;  %v9201_v27 = vld [vmem:[#allocation15 + $0x1ec] sm:$0xf0] }
 0x3d5   : > { %2340 = vmatpush.bf16.msrb.mxu2 %v7711_v49  ;;  %2353 = vmatpush.bf16.msrb.mxu3 %v7715_v37  ;;  %v7619_v31 = vor.u32 %v9242_v20, %v7618_v57  ;;  %v7723_v26 = vor.u32 %v9143_v25, %v7722_v24  ;;  %v7580_v46 = vld [vmem:[#allocation15 + $0x2f0] sm:$0xf0]  ;;  %v9234_v49 = vld [vmem:[#allocation15 + $0x2f4] sm:$0xf0]  ;;  %v7963_v37 = vor.u32 %v9201_v27, %v7962_v6  ;;  %v9230_v41 = vld [vmem:[#allocation15 + $0x2dc] sm:$0xf] }
 0x3d6   : > { %2296 = vmatmul.bf16.vlgmr.msra.gmra.mxu2 %v11015_v13  ;;  %2703 = vmatpush.bf16.msra.mxu1 %v7819_v12  ;;  %v1017_v33 = vld [vmem:[%s10924_s4] sm:$0xff]  ;;  %v7583_v12 = vor.u32 %v9229_v15, %v7580_v46  ;;  %v7587_v50 = vor.u32 %v9234_v49, %v7586_v36  ;;  %v9195_v21 = vld [vmem:[#allocation15 + $0x1c4] sm:$0xf]  ;;  %v7954_v1 = vld [vmem:[#allocation15 + $0x1c8] sm:$0xf]  ;;  %vm3409_vm11 = vcmask 1047556  }
 0x3d7   : > { %2366 = vmatpush.bf16.msra.mxu0 %v7719_v54  ;;  %2309 = vmatmul.bf16.vlgmr.msra.gmra.mxu3 %v11015_v13  ;;  %v7588_v54 = vld [vmem:[#allocation15 + $0x2f8] sm:$0xf0]  ;;  %v7930_v14 = vld [vmem:[#allocation15 + $0x190] sm:$0xf]  ;;  %v9221_v10 = vld [vmem:[#allocation15 + $0x294] sm:$0xf]  ;;  %v11468_v8 = vpack.c.bf16 %v1017_v33, %v1017_v33 }
 0x3d8   : > { %2322 = vmatmul.bf16.vlgmr.msrb.gmra.mxu0 %v11015_v13  ;;  %v9193_v55 = vld [vmem:[#allocation15 + $0x1ac] sm:$0xf0]  ;;  %v7591_v60 = vor.u32 %v9230_v41, %v7588_v54  ;;  %v7548_v23 = vld [vmem:[#allocation15 + $0x2b0] sm:$0xf0]  ;;  %v7554_v48 = vld [vmem:[#allocation15 + $0x298] sm:$0xf] }
 0x3d9   : > { %2341 = vmatpush.bf16.msrb.mxu2 %v7679_v63  ;;  %2354 = vmatpush.bf16.msrb.mxu3 %v7683_v47  ;;  %v9226_v35 = vld [vmem:[#allocation15 + $0x2b4] sm:$0xf0]  ;;  %v7931_v58 = vor.u32 %v9193_v55, %v7930_v14  ;;  %v9222_v22 = vld [vmem:[#allocation15 + $0x29c] sm:$0xf]  ;;  %v9185_v39 = vld [vmem:[#allocation15 + $0x16c] sm:$0xf0]  ;;  %v7551_v62 = vor.u32 %v9221_v10, %v7548_v23 }
 0x3da   : > { %2704 = vmatpush.bf16.msra.mxu1 %v7787_v5  ;;  %v7556_v3 = vld [vmem:[#allocation15 + $0x2b8] sm:$0xf0]  ;;  %v7555_v63 = vor.u32 %v9226_v35, %v7554_v48  ;;  %v9213_v47 = vld [vmem:[#allocation15 + $0x254] sm:$0xf]  ;;  %v9218_v5 = vld [vmem:[#allocation15 + $0x274] sm:$0xf0] }
 0x3db   : > { %2367 = vmatpush.bf16.msra.mxu0 %v7687_v7  ;;  %v7559_v4 = vor.u32 %v9222_v22, %v7556_v3  ;;  %v7522_v7 = vld [vmem:[#allocation15 + $0x258] sm:$0xf]  ;;  %v9214_v2 = vld [vmem:[#allocation15 + $0x25c] sm:$0xf]  ;;  %v7866_v56 = vld [vmem:[#allocation15 + $0x110] sm:$0xf] }
 0x3dc   : > { %1672 = vperm.xlu2 %9744, %v1592_v0   ;;  %1667 = vperm.xlu0 %9745, %v1577_v59   ;;  %v7898_v59 = vld [vmem:[#allocation15 + $0x150] sm:$0xf]  ;;  %v7516_v0 = vld [vmem:[#allocation15 + $0x270] sm:$0xf0]  ;;  %v7524_v44 = vld [vmem:[#allocation15 + $0x278] sm:$0xf0]  ;;  %v7523_v17 = vor.u32 %v9218_v5, %v7522_v7 }
 0x3dd   : > { %2342 = vmatpush.bf16.msrb.mxu2 %v7647_v9  ;;  %2355 = vmatpush.bf16.msrb.mxu3 %v7651_v34  ;;  %v7899_v30 = vor.u32 %v9185_v39, %v7898_v59  ;;  %v9177_v43 = vld [vmem:[#allocation15 + $0x12c] sm:$0xf0]  ;;  %v7519_v40 = vor.u32 %v9213_v47, %v7516_v0  ;;  %v7527_v19 = vor.u32 %v9214_v2, %v7524_v44  ;;  %v9205_v9 = vld [vmem:[#allocation15 + $0x214] sm:$0xf]  ;;  %v7490_v38 = vld [vmem:[#allocation15 + $0x218] sm:$0xf] }
 0x3de   : > { %2705 = vmatpush.bf16.msra.mxu1 %v7755_v51  ;;  %v7867_v18 = vor.u32 %v9177_v43, %v7866_v56  ;;  %v7484_v34 = vld [vmem:[#allocation15 + $0x230] sm:$0xf0]  ;;  %v9210_v52 = vld [vmem:[#allocation15 + $0x234] sm:$0xf0]  ;;  %v7492_v51 = vld [vmem:[#allocation15 + $0x238] sm:$0xf0] }
 0x3df   : > { %2368 = vmatpush.bf16.msra.mxu0 %v7655_v53  ;;  %v9206_v53 = vld [vmem:[#allocation15 + $0x21c] sm:$0xf]  ;;  %v7487_v57 = vor.u32 %v9205_v9, %v7484_v34  ;;  %v7491_v20 = vor.u32 %v9210_v52, %v7490_v38  ;;  %v7948_v16 = vld [vmem:[#allocation15 + $0x1e0] sm:$0xf0]  ;;  %v9200_v6 = vld [vmem:[#allocation15 + $0x1e4] sm:$0xf0] }
 0x3e0   : > { %v7495_v24 = vor.u32 %v9206_v53, %v7492_v51  ;;  %v7951_v25 = vor.u32 %v9195_v21, %v7948_v16  ;;  %v9196_v27 = vld [vmem:[#allocation15 + $0x1cc] sm:$0xf]  ;;  %v7834_v15 = vld [vmem:[#allocation15 + $0xd0] sm:$0xf]  ;;  %v7916_v46 = vld [vmem:[#allocation15 + $0x1a0] sm:$0xf0] }
 0x3e1   : > { %2343 = vmatpush.bf16.msrb.mxu2 %v7615_v28  ;;  %2356 = vmatpush.bf16.msrb.mxu3 %v7619_v31  ;;  %v7955_v28 = vor.u32 %v9200_v6, %v7954_v1  ;;  %v7922_v36 = vld [vmem:[#allocation15 + $0x188] sm:$0xf]  ;;  %v7924_v41 = vld [vmem:[#allocation15 + $0x1a8] sm:$0xf0]  ;;  %v7802_v54 = vld [vmem:[#allocation15 + $0x90] sm:$0xf] }
 0x3e2   : > { %2706 = vmatpush.bf16.msra.mxu1 %v7723_v26  ;;  %v9192_v49 = vld [vmem:[#allocation15 + $0x1a4] sm:$0xf0]  ;;  %v9161_v14 = vld [vmem:[#allocation15 + $0xac] sm:$0xf0]  ;;  %v7884_v10 = vld [vmem:[#allocation15 + $0x160] sm:$0xf0] }
 0x3e3   : > { %2369 = vmatpush.bf16.msra.mxu0 %v7623_v61  ;;  %v9187_v61 = vld [vmem:[#allocation15 + $0x184] sm:$0xf]  ;;  %v7923_v55 = vor.u32 %v9192_v49, %v7922_v36  ;;  %v7803_v23 = vor.u32 %v9161_v14, %v7802_v54  ;;  %v9184_v48 = vld [vmem:[#allocation15 + $0x164] sm:$0xf0]  ;;  %v9180_v35 = vld [vmem:[#allocation15 + $0x14c] sm:$0xf] }
 0x3e4   : > { %1682 = vperm.xlu2 %9744, %v1608_v42   ;;  %1677 = vperm.xlu0 %9745, %v1593_v11   ;;  %v7956_v11 = vld [vmem:[#allocation15 + $0x1e8] sm:$0xf0]  ;;  %v9169_v42 = vld [vmem:[#allocation15 + $0xec] sm:$0xf0]  ;;  %v7919_v33 = vor.u32 %v9187_v61, %v7916_v46  ;;  %v7852_v47 = vld [vmem:[#allocation15 + $0x120] sm:$0xf0] }
 0x3e5   : > { %2344 = vmatpush.bf16.msrb.mxu2 %v7583_v12  ;;  %2357 = vmatpush.bf16.msrb.mxu3 %v7587_v50  ;;  %v7959_v31 = vor.u32 %v9196_v27, %v7956_v11  ;;  %v7835_v26 = vor.u32 %v9169_v42, %v7834_v15  ;;  %v9179_v50 = vld [vmem:[#allocation15 + $0x144] sm:$0xf]  ;;  %v7770_v22 = vld [vmem:[#allocation15 + $0x50] sm:$0xf]  ;;  %v9176_v0 = vld [vmem:[#allocation15 + $0x124] sm:$0xf0] }
 0x3e6   : > { %2751 = vmatpush.bf16.msrb.mxu1 %v7963_v37  ;;  %v9188_v37 = vld [vmem:[#allocation15 + $0x18c] sm:$0xf]  ;;  %v9153_v3 = vld [vmem:[#allocation15 + $0x6c] sm:$0xf0]  ;;  %v7887_v59 = vor.u32 %v9179_v50, %v7884_v10  ;;  %v9163_v43 = vld [vmem:[#allocation15 + $0xc4] sm:$0xf] }
 0x3e7   : > { %2370 = vmatpush.bf16.msra.mxu0 %v7591_v60  ;;  %2707 = vmatmul.bf16.vlgmr.msra.gmra.mxu1 %v11468_v8  ;;  %v7927_v12 = vor.u32 %v9188_v37, %v7924_v41  ;;  %v7890_v60 = vld [vmem:[#allocation15 + $0x148] sm:$0xf]  ;;  %v9172_v7 = vld [vmem:[#allocation15 + $0x10c] sm:$0xf]  ;;  %v9145_v2 = vld [vmem:[#allocation15 + $0x2c] sm:$0xf0] }
 0x3e8   : > { %v7891_v39 = vor.u32 %v9184_v48, %v7890_v60  ;;  %v7860_v5 = vld [vmem:[#allocation15 + $0x128] sm:$0xf0]  ;;  %v9155_v51 = vld [vmem:[#allocation15 + $0x84] sm:$0xf]  ;;  %v9160_v21 = vld [vmem:[#allocation15 + $0xa4] sm:$0xf0] }
 0x3e9   : > { %2345 = vmatpush.bf16.msrb.mxu2 %v7551_v62  ;;  %2358 = vmatpush.bf16.msrb.mxu3 %v7555_v63  ;;  %v9171_v63 = vld [vmem:[#allocation15 + $0x104] sm:$0xf]  ;;  %v7863_v56 = vor.u32 %v9172_v7, %v7860_v5  ;;  %v9164_v9 = vld [vmem:[#allocation15 + $0xcc] sm:$0xf]  ;;  %v9152_v15 = vld [vmem:[#allocation15 + $0x64] sm:$0xf0] }
 0x3ea   : > { %2752 = vmatpush.bf16.msrb.mxu1 %v7931_v58  ;;  %v7892_v58 = vld [vmem:[#allocation15 + $0x168] sm:$0xf0]  ;;  %v7855_v44 = vor.u32 %v9171_v63, %v7852_v47  ;;  %v9147_v27 = vld [vmem:[#allocation15 + $0x44] sm:$0xf]  ;;  %v7730_v37 = vld [vmem:[#allocation15 + $0x8] sm:$0xf] }
 0x3eb   : > { %2371 = vmatpush.bf16.msra.mxu0 %v7559_v4  ;;  %v7895_v62 = vor.u32 %v9180_v35, %v7892_v58  ;;  %v7771_v4 = vor.u32 %v9153_v3, %v7770_v22  ;;  %v7828_v34 = vld [vmem:[#allocation15 + $0xe8] sm:$0xf0]  ;;  %v7756_v11 = vld [vmem:[#allocation15 + $0x60] sm:$0xf0]  ;;  %v9197_v10 = vld [vmem:[#allocation15 + $0x1d4] sm:$0xf] }
 0x3ec   : > { %1687 = vperm.xlu0 %9745, %v1609_v29   ;;  %v7858_v29 = vld [vmem:[#allocation15 + $0x108] sm:$0xf]  ;;  %v7831_v53 = vor.u32 %v9164_v9, %v7828_v34  ;;  %v9156_v16 = vld [vmem:[#allocation15 + $0x8c] sm:$0xf]  ;;  %v9139_v36 = vld [vmem:[#allocation15 + $0x4] sm:$0xf] }
 0x3ed   : > { %2346 = vmatpush.bf16.msrb.mxu2 %v7519_v40  ;;  %2359 = vmatpush.bf16.msrb.mxu3 %v7523_v17  ;;  %v7820_v40 = vld [vmem:[#allocation15 + $0xe0] sm:$0xf0]  ;;  %v7826_v17 = vld [vmem:[#allocation15 + $0xc8] sm:$0xf]  ;;  %v7796_v1 = vld [vmem:[#allocation15 + $0xa8] sm:$0xf0] }
 0x3ee   : > { %2753 = vmatpush.bf16.msrb.mxu1 %v7899_v30  ;;  %v7738_v30 = vld [vmem:[#allocation15 + $0x10] sm:$0xf]  ;;  %v7823_v38 = vor.u32 %v9163_v43, %v7820_v40  ;;  %v7799_v6 = vor.u32 %v9156_v16, %v7796_v1  ;;  %v9148_v42 = vld [vmem:[#allocation15 + $0x4c] sm:$0xf]  ;;  %v7724_v49 = vld [vmem:[#allocation15 + $0x20] sm:$0xf0] }
 0x3ef   : > { %2372 = vmatpush.bf16.msra.mxu0 %v7527_v19  ;;  %v7739_v19 = vor.u32 %v9145_v2, %v7738_v30  ;;  %v7764_v61 = vld [vmem:[#allocation15 + $0x68] sm:$0xf0]  ;;  %v7727_v54 = vor.u32 %v9139_v36, %v7724_v49  ;;  %v7964_v60 = vld [vmem:[#allocation15 + $0x1f0] sm:$0xf0]  ;;  %v9202_v35 = vld [vmem:[#allocation15 + $0x1f4] sm:$0xf0] }
 0x3f0   : > { %v7767_v46 = vor.u32 %v9148_v42, %v7764_v61  ;;  %v9140_v14 = vld [vmem:[#allocation15 + $0xc] sm:$0xf]  ;;  %v7967_v48 = vor.u32 %v9197_v10, %v7964_v60  ;;  %v9198_v58 = vld [vmem:[#allocation15 + $0x1dc] sm:$0xf]  ;;  %v7938_v63 = vld [vmem:[#allocation15 + $0x198] sm:$0xf] }
 0x3f1   : > { %2347 = vmatpush.bf16.msrb.mxu2 %v7487_v57  ;;  %2360 = vmatpush.bf16.msrb.mxu3 %v7491_v20  ;;  %v7788_v57 = vld [vmem:[#allocation15 + $0xa0] sm:$0xf0]  ;;  %v7794_v20 = vld [vmem:[#allocation15 + $0x88] sm:$0xf]  ;;  %v7972_v22 = vld [vmem:[#allocation15 + $0x1f8] sm:$0xf0] }
 0x3f2   : > { %2754 = vmatpush.bf16.msrb.mxu1 %v7867_v18  ;;  %v9168_v18 = vld [vmem:[#allocation15 + $0xe4] sm:$0xf0]  ;;  %v9181_v30 = vld [vmem:[#allocation15 + $0x154] sm:$0xf]  ;;  %v9186_v40 = vld [vmem:[#allocation15 + $0x174] sm:$0xf0] }
 0x3f3   : > { %2373 = vmatpush.bf16.msra.mxu0 %v7495_v24  ;;  %v7827_v52 = vor.u32 %v9168_v18, %v7826_v17  ;;  %v7791_v24 = vor.u32 %v9155_v51, %v7788_v57  ;;  %v7900_v2 = vld [vmem:[#allocation15 + $0x170] sm:$0xf0]  ;;  %v9182_v17 = vld [vmem:[#allocation15 + $0x15c] sm:$0xf]  ;;  %v9178_v51 = vld [vmem:[#allocation15 + $0x134] sm:$0xf0] }
 0x3f4   : > { %2348 = vmatmul.bf16.vlgmr.msrb.gmra.mxu2 %v11015_v13  ;;  %2361 = vmatmul.bf16.vlgmr.msrb.gmra.mxu3 %v11015_v13  ;;  %v7903_v43 = vor.u32 %v9181_v30, %v7900_v2  ;;  %v9173_v34 = vld [vmem:[#allocation15 + $0x114] sm:$0xf]  ;;  %v9174_v57 = vld [vmem:[#allocation15 + $0x11c] sm:$0xf]  ;;  %v8202_v42 = vld [vmem:[#allocation15 + $0x5c0] sm:$0xf] }
 0x3f5   : > { %2712 = vmatpush.bf16.msra.mxu2 %v7951_v25  ;;  %2725 = vmatpush.bf16.msra.mxu3 %v7955_v28  ;;  %v7795_v25 = vor.u32 %v9160_v21, %v7794_v20  ;;  %v7762_v28 = vld [vmem:[#allocation15 + $0x48] sm:$0xf]  ;;  %v7876_v21 = vld [vmem:[#allocation15 + $0x138] sm:$0xf0]  ;;  %v9165_v16 = vld [vmem:[#allocation15 + $0xd4] sm:$0xf] }
 0x3f6   : > { %2755 = vmatpush.bf16.msrb.mxu1 %v7835_v26  ;;  %2374 = vmatmul.bf16.vlgmr.msra.gmra.mxu0 %v11015_v13  ;;  %v7859_v13 = vor.u32 %v9176_v0, %v7858_v29  ;;  %v7763_v26 = vor.u32 %v9152_v15, %v7762_v28  ;;  %v9194_v29 = vld [vmem:[#allocation15 + $0x1b4] sm:$0xf0]  ;;  %v7940_v0 = vld [vmem:[#allocation15 + $0x1b8] sm:$0xf0]  ;;  %v7836_v1 = vld [vmem:[#allocation15 + $0xf0] sm:$0xf0] }
 0x3f7   : > { %2738 = vmatpush.bf16.msrb.mxu0 %v7959_v31  ;;  %v7759_v31 = vor.u32 %v9147_v27, %v7756_v11  ;;  %v7939_v7 = vor.u32 %v9194_v29, %v7938_v63  ;;  %v7842_v27 = vld [vmem:[#allocation15 + $0xd8] sm:$0xf]  ;;  %v9166_v28 = vld [vmem:[#allocation15 + $0xdc] sm:$0xf]  ;;  %v9157_v49 = vld [vmem:[#allocation15 + $0x94] sm:$0xf] }
 0x3f8   : > { %v9170_v11 = vld [vmem:[#allocation15 + $0xf4] sm:$0xf0]  ;;  %v7844_v15 = vld [vmem:[#allocation15 + $0xf8] sm:$0xf0]  ;;  %v9311_v30 = vld [vmem:[#allocation15 + $0x55c] sm:$0xf0] }
 0x3f9   : > { %2713 = vmatpush.bf16.msra.mxu2 %v7919_v33  ;;  %2726 = vmatpush.bf16.msra.mxu3 %v7923_v55  ;;  %v9144_v33 = vld [vmem:[#allocation15 + $0x24] sm:$0xf0]  ;;  %v7732_v55 = vld [vmem:[#allocation15 + $0x28] sm:$0xf0]  ;;  %v7812_v60 = vld [vmem:[#allocation15 + $0xb8] sm:$0xf0] }
 0x3fa   : > { %2756 = vmatpush.bf16.msrb.mxu1 %v7803_v23  ;;  %v7735_v50 = vor.u32 %v9140_v14, %v7732_v55  ;;  %v7970_v23 = vld [vmem:[#allocation15 + $0x1d8] sm:$0xf]  ;;  %v1022_v63 = vld [vmem:[%s10936_s19 + $0x20] sm:$0xff] }
 0x3fb   : > { %2739 = vmatpush.bf16.msrb.mxu0 %v7927_v12  ;;  %v7731_v12 = vor.u32 %v9144_v33, %v7730_v37  ;;  %v7971_v3 = vor.u32 %v9202_v35, %v7970_v23  ;;  %v7804_v37 = vld [vmem:[#allocation15 + $0xb0] sm:$0xf0]  ;;  %v7810_v14 = vld [vmem:[#allocation15 + $0x98] sm:$0xf]  ;;  %v8170_v23 = vld [vmem:[#allocation15 + $0x580] sm:$0xf] }
 0x3fc   : > { %v7807_v33 = vor.u32 %v9157_v49, %v7804_v37  ;;  %v9162_v55 = vld [vmem:[#allocation15 + $0xb4] sm:$0xf0]  ;;  %v1019_v35 = vld [vmem:[%s10936_s19 + $0x8] sm:$0xff]  ;;  %v9150_v29 = vld [vmem:[#allocation15 + $0x5c] sm:$0xf] }
 0x3fd   : > { %2714 = vmatpush.bf16.msra.mxu2 %v7887_v59  ;;  %2727 = vmatpush.bf16.msra.mxu3 %v7891_v39  ;;  %v7975_v59 = vor.u32 %v9198_v58, %v7972_v22  ;;  %v9189_v39 = vld [vmem:[#allocation15 + $0x194] sm:$0xf]  ;;  %v7811_v10 = vor.u32 %v9162_v55, %v7810_v14  ;;  %v9328_v49 = vld [vmem:[#allocation15 + $0x5e4] sm:$0xf0]  ;;  %v9324_v37 = vld [vmem:[#allocation15 + $0x5cc] sm:$0xf] }
 0x3fe   : > { %2757 = vmatpush.bf16.msrb.mxu1 %v7771_v4  ;;  %v9190_v4 = vld [vmem:[#allocation15 + $0x19c] sm:$0xf]  ;;  %v8212_v14 = vld [vmem:[#allocation15 + $0x5e8] sm:$0xf0]  ;;  %v8074_v55 = vld [vmem:[#allocation15 + $0x4c0] sm:$0xf] }
 0x3ff   : > { %2740 = vmatpush.bf16.msrb.mxu0 %v7895_v62  ;;  %v7932_v62 = vld [vmem:[#allocation15 + $0x1b0] sm:$0xf0]  ;;  %v7943_v5 = vor.u32 %v9190_v4, %v7940_v0 }
 0x400   : > { %v7935_v47 = vor.u32 %v9189_v39, %v7932_v62  ;;  %v7772_v39 = vld [vmem:[#allocation15 + $0x70] sm:$0xf0]  ;;  %v7778_v62 = vld [vmem:[#allocation15 + $0x58] sm:$0xf] }
 0x401   : > { %2715 = vmatpush.bf16.msra.mxu2 %v7855_v44  ;;  %2728 = vmatpush.bf16.msra.mxu3 %v7859_v13  ;;  %v7906_v44 = vld [vmem:[#allocation15 + $0x158] sm:$0xf] }
 0x402   : > { %2758 = vmatpush.bf16.msrb.mxu1 %v7739_v19  ;;  %v7908_v19 = vld [vmem:[#allocation15 + $0x178] sm:$0xf0]  ;;  %v7907_v18 = vor.u32 %v9186_v40, %v7906_v44  ;;  %v1023_v44 = vld [vmem:[%s10936_s19 + $0x28] sm:$0xff] }
 0x403   : > { %2741 = vmatpush.bf16.msrb.mxu0 %v7863_v56  ;;  %v7911_v9 = vor.u32 %v9182_v17, %v7908_v19  ;;  %v1021_v2 = vld [vmem:[%s10936_s19 + $0x18] sm:$0xff] }
 0x404   : > { %v1025_v19 = vld [vmem:[%s10936_s19 + $0x38] sm:$0xff] }
 0x405   : > { %2716 = vmatpush.bf16.msra.mxu2 %v7823_v38  ;;  %2729 = vmatpush.bf16.msra.mxu3 %v7827_v52  ;;  %v7868_v38 = vld [vmem:[#allocation15 + $0x130] sm:$0xf0] }
 0x406   : > { %2759 = vmatmul.bf16.vlgmr.msrb.gmra.mxu1 %v11468_v8  ;;  %v7871_v52 = vor.u32 %v9173_v34, %v7868_v38 }
 0x407   : > { %2742 = vmatpush.bf16.msrb.mxu0 %v7831_v53  ;;  %v7874_v53 = vld [vmem:[#allocation15 + $0x118] sm:$0xf] }
 0x408   : > { %v7875_v20 = vor.u32 %v9178_v51, %v7874_v53  ;;  %v9141_v53 = vld [vmem:[#allocation15 + $0x14] sm:$0xf] }
 0x409   : > { %2717 = vmatpush.bf16.msra.mxu2 %v7791_v24  ;;  %2730 = vmatpush.bf16.msra.mxu3 %v7795_v25  ;;  %v7879_v25 = vor.u32 %v9174_v57, %v7876_v21  ;;  %v7740_v51 = vld [vmem:[#allocation15 + $0x30] sm:$0xf0] }
 0x40a   : > { %v7743_v21 = vor.u32 %v9141_v53, %v7740_v51  ;;  %v9312_v51 = vld [vmem:[#allocation15 + $0x564] sm:$0xf0] }
 0x40b   : > { %2743 = vmatpush.bf16.msrb.mxu0 %v7799_v6  ;;  %v7839_v6 = vor.u32 %v9165_v16, %v7836_v1  ;;  %v9146_v16 = vld [vmem:[#allocation15 + $0x34] sm:$0xf0]  ;;  %v9142_v1 = vld [vmem:[#allocation15 + $0x1c] sm:$0xf] }
 0x40d   : > { %2718 = vmatpush.bf16.msra.mxu2 %v7759_v31  ;;  %2731 = vmatpush.bf16.msra.mxu3 %v7763_v26  ;;  %v7843_v31 = vor.u32 %v9170_v11, %v7842_v27  ;;  %v7847_v26 = vor.u32 %v9166_v28, %v7844_v15  ;;  %v8106_v27 = vld [vmem:[#allocation15 + $0x500] sm:$0xf] }
 0x40e   : > { %v11476_v41 = vpop.permute.xlu2 %1617  ;;  %v9303_v11 = vld [vmem:[#allocation15 + $0x51c] sm:$0xf0] }
 0x40f   : > { %2744 = vmatpush.bf16.msrb.mxu0 %v7767_v46  ;;  %v9327_v46 = vld [vmem:[#allocation15 + $0x5dc] sm:$0xf0]  ;;  %v1691_v38 = vmul.f32 %v11476_v41, %v1019_v35 }
 0x410   : > { %v8203_v36 = vor.u32 %v9327_v46, %v8202_v42  ;;  %v8107_v42 = vor.u32 %v9303_v11, %v8106_v27  ;;  %v1028_v27 = vld [vmem:[%s10936_s19 + $0x50] sm:$0xff] }
 0x411   : > { %2719 = vmatpush.bf16.msra.mxu2 %v7727_v54  ;;  %2732 = vmatpush.bf16.msra.mxu3 %v7731_v12  ;;  %v1018_v54 = vld [vmem:[%s10936_s19] sm:$0xff] }
 0x412   : > { %3156 = vmatpush.bf16.msra.mxu1 %v8203_v36  ;;  %v9158_v12 = vld [vmem:[#allocation15 + $0x9c] sm:$0xf] }
 0x413   : > { %2745 = vmatpush.bf16.msrb.mxu0 %v7735_v50  ;;  %v1020_v50 = vld [vmem:[%s10936_s19 + $0x10] sm:$0xff]  ;;  %v7815_v22 = vor.u32 %v9158_v12, %v7812_v60  ;;  %v9295_v12 = vld [vmem:[#allocation15 + $0x4dc] sm:$0xf0]  ;;  %v8215_v60 = vor.u32 %v9324_v37, %v8212_v14 }
 0x414   : > { %2720 = vmatmul.bf16.vlgmr.msra.gmra.mxu2 %v11468_v8  ;;  %2733 = vmatmul.bf16.vlgmr.msra.gmra.mxu3 %v11468_v8  ;;  %v8116_v14 = vld [vmem:[#allocation15 + $0x528] sm:$0xf0] }
 0x415   : > { %2764 = vmatpush.bf16.msrb.mxu2 %v7967_v48  ;;  %2777 = vmatpush.bf16.msrb.mxu3 %v7971_v3  ;;  %v9319_v48 = vld [vmem:[#allocation15 + $0x59c] sm:$0xf0] }
 0x416   : > { %2746 = vmatmul.bf16.vlgmr.msrb.gmra.mxu0 %v11468_v8  ;;  %v11481_v13 = vpop.permute.xlu2 %1627  ;;  %v8171_v3 = vor.u32 %v9319_v48, %v8170_v23  ;;  %v1027_v23 = vld [vmem:[%s10936_s19 + $0x48] sm:$0xff] }
 0x417   : > { %2790 = vmatpush.bf16.msra.mxu0 %v7975_v59  ;;  %v9149_v59 = vld [vmem:[#allocation15 + $0x54] sm:$0xf]  ;;  %v1693_v57 = vmul.f32 %v11481_v13, %v1021_v2  ;;  %v8204_v13 = vld [vmem:[#allocation15 + $0x5e0] sm:$0xf0]  ;;  %v9287_v2 = vld [vmem:[#allocation15 + $0x49c] sm:$0xf0] }
 0x418   : > { %3157 = vmatpush.bf16.msra.mxu1 %v8171_v3  ;;  %v7775_v4 = vor.u32 %v9149_v59, %v7772_v39  ;;  %v1026_v3 = vld [vmem:[%s10936_s19 + $0x40] sm:$0xff] }
 0x419   : > { %2765 = vmatpush.bf16.msrb.mxu2 %v7935_v47  ;;  %2778 = vmatpush.bf16.msrb.mxu3 %v7939_v7  ;;  %v9154_v47 = vld [vmem:[#allocation15 + $0x74] sm:$0xf0]  ;;  %v7780_v7 = vld [vmem:[#allocation15 + $0x78] sm:$0xf0]  ;;  %v9315_v59 = vld [vmem:[#allocation15 + $0x584] sm:$0xf] }
 0x41a   : > { %v7779_v0 = vor.u32 %v9154_v47, %v7778_v62  ;;  %v7783_v40 = vor.u32 %v9150_v29, %v7780_v7  ;;  %v8172_v39 = vld [vmem:[#allocation15 + $0x5a0] sm:$0xf0]  ;;  %v8178_v47 = vld [vmem:[#allocation15 + $0x588] sm:$0xf] }
 0x41b   : > { %2791 = vmatpush.bf16.msra.mxu0 %v7943_v5  ;;  %v8138_v5 = vld [vmem:[#allocation15 + $0x540] sm:$0xf]  ;;  %v9320_v29 = vld [vmem:[#allocation15 + $0x5a4] sm:$0xf0] }
 0x41c   : > { %v8139_v34 = vor.u32 %v9311_v30, %v8138_v5  ;;  %v8179_v7 = vor.u32 %v9320_v29, %v8178_v47  ;;  %v8180_v5 = vld [vmem:[#allocation15 + $0x5a8] sm:$0xf0]  ;;  %v8042_v30 = vld [vmem:[#allocation15 + $0x480] sm:$0xf] }
 0x41d   : > { %2766 = vmatpush.bf16.msrb.mxu2 %v7903_v43  ;;  %2779 = vmatpush.bf16.msrb.mxu3 %v7907_v18  ;;  %v9292_v47 = vld [vmem:[#allocation15 + $0x4cc] sm:$0xf] }
 0x41e   : > { %v1638_v61 = vpop.permute.xlu2 %1637  ;;  %3158 = vmatpush.bf16.msra.mxu1 %v8139_v34  ;;  %v8146_v34 = vld [vmem:[#allocation15 + $0x548] sm:$0xf] }
 0x41f   : > { %2792 = vmatpush.bf16.msra.mxu0 %v7911_v9 }
 0x421   : > { %2767 = vmatpush.bf16.msrb.mxu2 %v7871_v52  ;;  %2780 = vmatpush.bf16.msrb.mxu3 %v7875_v20  ;;  %v1024_v52 = vld [vmem:[%s10936_s19 + $0x30] sm:$0xff]  ;;  %v1695_v20 = vmul.f32 %v1638_v61, %v1023_v44  ;;  %v8210_v61 = vld [vmem:[#allocation15 + $0x5c8] sm:$0xf] }
 0x422   : > { %3159 = vmatpush.bf16.msra.mxu1 %v8107_v42 }
 0x423   : > { %2793 = vmatpush.bf16.msra.mxu0 %v7879_v25 }
 0x425   : > { %2768 = vmatpush.bf16.msrb.mxu2 %v7839_v6  ;;  %2781 = vmatpush.bf16.msrb.mxu3 %v7843_v31  ;;  %v7748_v6 = vld [vmem:[#allocation15 + $0x38] sm:$0xf0] }
 0x426   : > { %v11483_v56 = vpop.permute.xlu0 %1612  ;;  %v1648_v17 = vpop.permute.xlu2 %1647  ;;  %v7751_v15 = vor.u32 %v9142_v1, %v7748_v6 }
 0x427   : > { %2794 = vmatpush.bf16.msra.mxu0 %v7847_v26  ;;  %v1690_v43 = vmul.f32 %v11483_v56, %v1018_v54  ;;  %v7746_v56 = vld [vmem:[#allocation15 + $0x18] sm:$0xf]  ;;  %v9323_v26 = vld [vmem:[#allocation15 + $0x5c4] sm:$0xf]  ;;  %v1697_v46 = vmul.f32 %v1648_v17, %v1025_v19  ;;  %v8043_v19 = vor.u32 %v9287_v2, %v8042_v30 }
 0x428   : > { %v8207_v54 = vor.u32 %v9323_v26, %v8204_v13  ;;  %v9299_v26 = vld [vmem:[#allocation15 + $0x504] sm:$0xf] }
 0x429   : > { %2769 = vmatpush.bf16.msrb.mxu2 %v7807_v33  ;;  %2782 = vmatpush.bf16.msrb.mxu3 %v7811_v10  ;;  %v1706_v25 = vadd.f32 %v1691_v38, %v1690_v43  ;;  %v8211_v33 = vor.u32 %v9328_v49, %v8210_v61  ;;  %v1663_v6 = vpop.permute.xlu1 %1662  ;;  %v8108_v13 = vld [vmem:[#allocation15 + $0x520] sm:$0xf0]  ;;  %v9300_v49 = vld [vmem:[#allocation15 + $0x50c] sm:$0xf] }
 0x42a   : > { %v8111_v61 = vor.u32 %v9299_v26, %v8108_v13  ;;  %v1700_v37 = vmul.f32 %v1663_v6, %v1028_v27  ;;  %v8186_v27 = vld [vmem:[#allocation15 + $0x590] sm:$0xf]  ;;  %v8012_v26 = vld [vmem:[#allocation15 + $0x460] sm:$0xf0]  ;;  %v8018_v13 = vld [vmem:[#allocation15 + $0x448] sm:$0xf] }
 0x42b   : > { %2795 = vmatpush.bf16.msra.mxu0 %v7815_v22 }
 0x42d   : > { %2770 = vmatpush.bf16.msrb.mxu2 %v7775_v4  ;;  %2783 = vmatpush.bf16.msrb.mxu3 %v7779_v0  ;;  %v9316_v4 = vld [vmem:[#allocation15 + $0x58c] sm:$0xf] }
 0x42e   : > { %v1623_v24 = vpop.permute.xlu0 %1622  ;;  %v1658_v62 = vpop.permute.xlu2 %1657  ;;  %v8183_v17 = vor.u32 %v9316_v4, %v8180_v5  ;;  %v8084_v4 = vld [vmem:[#allocation15 + $0x4e8] sm:$0xf0] }
 0x42f   : > { %v1692_v18 = vmul.f32 %v1623_v24, %v1020_v50  ;;  %2796 = vmatpush.bf16.msra.mxu0 %v7783_v40  ;;  %v7747_v24 = vor.u32 %v9146_v16, %v7746_v56  ;;  %v1707_v50 = vrot.slane %v1706_v25, 4  ;;  %v1699_v38 = vmul.f32 %v1658_v62, %v1027_v23  ;;  %v8010_v56 = vld [vmem:[#allocation15 + $0x440] sm:$0xf] }
 0x430   : > { %v9279_v16 = vld [vmem:[#allocation15 + $0x45c] sm:$0xf0]  ;;  %v8119_v23 = vor.u32 %v9300_v49, %v8116_v14  ;;  %v8087_v2 = vor.u32 %v9292_v47, %v8084_v4  ;;  %v8020_v49 = vld [vmem:[#allocation15 + $0x468] sm:$0xf0] }
 0x431   : > { %v1713_v28 = vadd.f32 %v1693_v57, %v1692_v18  ;;  %2771 = vmatpush.bf16.msrb.mxu2 %v7743_v21  ;;  %2784 = vmatpush.bf16.msrb.mxu3 %v7747_v24  ;;  %v1708_v0 = vadd.f32 %v1707_v50, %v1706_v25  ;;  %v9307_v18 = vld [vmem:[#allocation15 + $0x544] sm:$0xf]  ;;  %v9308_v57 = vld [vmem:[#allocation15 + $0x54c] sm:$0xf] }
 0x432   : > { %v8148_v21 = vld [vmem:[#allocation15 + $0x568] sm:$0xf0] }
 0x433   : > { %2797 = vmatpush.bf16.msra.mxu0 %v7751_v15  ;;  %v1714_v48 = vrot.slane %v1713_v28, 4  ;;  %v1709_v1 = vrot.slane %v1708_v0, 2  ;;  %v8151_v24 = vor.u32 %v9308_v57, %v8148_v21  ;;  %v9288_v21 = vld [vmem:[#allocation15 + $0x4a4] sm:$0xf0]  ;;  %v9268_v4 = vld [vmem:[#allocation15 + $0x40c] sm:$0xf] }
 0x434   : > { %2772 = vmatmul.bf16.vlgmr.msrb.gmra.mxu2 %v11468_v8  ;;  %2785 = vmatmul.bf16.vlgmr.msrb.gmra.mxu3 %v11468_v8 }
 0x435   : > { %3169 = vmatpush.bf16.msra.mxu2 %v8207_v54  ;;  %3182 = vmatpush.bf16.msra.mxu3 %v8211_v33  ;;  %v1715_v44 = vadd.f32 %v1714_v48, %v1713_v28  ;;  %v11503_v54 = vadd.f32 %v1709_v1, %v1708_v0  ;;  %v8218_v0 = vld [vmem:[#allocation15 + $0x5d0] sm:$0xf] }
 0x436   : > { %v1633_v58 = vpop.permute.xlu0 %1632  ;;  %2798 = vmatmul.bf16.vlgmr.msra.gmra.mxu0 %v11468_v8  ;;  %v1673_v5 = vpop.permute.xlu2 %1672 }
 0x437   : > { %v1694_v9 = vmul.f32 %v1633_v58, %v1022_v63  ;;  %v8075_v58 = vor.u32 %v9295_v12, %v8074_v55  ;;  %3195 = vmatpush.bf16.msrb.mxu0 %v8215_v60  ;;  %v8175_v63 = vor.u32 %v9315_v59, %v8172_v39  ;;  %v1716_v11 = vrot.slane %v1715_v44, 2  ;;  %v7978_v55 = vld [vmem:[#allocation15 + $0x400] sm:$0xf] }
 0x438   : > { %v9271_v12 = vld [vmem:[#allocation15 + $0x41c] sm:$0xf0] }
 0x439   : > { %v1720_v41 = vadd.f32 %v1695_v20, %v1694_v9  ;;  %3160 = vmatpush.bf16.msra.mxu1 %v8075_v58  ;;  %3170 = vmatpush.bf16.msra.mxu2 %v8175_v63  ;;  %v8140_v9 = vld [vmem:[#allocation15 + $0x560] sm:$0xf0]  ;;  %v8147_v20 = vor.u32 %v9312_v51, %v8146_v34  ;;  %v11505_v50 = vadd.f32 %v1716_v11, %v1715_v44  ;;  %v9296_v63 = vld [vmem:[#allocation15 + $0x4e4] sm:$0xf0]  ;;  %v1711_v44 = vrot.slane %v11503_v54, 1  ;;  %v11517_v51 = vpop.f32.mrf.mxu1 }
 0x43a   : > { %3183 = vmatpush.bf16.msra.mxu3 %v8179_v7  ;;  %v8143_v8 = vor.u32 %v9307_v18, %v8140_v9  ;;  %v7979_v48 = vor.u32 %v9271_v12, %v7978_v55  ;;  %v8076_v58 = vld [vmem:[#allocation15 + $0x4e0] sm:$0xf0]  ;;  %v9329_v7 = vld [vmem:[#allocation15 + $0x5ec] sm:$0xf0] }
 0x43b   : > { %v1721_v35 = vrot.slane %v1720_v41, 4  ;;  %3196 = vmatpush.bf16.msrb.mxu0 %v8183_v17  ;;  %v1030_v17 = vld [vmem:[%s10936_s19 + $0x60] sm:$0xff]  ;;  %v9321_v11 = vld [vmem:[#allocation15 + $0x5ac] sm:$0xf0] }
 0x43c   : > { %v1702_v1 = vmul.f32 %v1673_v5, %v1030_v17  ;;  %v8154_v55 = vld [vmem:[#allocation15 + $0x550] sm:$0xf] }
 0x43d   : > { %v1722_v43 = vadd.f32 %v1721_v35, %v1720_v41  ;;  %3161 = vmatpush.bf16.msra.mxu1 %v8043_v19  ;;  %v1029_v41 = vld [vmem:[%s10936_s19 + $0x58] sm:$0xff]  ;;  %3171 = vmatpush.bf16.msra.mxu2 %v8143_v8  ;;  %v9291_v35 = vld [vmem:[#allocation15 + $0x4c4] sm:$0xf]  ;;  %v8050_v8 = vld [vmem:[#allocation15 + $0x488] sm:$0xf] }
 0x43e   : > { %v1643_v31 = vpop.permute.xlu0 %1642  ;;  %3184 = vmatpush.bf16.msra.mxu3 %v8147_v20  ;;  %v8079_v62 = vor.u32 %v9291_v35, %v8076_v58  ;;  %v9313_v12 = vld [vmem:[#allocation15 + $0x56c] sm:$0xf0]  ;;  %v7980_v58 = vld [vmem:[#allocation15 + $0x420] sm:$0xf0] }
 0x43f   : > { %v1696_v36 = vmul.f32 %v1643_v31, %v1024_v52  ;;  %v1723_v28 = vrot.slane %v1722_v43, 2  ;;  %v8011_v31 = vor.u32 %v9279_v16, %v8010_v56  ;;  %3197 = vmatpush.bf16.msrb.mxu0 %v8151_v24  ;;  %v9284_v56 = vld [vmem:[#allocation15 + $0x48c] sm:$0xf]  ;;  %v8051_v24 = vor.u32 %v9288_v21, %v8050_v8 }
 0x440   : > { %v8052_v16 = vld [vmem:[#allocation15 + $0x4a8] sm:$0xf0]  ;;  %v8155_v35 = vor.u32 %v9313_v12, %v8154_v55  ;;  %v11529_v8 = vadd.f32 %v1711_v44, %v11503_v54 }
 0x441   : > { %v1727_v10 = vadd.f32 %v1697_v46, %v1696_v36  ;;  %3162 = vmatpush.bf16.msra.mxu1 %v8011_v31  ;;  %v8114_v46 = vld [vmem:[#allocation15 + $0x508] sm:$0xf]  ;;  %3172 = vmatpush.bf16.msra.mxu2 %v8111_v61  ;;  %v8055_v6 = vor.u32 %v9284_v56, %v8052_v16  ;;  %v2286_v17 = vpop.f32.mrf.mxu1  ;;  %v9326_v16 = vld [vmem:[#allocation15 + $0x5dc] sm:$0xf] }
 0x442   : > { %v9304_v36 = vld [vmem:[#allocation15 + $0x524] sm:$0xf0]  ;;  %v2803_v55 = vpack.c.bf16 %v11529_v8, %v11529_v8 }
 0x443   : > { %v1728_v22 = vrot.slane %v1727_v10, 4  ;;  %v8115_v33 = vor.u32 %v9304_v36, %v8114_v46  ;;  %3198 = vmatpush.bf16.msrb.mxu0 %v8119_v23  ;;  %v9280_v46 = vld [vmem:[#allocation15 + $0x464] sm:$0xf0]  ;;  %v9276_v36 = vld [vmem:[#allocation15 + $0x44c] sm:$0xf]  ;;  %v1033_v23 = vld [vmem:[%s10936_s19 + $0x78] sm:$0xff] }
 0x444   : > { %v8019_v14 = vor.u32 %v9280_v46, %v8018_v13  ;;  %v9322_v13 = vld [vmem:[#allocation15 + $0x5b4] sm:$0xf0] }
 0x445   : > { %v1729_v52 = vadd.f32 %v1728_v22, %v1727_v10  ;;  %v11507_v10 = vadd.f32 %v1723_v28, %v1722_v43  ;;  %v8082_v22 = vld [vmem:[#allocation15 + $0x4c8] sm:$0xf]  ;;  %3185 = vmatpush.bf16.msra.mxu3 %v8115_v33  ;;  %3163 = vmatpush.bf16.msra.mxu1 %v7979_v48  ;;  %v1718_v43 = vrot.slane %v11505_v50, 1  ;;  %v9275_v28 = vld [vmem:[#allocation15 + $0x444] sm:$0xf]  ;;  %v8023_v48 = vor.u32 %v9276_v36, %v8020_v49 }
 0x446   : > { %v1653_v40 = vpop.permute.xlu0 %1652  ;;  %v8083_v29 = vor.u32 %v9296_v63, %v8082_v22  ;;  %3173 = vmatpush.bf16.msra.mxu2 %v8079_v62  ;;  %v8015_v61 = vor.u32 %v9275_v28, %v8012_v26  ;;  %v7986_v22 = vld [vmem:[#allocation15 + $0x408] sm:$0xf]  ;;  %v9297_v28 = vld [vmem:[#allocation15 + $0x4ec] sm:$0xf0]  ;;  %v8194_v26 = vld [vmem:[#allocation15 + $0x598] sm:$0xf] }
 0x447   : > { %v1698_v53 = vmul.f32 %v1653_v40, %v1026_v3  ;;  %v1730_v15 = vrot.slane %v1729_v52, 2  ;;  %v8219_v40 = vor.u32 %v9329_v7, %v8218_v0  ;;  %v1725_v19 = vrot.slane %v11507_v10, 1  ;;  %3199 = vmatpush.bf16.msrb.mxu0 %v8087_v2  ;;  %v7988_v0 = vld [vmem:[#allocation15 + $0x428] sm:$0xf0]  ;;  %v9305_v2 = vld [vmem:[#allocation15 + $0x52c] sm:$0xf0] }
 0x448   : > { %v7991_v5 = vor.u32 %v9268_v4, %v7988_v0  ;;  %v1719_v54 = vadd.f32 %v1718_v43, %v11505_v50  ;;  %v9318_v49 = vld [vmem:[#allocation15 + $0x59c] sm:$0xf]  ;;  %v8195_v50 = vor.u32 %v9322_v13, %v8194_v26 }
 0x449   : > { %v1734_v25 = vadd.f32 %v1699_v38, %v1698_v53  ;;  %v11509_v3 = vadd.f32 %v1730_v15, %v1729_v52  ;;  %v1031_v38 = vld [vmem:[%s10936_s19 + $0x68] sm:$0xff]  ;;  %3186 = vmatpush.bf16.msra.mxu3 %v8083_v29  ;;  %3208 = vmatpush.bf16.msrb.mxu1 %v8219_v40  ;;  %v9325_v40 = vld [vmem:[#allocation15 + $0x5d4] sm:$0xf]  ;;  %v11538_v44 = vadd.f32 %v1725_v19, %v11507_v10  ;;  %v9289_v10 = vld [vmem:[#allocation15 + $0x4ac] sm:$0xf0]  ;;  %v11551_v4 = vpop.f32.mrf.mxu1 }
 0x44a   : > { %v9283_v52 = vld [vmem:[#allocation15 + $0x484] sm:$0xf]  ;;  %v9309_v19 = vld [vmem:[#allocation15 + $0x554] sm:$0xf]  ;;  %v9294_v26 = vld [vmem:[#allocation15 + $0x4dc] sm:$0xf] }
 0x44b   : > { %v1735_v42 = vrot.slane %v1734_v25, 4  ;;  %v1732_v18 = vrot.slane %v11509_v3, 1  ;;  %v8044_v53 = vld [vmem:[#allocation15 + $0x4a0] sm:$0xf0]  ;;  %3200 = vmatpush.bf16.msrb.mxu0 %v8055_v6  ;;  %v8100_v13 = vld [vmem:[#allocation15 + $0x4f8] sm:$0xf0] }
 0x44c   : > { %v8047_v20 = vor.u32 %v9283_v52, %v8044_v53  ;;  %v8226_v52 = vld [vmem:[#allocation15 + $0x5d8] sm:$0xf] }
 0x44d   : > { %v1736_v59 = vadd.f32 %v1735_v42, %v1734_v25  ;;  %v8187_v42 = vor.u32 %v9321_v11, %v8186_v27  ;;  %3187 = vmatpush.bf16.msra.mxu3 %v8051_v24  ;;  %v9330_v53 = vld [vmem:[#allocation15 + $0x5f4] sm:$0xf0]  ;;  %v1733_v12 = vadd.f32 %v1732_v18, %v11509_v3 }
 0x44e   : > { %v1668_v60 = vpop.permute.xlu0 %1667  ;;  %3174 = vmatpush.bf16.msra.mxu2 %v8047_v20  ;;  %v8227_v56 = vor.u32 %v9330_v53, %v8226_v52  ;;  %v8132_v52 = vld [vmem:[#allocation15 + $0x538] sm:$0xf0] }
 0x44f   : > { %v1701_v39 = vmul.f32 %v1668_v60, %v1029_v41  ;;  %v1737_v9 = vrot.slane %v1736_v59, 2  ;;  %3209 = vmatpush.bf16.msrb.mxu1 %v8187_v42  ;;  %v9267_v60 = vld [vmem:[#allocation15 + $0x404] sm:$0xf]  ;;  %3201 = vmatpush.bf16.msrb.mxu0 %v8023_v48  ;;  %v8188_v42 = vld [vmem:[#allocation15 + $0x5b0] sm:$0xf0] }
 0x450   : > { %v7983_v29 = vor.u32 %v9267_v60, %v7980_v58  ;;  %v8162_v48 = vld [vmem:[#allocation15 + $0x558] sm:$0xf]  ;;  %v2804_v58 = vpack.c.bf16 %v1719_v54, %v1719_v54 }
 0x451   : > { %v1741_v30 = vadd.f32 %v1701_v39, %v1700_v37  ;;  %v11519_v41 = vadd.f32 %v1737_v9, %v1736_v59  ;;  %v1032_v37 = vld [vmem:[%s10936_s19 + $0x70] sm:$0xff]  ;;  %v9272_v59 = vld [vmem:[#allocation15 + $0x424] sm:$0xf0]  ;;  %v1683_v39 = vpop.permute.xlu2 %1682  ;;  %3188 = vmatpush.bf16.msra.mxu3 %v8019_v14  ;;  %v8098_v54 = vld [vmem:[#allocation15 + $0x4d8] sm:$0xf] }
 0x452   : > { %3175 = vmatpush.bf16.msra.mxu2 %v8015_v61  ;;  %v7987_v7 = vor.u32 %v9272_v59, %v7986_v22  ;;  %v8156_v14 = vld [vmem:[#allocation15 + $0x570] sm:$0xf0]  ;;  %v2805_v22 = vpack.c.bf16 %v11538_v44, %v11538_v44  ;;  %v2820_v53 = vunpack.c.l.b16 %v2804_v58  ;;  %v9298_v44 = vld [vmem:[#allocation15 + $0x4f4] sm:$0xf0] }
 0x453   : > { %v1742_v34 = vrot.slane %v1741_v30, 4  ;;  %v1739_v62 = vrot.slane %v11519_v41, 1  ;;  %3210 = vmatpush.bf16.msrb.mxu1 %v8155_v35  ;;  %3202 = vmatpush.bf16.msrb.mxu0 %v7991_v5  ;;  %v9314_v35 = vld [vmem:[#allocation15 + $0x574] sm:$0xf0]  ;;  %v8159_v18 = vor.u32 %v9309_v19, %v8156_v14  ;;  %v9281_v5 = vld [vmem:[#allocation15 + $0x46c] sm:$0xf0]  ;;  %v8099_v19 = vor.u32 %v9298_v44, %v8098_v54 }
 0x454   : > { %v8103_v14 = vor.u32 %v9294_v26, %v8100_v13  ;;  %v9334_v26 = vld [vmem:[#allocation12 + $0x58] sm:$0xff] }
 0x455   : > { %v1743_v57 = vadd.f32 %v1742_v34, %v1741_v30  ;;  %v8122_v30 = vld [vmem:[#allocation15 + $0x510] sm:$0xf]  ;;  %3189 = vmatpush.bf16.msra.mxu3 %v7987_v7  ;;  %v1740_v59 = vadd.f32 %v1739_v62, %v11519_v41  ;;  %v8124_v41 = vld [vmem:[#allocation15 + $0x530] sm:$0xf0]  ;;  %v8130_v62 = vld [vmem:[#allocation15 + $0x518] sm:$0xf] }
 0x456   : > { %v1678_v25 = vpop.permute.xlu0 %1677  ;;  %v8123_v34 = vor.u32 %v9305_v2, %v8122_v30  ;;  %3176 = vmatpush.bf16.msra.mxu2 %v7983_v29  ;;  %v8164_v29 = vld [vmem:[#allocation15 + $0x578] sm:$0xf0]  ;;  %v8026_v7 = vld [vmem:[#allocation15 + $0x450] sm:$0xf]  ;;  %v9301_v30 = vld [vmem:[#allocation15 + $0x514] sm:$0xf] }
 0x457   : > { %v1744_v31 = vrot.slane %v1743_v57, 2  ;;  %v1703_v15 = vmul.f32 %v1678_v25, %v1031_v38  ;;  %v8220_v38 = vld [vmem:[#allocation15 + $0x5f0] sm:$0xf0]  ;;  %v8090_v25 = vld [vmem:[#allocation15 + $0x4d0] sm:$0xf]  ;;  %v2807_v8 = vpack.c.bf16 %v1740_v59, %v1740_v59 }
 0x458   : > { %v8223_v21 = vor.u32 %v9325_v40, %v8220_v38  ;;  %3211 = vmatpush.bf16.msrb.mxu1 %v8123_v34  ;;  %v8163_v40 = vor.u32 %v9314_v35, %v8162_v48  ;;  %v9302_v38 = vld [vmem:[#allocation15 + $0x51c] sm:$0xf]  ;;  %v8066_v59 = vld [vmem:[#allocation15 + $0x498] sm:$0xf] }
 0x459   : > { %v1748_v33 = vadd.f32 %v1703_v15, %v1702_v1  ;;  %v11524_v63 = vadd.f32 %v1744_v31, %v1743_v57  ;;  %v1704_v57 = vmul.f32 %v1683_v39, %v1032_v37  ;;  %v8228_v1 = vld [vmem:[#allocation15 + $0x5f8] sm:$0xf0]  ;;  %v9317_v31 = vld [vmem:[#allocation15 + $0x594] sm:$0xf]  ;;  %v8091_v15 = vor.u32 %v9297_v28, %v8090_v25  ;;  %3234 = vmatpush.bf16.msrb.mxu3 %v8227_v56  ;;  %v9273_v25 = vld [vmem:[#allocation15 + $0x42c] sm:$0xf0] }
 0x45a   : > { %v8231_v11 = vor.u32 %v9326_v16, %v8228_v1  ;;  %3221 = vmatpush.bf16.msrb.mxu2 %v8223_v21  ;;  %v8191_v36 = vor.u32 %v9317_v31, %v8188_v42  ;;  %v8196_v37 = vld [vmem:[#allocation15 + $0x5b8] sm:$0xf0]  ;;  %v8027_v56 = vor.u32 %v9281_v5, %v8026_v7  ;;  %v8127_v16 = vor.u32 %v9301_v30, %v8124_v41  ;;  %v7994_v1 = vld [vmem:[#allocation15 + $0x410] sm:$0xf]  ;;  %v8092_v31 = vld [vmem:[#allocation15 + $0x4f0] sm:$0xf0] }
 0x45b   : > { %v1749_v47 = vrot.slane %v1748_v33, 4  ;;  %v1746_v24 = vrot.slane %v11524_v63, 1  ;;  %v8199_v43 = vor.u32 %v9318_v49, %v8196_v37  ;;  %v8135_v28 = vor.u32 %v9302_v38, %v8132_v52  ;;  %v9338_v30 = vld [vmem:[#allocation12 + $0x78] sm:$0xff] }
 0x45c   : > { %3247 = vmatpush.bf16.msra.mxu0 %v8231_v11  ;;  %3212 = vmatpush.bf16.msrb.mxu1 %v8091_v15  ;;  %v8036_v38 = vld [vmem:[#allocation15 + $0x478] sm:$0xf0]  ;;  %v9269_v52 = vld [vmem:[#allocation15 + $0x414] sm:$0xf] }
 0x45d   : > { %v1750_v9 = vadd.f32 %v1749_v47, %v1748_v33  ;;  %v8058_v33 = vld [vmem:[#allocation15 + $0x490] sm:$0xf]  ;;  %v1747_v39 = vadd.f32 %v1746_v24, %v11524_v63  ;;  %v9310_v47 = vld [vmem:[#allocation15 + $0x55c] sm:$0xf]  ;;  %3235 = vmatpush.bf16.msrb.mxu3 %v8195_v50  ;;  %v9306_v63 = vld [vmem:[#allocation15 + $0x534] sm:$0xf0] }
 0x45e   : > { %v1688_v20 = vpop.permute.xlu0 %1687  ;;  %3222 = vmatpush.bf16.msrb.mxu2 %v8191_v36  ;;  %v8059_v3 = vor.u32 %v9289_v10, %v8058_v33  ;;  %v8167_v17 = vor.u32 %v9310_v47, %v8164_v29  ;;  %v9293_v24 = vld [vmem:[#allocation15 + $0x4d4] sm:$0xf]  ;;  %v8131_v11 = vor.u32 %v9306_v63, %v8130_v62  ;;  %v2338_v36 = vpop.f32.mrf.mxu1  ;;  %v7995_v33 = vor.u32 %v9273_v25, %v7994_v1  ;;  %v9286_v47 = vld [vmem:[#allocation15 + $0x49c] sm:$0xf]  ;;  %v8034_v62 = vld [vmem:[#allocation15 + $0x458] sm:$0xf] }
 0x45f   : > { %v1751_v6 = vrot.slane %v1750_v9, 2  ;;  %v1705_v27 = vmul.f32 %v1688_v20, %v1033_v23  ;;  %v2819_v20 = vunpack.c.l.b16 %v2803_v55  ;;  %v8095_v50 = vor.u32 %v9293_v24, %v8092_v31  ;;  %v9285_v55 = vld [vmem:[#allocation15 + $0x494] sm:$0xf]  ;;  %v9282_v63 = vld [vmem:[#allocation15 + $0x474] sm:$0xf0] }
 0x460   : > { %3248 = vmatpush.bf16.msra.mxu0 %v8199_v43  ;;  %3213 = vmatpush.bf16.msrb.mxu1 %v8059_v3  ;;  %v9277_v3 = vld [vmem:[#allocation15 + $0x454] sm:$0xf]  ;;  %v9274_v25 = vld [vmem:[#allocation15 + $0x434] sm:$0xf0]  ;;  %v9270_v24 = vld [vmem:[#allocation15 + $0x41c] sm:$0xf] }
 0x461   : > { %v1752_v61 = vadd.f32 %v1751_v6, %v1750_v9  ;;  %v1755_v46 = vadd.f32 %v1705_v27, %v1704_v57  ;;  %v2806_v9 = vpack.c.bf16 %v1733_v12, %v1733_v12  ;;  %v2808_v57 = vpack.c.bf16 %v1747_v39, %v1747_v39  ;;  %3236 = vmatpush.bf16.msrb.mxu3 %v8163_v40  ;;  %v8060_v12 = vld [vmem:[#allocation15 + $0x4b0] sm:$0xf0]  ;;  %v9290_v39 = vld [vmem:[#allocation15 + $0x4b4] sm:$0xf0] }
 0x462   : > { %3223 = vmatpush.bf16.msrb.mxu2 %v8159_v18  ;;  %v2821_v6 = vunpack.c.l.b16 %v2805_v22  ;;  %v8063_v22 = vor.u32 %v9285_v55, %v8060_v12  ;;  %v8028_v18 = vld [vmem:[#allocation15 + $0x470] sm:$0xf0] }
 0x463   : > { %v1753_v60 = vrot.slane %v1752_v61, 1  ;;  %v1756_v23 = vrot.slane %v1755_v46, 4  ;;  %v2822_v15 = vunpack.c.l.b16 %v2806_v9  ;;  %v2824_v49 = vunpack.c.l.b16 %v2808_v57  ;;  %v9278_v9 = vld [vmem:[#allocation15 + $0x45c] sm:$0xf]  ;;  %v2297_v57 = vpop.f32.mrf.mxu2 }
 0x464   : > { %3249 = vmatpush.bf16.msra.mxu0 %v8167_v17  ;;  %3214 = vmatpush.bf16.msrb.mxu1 %v8027_v56  ;;  %v8031_v41 = vor.u32 %v9277_v3, %v8028_v18  ;;  %v2310_v56 = vpop.f32.mrf.mxu3  ;;  %v9464_v3 = vld [vmem:[#allocation15 + $0x9e4] sm:$0xf0] }
 0x465   : > { %v1757_v0 = vadd.f32 %v1756_v23, %v1755_v46  ;;  %v1754_v2 = vadd.f32 %v1753_v60, %v1752_v61  ;;  %v2827_v61 = vsel %vm12918_vm1, %v2820_v53, %v2819_v20  ;;  %v2823_v46 = vunpack.c.l.b16 %v2807_v8  ;;  %3237 = vmatpush.bf16.msrb.mxu3 %v8131_v11  ;;  %v7996_v53 = vld [vmem:[#allocation15 + $0x430] sm:$0xf0]  ;;  %v2323_v8 = vpop.f32.mrf.mxu0 }
 0x466   : > { %3224 = vmatpush.bf16.msrb.mxu2 %v8127_v16  ;;  %v2828_v43 = vsel %vm12917_vm2, %v2821_v6, %v2827_v61  ;;  %v2708_v40 = vpop.f32.mrf.mxu1  ;;  %v9337_v20 = vld [vmem:[#allocation12 + $0x70] sm:$0xff]  ;;  %v8039_v16 = vor.u32 %v9278_v9, %v8036_v38  ;;  %v7999_v1 = vor.u32 %v9269_v52, %v7996_v53  ;;  %v8004_v6 = vld [vmem:[#allocation15 + $0x438] sm:$0xf0]  ;;  %v8474_v52 = vld [vmem:[#allocation15 + $0x988] sm:$0xf] }
 0x467   : > { %v1758_v34 = vrot.slane %v1757_v0, 2  ;;  %v2809_v27 = vpack.c.bf16 %v1754_v2, %v1754_v2  ;;  %v2829_v60 = vsel %vm12916_vm3, %v2822_v15, %v2828_v43  ;;  %v8067_v2 = vor.u32 %v9290_v39, %v8066_v59  ;;  %v9335_v15 = vld [vmem:[#allocation12 + $0x60] sm:$0xff]  ;;  %v9456_v53 = vld [vmem:[#allocation15 + $0x9a4] sm:$0xf0] }
 0x468   : > { %3250 = vmatpush.bf16.msra.mxu0 %v8135_v28  ;;  %v2830_v48 = vsel %vm12915_vm4, %v2823_v46, %v2829_v60  ;;  %3215 = vmatpush.bf16.msrb.mxu1 %v7995_v33  ;;  %v8007_v31 = vor.u32 %v9270_v24, %v8004_v6  ;;  %v9332_v33 = vld [vmem:[#allocation12 + $0x48] sm:$0xff] }
 0x469   : > { %v1759_v21 = vadd.f32 %v1758_v34, %v1757_v0  ;;  %v2825_v10 = vunpack.c.l.b16 %v2809_v27  ;;  %v2831_v35 = vsel %vm12914_vm5, %v2824_v49, %v2830_v48  ;;  %3238 = vmatpush.bf16.msrb.mxu3 %v8099_v19  ;;  %v8068_v0 = vld [vmem:[#allocation15 + $0x4b8] sm:$0xf0]  ;;  %v11561_v34 = vadd.f32 %v2708_v40, %v11517_v51  ;;  %v8002_v51 = vld [vmem:[#allocation15 + $0x418] sm:$0xf]  ;;  %v9336_v27 = vld [vmem:[#allocation12 + $0x68] sm:$0xff] }
 0x46a   : > { %3225 = vmatpush.bf16.msrb.mxu2 %v8095_v50  ;;  %v8071_v17 = vor.u32 %v9286_v47, %v8068_v0  ;;  %v8003_v11 = vor.u32 %v9274_v25, %v8002_v51  ;;  %v9333_v49 = vld [vmem:[#allocation12 + $0x50] sm:$0xff]  ;;  %v9331_v19 = vld [vmem:[#allocation12 + $0x40] sm:$0xff]  ;;  %v8506_v0 = vld [vmem:[#allocation15 + $0x9c8] sm:$0xf] }
 0x46b   : > { %v1760_v42 = vrot.slane %v1759_v21, 1  ;;  %v2832_v29 = vsel %vm12913_vm6, %v2825_v10, %v2831_v35  ;;  %v2299_v44 = vpop.f32.mrf.mxu2  ;;  %v9459_v59 = vld [vmem:[#allocation15 + $0x9c4] sm:$0xf]  ;;  %v8466_v40 = vld [vmem:[#allocation15 + $0x980] sm:$0xf] }
 0x46c   : > { %3251 = vmatpush.bf16.msra.mxu0 %v8103_v14  ;;  %v9443_v51 = vld [vmem:[#allocation15 + $0x944] sm:$0xf]  ;;  %v8444_v44 = vld [vmem:[#allocation15 + $0x968] sm:$0xf0] }
 0x46d   : > { %v1761_v37 = vadd.f32 %v1760_v42, %v1759_v21  ;;  %3239 = vmatpush.bf16.msrb.mxu3 %v8067_v2  ;;  %v8035_v21 = vor.u32 %v9282_v63, %v8034_v62  ;;  %v2325_v54 = vpop.f32.mrf.mxu0  ;;  %v2312_v42 = vpop.f32.mrf.mxu3  ;;  %v8508_v2 = vld [vmem:[#allocation15 + $0x9e8] sm:$0xf0]  ;;  %v9451_v62 = vld [vmem:[#allocation15 + $0x984] sm:$0xf] }
 0x46e   : > { %3226 = vmatpush.bf16.msrb.mxu2 %v8063_v22  ;;  %v2710_v28 = vpop.f32.mrf.mxu1  ;;  %v9463_v22 = vld [vmem:[#allocation15 + $0x9dc] sm:$0xf0]  ;;  %v8468_v63 = vld [vmem:[#allocation15 + $0x9a0] sm:$0xf0]  ;;  %v9444_v54 = vld [vmem:[#allocation15 + $0x94c] sm:$0xf] }
 0x46f   : > { %v2810_v23 = vpack.c.bf16 %v1761_v37, %v1761_v37  ;;  %v8471_v38 = vor.u32 %v9451_v62, %v8468_v63  ;;  %v8436_v6 = vld [vmem:[#allocation15 + $0x960] sm:$0xf0] }
 0x470   : > { %3252 = vmatpush.bf16.msra.mxu0 %v8071_v17  ;;  %v8439_v28 = vor.u32 %v9443_v51, %v8436_v6 }
 0x471   : > { %v2826_v58 = vunpack.c.l.b16 %v2810_v23  ;;  %3240 = vmatpush.bf16.msrb.mxu3 %v8035_v21 }
 0x472   : > { %3227 = vmatpush.bf16.msrb.mxu2 %v8031_v41  ;;  %v9455_v41 = vld [vmem:[#allocation15 + $0x99c] sm:$0xf0] }
 0x473   : > { %v2833_v7 = vsel %vm12912_vm7, %v2826_v58, %v2832_v29  ;;  %v8498_v58 = vld [vmem:[#allocation15 + $0x9c0] sm:$0xf]  ;;  %v8500_v29 = vld [vmem:[#allocation15 + $0x9e0] sm:$0xf0]  ;;  %v8467_v9 = vor.u32 %v9455_v41, %v8466_v40 }
 0x474   : > { %v2834_v5 = vpack.c.b16 %v2833_v7, %v2833_v7  ;;  %3253 = vmatpush.bf16.msra.mxu0 %v8039_v16  ;;  %v8499_v47 = vor.u32 %v9463_v22, %v8498_v58  ;;  %v8503_v7 = vor.u32 %v9459_v59, %v8500_v29  ;;  %v8434_v16 = vld [vmem:[#allocation15 + $0x940] sm:$0xf]  ;;  %v8404_v29 = vld [vmem:[#allocation15 + $0x920] sm:$0xf0] }
 0x475   : > { %3241 = vmatpush.bf16.msrb.mxu3 %v8003_v11  ;;  %v11566_v46 = vpop.f32.mrf.mxu0  ;;  %v9448_v11 = vld [vmem:[#allocation15 + $0x964] sm:$0xf0]  ;;  %v8402_v58 = vld [vmem:[#allocation15 + $0x900] sm:$0xf] }
 0x476   : > { %3164 = vmatmul.bf16.vlgmr.msra.gmra.mxu1 %v2834_v5  ;;  %3177 = vmatmul.bf16.vlgmr.msra.gmra.mxu2 %v2834_v5  ;;  %v9439_v22 = vld [vmem:[#allocation15 + $0x91c] sm:$0xf0] }
 0x477   : > { %3190 = vmatmul.bf16.vlgmr.msra.gmra.mxu3 %v2834_v5  ;;  %3203 = vmatmul.bf16.vlgmr.msrb.gmra.mxu0 %v2834_v5  ;;  %v11568_v36 = vpop.f32.mrf.mxu2  ;;  %v11570_v37 = vpop.f32.mrf.mxu3  ;;  %v9431_v41 = vld [vmem:[#allocation15 + $0x8dc] sm:$0xf0] }
 0x478   : > { %3917 = vmatpush.bf16.msra.mxu1 %v9338_v30  ;;  %3228 = vmatpush.bf16.msrb.mxu2 %v7999_v1  ;;  %v9460_v30 = vld [vmem:[#allocation15 + $0x9cc] sm:$0xf]  ;;  %v9447_v1 = vld [vmem:[#allocation15 + $0x95c] sm:$0xf0] }
 0x479   : > { %3254 = vmatpush.bf16.msra.mxu0 %v8007_v31  ;;  %v8511_v17 = vor.u32 %v9460_v30, %v8508_v2  ;;  %5094 = vmatpush.bf16.msra.mxu3 %v8503_v7  ;;  %v8435_v24 = vor.u32 %v9447_v1, %v8434_v16  ;;  %v9440_v7 = vld [vmem:[#allocation15 + $0x924] sm:$0xf0]  ;;  %v9436_v2 = vld [vmem:[#allocation15 + $0x90c] sm:$0xf] }
 0x47c   : > { %3918 = vmatpush.bf16.msra.mxu1 %v9337_v20  ;;  %5081 = vmatpush.bf16.msra.mxu2 %v8499_v47  ;;  %v8476_v20 = vld [vmem:[#allocation15 + $0x9a8] sm:$0xf0]  ;;  %v9435_v47 = vld [vmem:[#allocation15 + $0x904] sm:$0xf] }
 0x47d   : > { %v2377_v43 = vpop.f32.mrf.mxu0  ;;  %5095 = vmatpush.bf16.msra.mxu3 %v8471_v38  ;;  %v8378_v38 = vld [vmem:[#allocation15 + $0x8c8] sm:$0xf] }
 0x47f   : > { %v2351_v10 = vpop.f32.mrf.mxu2  ;;  %v2364_v14 = vpop.f32.mrf.mxu3 }
 0x480   : > { %3919 = vmatpush.bf16.msra.mxu1 %v9336_v27  ;;  %5082 = vmatpush.bf16.msra.mxu2 %v8467_v9  ;;  %v8442_v27 = vld [vmem:[#allocation15 + $0x948] sm:$0xf]  ;;  %v8372_v9 = vld [vmem:[#allocation15 + $0x8e0] sm:$0xf0] }
 0x481   : > { %v8443_v31 = vor.u32 %v9448_v11, %v8442_v27  ;;  %5096 = vmatpush.bf16.msra.mxu3 %v8439_v28  ;;  %v8338_v11 = vld [vmem:[#allocation15 + $0x880] sm:$0xf] }
 0x482   : > { %v9423_v28 = vld [vmem:[#allocation15 + $0x89c] sm:$0xf0] }
 0x483   : > { %v2760_v13 = vpop.f32.mrf.mxu1 }
 0x484   : > { %3920 = vmatpush.bf16.msra.mxu1 %v9335_v15  ;;  %v11564_v61 = vadd.f32 %v2760_v13, %v11551_v4  ;;  %v8239_v4 = vld [vmem:[%s829_s13 + $0x8] sm:$0xff]  ;;  %v8447_v15 = vor.u32 %v9444_v54, %v8444_v44  ;;  %5083 = vmatpush.bf16.msra.mxu2 %v8435_v24  ;;  %s13050_s13 = smov %s13024_s24 }
 0x485   : > { %v11574_v55 = vpack.c.bf16 %v8239_v4, %v8239_v4  ;;  %v11592_v4 = vld [vmem:[#allocation16] sm:$0xff] }
 0x486   : > { %3216 = vmatmul.bf16.vlgmr.msrb.gmra.mxu1 %v2834_v5  ;;  %3229 = vmatmul.bf16.vlgmr.msrb.gmra.mxu2 %v2834_v5  ;;  %v3270_v14 = vperm.slane %v11592_v4, 0  ;;  %v3273_v59 = vperm.slane %v11592_v4, 3  ;;  %v3272_v51 = vperm.slane %v11592_v4, 2 }
 0x487   : > { %3242 = vmatmul.bf16.vlgmr.msrb.gmra.mxu3 %v2834_v5  ;;  %3255 = vmatmul.bf16.vlgmr.msra.gmra.mxu0 %v2834_v5  ;;  %v8507_v5 = vor.u32 %v9464_v3, %v8506_v0  ;;  %v8407_v3 = vor.u32 %v9435_v47, %v8404_v29 }
 0x488   : > { %3921 = vmatpush.bf16.msra.mxu1 %v9334_v26 }
 0x489   : > { %5107 = vmatpush.bf16.msrb.mxu0 %v8507_v5  ;;  %5097 = vmatpush.bf16.msra.mxu3 %v8407_v3 }
 0x48b   : > { %v2762_v50 = vpop.f32.mrf.mxu1 }
 0x48c   : > { %3922 = vmatpush.bf16.msra.mxu1 %v9333_v49 }
 0x490   : > { %3923 = vmatpush.bf16.msra.mxu1 %v9332_v33 }
 0x493   : > { %v2747_v12 = vpop.f32.mrf.mxu0 }
 0x494   : > { %3924 = vmatpush.bf16.msra.mxu1 %v9331_v19  ;;  %v11577_v60 = vadd.f32 %v2747_v12, %v2323_v8  ;;  %v9452_v8 = vld [vmem:[#allocation15 + $0x98c] sm:$0xf] }
 0x495   : > { %v8479_v21 = vor.u32 %v9452_v8, %v8476_v20  ;;  %v3271_v8 = vperm.slane %v11592_v4, 1 }
 0x497   : > { %3925 = vmatmul.bf16.vlgmr.msra.gmra.mxu1 %v11574_v55  ;;  %v2721_v23 = vpop.f32.mrf.mxu2  ;;  %v2734_v35 = vpop.f32.mrf.mxu3 }
 0x498   : > { %v11579_v48 = vadd.f32 %v2721_v23, %v2297_v57  ;;  %v11581_v39 = vadd.f32 %v2734_v35, %v2310_v56  ;;  %5120 = vmatpush.bf16.msrb.mxu1 %v8511_v17  ;;  %v8475_v57 = vor.u32 %v9456_v53, %v8474_v52  ;;  %v8370_v17 = vld [vmem:[#allocation15 + $0x8c0] sm:$0xf] }
 0x499   : > { %v8371_v63 = vor.u32 %v9431_v41, %v8370_v17  ;;  %v8274_v41 = vld [vmem:[#allocation15 + $0x800] sm:$0xf] }
 0x49a   : > { %5108 = vmatpush.bf16.msrb.mxu0 %v8475_v57 }
 0x49b   : > { %v2749_v18 = vpop.f32.mrf.mxu0 }
 0x49c   : > { %5121 = vmatpush.bf16.msrb.mxu1 %v8479_v21  ;;  %v8410_v18 = vld [vmem:[#allocation15 + $0x908] sm:$0xf] }
 0x49d   : > { %v8411_v30 = vor.u32 %v9440_v7, %v8410_v18  ;;  %v9432_v21 = vld [vmem:[#allocation15 + $0x8e4] sm:$0xf0] }
 0x49e   : > { %5109 = vmatpush.bf16.msrb.mxu0 %v8443_v31  ;;  %v8379_v24 = vor.u32 %v9432_v21, %v8378_v38  ;;  %v9419_v31 = vld [vmem:[#allocation15 + $0x884] sm:$0xf]  ;;  %v8314_v18 = vld [vmem:[#allocation15 + $0x848] sm:$0xf]  ;;  %v9407_v38 = vld [vmem:[#allocation15 + $0x81c] sm:$0xf0] }
 0x49f   : > { %v2723_v56 = vpop.f32.mrf.mxu2  ;;  %v2736_v25 = vpop.f32.mrf.mxu3  ;;  %v9416_v7 = vld [vmem:[#allocation15 + $0x864] sm:$0xf0]  ;;  %v8276_v21 = vld [vmem:[#allocation15 + $0x820] sm:$0xf0] }
 0x4a0   : > { %5122 = vmatpush.bf16.msrb.mxu1 %v8447_v15  ;;  %v9428_v56 = vld [vmem:[#allocation15 + $0x8cc] sm:$0xf]  ;;  %v8339_v15 = vor.u32 %v9423_v28, %v8338_v11 }
 0x4a1   : > { %v8380_v25 = vld [vmem:[#allocation15 + $0x8e8] sm:$0xf0] }
 0x4a2   : > { %5110 = vmatpush.bf16.msrb.mxu0 %v8411_v30  ;;  %v8383_v6 = vor.u32 %v9428_v56, %v8380_v25  ;;  %v9412_v30 = vld [vmem:[#allocation15 + $0x84c] sm:$0xf] }
 0x4a3   : > { %v9404_v25 = vld [vmem:[#allocation15 + $0x80c] sm:$0xf] }
 0x4a6   : > { %5111 = vmatpush.bf16.msrb.mxu0 %v8379_v24 }
 0x4b3   : > { %v2799_v42 = vpop.f32.mrf.mxu0 }
 0x4b4   : > { %v11584_v26 = vadd.f32 %v2799_v42, %v11566_v46  ;;  %v8340_v42 = vld [vmem:[#allocation15 + $0x8a0] sm:$0xf0] }
 0x4b7   : > { %v2773_v13 = vpop.f32.mrf.mxu2  ;;  %v2786_v33 = vpop.f32.mrf.mxu3 }
 0x4b8   : > { %v11587_v49 = vadd.f32 %v2773_v13, %v11568_v36  ;;  %v11590_v50 = vadd.f32 %v2786_v33, %v11570_v37  ;;  %v8403_v37 = vor.u32 %v9439_v22, %v8402_v58  ;;  %v8346_v13 = vld [vmem:[#allocation15 + $0x888] sm:$0xf]  ;;  %v9415_v58 = vld [vmem:[#allocation15 + $0x85c] sm:$0xf0]  ;;  %v9411_v22 = vld [vmem:[#allocation15 + $0x844] sm:$0xf] }
 0x4b9   : > { %v9424_v33 = vld [vmem:[#allocation15 + $0x8a4] sm:$0xf0] }
 0x4ba   : > { %5084 = vmatpush.bf16.msra.mxu2 %v8403_v37 }
 0x4bb   : > { %v2801_v43 = vpop.f32.mrf.mxu0 }
 0x4bc   : > { %v8347_v43 = vor.u32 %v9424_v33, %v8346_v13 }
 0x4be   : > { %5085 = vmatpush.bf16.msra.mxu2 %v8371_v63  ;;  %5112 = vmatpush.bf16.msrb.mxu0 %v8347_v43  ;;  %v3274_v63 = vperm.slane %v11592_v4, 4 }
 0x4bf   : > { %v2775_v10 = vpop.f32.mrf.mxu2  ;;  %v2788_v19 = vpop.f32.mrf.mxu3 }
 0x4c0   : > { %v9420_v10 = vld [vmem:[#allocation15 + $0x88c] sm:$0xf] }
 0x4c1   : > { %v8348_v19 = vld [vmem:[#allocation15 + $0x8a8] sm:$0xf0] }
 0x4c2   : > { %5086 = vmatpush.bf16.msra.mxu2 %v8339_v15 }
 0x4f3   : > { %v3165_v12 = vpop.f32.mrf.mxu1 }
 0x4f4   : > { %v3260_v23 = vadd.f32 %v3165_v12, %v11561_v34  ;;  %v3204_v35 = vpop.f32.mrf.mxu0  ;;  %v8412_v34 = vld [vmem:[#allocation15 + $0x928] sm:$0xf0] }
 0x4f5   : > { %v3263_v36 = vadd.f32 %v3204_v35, %v11577_v60  ;;  %v8415_v40 = vor.u32 %v9436_v2, %v8412_v34  ;;  %v9427_v60 = vld [vmem:[#allocation15 + $0x8c4] sm:$0xf]  ;;  %v8306_v35 = vld [vmem:[#allocation15 + $0x840] sm:$0xf]  ;;  %v8316_v2 = vld [vmem:[#allocation15 + $0x868] sm:$0xf0] }
 0x4f6   : > { %v3286_v46 = vadd.f32 %v3270_v14, %v3260_v23  ;;  %v8375_v20 = vor.u32 %v9427_v60, %v8372_v9  ;;  %v8319_v60 = vor.u32 %v9412_v30, %v8316_v2  ;;  %v8524_v30 = vld [vmem:[#allocation15 + $0x9f8] sm:$0xf0] }
 0x4f7   : > { %v3289_v5 = vadd.f32 %v3273_v59, %v3263_v36  ;;  %5123 = vmatpush.bf16.msrb.mxu1 %v8415_v40  ;;  %v8308_v59 = vld [vmem:[#allocation15 + $0x860] sm:$0xf0] }
 0x4f8   : > { %v8232_v0 = vmul.f32 -1.442695, %v3286_v46  ;;  %5098 = vmatpush.bf16.msra.mxu3 %v8375_v20  ;;  %v8351_v46 = vor.u32 %v9420_v10, %v8348_v19  ;;  %v8311_v3 = vor.u32 %v9411_v22, %v8308_v59  ;;  %v8275_v20 = vor.u32 %v9407_v38, %v8274_v41 }
 0x4f9   : > { %v8235_v62 = vmul.f32 -1.442695, %v3289_v5  ;;  %v3178_v53 = vpop.f32.mrf.mxu2  ;;  %v8315_v5 = vor.u32 %v9416_v7, %v8314_v18 }
 0x4fa   : > { %9829 = vpow2.f32 %v8232_v0  ;;  %v3191_v57 = vpop.f32.mrf.mxu3  ;;  %v3261_v16 = vadd.f32 %v3178_v53, %v11579_v48  ;;  %v8307_v0 = vor.u32 %v9415_v58, %v8306_v35  ;;  %v9461_v58 = vld [vmem:[#allocation15 + $0x9d4] sm:$0xf] }
 0x4fb   : > { %v3167_v52 = vpop.f32.mrf.mxu1  ;;  %9831 = vpow2.f32 %v8235_v62  ;;  %v3262_v1 = vadd.f32 %v3191_v57, %v11581_v39  ;;  %5124 = vmatpush.bf16.msrb.mxu1 %v8383_v6  ;;  %v8343_v39 = vor.u32 %v9419_v31, %v8340_v42  ;;  %5113 = vmatpush.bf16.msrb.mxu0 %v8315_v5  ;;  %v3277_v57 = vperm.slane %v11592_v4, 7  ;;  %v8284_v31 = vld [vmem:[#allocation15 + $0x828] sm:$0xf0]  ;;  %v9462_v5 = vld [vmem:[#allocation15 + $0x9dc] sm:$0xf] }
 0x4fc   : > { %v3206_v27 = vpop.f32.mrf.mxu0  ;;  %v3287_v54 = vadd.f32 %v3271_v8, %v3261_v16  ;;  %5087 = vmatpush.bf16.msra.mxu2 %v8307_v0  ;;  %v9403_v52 = vld [vmem:[#allocation15 + $0x804] sm:$0xf]  ;;  %v10545_v6 = vmov 1983009808   ;;  %v8287_v33 = vor.u32 %v9404_v25, %v8284_v31  ;;  %v9466_v0 = vld [vmem:[#allocation15 + $0x9f4] sm:$0xf0] }
 0x4fd   : > { %v3288_v44 = vadd.f32 %v3272_v51, %v3262_v1  ;;  %5099 = vmatpush.bf16.msra.mxu3 %v8343_v39  ;;  %v8282_v1 = vld [vmem:[#allocation15 + $0x808] sm:$0xf]  ;;  %v3412_v27 = vunpack.c.l.s4 %v10545_v6 }
 0x4fe   : > { %v8233_v12 = vmul.f32 -1.442695, %v3287_v54  ;;  %v9408_v51 = vld [vmem:[#allocation15 + $0x824] sm:$0xf0]  ;;  %v8514_v54 = vld [vmem:[#allocation15 + $0x9d0] sm:$0xf] }
 0x4ff   : > { %v8234_v23 = vmul.f32 -1.442695, %v3288_v44  ;;  %5125 = vmatpush.bf16.msrb.mxu1 %v8351_v46  ;;  %v8283_v28 = vor.u32 %v9408_v51, %v8282_v1  ;;  %v9465_v44 = vld [vmem:[#allocation15 + $0x9ec] sm:$0xf0]  ;;  %v11637_v59 = vunpack.c.0.s8 %v3412_v27 }
 0x500   : > { %v9830_v48 = vpop.eup %9829  ;;  %5088 = vmatpush.bf16.msra.mxu2 %v8275_v20 }
 0x501   : > { %v11602_v14 = vadd.f32 1.0, %v9830_v48  ;;  %v9832_v36 = vpop.eup %9831  ;;  %v3180_v47 = vpop.f32.mrf.mxu2  ;;  %5100 = vmatpush.bf16.msra.mxu3 %v8311_v3  ;;  %v8515_v48 = vor.u32 %v9465_v44, %v8514_v54  ;;  %5114 = vmatpush.bf16.msrb.mxu0 %v8283_v28 }
 0x502   : > { %v11605_v37 = vadd.f32 1.0, %v9832_v36  ;;  %v3193_v29 = vpop.f32.mrf.mxu3  ;;  %v8516_v47 = vld [vmem:[#allocation15 + $0x9f0] sm:$0xf0] }
 0x503   : > { %9833 = vrcp.f32 %v11602_v14  ;;  %v3217_v34 = vpop.f32.mrf.mxu1  ;;  %v3327_v40 = vand.u32 2147483647, %v11602_v14  ;;  %v3329_v53 = vand.u32 2147483648, %v11602_v14  ;;  %5126 = vmatpush.bf16.msrb.mxu1 %v8319_v60  ;;  %v8522_v29 = vld [vmem:[#allocation15 + $0x9d8] sm:$0xf]  ;;  %5089 = vmatmul.bf16.vlgmr.msra.gmra.mxu2 %v11574_v55  ;;  %vm3323_vm10 = vweird.f32 %v11602_v14 }
 0x504   : > { %9835 = vpow2.f32 %v8233_v12  ;;  %v3256_v17 = vpop.f32.mrf.mxu0  ;;  %v3264_v62 = vadd.f32 %v3217_v34, %v11564_v61  ;;  %v3372_v8 = vand.u32 2147483647, %v11605_v37  ;;  %v8279_v61 = vor.u32 %v9403_v52, %v8276_v21  ;;  %5133 = vmatpush.bf16.msrb.mxu2 %v8515_v48  ;;  %5115 = vmatmul.bf16.vlgmr.msrb.gmra.mxu0 %v11574_v55 }
 0x505   : > { %9837 = vpow2.f32 %v8234_v23  ;;  %v3267_v9 = vadd.f32 %v3256_v17, %v11584_v26  ;;  %v3374_v42 = vand.u32 2147483648, %v11605_v37  ;;  %vm11628_vm9 = vcmp.eq.f32.partialorder %v3327_v40, 8.507059e+37 }
 0x506   : > { %9839 = vrcp.f32 %v11605_v37  ;;  %v3290_v16 = vadd.f32 %v3274_v63, %v3264_v62  ;;  %5101 = vmatpush.bf16.msra.mxu3 %v8279_v61  ;;  %v3330_v18 = vor.u32 1.1754944e-38, %v3329_v53  ;;  %vm3368_vm12 = vweird.f32 %v11605_v37 }
 0x507   : > { %v3293_v11 = vadd.f32 %v3277_v57, %v3267_v9  ;;  %5127 = vmatpush.bf16.msrb.mxu1 %v8287_v33  ;;  %vm11646_vm8 = vcmp.eq.f32.partialorder %v3372_v8, 8.507059e+37  ;;  %v3375_v40 = vor.u32 1.1754944e-38, %v3374_v42  ;;  %v8519_v41 = vor.u32 %v9461_v58, %v8516_v47 }
 0x508   : > { %v8236_v19 = vmul.f32 -1.442695, %v3290_v16  ;;  %v8523_v63 = vor.u32 %v9466_v0, %v8522_v29  ;;  %v8527_v9 = vor.u32 %v9462_v5, %v8524_v30  ;;  %v3275_v0 = vperm.slane %v11592_v4, 5 }
 0x509   : > { %v11615_v56 = vpop.eup %9833  ;;  %9841 = vtanh.f32 %v3293_v11  ;;  %v3230_v12 = vpop.f32.mrf.mxu2  ;;  %5102 = vmatmul.bf16.vlgmr.msra.gmra.mxu3 %v11574_v55 }
 0x50a   : > { %v9836_v26 = vpop.eup %9835  ;;  %v3319_v24 = vmul.f32 %v11615_v56, %v11602_v14  ;;  %v11626_v23 = vpop.f32.mrf.mxu3  ;;  %vm3324_vm13 = vweird.f32 %v11615_v56  ;;  %5128 = vmatmul.bf16.vlgmr.msrb.gmra.mxu1 %v11574_v55  ;;  %v3265_v38 = vadd.f32 %v3230_v12, %v11587_v49  ;;  %5146 = vmatpush.bf16.msrb.mxu3 %v8519_v41 }
 0x50b   : > { %v9838_v15 = vpop.eup %9837  ;;  %v11620_v13 = vadd.f32 1.0, %v9836_v26  ;;  %v3219_v22 = vpop.f32.mrf.mxu1  ;;  %vm3325_vm14 = vmor %vm3323_vm10, %vm3324_vm13  ;;  %5159 = vmatpush.bf16.msra.mxu0 %v8523_v63  ;;  %5172 = vmatpush.bf16.msra.mxu1 %v8527_v9 }
 0x50c   : > { %v11622_v39 = vpop.eup %9839  ;;  %v3320_v43 = vsub.f32 1.0, %v3319_v24  ;;  %v11624_v10 = vadd.f32 1.0, %v9838_v15  ;;  %v3258_v3 = vpop.f32.mrf.mxu0  ;;  %v3291_v34 = vadd.f32 %v3275_v0, %v3265_v38 }
 0x50d   : > { %v3364_v35 = vmul.f32 %v11622_v39, %v11605_v37  ;;  %9843 = vrcp.f32 %v11620_v13  ;;  %vm3369_vm15 = vweird.f32 %v11622_v39  ;;  %v3342_v17 = vand.u32 2147483647, %v11620_v13 }
 0x50e   : > { %v3321_v36 = vmul.f32 %v11615_v56, %v3320_v43  ;;  %9845 = vrcp.f32 %v11624_v10  ;;  %vm3338_vm13 = vweird.f32 %v11620_v13  ;;  %v3344_v57 = vand.u32 2147483648, %v11620_v13  ;;  %vm3370_vm10 = vmor %vm3368_vm12, %vm3369_vm15 }
 0x50f   : > { %v3365_v7 = vsub.f32 1.0, %v3364_v35  ;;  %9847 = vpow2.f32 %v8236_v19  ;;  %v9842_v60 = vpop.eup %9841  ;;  %v3357_v25 = vand.u32 2147483647, %v11624_v10  ;;  %v3359_v26 = vand.u32 2147483648, %v11624_v10 }
 0x510   : > { %v3322_v2 = vadd.f32 %v11615_v56, %v3321_v36  ;;  %v3345_v31 = vor.u32 1.1754944e-38, %v3344_v57  ;;  %v11695_v22 = vperm.slane %v9842_v60, %v11637_v59 }
 0x511   : > { %v3366_v14 = vmul.f32 %v11622_v39, %v3365_v7  ;;  %v3232_v16 = vpop.f32.mrf.mxu2  ;;  %vm11686_vm15 = vcmp.eq.f32.partialorder %v3357_v25, 8.507059e+37  ;;  %v3360_v46 = vor.u32 1.1754944e-38, %v3359_v26 }
 0x512   : > { %v3326_v62 = vsel %vm3325_vm14, %v11615_v56, %v3322_v2  ;;  %vm3353_vm14 = vweird.f32 %v11624_v10  ;;  %v3577_v56 = vrot.slane %v9842_v60, 4  ;;  %v3245_v61 = vpop.f32.mrf.mxu3 }
 0x513   : > { %v9844_v52 = vpop.eup %9843  ;;  %v3331_v53 = vsel %vm11628_vm9, %v3330_v18, %v3326_v62  ;;  %v3367_v8 = vadd.f32 %v11622_v39, %v3366_v14  ;;  %vm11676_vm9 = vcmp.eq.f32.partialorder %v3342_v17, 8.507059e+37  ;;  %v10546_v17 = vmov 1934713408  }
 0x514   : > { %v9846_v20 = vpop.eup %9845  ;;  %v3408_v21 = vrot.slane %v3331_v53, 4  ;;  %v3334_v49 = vmul.f32 %v9844_v52, %v11620_v13  ;;  %v3414_v28 = vperm.slane %v3331_v53, %v11637_v59  ;;  %vm3339_vm12 = vweird.f32 %v9844_v52 }
 0x515   : > { %v3371_v1 = vsel %vm3370_vm10, %v11622_v39, %v3367_v8  ;;  %v3349_v51 = vmul.f32 %v9846_v20, %v11624_v10  ;;  %v9848_v24 = vpop.eup %9847  ;;  %v3578_v33 = vsel %vm3409_vm11, 0.0, %v3577_v56  ;;  %vm3340_vm10 = vmor %vm3338_vm13, %vm3339_vm12  ;;  %v3434_v41 = vunpack.c.l.s4 %v10546_v17 }
 0x516   : > { %v3410_v37 = vsel %vm3409_vm11, 0.0, %v3408_v21  ;;  %v3376_v6 = vsel %vm11646_vm8, %v3375_v40, %v3371_v1  ;;  %v3335_v27 = vsub.f32 1.0, %v3334_v49  ;;  %v11681_v42 = vadd.f32 1.0, %v9848_v24 }
 0x517   : > { %v3350_v54 = vsub.f32 1.0, %v3349_v51  ;;  %v3471_v44 = vrot.slane %v3376_v6, 4  ;;  %v3418_v48 = vperm.slane %v3410_v37, %v11637_v59  ;;  %v3476_v39 = vperm.slane %v3376_v6, %v11637_v59 }
 0x518   : > { %v3336_v15 = vmul.f32 %v9844_v52, %v3335_v27  ;;  %vm3354_vm8 = vweird.f32 %v9846_v20  ;;  %9849 = vrcp.f32 %v11681_v42  ;;  %v3431_v35 = vrot.slane %v3414_v28, 4 }
 0x519   : > { %v3351_v43 = vmul.f32 %v9846_v20, %v3350_v54  ;;  %v11698_v36 = vperm.slane %v3578_v33, %v11637_v59  ;;  %v3472_v47 = vsel %vm3409_vm11, 0.0, %v3471_v44  ;;  %vm3355_vm0 = vmor %vm3353_vm14, %vm3354_vm8  ;;  %v3443_v3 = vrot.slane %v3418_v48, 4 }
 0x51a   : > { %v3337_v19 = vadd.f32 %v9844_v52, %v3336_v15  ;;  %v3481_v18 = vrot.slane %v3476_v39, 4  ;;  %v3480_v40 = vperm.slane %v3472_v47, %v11637_v59  ;;  %v3387_v9 = vand.u32 2147483647, %v11681_v42 }
 0x51b   : > { %v3352_v58 = vadd.f32 %v9846_v20, %v3351_v43  ;;  %v3389_v57 = vand.u32 2147483648, %v11681_v42  ;;  %v3266_v49 = vadd.f32 %v11626_v23, %v11590_v50  ;;  %v11720_v61 = vunpack.c.0.s8 %v3434_v41 }
 0x51c   : > { %v3341_v29 = vsel %vm3340_vm10, %v9844_v52, %v3337_v19  ;;  %v8237_v52 = vmul.f32 -1.442695, %v3291_v34  ;;  %v3276_v51 = vperm.slane %v11592_v4, 6  ;;  %v3493_v23 = vrot.slane %v3480_v40, 4 }
 0x51d   : > { %v3346_v13 = vsel %vm11676_vm9, %v3345_v31, %v3341_v29  ;;  %v3356_v7 = vsel %vm3355_vm0, %v9846_v20, %v3352_v58  ;;  %vm3383_vm13 = vweird.f32 %v11681_v42  ;;  %vm3388_vm9 = vcmp.eq.f32.partialorder %v3387_v9, 8.507059e+37 }
 0x51e   : > { %v3419_v5 = vrot.slane %v3346_v13, 4  ;;  %v3424_v30 = vperm.slane %v3346_v13, %v11637_v59  ;;  %v3361_v2 = vsel %vm11686_vm15, %v3360_v46, %v3356_v7  ;;  %v9850_v60 = vpop.eup %9849  ;;  %9851 = vpow2.f32 %v8237_v52 }
 0x51f   : > { %v3461_v14 = vrot.slane %v3361_v2, 4  ;;  %v3466_v10 = vperm.slane %v3361_v2, %v11637_v59  ;;  %v3379_v38 = vmul.f32 %v9850_v60, %v11681_v42  ;;  %vm3384_vm0 = vweird.f32 %v9850_v60 }
 0x520   : > { %v3420_v62 = vsel %vm3409_vm11, 0.0, %v3419_v5  ;;  %v3429_v63 = vrot.slane %v3424_v30, 4  ;;  %v3432_v25 = vsel %vm3409_vm11, %v3424_v30, %v3431_v35  ;;  %vm3385_vm14 = vmor %vm3383_vm13, %vm3384_vm0  ;;  %v3390_v15 = vor.u32 1.1754944e-38, %v3389_v57 }
 0x521   : > { %v3428_v53 = vperm.slane %v3420_v62, %v11637_v59  ;;  %v3462_v8 = vsel %vm3409_vm11, 0.0, %v3461_v14  ;;  %v3483_v21 = vrot.slane %v3466_v10, 4  ;;  %v3380_v16 = vsub.f32 1.0, %v3379_v38 }
 0x522   : > { %v3470_v20 = vperm.slane %v3462_v8, %v11637_v59  ;;  %v3430_v1 = vsel %vm3409_vm11, %v3429_v63, %v3414_v28  ;;  %v11730_v6 = vperm.slane %v3432_v25, %v11720_v61  ;;  %v3482_v11 = vsel %vm3409_vm11, %v3481_v18, %v3466_v10 }
 0x523   : > { %v3441_v56 = vrot.slane %v3428_v53, 4  ;;  %v3444_v26 = vsel %vm3409_vm11, %v3428_v53, %v3443_v3  ;;  %v3381_v24 = vmul.f32 %v9850_v60, %v3380_v16  ;;  %v11727_v37 = vperm.slane %v3430_v1, %v11720_v61 }
 0x524   : > { %v3495_v27 = vrot.slane %v3470_v20, 4  ;;  %v3484_v28 = vsel %vm3409_vm11, %v3476_v39, %v3483_v21  ;;  %v11740_v54 = vperm.slane %v3444_v26, %v11720_v61  ;;  %v9852_v44 = vpop.eup %9851  ;;  %v3292_v33 = vadd.f32 %v3276_v51, %v3266_v49 }
 0x525   : > { %v3442_v50 = vsel %vm3409_vm11, %v3441_v56, %v3418_v48  ;;  %v3382_v4 = vadd.f32 %v9850_v60, %v3381_v24  ;;  %v3494_v48 = vsel %vm3409_vm11, %v3493_v23, %v3470_v20  ;;  %v11744_v19 = vadd.f32 1.0, %v9852_v44  ;;  %v9457_v44 = vld [vmem:[#allocation15 + $0x9ac] sm:$0xf0] }
 0x526   : > { %v11737_v31 = vperm.slane %v3442_v50, %v11720_v61  ;;  %v3453_v39 = vrot.slane %v11727_v37, 4  ;;  %v3455_v42 = vrot.slane %v11730_v6, 4  ;;  %v11749_v46 = vperm.slane %v3482_v11, %v11720_v61 }
 0x527   : > { %v3386_v43 = vsel %vm3385_vm14, %v9850_v60, %v3382_v4  ;;  %v11752_v35 = vperm.slane %v3484_v28, %v11720_v61  ;;  %v3496_v58 = vsel %vm3409_vm11, %v3480_v40, %v3495_v27  ;;  %9853 = vrcp.f32 %v11744_v19  ;;  %v1034_v40 = vld [vmem:[%s13024_s24] sm:$0xff] }
 0x528   : > { %v3391_v12 = vsel %vm3388_vm9, %v3390_v15, %v3386_v43  ;;  %v3457_v29 = vrot.slane %v11737_v31, 4  ;;  %v3459_v0 = vrot.slane %v11740_v54, 4  ;;  %v11762_v18 = vperm.slane %v3494_v48, %v11720_v61  ;;  %v8482_v4 = vld [vmem:[#allocation15 + $0x990] sm:$0xf]  ;;  %v9453_v15 = vld [vmem:[#allocation15 + $0x994] sm:$0xf] }
 0x529   : > { %v3513_v47 = vrot.slane %v3391_v12, 4  ;;  %v11759_v3 = vperm.slane %v3391_v12, %v11637_v59  ;;  %v11765_v13 = vperm.slane %v3496_v58, %v11720_v61  ;;  %v3587_v5 = vrot.slane %v11695_v22, 4  ;;  %v8490_v12 = vld [vmem:[#allocation15 + $0x998] sm:$0xf] }
 0x52a   : > { %v3599_v30 = vrot.slane %v11698_v36, 4  ;;  %v3404_v2 = vand.u32 2147483648, %v11744_v19  ;;  %v3402_v34 = vand.u32 2147483647, %v11744_v19  ;;  %v11775_v14 = vsel %vm3409_vm11, 0.0, %v3453_v39 }
 0x52b   : > { %v3514_v7 = vsel %vm3409_vm11, 0.0, %v3513_v47  ;;  %v3505_v10 = vrot.slane %v11749_v46, 4  ;;  %v3507_v17 = vrot.slane %v11752_v35, 4  ;;  %v11780_v41 = vsel %vm3409_vm11, 0.0, %v3455_v42 }
 0x52c   : > { %v11783_v60 = vsel %vm3409_vm11, 0.0, %v3457_v29  ;;  %v11786_v62 = vsel %vm3409_vm11, 0.0, %v3459_v0  ;;  %9855 = vtanh.f32 %v3292_v33  ;;  %v11789_v63 = vperm.slane %v3514_v7, %v11637_v59  ;;  %v8484_v33 = vld [vmem:[#allocation15 + $0x9b0] sm:$0xf0]  ;;  %v9458_v7 = vld [vmem:[#allocation15 + $0x9b4] sm:$0xf0] }
 0x52d   : > { %v3535_v9 = vrot.slane %v11759_v3, 4  ;;  %vm3398_vm12 = vweird.f32 %v11744_v19  ;;  %v3509_v52 = vrot.slane %v11762_v18, 4  ;;  %v3511_v53 = vrot.slane %v11765_v13, 4  ;;  %v9854_v8 = vpop.eup %9853 }
 0x52e   : > { %v3405_v38 = vor.u32 1.1754944e-38, %v3404_v2  ;;  %v3620_v57 = vrot.slane %v1034_v40, 1  ;;  %v3621_v20 = vrot.slane %v1034_v40, 2  ;;  %v3622_v21 = vrot.slane %v1034_v40, 3  ;;  %v9454_v2 = vld [vmem:[#allocation15 + $0x99c] sm:$0xf] }
 0x52f   : > { %v3394_v49 = vmul.f32 %v9854_v8, %v11744_v19  ;;  %vm11796_vm8 = vcmp.eq.f32.partialorder %v3402_v34, 8.507059e+37  ;;  %v11801_v16 = vsel %vm3409_vm11, 0.0, %v3505_v10  ;;  %v11804_v1 = vsel %vm3409_vm11, 0.0, %v3507_v17 }
 0x530   : > { %v3623_v51 = vrot.slane %v1034_v40, 4  ;;  %v3624_v25 = vrot.slane %v1034_v40, 5  ;;  %v3625_v26 = vrot.slane %v1034_v40, 6  ;;  %v3626_v24 = vrot.slane %v1034_v40, 7 }
 0x531   : > { %v3627_v50 = vperm.slane %v1034_v40, 0  ;;  %v3547_v23 = vrot.slane %v11789_v63, 4  ;;  %v3395_v27 = vsub.f32 1.0, %v3394_v49  ;;  %v11808_v11 = vsel %vm3409_vm11, 0.0, %v3509_v52  ;;  %v8492_v52 = vld [vmem:[#allocation15 + $0x9b8] sm:$0xf0] }
 0x532   : > { %v11811_v28 = vsel %vm3409_vm11, 0.0, %v3511_v53  ;;  %v9856_v48 = vpop.eup %9855  ;;  %vm3399_vm15 = vweird.f32 %v9854_v8  ;;  %v3628_v43 = vperm.slane %v3620_v57, 0  ;;  %v3629_v39 = vperm.slane %v3621_v20, 0 }
 0x533   : > { %v3630_v42 = vperm.slane %v3622_v21, 0  ;;  %v3396_v58 = vmul.f32 %v9854_v8, %v3395_v27  ;;  %v3567_v47 = vrot.slane %v9856_v48, 4  ;;  %v3572_v29 = vperm.slane %v9856_v48, %v11637_v59  ;;  %vm3400_vm10 = vmor %vm3398_vm12, %vm3399_vm15 }
 0x534   : > { %v3631_v0 = vperm.slane %v3623_v51, 0  ;;  %v3632_v34 = vperm.slane %v3624_v25, 0  ;;  %v3633_v40 = vperm.slane %v3625_v26, 0  ;;  %v3634_v10 = vperm.slane %v3626_v24, 0 }
 0x535   : > { %v3643_v17 = vmul.f32 %v3627_v50, %v11749_v46  ;;  %v3397_v53 = vadd.f32 %v9854_v8, %v3396_v58  ;;  %v3568_v49 = vsel %vm3409_vm11, 0.0, %v3567_v47  ;;  %v3588_v57 = vsel %vm3409_vm11, %v3587_v5, %v3572_v29 }
 0x536   : > { %v3589_v20 = vrot.slane %v3572_v29, 4  ;;  %v3576_v21 = vperm.slane %v3568_v49, %v11637_v59  ;;  %v3594_v51 = vperm.slane %v3588_v57, %v11720_v61  ;;  %v8483_v25 = vor.u32 %v9457_v44, %v8482_v4 }
 0x537   : > { %v8487_v26 = vor.u32 %v9453_v15, %v8484_v33  ;;  %v3401_v24 = vsel %vm3400_vm10, %v9854_v8, %v3397_v53  ;;  %v8491_v50 = vor.u32 %v9458_v7, %v8490_v12  ;;  %v8495_v27 = vor.u32 %v9454_v2, %v8492_v52 }
 0x538   : > { %v3590_v46 = vsel %vm3409_vm11, %v11695_v22, %v3589_v20  ;;  %v3406_v5 = vsel %vm11796_vm8, %v3405_v38, %v3401_v24  ;;  %v3600_v19 = vsel %vm3409_vm11, %v3599_v30, %v3576_v21  ;;  %v3601_v58 = vrot.slane %v3576_v21, 4  ;;  %5134 = vmatpush.bf16.msrb.mxu2 %v8483_v25 }
 0x539   : > { %v3598_v48 = vperm.slane %v3590_v46, %v11720_v61  ;;  %5147 = vmatpush.bf16.msrb.mxu3 %v8487_v26  ;;  %v3523_v4 = vrot.slane %v3406_v5, 4  ;;  %v3528_v8 = vperm.slane %v3406_v5, %v11637_v59  ;;  %v3606_v44 = vperm.slane %v3600_v19, %v11720_v61  ;;  %5160 = vmatpush.bf16.msra.mxu0 %v8491_v50 }
 0x53a   : > { %v3611_v22 = vrot.slane %v3594_v51, 4  ;;  %5173 = vmatpush.bf16.msra.mxu1 %v8495_v27  ;;  %v3602_v38 = vsel %vm3409_vm11, %v11698_v36, %v3601_v58  ;;  %v3651_v15 = vmul.f32 %v3594_v51, %v11727_v37  ;;  %v3644_v36 = vmul.f32 %v3628_v43, %v11801_v16 }
 0x53b   : > { %v3613_v56 = vrot.slane %v3598_v48, 4  ;;  %v3653_v33 = vmul.f32 %v3598_v48, %v11730_v6  ;;  %v3524_v30 = vsel %vm3409_vm11, 0.0, %v3523_v4  ;;  %v3533_v12 = vrot.slane %v3528_v8, 4 }
 0x53c   : > { %v3536_v47 = vsel %vm3409_vm11, %v3528_v8, %v3535_v9  ;;  %v3610_v29 = vperm.slane %v3602_v38, %v11720_v61  ;;  %v3532_v7 = vperm.slane %v3524_v30, %v11637_v59  ;;  %v3612_v2 = vsel %vm3409_vm11, 0.0, %v3611_v22 }
 0x53d   : > { %v3645_v52 = vmul.f32 %v3629_v39, %v11752_v35  ;;  %v3534_v37 = vsel %vm3409_vm11, %v3533_v12, %v11759_v3  ;;  %v3615_v6 = vrot.slane %v3606_v44, 4  ;;  %v3652_v49 = vmul.f32 %v3612_v2, %v11775_v14 }
 0x53e   : > { %v3617_v53 = vrot.slane %v3610_v29, 4  ;;  %v3545_v57 = vrot.slane %v3532_v7, 4  ;;  %v3548_v9 = vsel %vm3409_vm11, %v3532_v7, %v3547_v23  ;;  %v3614_v20 = vsel %vm3409_vm11, 0.0, %v3613_v56 }
 0x53f   : > { %v3646_v21 = vmul.f32 %v3630_v42, %v11804_v1  ;;  %v3647_v16 = vmul.f32 %v3631_v0, %v11762_v18  ;;  %v3648_v35 = vmul.f32 %v3632_v34, %v11808_v11  ;;  %v3649_v43 = vmul.f32 %v3633_v40, %v11765_v13 }
 0x540   : > { %v3654_v3 = vmul.f32 %v3614_v20, %v11780_v41  ;;  %v3546_v14 = vsel %vm3409_vm11, %v3545_v57, %v11789_v63  ;;  %v3616_v39 = vsel %vm3409_vm11, 0.0, %v3615_v6  ;;  %v3650_v51 = vmul.f32 %v3634_v10, %v11811_v28 }
 0x541   : > { %v3655_v23 = vmul.f32 %v3606_v44, %v11737_v31  ;;  %v3618_v25 = vsel %vm3409_vm11, 0.0, %v3617_v53  ;;  %v3656_v1 = vmul.f32 %v3616_v39, %v11783_v60  ;;  %v3657_v18 = vmul.f32 %v3610_v29, %v11740_v54 }
 0x542   : > { %vm3683_vm0 = vcmask 1041408   ;;  %v3540_v13 = vperm.slane %v3534_v37, %v11720_v61  ;;  %v3658_v41 = vmul.f32 %v3618_v25, %v11786_v62  ;;  %v3659_v11 = vadd.f32 %v3651_v15, %v3643_v17 }
 0x543   : > { %v3660_v42 = vadd.f32 %v3652_v49, %v3644_v36  ;;  %v3544_v63 = vperm.slane %v3536_v47, %v11720_v61  ;;  %v3661_v0 = vadd.f32 %v3653_v33, %v3645_v52  ;;  %v3662_v34 = vadd.f32 %v3654_v3, %v3646_v21  ;;  %v11878_v52 = vpop.f32.mrf.mxu1 }
 0x544   : > { %v3663_v28 = vadd.f32 %v3655_v23, %v3647_v16  ;;  %v3664_v40 = vadd.f32 %v3656_v1, %v3648_v35  ;;  %v3665_v31 = vadd.f32 %v3657_v18, %v3649_v43  ;;  %v3666_v10 = vadd.f32 %v3658_v41, %v3650_v51 }
 0x545   : > { %9857 = vtanh.f32 %v3659_v11  ;;  %v3684_v60 = vsel %vm3683_vm0, %v3659_v11, 0.0  ;;  %v3691_v54 = vsel %vm3683_vm0, %v3660_v42, 0.0  ;;  %v3552_v26 = vperm.slane %v3546_v14, %v11720_v61 }
 0x546   : > { %v3557_v24 = vrot.slane %v3540_v13, 4  ;;  %9859 = vtanh.f32 %v3660_v42  ;;  %v3698_v62 = vsel %vm3683_vm0, %v3661_v0, 0.0  ;;  %v3556_v17 = vperm.slane %v3548_v9, %v11720_v61 }
 0x547   : > { %v3559_v46 = vrot.slane %v3544_v63, 4  ;;  %9861 = vtanh.f32 %v3661_v0  ;;  %v3705_v50 = vsel %vm3683_vm0, %v3662_v34, 0.0  ;;  %v3685_v27 = vrot.slane %v3684_v60, 4 }
 0x548   : > { %9863 = vtanh.f32 %v3662_v34  ;;  %v3692_v5 = vrot.slane %v3691_v54, 4  ;;  %v3699_v48 = vrot.slane %v3698_v62, 4  ;;  %v3706_v19 = vrot.slane %v3705_v50, 4 }
 0x549   : > { %9865 = vtanh.f32 %v3663_v28  ;;  %v3712_v58 = vsel %vm3683_vm0, %v3663_v28, 0.0  ;;  %v3561_v4 = vrot.slane %v3552_v26, 4  ;;  %v3558_v8 = vsel %vm3409_vm11, 0.0, %v3557_v24 }
 0x54a   : > { %9867 = vtanh.f32 %v3664_v40  ;;  %v3560_v22 = vsel %vm3409_vm11, 0.0, %v3559_v46  ;;  %v3563_v38 = vrot.slane %v3556_v17, 4  ;;  %v3719_v56 = vsel %vm3683_vm0, %v3664_v40, 0.0 }
 0x54b   : > { %v9858_v44 = vpop.eup %9857  ;;  %9869 = vtanh.f32 %v3665_v31  ;;  %v3686_v30 = vadd.f32 %v3685_v27, %v3684_v60  ;;  %v3713_v12 = vrot.slane %v3712_v58, 4  ;;  %v3693_v7 = vadd.f32 %v3692_v5, %v3691_v54 }
 0x54c   : > { %v9860_v15 = vpop.eup %9859  ;;  %9871 = vtanh.f32 %v3666_v10  ;;  %v3675_v33 = vmul.f32 %v9858_v44, %v3540_v13  ;;  %v3700_v2 = vadd.f32 %v3699_v48, %v3698_v62  ;;  %v3707_v36 = vadd.f32 %v3706_v19, %v3705_v50 }
 0x54d   : > { %v9862_v47 = vpop.eup %9861  ;;  %v3676_v29 = vmul.f32 %v9860_v15, %v3558_v8  ;;  %v3562_v6 = vsel %vm3409_vm11, 0.0, %v3561_v4  ;;  %v3720_v49 = vrot.slane %v3719_v56, 4  ;;  %v3564_v21 = vsel %vm3409_vm11, 0.0, %v3563_v38 }
 0x54e   : > { %v9864_v37 = vpop.eup %9863  ;;  %v3677_v53 = vmul.f32 %v9862_v47, %v3544_v63  ;;  %v3687_v35 = vrot.slane %v3686_v30, 2  ;;  %v3714_v43 = vadd.f32 %v3713_v12, %v3712_v58  ;;  %v3694_v39 = vrot.slane %v3693_v7, 2 }
 0x54f   : > { %v9866_v57 = vpop.eup %9865  ;;  %v3678_v9 = vmul.f32 %v9864_v37, %v3560_v22  ;;  %v3701_v51 = vrot.slane %v3700_v2, 2  ;;  %v3708_v23 = vrot.slane %v3707_v36, 2  ;;  %v3721_v18 = vadd.f32 %v3720_v49, %v3719_v56 }
 0x550   : > { %v9868_v20 = vpop.eup %9867  ;;  %v3679_v16 = vmul.f32 %v9866_v57, %v3552_v26  ;;  %v3726_v13 = vsel %vm3683_vm0, %v3665_v31, 0.0  ;;  %v3733_v41 = vsel %vm3683_vm0, %v3666_v10, 0.0  ;;  %v3688_v63 = vadd.f32 %v3687_v35, %v3686_v30  ;;  %v3928_v26 = vpop.f32.mrf.mxu1 }
 0x551   : > { %v9870_v3 = vpop.eup %9869  ;;  %v11882_v14 = vmul.f32 %v9868_v20, %v3562_v6  ;;  %v3727_v42 = vrot.slane %v3726_v13, 4  ;;  %v3715_v0 = vrot.slane %v3714_v43, 2  ;;  %v3734_v34 = vrot.slane %v3733_v41, 4 }
 0x552   : > { %v9872_v25 = vpop.eup %9871  ;;  %v11884_v1 = vmul.f32 %v9870_v3, %v3556_v17  ;;  %v3695_v28 = vadd.f32 %v3694_v39, %v3693_v7  ;;  %v3702_v40 = vadd.f32 %v3701_v51, %v3700_v2  ;;  %v3709_v60 = vadd.f32 %v3708_v23, %v3707_v36 }
 0x553   : > { %v11888_v11 = vmul.f32 %v9872_v25, %v3564_v21  ;;  %v3728_v54 = vadd.f32 %v3727_v42, %v3726_v13  ;;  %v3722_v24 = vrot.slane %v3721_v18, 2  ;;  %v3735_v62 = vadd.f32 %v3734_v34, %v3733_v41 }
 0x554   : > { %v3748_v17 = vsel %vm3683_vm0, %v3675_v33, 0.0  ;;  %v3755_v46 = vsel %vm3683_vm0, %v3676_v29, 0.0  ;;  %v3762_v10 = vsel %vm3683_vm0, %v3677_v53, 0.0  ;;  %v3716_v27 = vadd.f32 %v3715_v0, %v3714_v43 }
 0x555   : > { %v3749_v31 = vrot.slane %v3748_v17, 4  ;;  %v3756_v50 = vrot.slane %v3755_v46, 4  ;;  %v3729_v5 = vrot.slane %v3728_v54, 2  ;;  %v3736_v48 = vrot.slane %v3735_v62, 2 }
 0x556   : > { %v3763_v19 = vrot.slane %v3762_v10, 4  ;;  %v3689_v58 = vrot.slane %v3688_v63, 1  ;;  %v3696_v4 = vrot.slane %v3695_v28, 1  ;;  %v3703_v22 = vrot.slane %v3702_v40, 1 }
 0x557   : > { %v3750_v8 = vadd.f32 %v3749_v31, %v3748_v17  ;;  %v3757_v44 = vadd.f32 %v3756_v50, %v3755_v46  ;;  %v3710_v38 = vrot.slane %v3709_v60, 1  ;;  %v3723_v56 = vadd.f32 %v3722_v24, %v3721_v18  ;;  %v8452_v24 = vld [vmem:[#allocation15 + $0x970] sm:$0xf0]  ;;  %v8458_v50 = vld [vmem:[#allocation15 + $0x958] sm:$0xf] }
 0x558   : > { %v3764_v15 = vadd.f32 %v3763_v19, %v3762_v10  ;;  %v3717_v12 = vrot.slane %v3716_v27, 1  ;;  %v3730_v47 = vadd.f32 %v3729_v5, %v3728_v54  ;;  %v3737_v29 = vadd.f32 %v3736_v48, %v3735_v62  ;;  %v9445_v54 = vld [vmem:[#allocation15 + $0x954] sm:$0xf]  ;;  %v9450_v10 = vld [vmem:[#allocation15 + $0x974] sm:$0xf0] }
 0x559   : > { %v3751_v30 = vrot.slane %v3750_v8, 2  ;;  %v3758_v33 = vrot.slane %v3757_v44, 2  ;;  %v3690_v2 = vadd.f32 %v3689_v58, %v3688_v63  ;;  %v3697_v36 = vadd.f32 %v3696_v4, %v3695_v28  ;;  %v8460_v5 = vld [vmem:[#allocation15 + $0x978] sm:$0xf0]  ;;  %v8418_v4 = vld [vmem:[#allocation15 + $0x910] sm:$0xf] }
 0x55a   : > { %v3765_v7 = vrot.slane %v3764_v15, 2  ;;  %v3704_v53 = vadd.f32 %v3703_v22, %v3702_v40  ;;  %v3711_v49 = vadd.f32 %v3710_v38, %v3709_v60  ;;  %v3724_v57 = vrot.slane %v3723_v56, 1  ;;  %v8450_v40 = vld [vmem:[#allocation15 + $0x950] sm:$0xf] }
 0x55b   : > { %v3752_v37 = vadd.f32 %v3751_v30, %v3750_v8  ;;  %v3759_v6 = vadd.f32 %v3758_v33, %v3757_v44  ;;  %v3769_v43 = vsel %vm3683_vm0, %v3678_v9, 0.0  ;;  %v3776_v3 = vsel %vm3683_vm0, %v3679_v16, 0.0  ;;  %v9449_v60 = vld [vmem:[#allocation15 + $0x96c] sm:$0xf0]  ;;  %v9437_v44 = vld [vmem:[#allocation15 + $0x914] sm:$0xf] }
 0x55c   : > { %v3766_v20 = vadd.f32 %v3765_v7, %v3764_v15  ;;  %v3718_v39 = vadd.f32 %v3717_v12, %v3716_v27  ;;  %v3731_v51 = vrot.slane %v3730_v47, 1  ;;  %v3738_v23 = vrot.slane %v3737_v29, 1  ;;  %v9446_v27 = vld [vmem:[#allocation15 + $0x95c] sm:$0xf]  ;;  %v9441_v8 = vld [vmem:[#allocation15 + $0x92c] sm:$0xf0] }
 0x55d   : > { %v3753_v21 = vrot.slane %v3752_v37, 1  ;;  %v3760_v35 = vrot.slane %v3759_v6, 1  ;;  %v3741_v18 = vmul.f32 0.5, %v3697_v36  ;;  %v3783_v42 = vsel %vm3683_vm0, %v11882_v14, 0.0  ;;  %v8420_v30 = vld [vmem:[#allocation15 + $0x930] sm:$0xf0] }
 0x55e   : > { %v3767_v25 = vrot.slane %v3766_v20, 1  ;;  %v3725_v63 = vadd.f32 %v3724_v57, %v3723_v56  ;;  %v3770_v34 = vrot.slane %v3769_v43, 4  ;;  %v3777_v28 = vrot.slane %v3776_v3, 4  ;;  %v8426_v33 = vld [vmem:[#allocation15 + $0x918] sm:$0xf] }
 0x55f   : > { %v3754_v13 = vadd.f32 %v3753_v21, %v3752_v37  ;;  %v3761_v41 = vadd.f32 %v3760_v35, %v3759_v6  ;;  %v3740_v9 = vmul.f32 0.5, %v3690_v2  ;;  %v3732_v62 = vadd.f32 %v3731_v51, %v3730_v47  ;;  %v9442_v2 = vld [vmem:[#allocation15 + $0x934] sm:$0xf0]  ;;  %v9438_v36 = vld [vmem:[#allocation15 + $0x91c] sm:$0xf] }
 0x560   : > { %v3768_v0 = vadd.f32 %v3767_v25, %v3766_v20  ;;  %v3739_v17 = vadd.f32 %v3738_v23, %v3737_v29  ;;  %v3742_v46 = vmul.f32 0.5, %v3704_v53  ;;  %v3784_v31 = vrot.slane %v3783_v42, 4  ;;  %v8428_v37 = vld [vmem:[#allocation15 + $0x938] sm:$0xf0]  ;;  %v8386_v20 = vld [vmem:[#allocation15 + $0x8d0] sm:$0xf] }
 0x561   : > { %v3804_v26 = vmul.f32 0.5, %v3754_v13  ;;  %v3805_v16 = vmul.f32 0.5, %v3761_v41  ;;  %v3743_v14 = vmul.f32 0.5, %v3711_v49  ;;  %v3820_v19 = vsel %vm12918_vm1, %v3741_v18, %v3740_v9  ;;  %v9433_v21 = vld [vmem:[#allocation15 + $0x8ec] sm:$0xf0] }
 0x562   : > { %v3806_v48 = vmul.f32 0.5, %v3768_v0  ;;  %v3744_v22 = vmul.f32 0.5, %v3718_v39  ;;  %v3745_v38 = vmul.f32 0.5, %v3725_v63  ;;  %v11899_v56 = vadd.f32 %v3770_v34, %v3769_v43  ;;  %v9429_v51 = vld [vmem:[#allocation15 + $0x8d4] sm:$0xf] }
 0x563   : > { %v3837_v58 = vsel %vm12918_vm1, %v3805_v16, %v3804_v26  ;;  %v11901_v15 = vadd.f32 %v3777_v28, %v3776_v3  ;;  %v3821_v12 = vsel %vm12917_vm2, %v3742_v46, %v3820_v19  ;;  %v8451_v29 = vor.u32 %v9449_v60, %v8450_v40  ;;  %v8388_v23 = vld [vmem:[#allocation15 + $0x8f0] sm:$0xf0]  ;;  %v8394_v41 = vld [vmem:[#allocation15 + $0x8d8] sm:$0xf]  ;;  %v9430_v28 = vld [vmem:[#allocation15 + $0x8dc] sm:$0xf] }
 0x564   : > { %v11905_v47 = vsel %vm12917_vm2, %v3806_v48, %v3837_v58  ;;  %v8455_v7 = vor.u32 %v9445_v54, %v8452_v24  ;;  %v3746_v6 = vmul.f32 0.5, %v3732_v62  ;;  %v3747_v53 = vmul.f32 0.5, %v3739_v17  ;;  %v8396_v40 = vld [vmem:[#allocation15 + $0x8f8] sm:$0xf0]  ;;  %v8354_v16 = vld [vmem:[#allocation15 + $0x890] sm:$0xf] }
 0x565   : > { %v11907_v49 = vadd.f32 %v3784_v31, %v3783_v42  ;;  %v3822_v57 = vsel %vm12916_vm3, %v3743_v14, %v3821_v12  ;;  %v11912_v35 = vsel %vm3683_vm0, %v11884_v1, 0.0  ;;  %5135 = vmatpush.bf16.msrb.mxu2 %v8451_v29  ;;  %v8459_v3 = vor.u32 %v9450_v10, %v8458_v50  ;;  %v9434_v42 = vld [vmem:[#allocation15 + $0x8f4] sm:$0xf0]  ;;  %v3931_v24 = vld [vmem:[%s10995_s21 + $0x18] sm:$0xff]  ;;  %v9425_v46 = vld [vmem:[#allocation15 + $0x8ac] sm:$0xf0] }
 0x566   : > { %v3823_v43 = vsel %vm12915_vm4, %v3744_v22, %v3822_v57  ;;  %5148 = vmatpush.bf16.msrb.mxu3 %v8455_v7  ;;  %v8463_v39 = vor.u32 %v9446_v27, %v8460_v5  ;;  %v8419_v18 = vor.u32 %v9441_v8, %v8418_v4  ;;  %v8423_v13 = vor.u32 %v9437_v44, %v8420_v30  ;;  %v9421_v31 = vld [vmem:[#allocation15 + $0x894] sm:$0xf]  ;;  %v8362_v58 = vld [vmem:[#allocation15 + $0x898] sm:$0xf]  ;;  %v9422_v30 = vld [vmem:[#allocation15 + $0x89c] sm:$0xf] }
 0x567   : > { %v3824_v25 = vsel %vm12914_vm5, %v3745_v38, %v3823_v43  ;;  %v3954_v63 = vperm.slane %v11878_v52, 0  ;;  %5161 = vmatpush.bf16.msra.mxu0 %v8459_v3  ;;  %v8427_v0 = vor.u32 %v9442_v2, %v8426_v33  ;;  %v8431_v34 = vor.u32 %v9438_v36, %v8428_v37  ;;  %v3930_v50 = vld [vmem:[%s10995_s21 + $0x8] sm:$0xff]  ;;  %v11934_v12 = vld [vmem:[#allocation15 + $0x850] sm:$0xf]  ;;  %v3933_v43 = vld [vmem:[%s10995_s21 + $0x38] sm:$0xff] }
 0x568   : > { %v3825_v1 = vsel %vm12913_vm6, %v3746_v6, %v3824_v25  ;;  %5174 = vmatpush.bf16.msra.mxu1 %v8463_v39  ;;  %v3947_v60 = vrot.slane %v11878_v52, 1  ;;  %v3772_v54 = vrot.slane %v11899_v56, 2  ;;  %v3779_v9 = vrot.slane %v11901_v15, 2  ;;  %v8356_v5 = vld [vmem:[#allocation15 + $0x8b0] sm:$0xf0] }
 0x569   : > { %v3826_v26 = vsel %vm12912_vm7, %v3747_v53, %v3825_v1  ;;  %5136 = vmatpush.bf16.msrb.mxu2 %v8419_v18  ;;  %v8387_v62 = vor.u32 %v9433_v21, %v8386_v20  ;;  %v8391_v17 = vor.u32 %v9429_v51, %v8388_v23  ;;  %v3786_v10 = vrot.slane %v11907_v49, 2  ;;  %v3932_v14 = vld [vmem:[%s10995_s21 + $0x28] sm:$0xff]  ;;  %v9417_v36 = vld [vmem:[#allocation15 + $0x86c] sm:$0xf0] }
 0x56a   : > { %3828 = vst [vmem:[%s11003_s11] sm:$0xff] %v3826_v26  ;;  %5149 = vmatpush.bf16.msrb.mxu3 %v8423_v13  ;;  %v3791_v27 = vrot.slane %v11912_v35, 4  ;;  %v8395_v48 = vor.u32 %v9434_v42, %v8394_v41  ;;  %v8399_v19 = vor.u32 %v9430_v28, %v8396_v40  ;;  %v9426_v4 = vld [vmem:[#allocation15 + $0x8b4] sm:$0xf0]  ;;  %v3971_v8 = vadd.f32 %v3954_v63, %v3931_v24  ;;  %v8364_v33 = vld [vmem:[#allocation15 + $0x8b8] sm:$0xf0] }
 0x56b   : > { %5162 = vmatpush.bf16.msra.mxu0 %v8427_v0  ;;  %v3955_v44 = vperm.slane %v3947_v60, 0  ;;  %v11929_v22 = vadd.f32 %v3772_v54, %v11899_v56  ;;  %v11932_v38 = vadd.f32 %v3779_v9, %v11901_v15  ;;  %v3970_v29 = vadd.f32 %v3954_v63, %v3930_v50  ;;  %v9413_v37 = vld [vmem:[#allocation15 + $0x854] sm:$0xf]  ;;  %v11939_v15 = vld [vmem:[#allocation15 + $0x858] sm:$0xf] }
 0x56c   : > { %5175 = vmatpush.bf16.msra.mxu1 %v8431_v34  ;;  %v8355_v7 = vor.u32 %v9425_v46, %v8354_v16  ;;  %v8359_v2 = vor.u32 %v9421_v31, %v8356_v5  ;;  %v8324_v6 = vld [vmem:[#allocation15 + $0x870] sm:$0xf0]  ;;  %9873 = vtanh.f32 %v3971_v8  ;;  %v11937_v56 = vadd.f32 %v3786_v10, %v11907_v49  ;;  %v11941_v57 = vld [vmem:[#allocation15 + $0x874] sm:$0xf0]  ;;  %v11943_v20 = vld [vmem:[#allocation15 + $0x85c] sm:$0xf] }
 0x56d   : > { %5137 = vmatpush.bf16.msrb.mxu2 %v8387_v62  ;;  %v3972_v53 = vadd.f32 %v3955_v44, %v3932_v14  ;;  %v11945_v21 = vld [vmem:[#allocation15 + $0x878] sm:$0xf0]  ;;  %9875 = vtanh.f32 %v3970_v29  ;;  %v11949_v3 = vadd.f32 %v3791_v27, %v11912_v35  ;;  %v8363_v39 = vor.u32 %v9426_v4, %v8362_v58  ;;  %v11953_v23 = vld [vmem:[#allocation15 + $0x810] sm:$0xf]  ;;  %v11963_v35 = vld [vmem:[#allocation15 + $0x814] sm:$0xf] }
 0x56e   : > { %5150 = vmatpush.bf16.msrb.mxu3 %v8391_v17  ;;  %v8367_v51 = vor.u32 %v9422_v30, %v8364_v33  ;;  %v11951_v49 = vld [vmem:[#allocation13 + $0x1] ss:$0 sm:$0xff]  ;;  %v11955_v25 = vld [vmem:[#allocation15 + $0x82c] sm:$0xf0]  ;;  %v3934_v18 = vld [vmem:[%s10995_s21 + $0x48] sm:$0xff]  ;;  %v3774_v13 = vrot.slane %v11929_v22, 1  ;;  %v8323_v0 = vor.u32 %v9417_v36, %v11934_v12  ;;  %v8327_v34 = vor.u32 %v9413_v37, %v8324_v6 }
 0x56f   : > { %5163 = vmatpush.bf16.msra.mxu0 %v8395_v48  ;;  %9877 = vtanh.f32 %v3972_v53  ;;  %v11961_v41 = vsel %vm3683_vm0, %v11888_v11, 0.0  ;;  %v3948_v42 = vrot.slane %v11878_v52, 2  ;;  %v3949_v63 = vrot.slane %v11878_v52, 3  ;;  %v11969_v28 = vld [vmem:[#allocation15 + $0x830] sm:$0xf0]  ;;  %v3937_v12 = vld [vmem:[%s10995_s21 + $0x78] sm:$0xff] }
 0x570   : > { %5176 = vmatpush.bf16.msra.mxu1 %v8399_v19  ;;  %v3781_v1 = vrot.slane %v11932_v38, 1  ;;  %v11971_v40 = vld [vmem:[#allocation15 + $0x7c0] sm:$0xf]  ;;  %v3973_v60 = vadd.f32 %v3955_v44, %v3933_v43  ;;  %v3936_v11 = vld [vmem:[%s10995_s21 + $0x68] sm:$0xff]  ;;  %v3788_v54 = vrot.slane %v11937_v56, 1  ;;  %v3950_v46 = vrot.slane %v11878_v52, 4 }
 0x571   : > { %5138 = vmatpush.bf16.msrb.mxu2 %v8355_v7  ;;  %v11975_v9 = vld [vmem:[#allocation15 + $0x818] sm:$0xf]  ;;  %v11979_v16 = vld [vmem:[#allocation15 + $0x81c] sm:$0xf]  ;;  %v9399_v24 = vld [vmem:[#allocation15 + $0x7dc] sm:$0xf0]  ;;  %v8331_v27 = vor.u32 %v11941_v57, %v11939_v15  ;;  %v8335_v5 = vor.u32 %v11943_v20, %v11945_v21  ;;  %v8291_v4 = vor.u32 %v11955_v25, %v11953_v23 }
 0x572   : > { %5151 = vmatpush.bf16.msrb.mxu3 %v8359_v2  ;;  %v11977_v26 = vld [vmem:[#allocation15 + $0x834] sm:$0xf0]  ;;  %v3956_v62 = vperm.slane %v3948_v42, 0  ;;  %v3957_v17 = vperm.slane %v3949_v63, 0  ;;  %v9874_v31 = vpop.eup %9873  ;;  %v3793_v50 = vrot.slane %v11949_v3, 2  ;;  %v3798_v10 = vrot.slane %v11961_v41, 4 }
 0x573   : > { %5164 = vmatpush.bf16.msra.mxu0 %v8363_v39  ;;  %v9395_v14 = vld [vmem:[#allocation15 + $0x7c4] sm:$0xf]  ;;  %v9876_v19 = vpop.eup %9875  ;;  %v4008_v58 = vmul.f32 %v9874_v31, %v11951_v49  ;;  %v8300_v8 = vld [vmem:[#allocation15 + $0x838] sm:$0xf0]  ;;  %v8762_v44 = vld [vmem:[#allocation15 + $0x7c8] sm:$0xf]  ;;  %v8295_v2 = vor.u32 %v11963_v35, %v11969_v28  ;;  %v8755_v36 = vor.u32 %v9399_v24, %v11971_v40  ;;  %9879 = vtanh.f32 %v3973_v60 }
 0x574   : > { %5177 = vmatpush.bf16.msra.mxu1 %v8367_v51  ;;  %v8756_v48 = vld [vmem:[#allocation15 + $0x7e0] sm:$0xf0]  ;;  %v3974_v30 = vadd.f32 %v3956_v62, %v3934_v18  ;;  %v3976_v33 = vadd.f32 %v3957_v17, %v3936_v11  ;;  %v4007_v7 = vmul.f32 %v9876_v19, %v11951_v49  ;;  %v9400_v37 = vld [vmem:[#allocation15 + $0x7e4] sm:$0xf0]  ;;  %v9396_v6 = vld [vmem:[#allocation15 + $0x7cc] sm:$0xf]  ;;  %v8299_v51 = vor.u32 %v11977_v26, %v11975_v9 }
 0x575   : > { %v9878_v29 = vpop.eup %9877  ;;  %5139 = vmatpush.bf16.msrb.mxu2 %v8323_v0  ;;  %v8764_v53 = vld [vmem:[#allocation15 + $0x7e8] sm:$0xf0]  ;;  %4025 = vadd.xlane.f32.xlu1 %v4008_v58  ;;  %v8759_v57 = vor.u32 %v9395_v14, %v8756_v48  ;;  %v8722_v20 = vld [vmem:[#allocation15 + $0x780] sm:$0xf]  ;;  %v11999_v39 = vperm.slane %v3950_v46, 0  ;;  %v8303_v23 = vor.u32 %v11979_v16, %v8300_v8  ;;  %v8763_v42 = vor.u32 %v9400_v37, %v8762_v44  ;;  %v3940_v8 = vld [vmem:[%s10995_s21 + $0xa8] sm:$0xff] }
 0x576   : > { %5152 = vmatpush.bf16.msrb.mxu3 %v8327_v34  ;;  %v4009_v15 = vmul.f32 %v9878_v29, %v11951_v49  ;;  %9881 = vtanh.f32 %v3974_v30  ;;  %v3935_v21 = vld [vmem:[%s10995_s21 + $0x58] sm:$0xff]  ;;  %v9391_v25 = vld [vmem:[#allocation15 + $0x79c] sm:$0xf0]  ;;  %4023 = vadd.xlane.f32.xlu2 %v4007_v7  ;;  %v8767_v63 = vor.u32 %v9396_v6, %v8764_v53  ;;  %v3977_v34 = vadd.f32 %v3957_v17, %v3937_v12  ;;  %v3938_v37 = vld [vmem:[%s10995_s21 + $0x88] sm:$0xff] }
 0x577   : > { %v3939_v43 = vld [vmem:[%s10995_s21 + $0x98] sm:$0xff]  ;;  %5165 = vmatpush.bf16.msra.mxu0 %v8331_v27  ;;  %9883 = vtanh.f32 %v3976_v33  ;;  %v3951_v28 = vrot.slane %v11878_v52, 5  ;;  %v3975_v9 = vadd.f32 %v3956_v62, %v3935_v21  ;;  %v8723_v26 = vor.u32 %v9391_v25, %v8722_v20  ;;  %v8690_v24 = vld [vmem:[#allocation15 + $0x740] sm:$0xf]  ;;  %v3942_v6 = vld [vmem:[%s10995_s21 + $0xc8] sm:$0xff] }
 0x578   : > { %5178 = vmatpush.bf16.msra.mxu1 %v8335_v5  ;;  %v9387_v18 = vld [vmem:[#allocation15 + $0x784] sm:$0xf]  ;;  %4027 = vadd.xlane.f32.xlu0 %v4009_v15  ;;  %v8730_v0 = vld [vmem:[#allocation15 + $0x788] sm:$0xf]  ;;  %v9388_v60 = vld [vmem:[#allocation15 + $0x78c] sm:$0xf]  ;;  %v3979_v46 = vadd.f32 %v11999_v39, %v3939_v43  ;;  %v12008_v17 = vadd.f32 %v3798_v10, %v11961_v41  ;;  %9885 = vtanh.f32 %v3977_v34  ;;  %v12016_v41 = vadd.f32 %v3793_v50, %v11949_v3 }
 0x579   : > { %v8724_v35 = vld [vmem:[#allocation15 + $0x7a0] sm:$0xf0]  ;;  %5140 = vmatpush.bf16.msrb.mxu2 %v8291_v4  ;;  %v9392_v40 = vld [vmem:[#allocation15 + $0x7a4] sm:$0xf0]  ;;  %v8732_v11 = vld [vmem:[#allocation15 + $0x7a8] sm:$0xf0]  ;;  %v9880_v27 = vpop.eup %9879  ;;  %9887 = vtanh.f32 %v3975_v9  ;;  %v3775_v50 = vadd.f32 %v3774_v13, %v11929_v22  ;;  %v3782_v22 = vadd.f32 %v3781_v1, %v11932_v38  ;;  %v3789_v13 = vadd.f32 %v3788_v54, %v11937_v56 }
 0x57a   : > { %5153 = vmatpush.bf16.msrb.mxu3 %v8295_v2  ;;  %v8727_v16 = vor.u32 %v9387_v18, %v8724_v35  ;;  %v3952_v31 = vrot.slane %v11878_v52, 6  ;;  %v9383_v5 = vld [vmem:[#allocation15 + $0x75c] sm:$0xf0]  ;;  %v9379_v14 = vld [vmem:[#allocation15 + $0x744] sm:$0xf]  ;;  %v8731_v19 = vor.u32 %v9392_v40, %v8730_v0  ;;  %v8735_v58 = vor.u32 %v9388_v60, %v8732_v11 }
 0x57b   : > { %5166 = vmatpush.bf16.msra.mxu0 %v8299_v51  ;;  %v8692_v48 = vld [vmem:[#allocation15 + $0x760] sm:$0xf0]  ;;  %v8698_v4 = vld [vmem:[#allocation15 + $0x748] sm:$0xf]  ;;  %v12011_v44 = vperm.slane %v3951_v28, 0  ;;  %v8691_v7 = vor.u32 %v9383_v5, %v8690_v24  ;;  %9889 = vtanh.f32 %v3979_v46  ;;  %v4010_v53 = vmul.f32 %v9880_v27, %v11951_v49 }
 0x57c   : > { %5179 = vmatpush.bf16.msra.mxu1 %v8303_v23  ;;  %v9882_v62 = vpop.eup %9881  ;;  %v9384_v33 = vld [vmem:[#allocation15 + $0x764] sm:$0xf0]  ;;  %v9380_v12 = vld [vmem:[#allocation15 + $0x74c] sm:$0xf]  ;;  %5141 = vmatmul.bf16.vlgmr.msrb.gmra.mxu2 %v11574_v55  ;;  %v8695_v2 = vor.u32 %v9379_v14, %v8692_v48  ;;  %v12023_v3 = vperm.slane %v3952_v31, 0  ;;  %v3800_v43 = vrot.slane %v12008_v17, 2  ;;  %v3978_v0 = vadd.f32 %v11999_v39, %v3938_v37 }
 0x57d   : > { %5505 = vmatpush.bf16.msra.mxu2 %v8755_v36  ;;  %v9884_v30 = vpop.eup %9883  ;;  %v4011_v10 = vmul.f32 %v9882_v62, %v11951_v49  ;;  %v8700_v29 = vld [vmem:[#allocation15 + $0x768] sm:$0xf0]  ;;  %5154 = vmatmul.bf16.vlgmr.msrb.gmra.mxu3 %v11574_v55  ;;  %v8658_v36 = vld [vmem:[#allocation15 + $0x700] sm:$0xf]  ;;  %v9371_v20 = vld [vmem:[#allocation15 + $0x704] sm:$0xf]  ;;  %v8699_v51 = vor.u32 %v9384_v33, %v8698_v4  ;;  %v3980_v18 = vadd.f32 %v12011_v44, %v3940_v8 }
 0x57e   : > { %5518 = vmatpush.bf16.msra.mxu3 %v8759_v57  ;;  %v4013_v15 = vmul.f32 %v9884_v30, %v11951_v49  ;;  %v9375_v57 = vld [vmem:[#allocation15 + $0x71c] sm:$0xf0]  ;;  %v8660_v21 = vld [vmem:[#allocation15 + $0x720] sm:$0xf0]  ;;  %5167 = vmatmul.bf16.vlgmr.msra.gmra.mxu0 %v11574_v55  ;;  %v8703_v23 = vor.u32 %v9380_v12, %v8700_v29  ;;  %v8666_v25 = vld [vmem:[#allocation15 + $0x708] sm:$0xf]  ;;  %v9886_v34 = vpop.eup %9885  ;;  %v3982_v38 = vadd.f32 %v12023_v3, %v3942_v6 }
 0x57f   : > { %5531 = vmatpush.bf16.msrb.mxu0 %v8763_v42  ;;  %4031 = vadd.xlane.f32.xlu1 %v4011_v10  ;;  %v9376_v35 = vld [vmem:[#allocation15 + $0x724] sm:$0xf0]  ;;  %v9372_v42 = vld [vmem:[#allocation15 + $0x70c] sm:$0xf]  ;;  %v3795_v28 = vrot.slane %v12016_v41, 1  ;;  %v8659_v40 = vor.u32 %v9375_v57, %v8658_v36  ;;  %v8663_v60 = vor.u32 %v9371_v20, %v8660_v21  ;;  %v9888_v1 = vpop.eup %9887  ;;  %9891 = vtanh.f32 %v3980_v18 }
 0x580   : > { %5544 = vmatpush.bf16.msrb.mxu1 %v8767_v63  ;;  %4029 = vadd.xlane.f32.xlu2 %v4010_v53  ;;  %v8668_v63 = vld [vmem:[#allocation15 + $0x728] sm:$0xf0]  ;;  %v8626_v11 = vld [vmem:[#allocation15 + $0x6c0] sm:$0xf]  ;;  %v9363_v56 = vld [vmem:[#allocation15 + $0x6c4] sm:$0xf]  ;;  %v8667_v39 = vor.u32 %v9376_v35, %v8666_v25  ;;  %v4014_v14 = vmul.f32 %v9886_v34, %v11951_v49  ;;  %9893 = vtanh.f32 %v3978_v0  ;;  %v3801_v53 = vadd.f32 %v3800_v43, %v12008_v17 }
 0x581   : > { %5506 = vmatpush.bf16.msra.mxu2 %v8723_v26  ;;  %4035 = vadd.xlane.f32.xlu0 %v4013_v15  ;;  %v9367_v9 = vld [vmem:[#allocation15 + $0x6dc] sm:$0xf0]  ;;  %v8628_v54 = vld [vmem:[#allocation15 + $0x6e0] sm:$0xf0]  ;;  %v9890_v26 = vpop.eup %9889  ;;  %v8634_v24 = vld [vmem:[#allocation15 + $0x6c8] sm:$0xf]  ;;  %9895 = vtanh.f32 %v3982_v38 }
 0x582   : > { %5519 = vmatpush.bf16.msra.mxu3 %v8727_v16  ;;  %5180 = vmatmul.bf16.vlgmr.msra.gmra.mxu1 %v11574_v55  ;;  %v8671_v16 = vor.u32 %v9372_v42, %v8668_v63  ;;  %v9368_v46 = vld [vmem:[#allocation15 + $0x6e4] sm:$0xf0]  ;;  %v3953_v31 = vrot.slane %v11878_v52, 7  ;;  %v3807_v27 = vmul.f32 0.5, %v3775_v50  ;;  %v3808_v5 = vmul.f32 0.5, %v3782_v22 }
 0x583   : > { %5532 = vmatpush.bf16.msrb.mxu0 %v8731_v19  ;;  %v9364_v48 = vld [vmem:[#allocation15 + $0x6cc] sm:$0xf]  ;;  %v8627_v55 = vor.u32 %v9367_v9, %v8626_v11  ;;  %v8631_v19 = vor.u32 %v9363_v56, %v8628_v54  ;;  %v9359_v4 = vld [vmem:[#allocation15 + $0x69c] sm:$0xf0]  ;;  %v3809_v8 = vmul.f32 0.5, %v3789_v13  ;;  %v4012_v52 = vmul.f32 %v9888_v1, %v11951_v49 }
 0x584   : > { %5545 = vmatpush.bf16.msrb.mxu1 %v8735_v58  ;;  %v8636_v62 = vld [vmem:[#allocation15 + $0x6e8] sm:$0xf0]  ;;  %v8594_v58 = vld [vmem:[#allocation15 + $0x680] sm:$0xf]  ;;  %v4016_v30 = vmul.f32 %v9890_v26, %v11951_v49  ;;  %v8635_v10 = vor.u32 %v9368_v46, %v8634_v24  ;;  %v9355_v33 = vld [vmem:[#allocation15 + $0x684] sm:$0xf]  ;;  %v3839_v15 = vsel %vm12916_vm3, %v3807_v27, %v11905_v47 }
 0x585   : > { %5507 = vmatpush.bf16.msra.mxu2 %v8691_v7  ;;  %v8596_v12 = vld [vmem:[#allocation15 + $0x6a0] sm:$0xf0]  ;;  %v3796_v7 = vadd.f32 %v3795_v28, %v12016_v41  ;;  %v8602_v36 = vld [vmem:[#allocation15 + $0x688] sm:$0xf]  ;;  %v12050_v50 = vperm.slane %v3953_v31, 0  ;;  %v8595_v57 = vor.u32 %v9359_v4, %v8594_v58  ;;  %v9892_v25 = vpop.eup %9891  ;;  %v3802_v17 = vrot.slane %v3801_v53, 1 }
 0x586   : > { %5520 = vmatpush.bf16.msra.mxu3 %v8695_v2  ;;  %v3943_v29 = vld [vmem:[%s10995_s21 + $0xd8] sm:$0xff]  ;;  %v8639_v2 = vor.u32 %v9364_v48, %v8636_v62  ;;  %v8599_v18 = vor.u32 %v9355_v33, %v8596_v12  ;;  %v8562_v22 = vld [vmem:[#allocation15 + $0x640] sm:$0xf]  ;;  %v9894_v47 = vpop.eup %9893  ;;  %v4017_v56 = vmul.f32 %v9892_v25, %v11951_v49  ;;  %v3944_v31 = vld [vmem:[%s10995_s21 + $0xe8] sm:$0xff]  ;;  %vm13027_vm13 = vcmask 130112  }
 0x587   : > { %5533 = vmatpush.bf16.msrb.mxu0 %v8699_v51  ;;  %4037 = vadd.xlane.f32.xlu1 %v4014_v14  ;;  %v9360_v37 = vld [vmem:[#allocation15 + $0x6a4] sm:$0xf0]  ;;  %v9356_v20 = vld [vmem:[#allocation15 + $0x68c] sm:$0xf]  ;;  %v3810_v51 = vmul.f32 0.5, %v3796_v7  ;;  %v3983_v13 = vadd.f32 %v12023_v3, %v3943_v29  ;;  %v3803_v9 = vadd.f32 %v3802_v17, %v3801_v53  ;;  %vm13028_vm14 = vmmov %vm13027_vm13 }
 0x588   : > { %5546 = vmatpush.bf16.msrb.mxu1 %v8703_v23  ;;  %v3941_v6 = vld [vmem:[%s10995_s21 + $0xb8] sm:$0xff]  ;;  %4033 = vadd.xlane.f32.xlu2 %v4012_v52  ;;  %v3840_v23 = vsel %vm12915_vm4, %v3808_v5, %v3839_v15  ;;  %v8603_v35 = vor.u32 %v9360_v37, %v8602_v36  ;;  %v9351_v42 = vld [vmem:[#allocation15 + $0x65c] sm:$0xf0]  ;;  %v4015_v5 = vmul.f32 %v9894_v47, %v11951_v49  ;;  %v9401_v4 = vld [vmem:[#allocation15 + $0x7ec] sm:$0xf0] }
 0x589   : > { %5508 = vmatpush.bf16.msra.mxu2 %v8659_v40  ;;  %4041 = vadd.xlane.f32.xlu0 %v4016_v30  ;;  %v8604_v41 = vld [vmem:[#allocation15 + $0x6a8] sm:$0xf0]  ;;  %v3841_v43 = vsel %vm12914_vm5, %v3809_v8, %v3840_v23  ;;  %v9347_v63 = vld [vmem:[#allocation15 + $0x644] sm:$0xf]  ;;  %v3981_v34 = vadd.f32 %v12011_v44, %v3941_v6  ;;  %v9896_v40 = vpop.eup %9895  ;;  %v8570_v11 = vld [vmem:[#allocation15 + $0x648] sm:$0xf]  ;;  %v8563_v44 = vor.u32 %v9351_v42, %v8562_v22  ;;  %9897 = vtanh.f32 %v3983_v13 }
 0x58a   : > { %5521 = vmatpush.bf16.msra.mxu3 %v8663_v60  ;;  %v3945_v21 = vld [vmem:[%s10995_s21 + $0xf8] sm:$0xff]  ;;  %v3842_v28 = vsel %vm12913_vm6, %v3810_v51, %v3841_v43  ;;  %v8607_v60 = vor.u32 %v9356_v20, %v8604_v41  ;;  %v8530_v26 = vld [vmem:[#allocation15 + $0x600] sm:$0xf]  ;;  %v3811_v27 = vmul.f32 0.5, %v3803_v9  ;;  %v4019_v14 = vmul.f32 %v9896_v40, %v11951_v49  ;;  %v9397_v8 = vld [vmem:[#allocation15 + $0x7d4] sm:$0xf] }
 0x58b   : > { %5534 = vmatpush.bf16.msrb.mxu0 %v8667_v39  ;;  %v8564_v0 = vld [vmem:[#allocation15 + $0x660] sm:$0xf0]  ;;  %v9352_v38 = vld [vmem:[#allocation15 + $0x664] sm:$0xf0]  ;;  %v9348_v3 = vld [vmem:[#allocation15 + $0x64c] sm:$0xf]  ;;  %v3985_v1 = vadd.f32 %v12050_v50, %v3945_v21  ;;  %9899 = vtanh.f32 %v3981_v34 }
 0x58c   : > { %5547 = vmatpush.bf16.msrb.mxu1 %v8671_v16  ;;  %v8572_v54 = vld [vmem:[#allocation15 + $0x668] sm:$0xf0]  ;;  %v9343_v39 = vld [vmem:[#allocation15 + $0x61c] sm:$0xf0]  ;;  %v8567_v16 = vor.u32 %v9347_v63, %v8564_v0  ;;  %v9339_v24 = vld [vmem:[#allocation15 + $0x604] sm:$0xf]  ;;  %v3843_v30 = vsel %vm12912_vm7, %v3811_v27, %v3842_v28 }
 0x58d   : > { %5509 = vmatpush.bf16.msra.mxu2 %v8627_v55  ;;  %v8532_v46 = vld [vmem:[#allocation15 + $0x620] sm:$0xf0]  ;;  %v8538_v48 = vld [vmem:[#allocation15 + $0x608] sm:$0xf]  ;;  %v8770_v55 = vld [vmem:[#allocation15 + $0x7d0] sm:$0xf]  ;;  %v8575_v58 = vor.u32 %v9348_v3, %v8572_v54  ;;  %9901 = vtanh.f32 %v3985_v1  ;;  %3845 = vst [vmem:[%s11006_s26] sm:$0xff] %v3843_v30  ;;  %v8531_v29 = vor.u32 %v9343_v39, %v8530_v26 }
 0x58e   : > { %5522 = vmatpush.bf16.msra.mxu3 %v8631_v19  ;;  %v9344_v62 = vld [vmem:[#allocation15 + $0x624] sm:$0xf0]  ;;  %v8571_v19 = vor.u32 %v9352_v38, %v8570_v11  ;;  %v8772_v52 = vld [vmem:[#allocation15 + $0x7f0] sm:$0xf0]  ;;  %v8540_v33 = vld [vmem:[#allocation15 + $0x628] sm:$0xf0]  ;;  %v8535_v7 = vor.u32 %v9339_v24, %v8532_v46  ;;  %v8771_v6 = vor.u32 %v9401_v4, %v8770_v55 }
 0x58f   : > { %5535 = vmatpush.bf16.msrb.mxu0 %v8635_v10  ;;  %4043 = vadd.xlane.f32.xlu1 %v4017_v56  ;;  %v9340_v10 = vld [vmem:[#allocation15 + $0x60c] sm:$0xf]  ;;  %v8778_v12 = vld [vmem:[#allocation15 + $0x7d8] sm:$0xf]  ;;  %v9398_v36 = vld [vmem:[#allocation15 + $0x7dc] sm:$0xf]  ;;  %v8775_v53 = vor.u32 %v9397_v8, %v8772_v52  ;;  %v9898_v20 = vpop.eup %9897  ;;  %v8539_v41 = vor.u32 %v9344_v62, %v8538_v48 }
 0x590   : > { %5548 = vmatpush.bf16.msrb.mxu1 %v8639_v2  ;;  %4039 = vadd.xlane.f32.xlu2 %v4015_v5  ;;  %v9402_v2 = vld [vmem:[#allocation15 + $0x7f4] sm:$0xf0]  ;;  %v8780_v37 = vld [vmem:[#allocation15 + $0x7f8] sm:$0xf0]  ;;  %v8738_v15 = vld [vmem:[#allocation15 + $0x790] sm:$0xf]  ;;  %v8543_v21 = vor.u32 %v9340_v10, %v8540_v33  ;;  %v4020_v28 = vmul.f32 %v9898_v20, %v11951_v49 }
 0x591   : > { %5510 = vmatpush.bf16.msra.mxu2 %v8595_v57  ;;  %4047 = vadd.xlane.f32.xlu0 %v4019_v14  ;;  %v3984_v57 = vadd.f32 %v12050_v50, %v3944_v31  ;;  %v9393_v51 = vld [vmem:[#allocation15 + $0x7ac] sm:$0xf0]  ;;  %v9389_v23 = vld [vmem:[#allocation15 + $0x794] sm:$0xf]  ;;  %v9900_v13 = vpop.eup %9899  ;;  %v8779_v17 = vor.u32 %v9402_v2, %v8778_v12  ;;  %v8783_v43 = vor.u32 %v9398_v36, %v8780_v37  ;;  %v8746_v47 = vld [vmem:[#allocation15 + $0x798] sm:$0xf] }
 0x592   : > { %5523 = vmatpush.bf16.msra.mxu3 %v8599_v18  ;;  %v8740_v25 = vld [vmem:[#allocation15 + $0x7b0] sm:$0xf0]  ;;  %v9394_v42 = vld [vmem:[#allocation15 + $0x7b4] sm:$0xf0]  ;;  %v9390_v63 = vld [vmem:[#allocation15 + $0x79c] sm:$0xf]  ;;  %v8739_v0 = vor.u32 %v9393_v51, %v8738_v15  ;;  %v4018_v40 = vmul.f32 %v9900_v13, %v11951_v49 }
 0x593   : > { %5536 = vmatpush.bf16.msrb.mxu0 %v8603_v35  ;;  %v9997_v18 = vld [vmem:[%s10924_s4] sm:$0xff]  ;;  %v9902_v35 = vpop.eup %9901  ;;  %v8743_v34 = vor.u32 %v9389_v23, %v8740_v25  ;;  %9903 = vtanh.f32 %v3984_v57  ;;  %v8747_v1 = vor.u32 %v9394_v42, %v8746_v47  ;;  %vm13029_vm9 = vmmov %vm13027_vm13 }
 0x594   : > { %5549 = vmatpush.bf16.msrb.mxu1 %v8607_v60  ;;  %v3850_v22 = vadd.f32 %v9997_v18, %v3843_v30  ;;  %v8748_v50 = vld [vmem:[#allocation15 + $0x7b8] sm:$0xf0]  ;;  %v8706_v60 = vld [vmem:[#allocation15 + $0x750] sm:$0xf]  ;;  %v4022_v3 = vmul.f32 %v9902_v35, %v11951_v49  ;;  %v9381_v56 = vld [vmem:[#allocation15 + $0x754] sm:$0xf] }
 0x595   : > { %5511 = vmatpush.bf16.msra.mxu2 %v8563_v44  ;;  %v9385_v11 = vld [vmem:[#allocation15 + $0x76c] sm:$0xf0]  ;;  %v8751_v9 = vor.u32 %v9390_v63, %v8748_v50  ;;  %v8708_v54 = vld [vmem:[#allocation15 + $0x770] sm:$0xf0]  ;;  %v8714_v26 = vld [vmem:[#allocation15 + $0x758] sm:$0xf] }
 0x596   : > { %5524 = vmatpush.bf16.msra.mxu3 %v8567_v16  ;;  %v12074_v38 = vpack.c.bf16 %v3850_v22, %v3850_v22  ;;  %v9386_v39 = vld [vmem:[#allocation15 + $0x774] sm:$0xf0]  ;;  %v9382_v44 = vld [vmem:[#allocation15 + $0x75c] sm:$0xf]  ;;  %v8707_v24 = vor.u32 %v9385_v11, %v8706_v60  ;;  %v8711_v46 = vor.u32 %v9381_v56, %v8708_v54  ;;  %v8674_v31 = vld [vmem:[#allocation15 + $0x710] sm:$0xf] }
 0x597   : > { %5537 = vmatpush.bf16.msrb.mxu0 %v8571_v19  ;;  %4049 = vadd.xlane.f32.xlu1 %v4020_v28  ;;  %v8716_v16 = vld [vmem:[#allocation15 + $0x778] sm:$0xf0]  ;;  %v9377_v27 = vld [vmem:[#allocation15 + $0x72c] sm:$0xf0]  ;;  %v8715_v14 = vor.u32 %v9386_v39, %v8714_v26  ;;  %v9373_v62 = vld [vmem:[#allocation15 + $0x714] sm:$0xf] }
 0x598   : > { %5550 = vmatpush.bf16.msrb.mxu1 %v8575_v58  ;;  %4045 = vadd.xlane.f32.xlu2 %v4018_v40  ;;  %v8719_v48 = vor.u32 %v9382_v44, %v8716_v16  ;;  %v8676_v55 = vld [vmem:[#allocation15 + $0x730] sm:$0xf0]  ;;  %v8682_v19 = vld [vmem:[#allocation15 + $0x718] sm:$0xf]  ;;  %v9374_v4 = vld [vmem:[#allocation15 + $0x71c] sm:$0xf]  ;;  %v8675_v52 = vor.u32 %v9377_v27, %v8674_v31 }
 0x599   : > { %5512 = vmatpush.bf16.msra.mxu2 %v8531_v29  ;;  %4053 = vadd.xlane.f32.xlu0 %v4022_v3  ;;  %v9904_v5 = vpop.eup %9903  ;;  %v9378_v58 = vld [vmem:[#allocation15 + $0x734] sm:$0xf0]  ;;  %v8684_v8 = vld [vmem:[#allocation15 + $0x738] sm:$0xf0]  ;;  %v8679_v10 = vor.u32 %v9373_v62, %v8676_v55  ;;  %v8642_v33 = vld [vmem:[#allocation15 + $0x6d0] sm:$0xf]  ;;  %v12086_v62 = vpop.f32.mrf.mxu0 }
 0x59a   : > { %5525 = vmatpush.bf16.msra.mxu3 %v8535_v7  ;;  %v4021_v30 = vmul.f32 %v9904_v5, %v11951_v49  ;;  %v9369_v12 = vld [vmem:[#allocation15 + $0x6ec] sm:$0xf0]  ;;  %v8683_v29 = vor.u32 %v9378_v58, %v8682_v19  ;;  %v8687_v7 = vor.u32 %v9374_v4, %v8684_v8  ;;  %v9365_v2 = vld [vmem:[#allocation15 + $0x6d4] sm:$0xf]  ;;  %v8650_v37 = vld [vmem:[#allocation15 + $0x6d8] sm:$0xf]  ;;  %v12088_v55 = vpop.f32.mrf.mxu1  ;;  %v12090_v19 = vpop.f32.mrf.mxu2 }
 0x59b   : > { %5538 = vmatpush.bf16.msrb.mxu0 %v8539_v41  ;;  %v8644_v36 = vld [vmem:[#allocation15 + $0x6f0] sm:$0xf0]  ;;  %v8652_v15 = vld [vmem:[#allocation15 + $0x6f8] sm:$0xf0]  ;;  %v8643_v57 = vor.u32 %v9369_v12, %v8642_v33  ;;  %v8610_v41 = vld [vmem:[#allocation15 + $0x690] sm:$0xf]  ;;  %v12092_v58 = vpop.f32.mrf.mxu3 }
 0x59c   : > { %5551 = vmatpush.bf16.msrb.mxu1 %v8543_v21  ;;  %5513 = vmatmul.bf16.vlgmr.msra.gmra.mxu2 %v12074_v38  ;;  %v8647_v20 = vor.u32 %v9365_v2, %v8644_v36  ;;  %v9361_v49 = vld [vmem:[#allocation15 + $0x6ac] sm:$0xf0]  ;;  %v9357_v23 = vld [vmem:[#allocation15 + $0x694] sm:$0xf]  ;;  %v8618_v18 = vld [vmem:[#allocation15 + $0x698] sm:$0xf] }
 0x59d   : > { %5557 = vmatpush.bf16.msrb.mxu2 %v8771_v6  ;;  %5526 = vmatmul.bf16.vlgmr.msra.gmra.mxu3 %v12074_v38  ;;  %v9370_v6 = vld [vmem:[#allocation15 + $0x6f4] sm:$0xf0]  ;;  %v8612_v25 = vld [vmem:[#allocation15 + $0x6b0] sm:$0xf0]  ;;  %v9358_v13 = vld [vmem:[#allocation15 + $0x69c] sm:$0xf] }
 0x59e   : > { %5570 = vmatpush.bf16.msrb.mxu3 %v8775_v53  ;;  %5539 = vmatmul.bf16.vlgmr.msrb.gmra.mxu0 %v12074_v38  ;;  %v9366_v53 = vld [vmem:[#allocation15 + $0x6dc] sm:$0xf]  ;;  %v8651_v21 = vor.u32 %v9370_v6, %v8650_v37  ;;  %v9362_v22 = vld [vmem:[#allocation15 + $0x6b4] sm:$0xf0]  ;;  %v8615_v47 = vor.u32 %v9357_v23, %v8612_v25  ;;  %v8578_v35 = vld [vmem:[#allocation15 + $0x650] sm:$0xf] }
 0x59f   : > { %5583 = vmatpush.bf16.msra.mxu0 %v8779_v17  ;;  %5552 = vmatmul.bf16.vlgmr.msrb.gmra.mxu1 %v12074_v38  ;;  %v8655_v51 = vor.u32 %v9366_v53, %v8652_v15  ;;  %v8620_v17 = vld [vmem:[#allocation15 + $0x6b8] sm:$0xf0]  ;;  %v9353_v42 = vld [vmem:[#allocation15 + $0x66c] sm:$0xf0]  ;;  %v8619_v63 = vor.u32 %v9362_v22, %v8618_v18  ;;  %v8586_v28 = vld [vmem:[#allocation15 + $0x658] sm:$0xf] }
 0x5a0   : > { %5596 = vmatpush.bf16.msra.mxu1 %v8783_v43  ;;  %4051 = vadd.xlane.f32.xlu2 %v4021_v30  ;;  %v8611_v43 = vor.u32 %v9361_v49, %v8610_v41  ;;  %v8623_v50 = vor.u32 %v9358_v13, %v8620_v17  ;;  %v9354_v40 = vld [vmem:[#allocation15 + $0x674] sm:$0xf0]  ;;  %v9350_v60 = vld [vmem:[#allocation15 + $0x65c] sm:$0xf]  ;;  %v8579_v3 = vor.u32 %v9353_v42, %v8578_v35  ;;  %v9345_v56 = vld [vmem:[#allocation15 + $0x62c] sm:$0xf0] }
 0x5a1   : > { %5558 = vmatpush.bf16.msrb.mxu2 %v8739_v0  ;;  %v9349_v0 = vld [vmem:[#allocation15 + $0x654] sm:$0xf]  ;;  %v8588_v11 = vld [vmem:[#allocation15 + $0x678] sm:$0xf0]  ;;  %v8587_v54 = vor.u32 %v9354_v40, %v8586_v28  ;;  %v8554_v16 = vld [vmem:[#allocation15 + $0x618] sm:$0xf]  ;;  %v5118_v30 = vpop.f32.mrf.mxu0 }
 0x5a2   : > { %5571 = vmatpush.bf16.msrb.mxu3 %v8743_v34  ;;  %v8580_v34 = vld [vmem:[#allocation15 + $0x670] sm:$0xf0]  ;;  %v8591_v26 = vor.u32 %v9350_v60, %v8588_v11  ;;  %v8556_v31 = vld [vmem:[#allocation15 + $0x638] sm:$0xf0]  ;;  %v5092_v33 = vpop.f32.mrf.mxu2  ;;  %vm13030_vm12 = vmmov %vm13029_vm9 }
 0x5a3   : > { %5584 = vmatpush.bf16.msra.mxu0 %v8747_v1  ;;  %v8583_v1 = vor.u32 %v9349_v0, %v8580_v34  ;;  %v9341_v39 = vld [vmem:[#allocation15 + $0x614] sm:$0xf]  ;;  %v5105_v12 = vpop.f32.mrf.mxu3  ;;  %vm13031_vm8 = vmmov %vm13029_vm9 }
 0x5a4   : > { %5597 = vmatpush.bf16.msra.mxu1 %v8751_v9  ;;  %v8546_v9 = vld [vmem:[#allocation15 + $0x610] sm:$0xf]  ;;  %v8548_v44 = vld [vmem:[#allocation15 + $0x630] sm:$0xf0]  ;;  %vm13032_vm15 = vmmov %vm13031_vm8 }
 0x5a5   : > { %5559 = vmatpush.bf16.msrb.mxu2 %v8707_v24  ;;  %v9346_v24 = vld [vmem:[#allocation15 + $0x634] sm:$0xf0]  ;;  %v8547_v27 = vor.u32 %v9345_v56, %v8546_v9  ;;  %v8551_v5 = vor.u32 %v9341_v39, %v8548_v44  ;;  %vm13033_vm10 = vmmov %vm13031_vm8 }
 0x5a6   : > { %5572 = vmatpush.bf16.msrb.mxu3 %v8711_v46  ;;  %v9342_v46 = vld [vmem:[#allocation15 + $0x61c] sm:$0xf] }
 0x5a7   : > { %5585 = vmatpush.bf16.msra.mxu0 %v8715_v14  ;;  %v8555_v14 = vor.u32 %v9346_v24, %v8554_v16 }
 0x5a8   : > { %5598 = vmatpush.bf16.msra.mxu1 %v8719_v48  ;;  %v8559_v48 = vor.u32 %v9342_v46, %v8556_v31 }
 0x5a9   : > { %5560 = vmatpush.bf16.msrb.mxu2 %v8675_v52 }
 0x5aa   : > { %5573 = vmatpush.bf16.msrb.mxu3 %v8679_v10  ;;  %v5131_v10 = vpop.f32.mrf.mxu1 }
 0x5ab   : > { %5586 = vmatpush.bf16.msra.mxu0 %v8683_v29 }
 0x5ac   : > { %5599 = vmatpush.bf16.msra.mxu1 %v8687_v7 }
 0x5ad   : > { %5561 = vmatpush.bf16.msrb.mxu2 %v8643_v57 }
 0x5ae   : > { %5574 = vmatpush.bf16.msrb.mxu3 %v8647_v20 }
 0x5af   : > { %5587 = vmatpush.bf16.msra.mxu0 %v8651_v21 }
 0x5b0   : > { %5600 = vmatpush.bf16.msra.mxu1 %v8655_v51 }
 0x5b1   : > { %5562 = vmatpush.bf16.msrb.mxu2 %v8611_v43 }
 0x5b2   : > { %5575 = vmatpush.bf16.msrb.mxu3 %v8615_v47 }
 0x5b3   : > { %5588 = vmatpush.bf16.msra.mxu0 %v8619_v63 }
 0x5b4   : > { %5601 = vmatpush.bf16.msra.mxu1 %v8623_v50 }
 0x5b5   : > { %5563 = vmatpush.bf16.msrb.mxu2 %v8579_v3 }
 0x5b6   : > { %5576 = vmatpush.bf16.msrb.mxu3 %v8583_v1 }
 0x5b7   : > { %5589 = vmatpush.bf16.msra.mxu0 %v8587_v54 }
 0x5b8   : > { %5602 = vmatpush.bf16.msra.mxu1 %v8591_v26 }
 0x5b9   : > { %5564 = vmatpush.bf16.msrb.mxu2 %v8547_v27 }
 0x5ba   : > { %5577 = vmatpush.bf16.msrb.mxu3 %v8551_v5 }
 0x5bb   : > { %5590 = vmatpush.bf16.msra.mxu0 %v8555_v14 }
 0x5bc   : > { %5603 = vmatpush.bf16.msra.mxu1 %v8559_v48  ;;  %5565 = vmatmul.bf16.vlgmr.msrb.gmra.mxu2 %v12074_v38 }
 0x5bd   : > { %5578 = vmatmul.bf16.vlgmr.msrb.gmra.mxu3 %v12074_v38 }
 0x5be   : > { %5591 = vmatmul.bf16.vlgmr.msra.gmra.mxu0 %v12074_v38 }
 0x5bf   : > { %5604 = vmatmul.bf16.vlgmr.msra.gmra.mxu1 %v12074_v38 }
 0x5e8   : > { %v12094_v4 = vpop.xlane.xlu1 %4025 }
 0x5e9   : > { %v12096_v8 = vpop.xlane.xlu2 %4023  ;;  %v4072_v13 = vperm.slane %v12094_v4, %v11085_v45 }
 0x5ea   : > { %v4071_v17 = vperm.slane %v12096_v8, %v11080_v32 }
 0x5eb   : > { %v12098_v52 = vpop.xlane.xlu0 %4027 }
 0x5ec   : > { %v4074_v43 = vperm.slane %v12098_v52, %v11080_v32  ;;  %v4073_v34 = vsel %vm13029_vm9, %v4072_v13, %v4071_v17  ;;  %vm13036_vm9 = vmmov %vm13031_vm8 }
 0x5f2   : > { %v12100_v29 = vpop.xlane.xlu1 %4031 }
 0x5f3   : > { %v12102_v38 = vpop.xlane.xlu2 %4029  ;;  %v4077_v47 = vperm.slane %v12100_v29, %v11080_v32 }
 0x5f4   : > { %v12104_v7 = vpop.xlane.xlu0 %4035  ;;  %v4075_v21 = vperm.slane %v12102_v38, %v11085_v45 }
 0x5f5   : > { %v4080_v28 = vperm.slane %v12104_v7, %v11080_v32 }
 0x5f6   : > { %v4076_v35 = vsel %vm13027_vm13, %v4075_v21, %v4074_v43  ;;  %vm13034_vm13 = vmmov %vm13031_vm8 }
 0x5f7   : > { %v4095_v11 = vsel %vm12918_vm1, %v4076_v35, %v4073_v34 }
 0x5fa   : > { %v12106_v2 = vpop.xlane.xlu1 %4037 }
 0x5fb   : > { %v12108_v36 = vpop.xlane.xlu2 %4033  ;;  %v12110_v37 = vpop.f32.mrf.mxu0  ;;  %v4081_v42 = vperm.slane %v12106_v2, %v11085_v45 }
 0x5fc   : > { %v12112_v6 = vpop.xlane.xlu0 %4041  ;;  %v4078_v25 = vperm.slane %v12108_v36, %v11085_v45 }
 0x5fd   : > { %v4084_v3 = vperm.slane %v12112_v6, %v11085_v45  ;;  %v4082_v1 = vsel %vm13030_vm12, %v4081_v42, %v4080_v28  ;;  %vm13037_vm12 = vmmov %vm13031_vm8 }
 0x5fe   : > { %v4079_v63 = vsel %vm13028_vm14, %v4078_v25, %v4077_v47  ;;  %vm13035_vm14 = vcmask 130048  }
 0x5ff   : > { %v5181_v53 = vpop.f32.mrf.mxu1  ;;  %v12114_v15 = vpop.f32.mrf.mxu2  ;;  %v4096_v9 = vsel %vm12917_vm2, %v4079_v63, %v4095_v11 }
 0x600   : > { %v12116_v57 = vpop.f32.mrf.mxu3  ;;  %v4097_v24 = vsel %vm12916_vm3, %v4082_v1, %v4096_v9 }
 0x602   : > { %v12118_v20 = vpop.xlane.xlu1 %4043 }
 0x603   : > { %v12120_v41 = vpop.xlane.xlu2 %4039  ;;  %v5170_v49 = vpop.f32.mrf.mxu0  ;;  %v4086_v56 = vperm.slane %v12118_v20, %v11080_v32 }
 0x604   : > { %v12126_v18 = vpop.xlane.xlu0 %4047  ;;  %v4083_v50 = vperm.slane %v12120_v41, %v11080_v32 }
 0x605   : > { %v4089_v44 = vperm.slane %v12126_v18, %v11080_v32 }
 0x606   : > { %v4085_v54 = vsel %vm13031_vm8, %v4084_v3, %v4083_v50 }
 0x607   : > { %v5183_v51 = vpop.f32.mrf.mxu1  ;;  %v5144_v23 = vpop.f32.mrf.mxu2  ;;  %v4098_v46 = vsel %vm12915_vm4, %v4085_v54, %v4097_v24 }
 0x608   : > { %v5157_v22 = vpop.f32.mrf.mxu3 }
 0x60a   : > { %v12147_v40 = vpop.xlane.xlu1 %4049 }
 0x60b   : > { %v12142_v0 = vpop.xlane.xlu2 %4045  ;;  %v4090_v26 = vperm.slane %v12147_v40, %v11085_v45 }
 0x60c   : > { %v4087_v60 = vperm.slane %v12142_v0, %v11085_v45  ;;  %v12164_v16 = vpop.xlane.xlu0 %4053 }
 0x60d   : > { %v4091_v27 = vsel %vm13033_vm10, %v4090_v26, %v4089_v44  ;;  %v4093_v14 = vperm.slane %v12164_v16, %v11085_v45  ;;  %vm13039_vm10 = vmmov %vm13031_vm8 }
 0x60e   : > { %v4088_v39 = vsel %vm13032_vm15, %v4087_v60, %v4086_v56  ;;  %vm13038_vm15 = vmmov %vm13031_vm8 }
 0x60f   : > { %v4099_v5 = vsel %vm12914_vm5, %v4088_v39, %v4098_v46 }
 0x610   : > { %v4100_v10 = vsel %vm12913_vm6, %v4091_v27, %v4099_v5 }
 0x613   : > { %v12168_v31 = vpop.xlane.xlu2 %4051 }
 0x614   : > { %v4092_v48 = vperm.slane %v12168_v31, %v11080_v32 }
 0x616   : > { %v4094_v30 = vsel %vm13034_vm13, %v4093_v14, %v4092_v48  ;;  %vm13040_vm13 = vmmov %vm13031_vm8 }
 0x617   : > { %v4101_v33 = vsel %vm12912_vm7, %v4094_v30, %v4100_v10 }
 0x618   : > { %v4103_v12 = vsel %vm13035_vm14, %v4101_v33, -inf  ;;  %vm13041_vm14 = vmmov %vm13031_vm8 }
 0x619   : > { %4104 = vmax.xlane.f32.xlu1 %v4103_v12 }
 0x61b   : > { %v5540_v49 = vpop.f32.mrf.mxu0 }
 0x61c   : > { %v12181_v21 = vadd.f32 %v5540_v49, %v12086_v62  ;;  %v5553_v51 = vpop.f32.mrf.mxu1 }
 0x61d   : > { %v12184_v23 = vadd.f32 %v5553_v51, %v12088_v55 }
 0x61f   : > { %v5514_v25 = vpop.f32.mrf.mxu2 }
 0x620   : > { %v12187_v22 = vadd.f32 %v5514_v25, %v12090_v19  ;;  %v5527_v13 = vpop.f32.mrf.mxu3 }
 0x621   : > { %v12190_v17 = vadd.f32 %v5527_v13, %v12092_v58 }
 0x623   : > { %v5542_v43 = vpop.f32.mrf.mxu0 }
 0x624   : > { %v5555_v47 = vpop.f32.mrf.mxu1 }
 0x627   : > { %v5516_v35 = vpop.f32.mrf.mxu2 }
 0x628   : > { %v5529_v42 = vpop.f32.mrf.mxu3 }
 0x63b   : > { %v5592_v63 = vpop.f32.mrf.mxu0 }
 0x63c   : > { %v5605_v50 = vpop.f32.mrf.mxu1  ;;  %v12193_v62 = vadd.f32 %v5592_v63, %v12110_v37 }
 0x63d   : > { %v12195_v34 = vadd.f32 %v5605_v50, %v5181_v53 }
 0x63f   : > { %v5566_v55 = vpop.f32.mrf.mxu2 }
 0x640   : > { %v12198_v28 = vadd.f32 %v5566_v55, %v12114_v15  ;;  %v5579_v19 = vpop.f32.mrf.mxu3 }
 0x641   : > { %v12201_v60 = vadd.f32 %v5579_v19, %v12116_v57 }
 0x643   : > { %v5594_v58 = vpop.f32.mrf.mxu0 }
 0x644   : > { %v5607_v11 = vpop.f32.mrf.mxu1 }
 0x647   : > { %v5568_v3 = vpop.f32.mrf.mxu2 }
 0x648   : > { %v5581_v1 = vpop.f32.mrf.mxu3 }
 0x68c   : > { %v12203_v9 = vpop.xlane.xlu1 %4104 }
 0x68d   : > { %v4108_v56 = vperm.slane %v12203_v9, 1  ;;  %v4107_v37 = vperm.slane %v12203_v9, 0  ;;  %v4110_v26 = vperm.slane %v12203_v9, 3  ;;  %v4109_v57 = vperm.slane %v12203_v9, 2 }
 0x68e   : > { %v4113_v12 = vperm.slane %v12203_v9, 6  ;;  %v4112_v13 = vperm.slane %v12203_v9, 5  ;;  %v4114_v42 = vperm.slane %v12203_v9, 7 }
 0x68f   : > { %v4125_v53 = vsub.f32 %v12098_v52, %v4108_v56  ;;  %v4124_v54 = vsub.f32 %v12094_v4, %v4107_v37  ;;  %v4123_v15 = vsub.f32 %v12096_v8, %v4107_v37  ;;  %v4129_v46 = vsub.f32 %v12104_v7, %v4110_v26 }
 0x690   : > { %v4126_v27 = vsub.f32 %v12102_v38, %v4108_v56  ;;  %v4127_v52 = vsub.f32 %v12100_v29, %v4109_v57  ;;  %v4111_v4 = vperm.slane %v12203_v9, 4  ;;  %v4128_v29 = vsub.f32 %v12108_v36, %v4109_v57 }
 0x691   : > { %v4143_v39 = vmul.f32 1.442695, %v4125_v53  ;;  %v4141_v44 = vmul.f32 1.442695, %v4124_v54  ;;  %v4139_v24 = vmul.f32 1.442695, %v4123_v15  ;;  %v4130_v7 = vsub.f32 %v12106_v2, %v4110_v26 }
 0x692   : > { %v4151_v5 = vmul.f32 1.442695, %v4129_v46  ;;  %v4145_v8 = vmul.f32 1.442695, %v4126_v27  ;;  %v4147_v48 = vmul.f32 1.442695, %v4127_v52  ;;  %v4132_v38 = vsub.f32 %v12112_v6, %v4111_v4 }
 0x693   : > { %9905 = vpow2.f32 %v4143_v39  ;;  %v4149_v49 = vmul.f32 1.442695, %v4128_v29  ;;  %v4153_v25 = vmul.f32 1.442695, %v4130_v7  ;;  %v4135_v2 = vsub.f32 %v12126_v18, %v4113_v12 }
 0x694   : > { %9907 = vpow2.f32 %v4141_v44  ;;  %v4157_v33 = vmul.f32 1.442695, %v4132_v38  ;;  %v4131_v36 = vsub.f32 %v12120_v41, %v4111_v4  ;;  %v4133_v47 = vsub.f32 %v12118_v20, %v4112_v13 }
 0x695   : > { %9909 = vpow2.f32 %v4139_v24  ;;  %v4163_v35 = vmul.f32 1.442695, %v4135_v2  ;;  %v4138_v41 = vsub.f32 %v12164_v16, %v4114_v42  ;;  %v4134_v20 = vsub.f32 %v12142_v0, %v4112_v13 }
 0x696   : > { %9911 = vpow2.f32 %v4151_v5  ;;  %v4155_v63 = vmul.f32 1.442695, %v4131_v36  ;;  %v4159_v55 = vmul.f32 1.442695, %v4133_v47  ;;  %v4136_v58 = vsub.f32 %v12147_v40, %v4113_v12 }
 0x697   : > { %9913 = vpow2.f32 %v4145_v8  ;;  %v4169_v11 = vmul.f32 1.442695, %v4138_v41  ;;  %v4161_v3 = vmul.f32 1.442695, %v4134_v20  ;;  %v4137_v0 = vsub.f32 %v12168_v31, %v4114_v42 }
 0x698   : > { %9915 = vpow2.f32 %v4147_v48  ;;  %v4165_v9 = vmul.f32 1.442695, %v4136_v58 }
 0x699   : > { %v12216_v14 = vpop.eup %9905  ;;  %9917 = vpow2.f32 %v4157_v33  ;;  %v4167_v40 = vmul.f32 1.442695, %v4137_v0 }
 0x69a   : > { %v12218_v30 = vpop.eup %9907  ;;  %4194 = vperm.xlu1 %9746, %v12216_v14   ;;  %9919 = vpow2.f32 %v4149_v49 }
 0x69b   : > { %v12221_v10 = vpop.eup %9909  ;;  %4191 = vperm.xlu0 %9745, %v12218_v30   ;;  %9921 = vpow2.f32 %v4153_v25 }
 0x69c   : > { %4188 = vperm.xlu2 %9744, %v12221_v10   ;;  %v12229_v51 = vpop.eup %9911  ;;  %9923 = vpow2.f32 %v4163_v35 }
 0x69d   : > { %v12232_v43 = vpop.eup %9913  ;;  %9925 = vpow2.f32 %v4155_v63 }
 0x69e   : > { %v12235_v6 = vpop.eup %9915  ;;  %9927 = vpow2.f32 %v4159_v55 }
 0x69f   : > { %v12243_v50 = vpop.eup %9917  ;;  %9929 = vpow2.f32 %v4169_v11 }
 0x6a0   : > { %v12245_v19 = vpop.eup %9919  ;;  %9931 = vpow2.f32 %v4161_v3 }
 0x6a1   : > { %v12248_v18 = vpop.eup %9921  ;;  %9933 = vpow2.f32 %v4165_v9 }
 0x6a2   : > { %4206 = vperm.xlu1 %9746, %v12229_v51   ;;  %v12255_v1 = vpop.eup %9923  ;;  %9935 = vpow2.f32 %v4167_v40 }
 0x6a3   : > { %4197 = vperm.xlu0 %9745, %v12232_v43   ;;  %v12257_v56 = vpop.eup %9925 }
 0x6a4   : > { %4200 = vperm.xlu2 %9744, %v12235_v6   ;;  %v12260_v37 = vpop.eup %9927 }
 0x6a5   : > { %v12265_v16 = vpop.eup %9929 }
 0x6a6   : > { %v12267_v53 = vpop.eup %9931 }
 0x6a7   : > { %v12270_v54 = vpop.eup %9933 }
 0x6a8   : > { %v12274_v15 = vpop.eup %9935 }
 0x6aa   : > { %4215 = vperm.xlu1 %9746, %v12243_v50  }
 0x6ab   : > { %4203 = vperm.xlu0 %9745, %v12245_v19  }
 0x6ac   : > { %4209 = vperm.xlu2 %9744, %v12248_v18  }
 0x6b2   : > { %4224 = vperm.xlu1 %9746, %v12255_v1  }
 0x6b3   : > { %4212 = vperm.xlu0 %9745, %v12257_v56  }
 0x6b4   : > { %4218 = vperm.xlu2 %9744, %v12260_v37  }
 0x6ba   : > { %4233 = vperm.xlu1 %9746, %v12265_v16  }
 0x6bb   : > { %4221 = vperm.xlu0 %9745, %v12267_v53  }
 0x6bc   : > { %4227 = vperm.xlu2 %9744, %v12270_v54  }
 0x6c3   : > { %4230 = vperm.xlu0 %9745, %v12274_v15  }
 0x6f6   : > { %v4189_v31 = vpop.permute.xlu2 %4188 }
 0x6f7   : > { %v4235_v12 = vperm.slane %v4189_v31, %v11080_v32 }
 0x6fe   : > { %v4201_v39 = vpop.permute.xlu2 %4200 }
 0x6ff   : > { %v4241_v33 = vperm.slane %v4201_v39, %v11080_v32 }
 0x706   : > { %v4210_v27 = vpop.permute.xlu2 %4209 }
 0x707   : > { %v4245_v55 = vperm.slane %v4210_v27, %v11085_v45 }
 0x70c   : > { %v4195_v26 = vpop.permute.xlu1 %4194 }
 0x70d   : > { %v4192_v57 = vpop.permute.xlu0 %4191  ;;  %v4238_v29 = vperm.slane %v4195_v26, %v11080_v32 }
 0x70e   : > { %v4219_v4 = vpop.permute.xlu2 %4218  ;;  %v4236_v7 = vperm.slane %v4192_v57, %v11085_v45 }
 0x70f   : > { %v4250_v41 = vperm.slane %v4219_v4, %v11080_v32 }
 0x710   : > { %v4237_v36 = vsel %vm13031_vm8, %v4236_v7, %v4235_v12 }
 0x714   : > { %v4207_v44 = vpop.permute.xlu1 %4206 }
 0x715   : > { %v4198_v24 = vpop.permute.xlu0 %4197  ;;  %v4244_v47 = vperm.slane %v4207_v44, %v11080_v32 }
 0x716   : > { %v4239_v8 = vperm.slane %v4198_v24, %v11085_v45  ;;  %v4228_v3 = vpop.permute.xlu2 %4227 }
 0x717   : > { %v4246_v11 = vsel %vm13039_vm10, %v4245_v55, %v4244_v47  ;;  %v4254_v57 = vperm.slane %v4228_v3, %v11085_v45 }
 0x718   : > { %v4240_v49 = vsel %vm13036_vm9, %v4239_v8, %v4238_v29  ;;  %vm13042_vm9 = vmmov %vm13031_vm8 }
 0x719   : > { %v4259_v42 = vsel %vm12918_vm1, %v4240_v49, %v4237_v36 }
 0x71c   : > { %v4216_v52 = vpop.permute.xlu1 %4215 }
 0x71d   : > { %v4204_v46 = vpop.permute.xlu0 %4203  ;;  %v4248_v63 = vperm.slane %v4216_v52, %v11085_v45 }
 0x71e   : > { %v4242_v48 = vperm.slane %v4204_v46, %v11085_v45 }
 0x720   : > { %v4243_v25 = vsel %vm13037_vm12, %v4242_v48, %v4241_v33  ;;  %vm13043_vm12 = vcmask 130048  }
 0x721   : > { %v4260_v20 = vsel %vm12917_vm2, %v4243_v25, %v4259_v42 }
 0x722   : > { %v4261_v40 = vsel %vm12916_vm3, %v4246_v11, %v4260_v20 }
 0x724   : > { %v4225_v38 = vpop.permute.xlu1 %4224 }
 0x725   : > { %v4213_v5 = vpop.permute.xlu0 %4212  ;;  %v4253_v0 = vperm.slane %v4225_v38, %v11080_v32 }
 0x726   : > { %v4247_v13 = vperm.slane %v4213_v5, %v11080_v32 }
 0x727   : > { %v4255_v27 = vsel %vm13041_vm14, %v4254_v57, %v4253_v0 }
 0x728   : > { %v4249_v58 = vsel %vm13038_vm15, %v4248_v63, %v4247_v13 }
 0x729   : > { %v4262_v26 = vsel %vm12915_vm4, %v4249_v58, %v4261_v40 }
 0x72c   : > { %v4234_v31 = vpop.permute.xlu1 %4233 }
 0x72d   : > { %v4222_v2 = vpop.permute.xlu0 %4221  ;;  %v4257_v24 = vperm.slane %v4234_v31, %v11085_v45 }
 0x72e   : > { %v4251_v35 = vperm.slane %v4222_v2, %v11085_v45 }
 0x730   : > { %v4252_v9 = vsel %vm13040_vm13, %v4251_v35, %v4250_v41 }
 0x731   : > { %v4263_v44 = vsel %vm12914_vm5, %v4252_v9, %v4262_v26 }
 0x732   : > { %v4264_v5 = vsel %vm12913_vm6, %v4255_v27, %v4263_v44 }
 0x735   : > { %v4231_v39 = vpop.permute.xlu0 %4230 }
 0x736   : > { %v4256_v46 = vperm.slane %v4231_v39, %v11080_v32 }
 0x738   : > { %v4258_v52 = vsel %vm13042_vm9, %v4257_v24, %v4256_v46 }
 0x739   : > { %v4265_v4 = vsel %vm12912_vm7, %v4258_v52, %v4264_v5 }
 0x73a   : > { %v4267_v8 = vsel %vm13043_vm12, %v4265_v4, 0.0 }
 0x73b   : > { %4268 = vadd.xlane.f32.xlu2 %v4267_v8 }
 0x7ae   : > { %v12309_v48 = vpop.xlane.xlu2 %4268 }
 0x7af   : > { %v4271_v38 = vperm.slane %v12309_v48, 0  ;;  %v4272_v29 = vperm.slane %v12309_v48, 1  ;;  %v12314_v45 = vperm.slane %v12309_v48, 2  ;;  %v4276_v32 = vperm.slane %v12309_v48, 5 }
 0x7b0   : > { %v12319_v33 = vperm.slane %v12309_v48, 3  ;;  %v12327_v58 = vperm.slane %v12309_v48, 4 }
 0x7b1   : > { %9937 = vrcp.f32 %v4271_v38  ;;  %v4296_v36 = vand.u32 2147483647, %v4271_v38  ;;  %v4298_v47 = vand.u32 2147483648, %v4271_v38  ;;  %v4376_v11 = vand.u32 2147483647, %v4276_v32 }
 0x7b2   : > { %9939 = vrcp.f32 %v4272_v29  ;;  %vm4292_vm15 = vweird.f32 %v4271_v38  ;;  %v4378_v0 = vand.u32 2147483648, %v4276_v32  ;;  %v4314_v46 = vand.u32 2147483648, %v4272_v29 }
 0x7b3   : > { %9941 = vrcp.f32 %v12314_v45  ;;  %vm4297_vm13 = vcmp.eq.f32.partialorder %v4296_v36, 8.507059e+37  ;;  %v4299_v40 = vor.u32 1.1754944e-38, %v4298_v47  ;;  %vm4308_vm12 = vweird.f32 %v4272_v29 }
 0x7b4   : > { %9943 = vrcp.f32 %v4276_v32  ;;  %v4312_v5 = vand.u32 2147483647, %v4272_v29 }
 0x7b5   : > { %9945 = vrcp.f32 %v12319_v33 }
 0x7b6   : > { %9947 = vrcp.f32 %v12327_v58 }
 0x7b7   : > { %v9938_v7 = vpop.eup %9937 }
 0x7b8   : > { %v9940_v12 = vpop.eup %9939  ;;  %v4288_v49 = vmul.f32 %v9938_v7, %v4271_v38  ;;  %vm4293_vm8 = vweird.f32 %v9938_v7  ;;  %v4379_v38 = vor.u32 1.1754944e-38, %v4378_v0 }
 0x7b9   : > { %v12321_v25 = vpop.eup %9941  ;;  %v4304_v13 = vmul.f32 %v9940_v12, %v4272_v29  ;;  %vm4294_vm10 = vmor %vm4292_vm15, %vm4293_vm8  ;;  %vm4309_vm14 = vweird.f32 %v9940_v12  ;;  %vm4372_vm8 = vweird.f32 %v4276_v32 }
 0x7ba   : > { %v4289_v2 = vsub.f32 1.0, %v4288_v49  ;;  %v9944_v42 = vpop.eup %9943  ;;  %v4320_v55 = vmul.f32 %v12321_v25, %v12314_v45  ;;  %vm12334_vm15 = vmor %vm4308_vm12, %vm4309_vm14  ;;  %v4315_v49 = vor.u32 1.1754944e-38, %v4314_v46  ;;  %vm4313_vm14 = vcmp.eq.f32.partialorder %v4312_v5, 8.507059e+37 }
 0x7bb   : > { %v4305_v35 = vsub.f32 1.0, %v4304_v13  ;;  %v4368_v41 = vmul.f32 %v9944_v42, %v4276_v32  ;;  %v12329_v39 = vpop.eup %9945  ;;  %vm4373_vm9 = vweird.f32 %v9944_v42  ;;  %v12346_v13 = vperm.slane %v12309_v48, 6 }
 0x7bc   : > { %v4290_v63 = vmul.f32 %v9938_v7, %v4289_v2  ;;  %v4321_v57 = vsub.f32 1.0, %v4320_v55  ;;  %vm4324_vm12 = vweird.f32 %v12314_v45 }
 0x7bd   : > { %v4306_v20 = vmul.f32 %v9940_v12, %v4305_v35  ;;  %v4369_v9 = vsub.f32 1.0, %v4368_v41  ;;  %v9948_v35 = vpop.eup %9947  ;;  %v4328_v41 = vand.u32 2147483647, %v12314_v45  ;;  %9949 = vrcp.f32 %v12346_v13 }
 0x7be   : > { %v4291_v3 = vadd.f32 %v9938_v7, %v4290_v63 }
 0x7bf   : > { %v4307_v26 = vadd.f32 %v9940_v12, %v4306_v20  ;;  %v4370_v44 = vmul.f32 %v9944_v42, %v4369_v9 }
 0x7c0   : > { %v4295_v31 = vsel %vm4294_vm10, %v9938_v7, %v4291_v3  ;;  %vm4374_vm10 = vmor %vm4372_vm8, %vm4373_vm9  ;;  %vm4325_vm9 = vweird.f32 %v12321_v25 }
 0x7c1   : > { %v4300_v24 = vsel %vm4297_vm13, %v4299_v40, %v4295_v31  ;;  %v4371_v4 = vadd.f32 %v9944_v42, %v4370_v44  ;;  %v4311_v7 = vsel %vm12334_vm15, %v9940_v12, %v4307_v26  ;;  %vm4377_vm13 = vcmp.eq.f32.partialorder %v4376_v11, 8.507059e+37  ;;  %vm4326_vm8 = vmor %vm4324_vm12, %vm4325_vm9 }
 0x7c2   : > { %v4302_v27 = vmul.f32 %v12218_v30, %v4300_v24  ;;  %v4301_v52 = vmul.f32 %v12221_v10, %v4300_v24  ;;  %v4322_v30 = vmul.f32 %v12321_v25, %v4321_v57  ;;  %v4336_v10 = vmul.f32 %v12329_v39, %v12319_v33 }
 0x7c3   : > { %v4375_v29 = vsel %vm4374_vm10, %v9944_v42, %v4371_v4  ;;  %v4316_v36 = vsel %vm4313_vm14, %v4315_v49, %v4311_v7  ;;  %v4330_v42 = vand.u32 2147483648, %v12314_v45  ;;  %v4352_v11 = vmul.f32 %v9948_v35, %v12327_v58  ;;  %v9950_v0 = vpop.eup %9949 }
 0x7c4   : > { %4422 = vperm.xlu1 %9746, %v4302_v27   ;;  %4417 = vperm.xlu0 %9745, %v4301_v52   ;;  %v12343_v32 = vsel %vm4377_vm13, %v4379_v38, %v4375_v29  ;;  %v4323_v12 = vadd.f32 %v12321_v25, %v4322_v30  ;;  %v4337_v47 = vsub.f32 1.0, %v4336_v10  ;;  %v4318_v63 = vmul.f32 %v12232_v43, %v4316_v36 }
 0x7c5   : > { %v4381_v2 = vmul.f32 %v12260_v37, %v12343_v32  ;;  %v4317_v55 = vmul.f32 %v12216_v14, %v4316_v36  ;;  %v4331_v3 = vor.u32 1.1754944e-38, %v4330_v42  ;;  %vm4329_vm15 = vcmp.eq.f32.partialorder %v4328_v41, 8.507059e+37 }
 0x7c6   : > { %v4327_v37 = vsel %vm4326_vm8, %v12321_v25, %v4323_v12  ;;  %v4338_v20 = vmul.f32 %v12329_v39, %v4337_v47  ;;  %v12362_v43 = vperm.slane %v12309_v48, 7  ;;  %vm4341_vm10 = vweird.f32 %v12329_v39 }
 0x7c7   : > { %4467 = vperm.xlu2 %9744, %v4381_v2   ;;  %v4332_v14 = vsel %vm4329_vm15, %v4331_v3, %v4327_v37  ;;  %v4353_v45 = vsub.f32 1.0, %v4352_v11  ;;  %v4346_v40 = vand.u32 2147483648, %v12319_v33  ;;  %vm4340_vm13 = vweird.f32 %v12319_v33 }
 0x7c8   : > { %v4339_v9 = vadd.f32 %v12329_v39, %v4338_v20  ;;  %v4334_v25 = vmul.f32 %v12245_v19, %v4332_v14  ;;  %v4333_v31 = vmul.f32 %v12235_v6, %v4332_v14  ;;  %v4344_v26 = vand.u32 2147483647, %v12319_v33  ;;  %vm4342_vm14 = vmor %vm4340_vm13, %vm4341_vm10 }
 0x7c9   : > { %9951 = vrcp.f32 %v12362_v43  ;;  %v4354_v57 = vmul.f32 %v9948_v35, %v4353_v45  ;;  %v4384_v44 = vmul.f32 %v9950_v0, %v12346_v13  ;;  %v4347_v24 = vor.u32 1.1754944e-38, %v4346_v40  ;;  %v10000_v40 = vld [vmem:[%s10936_s19 + $0x18] sm:$0xff] }
 0x7ca   : > { %v4343_v48 = vsel %vm4342_vm14, %v12329_v39, %v4339_v9  ;;  %vm4345_vm9 = vcmp.eq.f32.partialorder %v4344_v26, 8.507059e+37  ;;  %vm4357_vm12 = vweird.f32 %v9948_v35  ;;  %v4362_v52 = vand.u32 2147483648, %v12327_v58  ;;  %v9998_v9 = vld [vmem:[%s10936_s19 + $0x8] sm:$0xff] }
 0x7cb   : > { %v4348_v46 = vsel %vm4345_vm9, %v4347_v24, %v4343_v48  ;;  %v4355_v19 = vadd.f32 %v9948_v35, %v4354_v57  ;;  %v4385_v6 = vsub.f32 1.0, %v4384_v44  ;;  %vm4356_vm8 = vweird.f32 %v12327_v58  ;;  %v10002_v26 = vld [vmem:[%s10936_s19 + $0x28] sm:$0xff]  ;;  %v9010_v44 = vld [vmem:[#allocation15 + $0xbc0] sm:$0xf] }
 0x7cc   : > { %4432 = vperm.xlu1 %9746, %v4318_v63   ;;  %4427 = vperm.xlu0 %9745, %v4317_v55   ;;  %v4350_v33 = vmul.f32 %v12248_v18, %v4348_v46  ;;  %v4349_v5 = vmul.f32 %v12229_v51, %v4348_v46  ;;  %v4360_v39 = vand.u32 2147483647, %v12327_v58  ;;  %vm4358_vm15 = vmor %vm4356_vm8, %vm4357_vm12  ;;  %v4363_v7 = vor.u32 1.1754944e-38, %v4362_v52  ;;  %v9527_v24 = vld [vmem:[#allocation15 + $0xbdc] sm:$0xf0] }
 0x7cd   : > { %v4359_v4 = vsel %vm4358_vm15, %v9948_v35, %v4355_v19  ;;  %v4386_v8 = vmul.f32 %v9950_v0, %v4385_v6  ;;  %vm4389_vm13 = vweird.f32 %v9950_v0  ;;  %v4394_v18 = vand.u32 2147483648, %v12346_v13  ;;  %v9523_v19 = vld [vmem:[#allocation15 + $0xbc4] sm:$0xf] }
 0x7ce   : > { %vm4361_vm10 = vcmp.eq.f32.partialorder %v4360_v39, 8.507059e+37  ;;  %vm4388_vm14 = vweird.f32 %v12346_v13  ;;  %v4392_v58 = vand.u32 2147483647, %v12346_v13  ;;  %v4410_v42 = vand.u32 2147483648, %v12362_v43  ;;  %v9012_v6 = vld [vmem:[#allocation15 + $0xbe0] sm:$0xf0] }
 0x7cf   : > { %v9952_v27 = vpop.eup %9951  ;;  %v4364_v30 = vsel %vm4361_vm10, %v4363_v7, %v4359_v4  ;;  %v4387_v10 = vadd.f32 %v9950_v0, %v4386_v8  ;;  %vm4390_vm9 = vmor %vm4388_vm14, %vm4389_vm13  ;;  %v4395_v12 = vor.u32 1.1754944e-38, %v4394_v18  ;;  %vm4404_vm15 = vweird.f32 %v12362_v43  ;;  %v9524_v39 = vld [vmem:[#allocation15 + $0xbcc] sm:$0xf]  ;;  %v10004_v18 = vld [vmem:[%s10936_s19 + $0x38] sm:$0xff] }
 0x7d0   : > { %v4400_v38 = vmul.f32 %v9952_v27, %v12362_v43  ;;  %v4366_v51 = vmul.f32 %v12243_v50, %v4364_v30  ;;  %v4365_v49 = vmul.f32 %v12257_v56, %v4364_v30  ;;  %vm4393_vm12 = vcmp.eq.f32.partialorder %v4392_v58, 8.507059e+37  ;;  %v9020_v4 = vld [vmem:[#allocation15 + $0xbe8] sm:$0xf0] }
 0x7d1   : > { %v4391_v2 = vsel %vm4390_vm9, %v9950_v0, %v4387_v10  ;;  %vm4405_vm8 = vweird.f32 %v9952_v27  ;;  %v4382_v56 = vmul.f32 %v12267_v53, %v12343_v32  ;;  %v4408_v13 = vand.u32 2147483647, %v12362_v43 }
 0x7d2   : > { %v4401_v29 = vsub.f32 1.0, %v4400_v38  ;;  %v4396_v47 = vsel %vm4393_vm12, %v4395_v12, %v4391_v2  ;;  %vm4406_vm10 = vmor %vm4404_vm15, %vm4405_vm8  ;;  %v4411_v55 = vor.u32 1.1754944e-38, %v4410_v42  ;;  %v9011_v46 = vor.u32 %v9527_v24, %v9010_v44  ;;  %v8978_v42 = vld [vmem:[#allocation15 + $0xb80] sm:$0xf]  ;;  %v9512_v24 = vld [vmem:[#allocation15 + $0xb64] sm:$0xf0] }
 0x7d3   : > { %v4397_v50 = vmul.f32 %v12255_v1, %v4396_v47  ;;  %vm4409_vm13 = vcmp.eq.f32.partialorder %v4408_v13, 8.507059e+37  ;;  %v4398_v1 = vmul.f32 %v12270_v54, %v4396_v47  ;;  %v9515_v13 = vld [vmem:[#allocation15 + $0xb84] sm:$0xf] }
 0x7d4   : > { %4442 = vperm.xlu1 %9746, %v4334_v25   ;;  %4437 = vperm.xlu0 %9745, %v4333_v31   ;;  %v4402_v36 = vmul.f32 %v9952_v27, %v4401_v29  ;;  %v10001_v25 = vld [vmem:[%s10936_s19 + $0x10] sm:$0xff]  ;;  %v9023_v29 = vor.u32 %v9524_v39, %v9020_v4 }
 0x7d5   : > { %5962 = vmatpush.bf16.msra.mxu2 %v9011_v46  ;;  %v9508_v46 = vld [vmem:[#allocation15 + $0xb4c] sm:$0xf] }
 0x7d6   : > { %v4403_v35 = vadd.f32 %v9952_v27, %v4402_v36  ;;  %6001 = vmatpush.bf16.msrb.mxu1 %v9023_v29  ;;  %v9499_v29 = vld [vmem:[#allocation15 + $0xb04] sm:$0xf] }
 0x7d8   : > { %v4407_v63 = vsel %vm4406_vm10, %v9952_v27, %v4403_v35  ;;  %v9018_v27 = vld [vmem:[#allocation15 + $0xbc8] sm:$0xf] }
 0x7d9   : > { %v4412_v41 = vsel %vm4409_vm13, %v4411_v55, %v4407_v63  ;;  %v8980_v63 = vld [vmem:[#allocation15 + $0xba0] sm:$0xf0]  ;;  %v8986_v55 = vld [vmem:[#allocation15 + $0xb88] sm:$0xf] }
 0x7da   : > { %v4413_v37 = vmul.f32 %v12274_v15, %v4412_v41  ;;  %v4414_v53 = vmul.f32 %v12265_v16, %v4412_v41  ;;  %v9999_v15 = vld [vmem:[%s10936_s19] sm:$0xff] }
 0x7db   : > { %v10003_v16 = vld [vmem:[%s10936_s19 + $0x20] sm:$0xff] }
 0x7dc   : > { %4452 = vperm.xlu1 %9746, %v4350_v33   ;;  %4447 = vperm.xlu0 %9745, %v4349_v5   ;;  %v9015_v33 = vor.u32 %v9523_v19, %v9012_v6  ;;  %v9528_v5 = vld [vmem:[#allocation15 + $0xbe4] sm:$0xf0]  ;;  %v8956_v19 = vld [vmem:[#allocation15 + $0xb68] sm:$0xf0] }
 0x7dd   : > { %v9019_v10 = vor.u32 %v9528_v5, %v9018_v27  ;;  %v8959_v4 = vor.u32 %v9508_v46, %v8956_v19  ;;  %v9487_v46 = vld [vmem:[#allocation15 + $0xa9c] sm:$0xf0]  ;;  %v9483_v19 = vld [vmem:[#allocation15 + $0xa84] sm:$0xf] }
 0x7de   : > { %5975 = vmatpush.bf16.msra.mxu3 %v9015_v33 }
 0x7df   : > { %5988 = vmatpush.bf16.msrb.mxu0 %v9019_v10 }
 0x7e4   : > { %4462 = vperm.xlu1 %9746, %v4366_v51   ;;  %4457 = vperm.xlu0 %9745, %v4365_v49   ;;  %v10005_v49 = vld [vmem:[%s10936_s19 + $0x30] sm:$0xff] }
 0x7ec   : > { %4477 = vperm.xlu1 %9746, %v4397_v50   ;;  %4472 = vperm.xlu0 %9745, %v4382_v56   ;;  %v9519_v50 = vld [vmem:[#allocation15 + $0xb9c] sm:$0xf0] }
 0x7ed   : > { %v8979_v56 = vor.u32 %v9519_v50, %v8978_v42 }
 0x7ef   : > { %5963 = vmatpush.bf16.msra.mxu2 %v8979_v56 }
 0x7f4   : > { %4487 = vperm.xlu1 %9746, %v4413_v37   ;;  %4482 = vperm.xlu0 %9745, %v4398_v1   ;;  %v8983_v37 = vor.u32 %v9515_v13, %v8980_v63  ;;  %v9520_v1 = vld [vmem:[#allocation15 + $0xba4] sm:$0xf0]  ;;  %v8882_v63 = vld [vmem:[#allocation15 + $0xac0] sm:$0xf] }
 0x7f6   : > { %5976 = vmatpush.bf16.msra.mxu3 %v8983_v37  ;;  %v9491_v37 = vld [vmem:[#allocation15 + $0xac4] sm:$0xf] }
 0x7fc   : > { %4492 = vperm.xlu0 %9745, %v4414_v53   ;;  %v9516_v53 = vld [vmem:[#allocation15 + $0xb8c] sm:$0xf] }
 0x836   : > { %v4423_v32 = vpop.permute.xlu1 %4422  ;;  %v4418_v20 = vpop.permute.xlu0 %4417 }
 0x837   : > { %v4496_v45 = vmul.f32 %v9998_v9, %v4423_v32  ;;  %v4495_v0 = vmul.f32 %v9999_v15, %v4418_v20  ;;  %v8988_v32 = vld [vmem:[#allocation15 + $0xba8] sm:$0xf0]  ;;  %v9511_v15 = vld [vmem:[#allocation15 + $0xb5c] sm:$0xf0] }
 0x838   : > { %v8991_v9 = vor.u32 %v9516_v53, %v8988_v32 }
 0x839   : > { %v4511_v52 = vadd.f32 %v4496_v45, %v4495_v0  ;;  %v8946_v45 = vld [vmem:[#allocation15 + $0xb40] sm:$0xf]  ;;  %v9507_v0 = vld [vmem:[#allocation15 + $0xb44] sm:$0xf] }
 0x83a   : > { %6002 = vmatpush.bf16.msrb.mxu1 %v8991_v9 }
 0x83b   : > { %v4512_v2 = vrot.slane %v4511_v52, 4 }
 0x83d   : > { %v4513_v41 = vadd.f32 %v4512_v2, %v4511_v52  ;;  %v4468_v52 = vpop.permute.xlu2 %4467 }
 0x83e   : > { %v4433_v11 = vpop.permute.xlu1 %4432  ;;  %v4428_v3 = vpop.permute.xlu0 %4427  ;;  %6003 = vmatpush.bf16.msrb.mxu1 %v8959_v4 }
 0x83f   : > { %v4498_v54 = vmul.f32 %v10000_v40, %v4433_v11  ;;  %v4497_v31 = vmul.f32 %v10001_v25, %v4428_v3  ;;  %v4514_v33 = vrot.slane %v4513_v41, 2 }
 0x841   : > { %v4518_v8 = vadd.f32 %v4498_v54, %v4497_v31  ;;  %v10006_v54 = vld [vmem:[%s10936_s19 + $0x48] sm:$0xff]  ;;  %v10007_v31 = vld [vmem:[%s10936_s19 + $0x40] sm:$0xff] }
 0x843   : > { %v4519_v12 = vrot.slane %v4518_v8, 4 }
 0x845   : > { %v4520_v20 = vadd.f32 %v4519_v12, %v4518_v8  ;;  %v9500_v12 = vld [vmem:[#allocation15 + $0xb0c] sm:$0xf] }
 0x846   : > { %v4443_v43 = vpop.permute.xlu1 %4442  ;;  %v4438_v14 = vpop.permute.xlu0 %4437 }
 0x847   : > { %v4500_v48 = vmul.f32 %v10002_v26, %v4443_v43  ;;  %v4499_v57 = vmul.f32 %v10003_v16, %v4438_v14  ;;  %v8987_v14 = vor.u32 %v9520_v1, %v8986_v55  ;;  %v8954_v16 = vld [vmem:[#allocation15 + $0xb48] sm:$0xf]  ;;  %v4521_v5 = vrot.slane %v4520_v20, 2  ;;  %v9495_v55 = vld [vmem:[#allocation15 + $0xadc] sm:$0xf0] }
 0x848   : > { %v8955_v27 = vor.u32 %v9512_v24, %v8954_v16  ;;  %v8850_v24 = vld [vmem:[#allocation15 + $0xa80] sm:$0xf] }
 0x849   : > { %v4525_v38 = vadd.f32 %v4500_v48, %v4499_v57  ;;  %v8948_v48 = vld [vmem:[#allocation15 + $0xb60] sm:$0xf0]  ;;  %5989 = vmatpush.bf16.msrb.mxu0 %v8987_v14  ;;  %v8947_v57 = vor.u32 %v9511_v15, %v8946_v45  ;;  %v12407_v42 = vadd.f32 %v4521_v5, %v4520_v20  ;;  %v8883_v20 = vor.u32 %v9495_v55, %v8882_v63  ;;  %v9496_v45 = vld [vmem:[#allocation15 + $0xae4] sm:$0xf0]  ;;  %v9492_v15 = vld [vmem:[#allocation15 + $0xacc] sm:$0xf] }
 0x84a   : > { %v8951_v44 = vor.u32 %v9507_v0, %v8948_v48  ;;  %v8884_v14 = vld [vmem:[#allocation15 + $0xae0] sm:$0xf0]  ;;  %v8892_v0 = vld [vmem:[#allocation15 + $0xae8] sm:$0xf0]  ;;  %v9488_v5 = vld [vmem:[#allocation15 + $0xaa4] sm:$0xf0] }
 0x84b   : > { %v4526_v47 = vrot.slane %v4525_v38, 4  ;;  %5964 = vmatpush.bf16.msra.mxu2 %v8947_v57  ;;  %v8887_v9 = vor.u32 %v9491_v37, %v8884_v14  ;;  %v9476_v37 = vld [vmem:[#allocation15 + $0xa4c] sm:$0xf] }
 0x84c   : > { %5977 = vmatpush.bf16.msra.mxu3 %v8951_v44 }
 0x84d   : > { %v4527_v11 = vadd.f32 %v4526_v47, %v4525_v38  ;;  %5990 = vmatpush.bf16.msrb.mxu0 %v8955_v27  ;;  %v8924_v47 = vld [vmem:[#allocation15 + $0xb28] sm:$0xf0]  ;;  %v8851_v27 = vor.u32 %v9487_v46, %v8850_v24 }
 0x84e   : > { %v4453_v7 = vpop.permute.xlu1 %4452  ;;  %v4448_v30 = vpop.permute.xlu0 %4447  ;;  %v8927_v13 = vor.u32 %v9500_v12, %v8924_v47  ;;  %v9468_v24 = vld [vmem:[#allocation15 + $0xa0c] sm:$0xf] }
 0x84f   : > { %v4502_v51 = vmul.f32 %v10004_v18, %v4453_v7  ;;  %v4501_v58 = vmul.f32 %v10005_v49, %v4448_v30  ;;  %v4528_v39 = vrot.slane %v4527_v11, 2  ;;  %v8914_v7 = vld [vmem:[#allocation15 + $0xb00] sm:$0xf]  ;;  %v8916_v18 = vld [vmem:[#allocation15 + $0xb20] sm:$0xf0]  ;;  %v10008_v49 = vld [vmem:[%s10936_s19 + $0x50] sm:$0xff] }
 0x850   : > { %v9503_v30 = vld [vmem:[#allocation15 + $0xb1c] sm:$0xf0]  ;;  %v8919_v2 = vor.u32 %v9499_v29, %v8916_v18  ;;  %6004 = vmatpush.bf16.msrb.mxu1 %v8927_v13  ;;  %v9480_v13 = vld [vmem:[#allocation15 + $0xa64] sm:$0xf0]  ;;  %v8796_v46 = vld [vmem:[#allocation15 + $0xa28] sm:$0xf0] }
 0x851   : > { %v4532_v36 = vadd.f32 %v4502_v51, %v4501_v58  ;;  %v8915_v10 = vor.u32 %v9503_v30, %v8914_v7  ;;  %v8922_v51 = vld [vmem:[#allocation15 + $0xb08] sm:$0xf]  ;;  %v4505_v58 = vmul.f32 %v10008_v49, %v4468_v52  ;;  %v12409_v1 = vadd.f32 %v4528_v39, %v4527_v11  ;;  %v8852_v52 = vld [vmem:[#allocation15 + $0xaa0] sm:$0xf0]  ;;  %v8860_v7 = vld [vmem:[#allocation15 + $0xaa8] sm:$0xf0] }
 0x852   : > { %5978 = vmatpush.bf16.msra.mxu3 %v8919_v2  ;;  %v8855_v4 = vor.u32 %v9483_v19, %v8852_v52  ;;  %v8818_v30 = vld [vmem:[#allocation15 + $0xa40] sm:$0xf]  ;;  %v10011_v49 = vld [vmem:[%s10936_s19 + $0x68] sm:$0xff]  ;;  %v9026_v19 = vld [vmem:[#allocation15 + $0xbd0] sm:$0xf] }
 0x853   : > { %v4533_v35 = vrot.slane %v4532_v36, 4  ;;  %5965 = vmatpush.bf16.msra.mxu2 %v8915_v10  ;;  %v4530_v48 = vrot.slane %v12409_v1, 1  ;;  %v10010_v29 = vld [vmem:[%s10936_s19 + $0x60] sm:$0xff]  ;;  %v9529_v52 = vld [vmem:[#allocation15 + $0xbec] sm:$0xf0] }
 0x854   : > { %v9479_v2 = vld [vmem:[#allocation15 + $0xa5c] sm:$0xf0] }
 0x855   : > { %v4534_v40 = vadd.f32 %v4533_v35, %v4532_v36  ;;  %v9504_v36 = vld [vmem:[#allocation15 + $0xb24] sm:$0xf0]  ;;  %v12405_v35 = vadd.f32 %v4514_v33, %v4513_v41  ;;  %v8819_v47 = vor.u32 %v9479_v2, %v8818_v30  ;;  %v9034_v30 = vld [vmem:[#allocation15 + $0xbd8] sm:$0xf] }
 0x856   : > { %v4463_v3 = vpop.permute.xlu1 %4462  ;;  %v4458_v43 = vpop.permute.xlu0 %4457  ;;  %v8923_v56 = vor.u32 %v9504_v36, %v8922_v51  ;;  %v8890_v41 = vld [vmem:[#allocation15 + $0xac8] sm:$0xf]  ;;  %5979 = vmatpush.bf16.msra.mxu3 %v8887_v9  ;;  %v9475_v36 = vld [vmem:[#allocation15 + $0xa44] sm:$0xf] }
 0x857   : > { %v4504_v25 = vmul.f32 %v10006_v54, %v4463_v3  ;;  %v4503_v26 = vmul.f32 %v10007_v31, %v4458_v43  ;;  %v4535_v8 = vrot.slane %v4534_v40, 2  ;;  %v10009_v3 = vld [vmem:[%s10936_s19 + $0x58] sm:$0xff]  ;;  %v8891_v31 = vor.u32 %v9496_v45, %v8890_v41  ;;  %5966 = vmatpush.bf16.msra.mxu2 %v8883_v20  ;;  %v8858_v33 = vld [vmem:[#allocation15 + $0xa88] sm:$0xf]  ;;  %v9471_v41 = vld [vmem:[#allocation15 + $0xa1c] sm:$0xf0] }
 0x858   : > { %5991 = vmatpush.bf16.msrb.mxu0 %v8923_v56  ;;  %v4516_v11 = vrot.slane %v12405_v35, 1  ;;  %v8826_v56 = vld [vmem:[#allocation15 + $0xa48] sm:$0xf]  ;;  %v9467_v20 = vld [vmem:[#allocation15 + $0xa04] sm:$0xf] }
 0x859   : > { %v4539_v6 = vadd.f32 %v4504_v25, %v4503_v26  ;;  %v12411_v53 = vadd.f32 %v4535_v8, %v4534_v40  ;;  %v4523_v40 = vrot.slane %v12407_v42, 1  ;;  %v8895_v26 = vor.u32 %v9492_v15, %v8892_v0  ;;  %v8788_v9 = vld [vmem:[#allocation15 + $0xa20] sm:$0xf0] }
 0x85a   : > { %v8859_v8 = vor.u32 %v9488_v5, %v8858_v33  ;;  %5980 = vmatpush.bf16.msra.mxu3 %v8855_v4  ;;  %v9525_v33 = vld [vmem:[#allocation15 + $0xbd4] sm:$0xf] }
 0x85b   : > { %v4540_v38 = vrot.slane %v4539_v6, 4  ;;  %v4537_v16 = vrot.slane %v12411_v53, 1  ;;  %6005 = vmatpush.bf16.msrb.mxu1 %v8895_v26  ;;  %5967 = vmatpush.bf16.msra.mxu2 %v8851_v27  ;;  %v9472_v26 = vld [vmem:[#allocation15 + $0xa24] sm:$0xf0]  ;;  %v10012_v5 = vld [vmem:[%s10936_s19 + $0x70] sm:$0xff] }
 0x85c   : > { %5992 = vmatpush.bf16.msrb.mxu0 %v8891_v31  ;;  %v8794_v31 = vld [vmem:[#allocation15 + $0xa08] sm:$0xf] }
 0x85d   : > { %v4541_v32 = vadd.f32 %v4540_v38, %v4539_v6  ;;  %v9484_v38 = vld [vmem:[#allocation15 + $0xa8c] sm:$0xf] }
 0x85e   : > { %v4473_v50 = vpop.permute.xlu0 %4472  ;;  %v4478_v54 = vpop.permute.xlu1 %4477  ;;  %v8863_v12 = vor.u32 %v9484_v38, %v8860_v7  ;;  %v9027_v38 = vor.u32 %v9529_v52, %v9026_v19  ;;  %v9514_v19 = vld [vmem:[#allocation15 + $0xb74] sm:$0xf0] }
 0x85f   : > { %v4506_v43 = vmul.f32 %v10009_v3, %v4473_v50  ;;  %v4542_v57 = vrot.slane %v4541_v32, 2  ;;  %v4507_v18 = vmul.f32 %v10010_v29, %v4478_v54  ;;  %v8820_v50 = vld [vmem:[#allocation15 + $0xa60] sm:$0xf0]  ;;  %v8786_v3 = vld [vmem:[#allocation15 + $0xa00] sm:$0xf]  ;;  %5968 = vmatpush.bf16.msra.mxu2 %v8819_v47 }
 0x860   : > { %5993 = vmatpush.bf16.msrb.mxu0 %v8859_v8  ;;  %v8823_v55 = vor.u32 %v9475_v36, %v8820_v50  ;;  %6006 = vmatpush.bf16.msrb.mxu1 %v8863_v12  ;;  %v8799_v8 = vor.u32 %v9468_v24, %v8796_v46  ;;  %v9530_v29 = vld [vmem:[#allocation15 + $0xbf4] sm:$0xf0]  ;;  %v9036_v12 = vld [vmem:[#allocation15 + $0xbf8] sm:$0xf0]  ;;  %v8994_v47 = vld [vmem:[#allocation15 + $0xb90] sm:$0xf]  ;;  %v12431_v50 = vadd.f32 %v4516_v11, %v12405_v35 }
 0x861   : > { %v4546_v25 = vadd.f32 %v4506_v43, %v4505_v58  ;;  %v12418_v10 = vadd.f32 %v4542_v57, %v4541_v32  ;;  %v8828_v32 = vld [vmem:[#allocation15 + $0xa68] sm:$0xf0]  ;;  %v8827_v43 = vor.u32 %v9480_v13, %v8826_v56  ;;  %v8791_v57 = vor.u32 %v9467_v20, %v8788_v9  ;;  %v9518_v20 = vld [vmem:[#allocation15 + $0xb9c] sm:$0xf]  ;;  %v8962_v9 = vld [vmem:[#allocation15 + $0xb50] sm:$0xf] }
 0x862   : > { %v8831_v14 = vor.u32 %v9476_v37, %v8828_v32  ;;  %5981 = vmatpush.bf16.msra.mxu3 %v8823_v55  ;;  %v9035_v36 = vor.u32 %v9530_v29, %v9034_v30  ;;  %v4524_v56 = vadd.f32 %v4523_v40, %v12407_v42  ;;  %v9517_v55 = vld [vmem:[#allocation15 + $0xb94] sm:$0xf]  ;;  %v4531_v35 = vadd.f32 %v4530_v48, %v12409_v1  ;;  %v9004_v40 = vld [vmem:[#allocation15 + $0xbb8] sm:$0xf0]  ;;  %v8970_v46 = vld [vmem:[#allocation15 + $0xb58] sm:$0xf] }
 0x863   : > { %v4547_v44 = vrot.slane %v4546_v25, 4  ;;  %v4544_v45 = vrot.slane %v12418_v10, 1  ;;  %v8996_v37 = vld [vmem:[#allocation15 + $0xbb0] sm:$0xf0]  ;;  %v8938_v29 = vld [vmem:[#allocation15 + $0xb18] sm:$0xf] }
 0x864   : > { %5994 = vmatpush.bf16.msrb.mxu0 %v8827_v43  ;;  %6007 = vmatpush.bf16.msrb.mxu1 %v8831_v14  ;;  %v9002_v14 = vld [vmem:[#allocation15 + $0xb98] sm:$0xf]  ;;  %v8999_v42 = vor.u32 %v9517_v55, %v8996_v37  ;;  %v5610_v24 = vpack.c.bf16 %v4524_v56, %v4524_v56  ;;  %v8898_v56 = vld [vmem:[#allocation15 + $0xad0] sm:$0xf] }
 0x865   : > { %v4548_v6 = vadd.f32 %v4547_v44, %v4546_v25  ;;  %v8787_v25 = vor.u32 %v9471_v41, %v8786_v3  ;;  %v8795_v44 = vor.u32 %v9472_v26, %v8794_v31  ;;  %v9522_v41 = vld [vmem:[#allocation15 + $0xbb4] sm:$0xf0]  ;;  %v9007_v26 = vor.u32 %v9518_v20, %v9004_v40 }
 0x866   : > { %v4483_v39 = vpop.permute.xlu0 %4482  ;;  %v4488_v0 = vpop.permute.xlu1 %4487  ;;  %5982 = vmatpush.bf16.msra.mxu3 %v8791_v57  ;;  %v9003_v11 = vor.u32 %v9522_v41, %v9002_v14  ;;  %v9509_v57 = vld [vmem:[#allocation15 + $0xb54] sm:$0xf]  ;;  %v4545_v1 = vadd.f32 %v4544_v45, %v12418_v10  ;;  %v9505_v10 = vld [vmem:[#allocation15 + $0xb2c] sm:$0xf0] }
 0x867   : > { %v4549_v51 = vrot.slane %v4548_v6, 2  ;;  %v4508_v58 = vmul.f32 %v10011_v49, %v4483_v39  ;;  %v4509_v39 = vmul.f32 %v10012_v5, %v4488_v0  ;;  %5969 = vmatpush.bf16.msra.mxu2 %v8787_v25  ;;  %v9513_v0 = vld [vmem:[#allocation15 + $0xb6c] sm:$0xf0]  ;;  %v5609_v5 = vpack.c.bf16 %v12431_v50, %v12431_v50  ;;  %v9501_v45 = vld [vmem:[#allocation15 + $0xb14] sm:$0xf] }
 0x868   : > { %5995 = vmatpush.bf16.msrb.mxu0 %v8795_v44  ;;  %6008 = vmatpush.bf16.msrb.mxu1 %v8799_v8  ;;  %v8964_v44 = vld [vmem:[#allocation15 + $0xb70] sm:$0xf0]  ;;  %v8971_v8 = vor.u32 %v9514_v19, %v8970_v46 }
 0x869   : > { %v4553_v63 = vadd.f32 %v4508_v58, %v4507_v18  ;;  %v12423_v15 = vadd.f32 %v4549_v51, %v4548_v6  ;;  %v9028_v6 = vld [vmem:[#allocation15 + $0xbf0] sm:$0xf0]  ;;  %v9526_v18 = vld [vmem:[#allocation15 + $0xbdc] sm:$0xf] }
 0x86a   : > { %v9031_v7 = vor.u32 %v9525_v33, %v9028_v6  ;;  %v10013_v58 = vld [vmem:[%s10936_s19 + $0x78] sm:$0xff]  ;;  %v9039_v13 = vor.u32 %v9526_v18, %v9036_v12  ;;  %v8930_v6 = vld [vmem:[#allocation15 + $0xb10] sm:$0xf] }
 0x86b   : > { %v4554_v54 = vrot.slane %v4553_v63, 4  ;;  %v4551_v51 = vrot.slane %v12423_v15, 1  ;;  %6014 = vmatpush.bf16.msrb.mxu2 %v9027_v38  ;;  %v8972_v33 = vld [vmem:[#allocation15 + $0xb78] sm:$0xf0]  ;;  %v9506_v18 = vld [vmem:[#allocation15 + $0xb34] sm:$0xf0] }
 0x86c   : > { %6027 = vmatpush.bf16.msrb.mxu3 %v9031_v7  ;;  %6040 = vmatpush.bf16.msra.mxu0 %v9035_v36  ;;  %v8940_v36 = vld [vmem:[#allocation15 + $0xb38] sm:$0xf0]  ;;  %v8939_v37 = vor.u32 %v9506_v18, %v8938_v29  ;;  %v9485_v46 = vld [vmem:[#allocation15 + $0xa94] sm:$0xf] }
 0x86d   : > { %v4555_v27 = vadd.f32 %v4554_v54, %v4553_v63  ;;  %v9521_v63 = vld [vmem:[#allocation15 + $0xbac] sm:$0xf0]  ;;  %v4538_v54 = vadd.f32 %v4537_v16, %v12411_v53  ;;  %6053 = vmatpush.bf16.msra.mxu1 %v9039_v13  ;;  %v4552_v48 = vadd.f32 %v4551_v51, %v12423_v15  ;;  %v8963_v53 = vor.u32 %v9513_v0, %v8962_v9  ;;  %v8932_v15 = vld [vmem:[#allocation15 + $0xb30] sm:$0xf0]  ;;  %v9494_v9 = vld [vmem:[#allocation15 + $0xadc] sm:$0xf] }
 0x86e   : > { %v4493_v4 = vpop.permute.xlu0 %4492  ;;  %v8995_v43 = vor.u32 %v9521_v63, %v8994_v47  ;;  %v8967_v16 = vor.u32 %v9509_v57, %v8964_v44  ;;  %v5626_v51 = vunpack.c.l.b16 %v5610_v24  ;;  %v8931_v47 = vor.u32 %v9505_v10, %v8930_v6  ;;  %v8908_v0 = vld [vmem:[#allocation15 + $0xaf8] sm:$0xf0]  ;;  %v8866_v57 = vld [vmem:[#allocation15 + $0xa90] sm:$0xf]  ;;  %v8868_v19 = vld [vmem:[#allocation15 + $0xab0] sm:$0xf0] }
 0x86f   : > { %v4556_v49 = vrot.slane %v4555_v27, 2  ;;  %v4510_v2 = vmul.f32 %v10013_v58, %v4493_v4  ;;  %v5612_v38 = vpack.c.bf16 %v4538_v54, %v4538_v54  ;;  %v5614_v58 = vpack.c.bf16 %v4552_v48, %v4552_v48  ;;  %v9489_v48 = vld [vmem:[#allocation15 + $0xaac] sm:$0xf0]  ;;  %v9490_v6 = vld [vmem:[#allocation15 + $0xab4] sm:$0xf0] }
 0x870   : > { %6015 = vmatpush.bf16.msrb.mxu2 %v8995_v43  ;;  %6028 = vmatpush.bf16.msrb.mxu3 %v8999_v42  ;;  %v8935_v50 = vor.u32 %v9501_v45, %v8932_v15  ;;  %v5625_v13 = vunpack.c.l.b16 %v5609_v5  ;;  %v8900_v43 = vld [vmem:[#allocation15 + $0xaf0] sm:$0xf0]  ;;  %v9498_v42 = vld [vmem:[#allocation15 + $0xaf4] sm:$0xf0]  ;;  %v9486_v10 = vld [vmem:[#allocation15 + $0xa9c] sm:$0xf] }
 0x871   : > { %v4557_v32 = vadd.f32 %v4556_v49, %v4555_v27  ;;  %v4560_v3 = vadd.f32 %v4510_v2, %v4509_v39  ;;  %v9510_v27 = vld [vmem:[#allocation15 + $0xb5c] sm:$0xf]  ;;  %v5611_v39 = vpack.c.bf16 %v4531_v35, %v4531_v35  ;;  %6041 = vmatpush.bf16.msra.mxu0 %v9003_v11  ;;  %6054 = vmatpush.bf16.msra.mxu1 %v9007_v26  ;;  %v5628_v14 = vunpack.c.l.b16 %v5612_v38  ;;  %v8906_v35 = vld [vmem:[#allocation15 + $0xad8] sm:$0xf]  ;;  %v8834_v15 = vld [vmem:[#allocation15 + $0xa50] sm:$0xf] }
 0x872   : > { %v8975_v30 = vor.u32 %v9510_v27, %v8972_v33  ;;  %v5613_v49 = vpack.c.bf16 %v4545_v1, %v4545_v1  ;;  %v9502_v2 = vld [vmem:[#allocation15 + $0xb1c] sm:$0xf]  ;;  %v5633_v11 = vsel %vm12918_vm1, %v5626_v51, %v5625_v13  ;;  %v5630_v54 = vunpack.c.l.b16 %v5614_v58  ;;  %v8874_v33 = vld [vmem:[#allocation15 + $0xa98] sm:$0xf]  ;;  %v8836_v29 = vld [vmem:[#allocation15 + $0xa70] sm:$0xf0] }
 0x873   : > { %v4558_v25 = vrot.slane %v4557_v32, 1  ;;  %v4561_v31 = vrot.slane %v4560_v3, 4  ;;  %v5627_v63 = vunpack.c.l.b16 %v5611_v39  ;;  %v8943_v20 = vor.u32 %v9502_v2, %v8940_v36  ;;  %v8876_v45 = vld [vmem:[#allocation15 + $0xab8] sm:$0xf0]  ;;  %v8842_v2 = vld [vmem:[#allocation15 + $0xa58] sm:$0xf] }
 0x874   : > { %6016 = vmatpush.bf16.msrb.mxu2 %v8963_v53  ;;  %6029 = vmatpush.bf16.msrb.mxu3 %v8967_v16  ;;  %v5629_v40 = vunpack.c.l.b16 %v5613_v49  ;;  %v8907_v1 = vor.u32 %v9498_v42, %v8906_v35  ;;  %v8911_v53 = vor.u32 %v9494_v9, %v8908_v0  ;;  %v8875_v49 = vor.u32 %v9490_v6, %v8874_v33  ;;  %v9482_v36 = vld [vmem:[#allocation15 + $0xa74] sm:$0xf0]  ;;  %v8802_v13 = vld [vmem:[#allocation15 + $0xa10] sm:$0xf]  ;;  %v9470_v35 = vld [vmem:[#allocation15 + $0xa1c] sm:$0xf] }
 0x875   : > { %v4562_v52 = vadd.f32 %v4561_v31, %v4560_v3  ;;  %v4559_v4 = vadd.f32 %v4558_v25, %v4557_v32  ;;  %6042 = vmatpush.bf16.msra.mxu0 %v8971_v8  ;;  %v9497_v32 = vld [vmem:[#allocation15 + $0xaec] sm:$0xf0]  ;;  %v9493_v3 = vld [vmem:[#allocation15 + $0xad4] sm:$0xf]  ;;  %6055 = vmatpush.bf16.msra.mxu1 %v8975_v30  ;;  %v5634_v44 = vsel %vm12917_vm2, %v5627_v63, %v5633_v11  ;;  %v8812_v42 = vld [vmem:[#allocation15 + $0xa38] sm:$0xf0] }
 0x876   : > { %v8899_v31 = vor.u32 %v9497_v32, %v8898_v56  ;;  %v8903_v26 = vor.u32 %v9493_v3, %v8900_v43  ;;  %v5635_v27 = vsel %vm12916_vm3, %v5628_v14, %v5634_v44  ;;  %v8871_v8 = vor.u32 %v9485_v46, %v8868_v19  ;;  %v9477_v30 = vld [vmem:[#allocation15 + $0xa54] sm:$0xf]  ;;  %v8844_v56 = vld [vmem:[#allocation15 + $0xa78] sm:$0xf0]  ;;  %v9473_v63 = vld [vmem:[#allocation15 + $0xa2c] sm:$0xf0] }
 0x877   : > { %v4563_v7 = vrot.slane %v4562_v52, 2  ;;  %v5615_v55 = vpack.c.bf16 %v4559_v4, %v4559_v4  ;;  %v5636_v16 = vsel %vm12915_vm4, %v5629_v40, %v5635_v27  ;;  %v8867_v4 = vor.u32 %v9489_v48, %v8866_v57  ;;  %v8810_v43 = vld [vmem:[#allocation15 + $0xa18] sm:$0xf]  ;;  %v12455_v9 = vld [vmem:[#allocation16 + $0x8] sm:$0xff] }
 0x878   : > { %6017 = vmatpush.bf16.msrb.mxu2 %v8931_v47  ;;  %6030 = vmatpush.bf16.msrb.mxu3 %v8935_v50  ;;  %v5637_v5 = vsel %vm12914_vm5, %v5630_v54, %v5636_v16  ;;  %v8879_v58 = vor.u32 %v9486_v10, %v8876_v45  ;;  %v8839_v47 = vor.u32 %v9477_v30, %v8836_v29  ;;  %v9478_v50 = vld [vmem:[#allocation15 + $0xa5c] sm:$0xf]  ;;  %v6079_v0 = vperm.slane %v12455_v9, 2 }
 0x879   : > { %v4564_v12 = vadd.f32 %v4563_v7, %v4562_v52  ;;  %v5631_v24 = vunpack.c.l.b16 %v5615_v55  ;;  %6043 = vmatpush.bf16.msra.mxu0 %v8939_v37  ;;  %6056 = vmatpush.bf16.msra.mxu1 %v8943_v20  ;;  %v9481_v7 = vld [vmem:[#allocation15 + $0xa6c] sm:$0xf0]  ;;  %v9469_v55 = vld [vmem:[#allocation15 + $0xa14] sm:$0xf]  ;;  %v8843_v32 = vor.u32 %v9482_v36, %v8842_v2  ;;  %v8847_v3 = vor.u32 %v9478_v50, %v8844_v56  ;;  %v9474_v20 = vld [vmem:[#allocation15 + $0xa34] sm:$0xf0] }
 0x87a   : > { %v8804_v37 = vld [vmem:[#allocation15 + $0xa30] sm:$0xf0]  ;;  %v8803_v14 = vor.u32 %v9473_v63, %v8802_v13  ;;  %v8811_v11 = vor.u32 %v9474_v20, %v8810_v43  ;;  %v8815_v40 = vor.u32 %v9470_v35, %v8812_v42  ;;  %v6080_v54 = vperm.slane %v12455_v9, 3 }
 0x87b   : > { %v4565_v41 = vrot.slane %v4564_v12, 1  ;;  %v5638_v38 = vsel %vm12913_vm6, %v5631_v24, %v5637_v5  ;;  %v6078_v48 = vperm.slane %v12455_v9, 1 }
 0x87c   : > { %6018 = vmatpush.bf16.msrb.mxu2 %v8899_v31  ;;  %6031 = vmatpush.bf16.msrb.mxu3 %v8903_v26 }
 0x87d   : > { %v4566_v25 = vadd.f32 %v4565_v41, %v4564_v12  ;;  %6044 = vmatpush.bf16.msra.mxu0 %v8907_v1  ;;  %6057 = vmatpush.bf16.msra.mxu1 %v8911_v53  ;;  %v8835_v12 = vor.u32 %v9481_v7, %v8834_v15  ;;  %v8807_v41 = vor.u32 %v9469_v55, %v8804_v37  ;;  %v6077_v1 = vperm.slane %v12455_v9, 0 }
 0x87e   : > { %v6083_v7 = vperm.slane %v12455_v9, 6 }
 0x87f   : > { %v5616_v52 = vpack.c.bf16 %v4566_v25, %v4566_v25 }
 0x880   : > { %6019 = vmatpush.bf16.msrb.mxu2 %v8867_v4  ;;  %6032 = vmatpush.bf16.msrb.mxu3 %v8871_v8 }
 0x881   : > { %v5632_v39 = vunpack.c.l.b16 %v5616_v52  ;;  %6045 = vmatpush.bf16.msra.mxu0 %v8875_v49  ;;  %6058 = vmatpush.bf16.msra.mxu1 %v8879_v58 }
 0x883   : > { %v5639_v18 = vsel %vm12912_vm7, %v5632_v39, %v5638_v38 }
 0x884   : > { %v5640_v51 = vpack.c.b16 %v5639_v18, %v5639_v18  ;;  %6020 = vmatpush.bf16.msrb.mxu2 %v8835_v12  ;;  %6033 = vmatpush.bf16.msrb.mxu3 %v8839_v47  ;;  %v6084_v12 = vperm.slane %v12455_v9, 7 }
 0x885   : > { %6046 = vmatpush.bf16.msra.mxu0 %v8843_v32  ;;  %6059 = vmatpush.bf16.msra.mxu1 %v8847_v3 }
 0x886   : > { %5970 = vmatmul.bf16.vlgmr.msra.gmra.mxu2 %v5640_v51  ;;  %5983 = vmatmul.bf16.vlgmr.msra.gmra.mxu3 %v5640_v51 }
 0x887   : > { %5996 = vmatmul.bf16.vlgmr.msrb.gmra.mxu0 %v5640_v51  ;;  %6009 = vmatmul.bf16.vlgmr.msrb.gmra.mxu1 %v5640_v51 }
 0x888   : > { %6021 = vmatpush.bf16.msrb.mxu2 %v8803_v14  ;;  %6034 = vmatpush.bf16.msrb.mxu3 %v8807_v41 }
 0x889   : > { %6047 = vmatpush.bf16.msra.mxu0 %v8811_v11  ;;  %6060 = vmatpush.bf16.msra.mxu1 %v8815_v40 }
 0x896   : > { %6022 = vmatmul.bf16.vlgmr.msrb.gmra.mxu2 %v5640_v51  ;;  %6035 = vmatmul.bf16.vlgmr.msrb.gmra.mxu3 %v5640_v51 }
 0x897   : > { %6048 = vmatmul.bf16.vlgmr.msra.gmra.mxu0 %v5640_v51  ;;  %6061 = vmatmul.bf16.vlgmr.msra.gmra.mxu1 %v5640_v51 }
 0x904   : > { %v5997_v25 = vpop.f32.mrf.mxu0  ;;  %v6010_v31 = vpop.f32.mrf.mxu1 }
 0x905   : > { %v6068_v26 = vadd.f32 %v5997_v25, %v12181_v21  ;;  %v6069_v57 = vadd.f32 %v6010_v31, %v12184_v23 }
 0x907   : > { %v6095_v44 = vadd.f32 %v6079_v0, %v6068_v26  ;;  %v6096_v24 = vadd.f32 %v6080_v54, %v6069_v57 }
 0x909   : > { %v9042_v46 = vmul.f32 -1.442695, %v6095_v44  ;;  %v9043_v19 = vmul.f32 -1.442695, %v6096_v24  ;;  %v5971_v27 = vpop.f32.mrf.mxu2  ;;  %v5984_v52 = vpop.f32.mrf.mxu3  ;;  %v12507_v44 = vld [vmem:[%s13050_s13 + $0x8] sm:$0xff] }
 0x90a   : > { %v6066_v53 = vadd.f32 %v5971_v27, %v12187_v22  ;;  %v6067_v16 = vadd.f32 %v5984_v52, %v12190_v17 }
 0x90b   : > { %9953 = vpow2.f32 %v9042_v46 }
 0x90c   : > { %9955 = vpow2.f32 %v9043_v19  ;;  %v6093_v33 = vadd.f32 %v6077_v1, %v6066_v53  ;;  %v6094_v21 = vadd.f32 %v6078_v48, %v6067_v16  ;;  %v5999_v6 = vpop.f32.mrf.mxu0  ;;  %v6012_v23 = vpop.f32.mrf.mxu1  ;;  %v6426_v53 = vrot.slane %v12507_v44, 1 }
 0x90d   : > { %v6427_v6 = vrot.slane %v12507_v44, 2  ;;  %v6428_v23 = vrot.slane %v12507_v44, 3 }
 0x90e   : > { %v9040_v5 = vmul.f32 -1.442695, %v6093_v33  ;;  %v9041_v39 = vmul.f32 -1.442695, %v6094_v21 }
 0x910   : > { %9957 = vpow2.f32 %v9040_v5 }
 0x911   : > { %v9954_v4 = vpop.eup %9953  ;;  %9959 = vpow2.f32 %v9041_v39  ;;  %v5973_v8 = vpop.f32.mrf.mxu2 }
 0x912   : > { %v5986_v10 = vpop.f32.mrf.mxu3  ;;  %v9956_v45 = vpop.eup %9955  ;;  %v12465_v15 = vadd.f32 1.0, %v9954_v4  ;;  %v6429_v8 = vrot.slane %v12507_v44, 4 }
 0x913   : > { %v12467_v38 = vadd.f32 1.0, %v9956_v45  ;;  %v6430_v10 = vrot.slane %v12507_v44, 5 }
 0x914   : > { %9961 = vrcp.f32 %v12465_v15  ;;  %v6049_v22 = vpop.f32.mrf.mxu0  ;;  %v6062_v17 = vpop.f32.mrf.mxu1  ;;  %v6164_v51 = vand.u32 2147483647, %v12465_v15  ;;  %v6166_v58 = vand.u32 2147483648, %v12465_v15  ;;  %vm6160_vm14 = vweird.f32 %v12465_v15 }
 0x915   : > { %9963 = vrcp.f32 %v12467_v38  ;;  %v6072_v29 = vadd.f32 %v6049_v22, %v12193_v62  ;;  %v6073_v36 = vadd.f32 %v6062_v17, %v12195_v34  ;;  %v6179_v47 = vand.u32 2147483647, %v12467_v38 }
 0x916   : > { %v9958_v30 = vpop.eup %9957  ;;  %vm6175_vm9 = vweird.f32 %v12467_v38  ;;  %v6181_v13 = vand.u32 2147483648, %v12467_v38  ;;  %vm12490_vm12 = vcmp.eq.f32.partialorder %v6164_v51, 8.507059e+37  ;;  %v6167_v3 = vor.u32 1.1754944e-38, %v6166_v58 }
 0x917   : > { %v9960_v18 = vpop.eup %9959  ;;  %v12474_v49 = vadd.f32 1.0, %v9958_v30  ;;  %v6099_v50 = vadd.f32 %v6083_v7, %v6072_v29  ;;  %v6100_v41 = vadd.f32 %v6084_v12, %v6073_v36  ;;  %vm12498_vm8 = vcmp.eq.f32.partialorder %v6179_v47, 8.507059e+37 }
 0x918   : > { %v12477_v2 = vadd.f32 1.0, %v9960_v18  ;;  %v6182_v54 = vor.u32 1.1754944e-38, %v6181_v13 }
 0x919   : > { %9965 = vrcp.f32 %v12474_v49  ;;  %v12483_v56 = vpop.f32.mrf.mxu2  ;;  %v6136_v37 = vand.u32 2147483648, %v12474_v49  ;;  %v6134_v14 = vand.u32 2147483647, %v12474_v49  ;;  %vm6130_vm10 = vweird.f32 %v12474_v49 }
 0x91a   : > { %v9962_v62 = vpop.eup %9961  ;;  %9967 = vrcp.f32 %v12477_v2  ;;  %v6151_v32 = vand.u32 2147483648, %v12477_v2  ;;  %v6149_v40 = vand.u32 2147483647, %v12477_v2  ;;  %vm6145_vm7 = vweird.f32 %v12477_v2 }
 0x91b   : > { %v9964_v63 = vpop.eup %9963  ;;  %v6156_v34 = vmul.f32 %v9962_v62, %v12465_v15  ;;  %9969 = vtanh.f32 %v6099_v50  ;;  %vm6161_vm15 = vweird.f32 %v9962_v62  ;;  %v6137_v26 = vor.u32 1.1754944e-38, %v6136_v37 }
 0x91c   : > { %v6171_v43 = vmul.f32 %v9964_v63, %v12467_v38  ;;  %v6051_v20 = vpop.f32.mrf.mxu0  ;;  %v6064_v35 = vpop.f32.mrf.mxu1  ;;  %vm6176_vm13 = vweird.f32 %v9964_v63  ;;  %v6152_v57 = vor.u32 1.1754944e-38, %v6151_v32  ;;  %vm12510_vm5 = vcmp.eq.f32.partialorder %v6134_v14, 8.507059e+37  ;;  %vm6162_vm2 = vmor %vm6160_vm14, %vm6161_vm15 }
 0x91d   : > { %v6157_v42 = vsub.f32 1.0, %v6156_v34  ;;  %9971 = vtanh.f32 %v6100_v41  ;;  %vm12515_vm3 = vcmp.eq.f32.partialorder %v6149_v40, 8.507059e+37  ;;  %vm6177_vm1 = vmor %vm6175_vm9, %vm6176_vm13  ;;  %vm13060_vm14 = vcmask 1046534  }
 0x91e   : > { %v6172_v0 = vsub.f32 1.0, %v6171_v43  ;;  %vm13061_vm9 = vcmask 1047559  }
 0x91f   : > { %v9966_v25 = vpop.eup %9965  ;;  %v6158_v31 = vmul.f32 %v9962_v62, %v6157_v42 }
 0x920   : > { %v9968_v24 = vpop.eup %9967  ;;  %v6173_v1 = vmul.f32 %v9964_v63, %v6172_v0  ;;  %v6126_v48 = vmul.f32 %v9966_v25, %v12474_v49  ;;  %vm6131_vm6 = vweird.f32 %v9966_v25 }
 0x921   : > { %v6159_v19 = vadd.f32 %v9962_v62, %v6158_v31  ;;  %v6141_v27 = vmul.f32 %v9968_v24, %v12477_v2  ;;  %vm6146_vm4 = vweird.f32 %v9968_v24  ;;  %v6025_v16 = vpop.f32.mrf.mxu2  ;;  %v9970_v5 = vpop.eup %9969 }
 0x922   : > { %v6174_v33 = vadd.f32 %v9964_v63, %v6173_v1  ;;  %v6127_v21 = vsub.f32 1.0, %v6126_v48  ;;  %v6373_v17 = vrot.slane %v9970_v5, 4  ;;  %v12544_v13 = vperm.slane %v9970_v5, %v11637_v59  ;;  %v12577_v5 = vpop.f32.mrf.mxu3 }
 0x923   : > { %v6163_v39 = vsel %vm6162_vm2, %v9962_v62, %v6159_v19  ;;  %v6142_v4 = vsub.f32 1.0, %v6141_v27  ;;  %v12535_v38 = vpop.eup %9971  ;;  %vm6147_vm2 = vmor %vm6145_vm7, %vm6146_vm4  ;;  %vm13056_vm4 = vcmask 1042434   ;;  %vm13059_vm7 = vcmask 1045509  }
 0x924   : > { %v6168_v45 = vsel %vm12490_vm12, %v6167_v3, %v6163_v39  ;;  %v6178_v15 = vsel %vm6177_vm1, %v9964_v63, %v6174_v33  ;;  %v6128_v22 = vmul.f32 %v9966_v25, %v6127_v21  ;;  %v6374_v12 = vsel %vm3409_vm11, 0.0, %v6373_v17  ;;  %vm6132_vm1 = vmor %vm6130_vm10, %vm6131_vm6 }
 0x925   : > { %v6267_v7 = vrot.slane %v6168_v45, 4  ;;  %v6272_v30 = vperm.slane %v6168_v45, %v11637_v59  ;;  %v6183_v29 = vsel %vm12498_vm8, %v6182_v54, %v6178_v15  ;;  %v6143_v18 = vmul.f32 %v9968_v24, %v6142_v4 }
 0x926   : > { %v6277_v51 = vrot.slane %v6183_v29, 4  ;;  %v6282_v58 = vperm.slane %v6183_v29, %v11637_v59  ;;  %v6129_v36 = vadd.f32 %v9966_v25, %v6128_v22  ;;  %v12555_v43 = vperm.slane %v6374_v12, %v11637_v59 }
 0x927   : > { %v6268_v47 = vsel %vm3409_vm11, 0.0, %v6267_v7  ;;  %v6289_v50 = vrot.slane %v6272_v30, 4  ;;  %v6144_v62 = vadd.f32 %v9968_v24, %v6143_v18  ;;  %v6395_v40 = vrot.slane %v12544_v13, 4 }
 0x928   : > { %v6276_v63 = vperm.slane %v6268_v47, %v11637_v59  ;;  %v6278_v34 = vsel %vm3409_vm11, 0.0, %v6277_v51  ;;  %v6287_v55 = vrot.slane %v6282_v58, 4  ;;  %v6133_v37 = vsel %vm6132_vm1, %v9966_v25, %v6129_v36 }
 0x929   : > { %v6286_v32 = vperm.slane %v6278_v34, %v11637_v59  ;;  %v6138_v49 = vsel %vm12510_vm5, %v6137_v26, %v6133_v37  ;;  %v6148_v3 = vsel %vm6147_vm2, %v9968_v24, %v6144_v62  ;;  %v6407_v25 = vrot.slane %v12555_v43, 4 }
 0x92a   : > { %v6301_v14 = vrot.slane %v6276_v63, 4  ;;  %v6215_v41 = vrot.slane %v6138_v49, 4  ;;  %v6220_v20 = vperm.slane %v6138_v49, %v11637_v59  ;;  %v6153_v35 = vsel %vm12515_vm3, %v6152_v57, %v6148_v3 }
 0x92b   : > { %v6299_v42 = vrot.slane %v6286_v32, 4  ;;  %v6225_v11 = vrot.slane %v6153_v35, 4  ;;  %v6230_v2 = vperm.slane %v6153_v35, %v11637_v59  ;;  %v6288_v31 = vsel %vm3409_vm11, %v6287_v55, %v6272_v30 }
 0x92c   : > { %v6216_v0 = vsel %vm3409_vm11, 0.0, %v6215_v41  ;;  %v6237_v54 = vrot.slane %v6220_v20, 4  ;;  %v6290_v57 = vsel %vm3409_vm11, %v6282_v58, %v6289_v50  ;;  %v6294_v19 = vperm.slane %v6288_v31, %v11720_v61 }
 0x92d   : > { %v6224_v26 = vperm.slane %v6216_v0, %v11637_v59  ;;  %v6226_v24 = vsel %vm3409_vm11, 0.0, %v6225_v11  ;;  %v6235_v1 = vrot.slane %v6230_v2, 4  ;;  %v6298_v27 = vperm.slane %v6290_v57, %v11720_v61 }
 0x92e   : > { %v6234_v48 = vperm.slane %v6226_v24, %v11637_v59  ;;  %v6238_v46 = vsel %vm3409_vm11, %v6230_v2, %v6237_v54  ;;  %v6300_v21 = vsel %vm3409_vm11, %v6299_v42, %v6276_v63  ;;  %v6302_v45 = vsel %vm3409_vm11, %v6286_v32, %v6301_v14  ;;  %v6038_v54 = vpop.f32.mrf.mxu3 }
 0x92f   : > { %v6249_v52 = vrot.slane %v6224_v26, 4  ;;  %v6236_v16 = vsel %vm3409_vm11, %v6235_v1, %v6220_v20  ;;  %v12574_v33 = vperm.slane %v6238_v46, %v11720_v61  ;;  %v6306_v15 = vperm.slane %v6300_v21, %v11720_v61 }
 0x930   : > { %v6247_v39 = vrot.slane %v6234_v48, 4  ;;  %v12580_v4 = vperm.slane %v6236_v16, %v11720_v61  ;;  %v6310_v7 = vperm.slane %v6302_v45, %v11720_v61  ;;  %v6311_v30 = vrot.slane %v6294_v19, 4 }
 0x931   : > { %v6250_v22 = vsel %vm3409_vm11, %v6234_v48, %v6249_v52  ;;  %v6261_v17 = vrot.slane %v12574_v33, 4  ;;  %v6313_v58 = vrot.slane %v6298_v27, 4  ;;  %v6315_v50 = vrot.slane %v6306_v15, 4 }
 0x932   : > { %v6248_v29 = vsel %vm3409_vm11, %v6247_v39, %v6224_v26  ;;  %v6258_v18 = vperm.slane %v6250_v22, %v11720_v61  ;;  %v6259_v51 = vrot.slane %v12580_v4, 4  ;;  %v6312_v47 = vsel %vm3409_vm11, 0.0, %v6311_v30 }
 0x933   : > { %v6254_v36 = vperm.slane %v6248_v29, %v11720_v61  ;;  %v6262_v12 = vsel %vm3409_vm11, 0.0, %v6261_v17  ;;  %v6314_v34 = vsel %vm3409_vm11, 0.0, %v6313_v58  ;;  %v6317_v55 = vrot.slane %v6310_v7, 4 }
 0x934   : > { %v6260_v62 = vsel %vm3409_vm11, 0.0, %v6259_v51  ;;  %v6265_v63 = vrot.slane %v6258_v18, 4  ;;  %v6316_v32 = vsel %vm3409_vm11, 0.0, %v6315_v50  ;;  %v6383_v49 = vrot.slane %v12535_v38, 4 }
 0x935   : > { %v6263_v37 = vrot.slane %v6254_v36, 4  ;;  %v6388_v3 = vperm.slane %v12535_v38, %v11637_v59  ;;  %v6318_v41 = vsel %vm3409_vm11, 0.0, %v6317_v55  ;;  %v6431_v20 = vrot.slane %v12507_v44, 6 }
 0x936   : > { %v6266_v14 = vsel %vm3409_vm11, 0.0, %v6265_v63  ;;  %v6432_v35 = vrot.slane %v12507_v44, 7  ;;  %v6384_v11 = vsel %vm3409_vm11, 0.0, %v6383_v49  ;;  %v6433_v26 = vperm.slane %v12507_v44, 0 }
 0x937   : > { %v6264_v42 = vsel %vm3409_vm11, 0.0, %v6263_v37  ;;  %v6393_v2 = vrot.slane %v6388_v3, 4  ;;  %v6396_v0 = vsel %vm3409_vm11, %v6388_v3, %v6395_v40  ;;  %v6392_v31 = vperm.slane %v6384_v11, %v11637_v59 }
 0x938   : > { %v6404_v38 = vperm.slane %v6396_v0, %v11720_v61  ;;  %v6434_v24 = vperm.slane %v6426_v53, 0  ;;  %v6435_v57 = vperm.slane %v6427_v6, 0  ;;  %v6436_v48 = vperm.slane %v6428_v23, 0 }
 0x939   : > { %v6394_v1 = vsel %vm3409_vm11, %v6393_v2, %v12544_v13  ;;  %v6437_v40 = vperm.slane %v6429_v8, 0  ;;  %v6405_v52 = vrot.slane %v6392_v31, 4  ;;  %v6408_v16 = vsel %vm3409_vm11, %v6392_v31, %v6407_v25 }
 0x93a   : > { %v6400_v46 = vperm.slane %v6394_v1, %v11720_v61  ;;  %v6419_v21 = vrot.slane %v6404_v38, 4  ;;  %v6416_v53 = vperm.slane %v6408_v16, %v11720_v61  ;;  %v6438_v13 = vperm.slane %v6430_v10, 0 }
 0x93b   : > { %v6439_v39 = vperm.slane %v6431_v20, 0  ;;  %v6440_v45 = vperm.slane %v6432_v35, 0  ;;  %v6406_v6 = vsel %vm3409_vm11, %v6405_v52, %v12555_v43  ;;  %v6449_v8 = vmul.f32 %v6433_v26, %v6294_v19 }
 0x93c   : > { %v6417_v23 = vrot.slane %v6400_v46, 4  ;;  %v6420_v22 = vsel %vm3409_vm11, 0.0, %v6419_v21  ;;  %v6412_v17 = vperm.slane %v6406_v6, %v11720_v61  ;;  %v6423_v30 = vrot.slane %v6416_v53, 4 }
 0x93d   : > { %v6450_v29 = vmul.f32 %v6434_v24, %v6312_v47  ;;  %v6451_v25 = vmul.f32 %v6435_v57, %v6298_v27  ;;  %v6452_v58 = vmul.f32 %v6436_v48, %v6314_v34  ;;  %v6453_v50 = vmul.f32 %v6437_v40, %v6306_v15 }
 0x93e   : > { %v6418_v51 = vsel %vm3409_vm11, 0.0, %v6417_v23  ;;  %v6454_v44 = vmul.f32 %v6438_v13, %v6316_v32  ;;  %v6421_v10 = vrot.slane %v6412_v17, 4  ;;  %v6424_v63 = vsel %vm3409_vm11, 0.0, %v6423_v30 }
 0x93f   : > { %v6455_v55 = vmul.f32 %v6439_v39, %v6310_v7  ;;  %v6456_v37 = vmul.f32 %v6440_v45, %v6318_v41  ;;  %v6457_v43 = vmul.f32 %v6400_v46, %v12580_v4  ;;  %v6458_v49 = vmul.f32 %v6418_v51, %v6260_v62 }
 0x940   : > { %v6459_v19 = vmul.f32 %v6404_v38, %v12574_v33  ;;  %v6460_v3 = vmul.f32 %v6420_v22, %v6262_v12  ;;  %v6422_v20 = vsel %vm3409_vm11, 0.0, %v6421_v10  ;;  %v6461_v47 = vmul.f32 %v6412_v17, %v6254_v36 }
 0x941   : > { %v6463_v27 = vmul.f32 %v6416_v53, %v6258_v18  ;;  %v6464_v35 = vmul.f32 %v6424_v63, %v6266_v14  ;;  %v6462_v11 = vmul.f32 %v6422_v20, %v6264_v42  ;;  %v12633_v34 = vadd.f32 %v6457_v43, %v6449_v8 }
 0x942   : > { %v12635_v15 = vadd.f32 %v6458_v49, %v6450_v29  ;;  %v12637_v32 = vadd.f32 %v6459_v19, %v6451_v25  ;;  %v12639_v7 = vadd.f32 %v6460_v3, %v6452_v58  ;;  %v12641_v41 = vadd.f32 %v6461_v47, %v6453_v50 }
 0x943   : > { %v12643_v4 = vadd.f32 %v6463_v27, %v6455_v55  ;;  %v12645_v33 = vadd.f32 %v6464_v35, %v6456_v37  ;;  %v12647_v12 = vadd.f32 %v6462_v11, %v6454_v44  ;;  %v6489_v18 = vsel %vm3683_vm0, %v12633_v34, 0.0 }
 0x944   : > { %v6496_v36 = vsel %vm3683_vm0, %v12635_v15, 0.0  ;;  %v6490_v62 = vrot.slane %v6489_v18, 4  ;;  %v6503_v42 = vsel %vm3683_vm0, %v12637_v32, 0.0  ;;  %v6510_v0 = vsel %vm3683_vm0, %v12639_v7, 0.0 }
 0x945   : > { %v6497_v14 = vrot.slane %v6496_v36, 4  ;;  %v6504_v2 = vrot.slane %v6503_v42, 4  ;;  %v6517_v54 = vsel %vm3683_vm0, %v12641_v41, 0.0  ;;  %v6081_v31 = vperm.slane %v12455_v9, 4 }
 0x946   : > { %v6491_v38 = vadd.f32 %v6490_v62, %v6489_v18  ;;  %v6511_v24 = vrot.slane %v6510_v0, 4  ;;  %v6070_v1 = vadd.f32 %v12483_v56, %v12198_v28  ;;  %v6518_v48 = vrot.slane %v6517_v54, 4 }
 0x947   : > { %v6498_v26 = vadd.f32 %v6497_v14, %v6496_v36  ;;  %v6505_v57 = vadd.f32 %v6504_v2, %v6503_v42  ;;  %v6524_v40 = vsel %vm3683_vm0, %v12647_v12, 0.0  ;;  %v6531_v28 = vsel %vm3683_vm0, %v12643_v4, 0.0 }
 0x948   : > { %v6492_v46 = vrot.slane %v6491_v38, 2  ;;  %v6512_v16 = vadd.f32 %v6511_v24, %v6510_v0  ;;  %v6519_v53 = vadd.f32 %v6518_v48, %v6517_v54  ;;  %v6525_v13 = vrot.slane %v6524_v40, 4 }
 0x949   : > { %v6499_v52 = vrot.slane %v6498_v26, 2  ;;  %v6506_v21 = vrot.slane %v6505_v57, 2  ;;  %v6097_v23 = vadd.f32 %v6081_v31, %v6070_v1  ;;  %v6532_v25 = vrot.slane %v6531_v28, 4 }
 0x94a   : > { %v6493_v39 = vadd.f32 %v6492_v46, %v6491_v38  ;;  %v6513_v6 = vrot.slane %v6512_v16, 2  ;;  %v6520_v8 = vrot.slane %v6519_v53, 2  ;;  %v6526_v17 = vadd.f32 %v6525_v13, %v6524_v40 }
 0x94b   : > { %v6500_v45 = vadd.f32 %v6499_v52, %v6498_v26  ;;  %v6507_v22 = vadd.f32 %v6506_v21, %v6505_v57  ;;  %v6538_v44 = vsel %vm3683_vm0, %v12645_v33, 0.0  ;;  %v6533_v37 = vadd.f32 %v6532_v25, %v6531_v28 }
 0x94c   : > { %v6494_v56 = vrot.slane %v6493_v39, 1  ;;  %v6514_v29 = vadd.f32 %v6513_v6, %v6512_v16  ;;  %v6521_v58 = vadd.f32 %v6520_v8, %v6519_v53  ;;  %v6527_v50 = vrot.slane %v6526_v17, 2 }
 0x94d   : > { %v6501_v30 = vrot.slane %v6500_v45, 1  ;;  %v6508_v51 = vrot.slane %v6507_v22, 1  ;;  %v6539_v3 = vrot.slane %v6538_v44, 4  ;;  %v6534_v47 = vrot.slane %v6533_v37, 2 }
 0x94e   : > { %v6495_v10 = vadd.f32 %v6494_v56, %v6493_v39  ;;  %v6515_v55 = vrot.slane %v6514_v29, 1  ;;  %v6522_v49 = vrot.slane %v6521_v58, 1  ;;  %v6528_v19 = vadd.f32 %v6527_v50, %v6526_v17 }
 0x94f   : > { %v6502_v63 = vadd.f32 %v6501_v30, %v6500_v45  ;;  %v6509_v43 = vadd.f32 %v6508_v51, %v6507_v22  ;;  %v6540_v36 = vadd.f32 %v6539_v3, %v6538_v44  ;;  %v6535_v14 = vadd.f32 %v6534_v47, %v6533_v37 }
 0x950   : > { %v6516_v20 = vadd.f32 %v6515_v55, %v6514_v29  ;;  %v6545_v27 = vmul.f32 0.5, %v6495_v10  ;;  %v6523_v11 = vadd.f32 %v6522_v49, %v6521_v58  ;;  %v6529_v18 = vrot.slane %v6528_v19, 1 }
 0x951   : > { %v6546_v35 = vmul.f32 0.5, %v6502_v63  ;;  %v6547_v62 = vmul.f32 0.5, %v6509_v43  ;;  %vm13055_vm3 = vcmask 1041409   ;;  %v9044_v0 = vmul.f32 -1.442695, %v6097_v23 }
 0x952   : > { %v6548_v42 = vmul.f32 0.5, %v6516_v20  ;;  %v6530_v54 = vadd.f32 %v6529_v18, %v6528_v19  ;;  %v6541_v31 = vrot.slane %v6540_v36, 2  ;;  %v6549_v38 = vmul.f32 0.5, %v6523_v11 }
 0x953   : > { %v6625_v2 = vsel %vm13055_vm3, %v6546_v35, %v6545_v27  ;;  %v6536_v24 = vrot.slane %v6535_v14, 1  ;;  %vm13057_vm5 = vcmask 1043459   ;;  %9973 = vpow2.f32 %v9044_v0 }
 0x954   : > { %v6626_v26 = vsel %vm13056_vm4, %v6547_v62, %v6625_v2  ;;  %v6071_v57 = vadd.f32 %v12577_v5, %v12201_v60  ;;  %v6542_v48 = vadd.f32 %v6541_v31, %v6540_v36  ;;  %v6550_v40 = vmul.f32 0.5, %v6530_v54 }
 0x955   : > { %v6627_v1 = vsel %vm13057_vm5, %v6548_v42, %v6626_v26  ;;  %vm13058_vm6 = vcmask 1044484   ;;  %v6082_v52 = vperm.slane %v12455_v9, 5  ;;  %v6537_v16 = vadd.f32 %v6536_v24, %v6535_v14 }
 0x956   : > { %v6628_v46 = vsel %vm13058_vm6, %v6549_v38, %v6627_v1  ;;  %v6543_v21 = vrot.slane %v6542_v48, 1  ;;  %vm6653_vm4 = vcmask 7168   ;;  %v10547_v26 = vmov -inf  }
 0x957   : > { %v6629_v53 = vsel %vm13059_vm7, %v6550_v40, %v6628_v46  ;;  %v6098_v13 = vadd.f32 %v6082_v52, %v6071_v57  ;;  %v6551_v39 = vmul.f32 0.5, %v6537_v16  ;;  %6654 = vst.msk [vmem:[#allocation3] sm:$0xff] %vm6653_vm4, %v10547_v26  ;;  %v10548_v40 = vmov 0.0  }
 0x958   : > { %v6544_v45 = vadd.f32 %v6543_v21, %v6542_v48  ;;  %6655 = vst.msk [vmem:[#allocation4] sm:$0xff] %vm6653_vm4, %v10548_v40 }
 0x959   : > { %v9045_v6 = vmul.f32 -1.442695, %v6098_v13  ;;  %v9974_v23 = vpop.eup %9973  ;;  %v6630_v22 = vsel %vm13060_vm14, %v6551_v39, %v6629_v53 }
 0x95a   : > { %v6552_v8 = vmul.f32 0.5, %v6544_v45  ;;  %v6123_v60 = vadd.f32 1.0, %v9974_v23 }
 0x95b   : > { %9975 = vpow2.f32 %v9045_v6 }
 0x95c   : > { %v6631_v5 = vsel %vm13061_vm9, %v6552_v8, %v6630_v22  ;;  %9977 = vrcp.f32 %v6123_v60  ;;  %v6196_v29 = vand.u32 2147483648, %v6123_v60  ;;  %v6194_v51 = vand.u32 2147483647, %v6123_v60 }
 0x95d   : > { %9046 = vst [vmem:[%s11003_s11 + $0x8] sm:$0xff] %v6631_v5  ;;  %vm6190_vm8 = vweird.f32 %v6123_v60 }
 0x95e   : > { %v6197_v44 = vor.u32 1.1754944e-38, %v6196_v29  ;;  %vm6195_vm10 = vcmp.eq.f32.partialorder %v6194_v51, 8.507059e+37 }
 0x961   : > { %v9976_v17 = vpop.eup %9975 }
 0x962   : > { %v6124_v9 = vadd.f32 1.0, %v9976_v17  ;;  %v9978_v28 = vpop.eup %9977 }
 0x963   : > { %v6186_v56 = vmul.f32 %v9978_v28, %v6123_v60  ;;  %vm6191_vm12 = vweird.f32 %v9978_v28 }
 0x964   : > { %9979 = vrcp.f32 %v6124_v9  ;;  %vm6192_vm15 = vmor %vm6190_vm8, %vm6191_vm12  ;;  %v6211_v49 = vand.u32 2147483648, %v6124_v9  ;;  %v6209_v20 = vand.u32 2147483647, %v6124_v9  ;;  %vm6205_vm1 = vweird.f32 %v6124_v9 }
 0x965   : > { %v6187_v30 = vsub.f32 1.0, %v6186_v56  ;;  %9981 = vtanh.f32 %v12633_v34 }
 0x966   : > { %9983 = vtanh.f32 %v12635_v15  ;;  %v6212_v11 = vor.u32 1.1754944e-38, %v6211_v49  ;;  %vm6210_vm3 = vcmp.eq.f32.partialorder %v6209_v20, 8.507059e+37 }
 0x967   : > { %v6188_v25 = vmul.f32 %v9978_v28, %v6187_v30  ;;  %9985 = vtanh.f32 %v12637_v32 }
 0x968   : > { %9987 = vtanh.f32 %v12639_v7 }
 0x969   : > { %v6189_v50 = vadd.f32 %v9978_v28, %v6188_v25  ;;  %9989 = vtanh.f32 %v12641_v41 }
 0x96a   : > { %v9980_v58 = vpop.eup %9979  ;;  %9991 = vtanh.f32 %v12643_v4 }
 0x96b   : > { %v6201_v10 = vmul.f32 %v9980_v58, %v6124_v9  ;;  %v6193_v63 = vsel %vm6192_vm15, %v9978_v28, %v6189_v50  ;;  %vm6206_vm13 = vweird.f32 %v9980_v58  ;;  %v9982_v42 = vpop.eup %9981  ;;  %9993 = vtanh.f32 %v12645_v33 }
 0x96c   : > { %v6198_v55 = vsel %vm6195_vm10, %v6197_v44, %v6193_v63  ;;  %vm6207_vm2 = vmor %vm6205_vm1, %vm6206_vm13  ;;  %v9984_v54 = vpop.eup %9983  ;;  %9995 = vtanh.f32 %v12647_v12 }
 0x96d   : > { %v6202_v37 = vsub.f32 1.0, %v6201_v10  ;;  %v6319_v43 = vrot.slane %v6198_v55, 4  ;;  %v6324_v19 = vperm.slane %v6198_v55, %v11637_v59  ;;  %v9986_v38 = vpop.eup %9985 }
 0x96e   : > { %v9988_v4 = vpop.eup %9987 }
 0x96f   : > { %v6203_v3 = vmul.f32 %v9980_v58, %v6202_v37  ;;  %v6320_v47 = vsel %vm3409_vm11, 0.0, %v6319_v43  ;;  %v6341_v18 = vrot.slane %v6324_v19, 4  ;;  %v9990_v46 = vpop.eup %9989 }
 0x970   : > { %v6328_v35 = vperm.slane %v6320_v47, %v11637_v59  ;;  %v9992_v33 = vpop.eup %9991 }
 0x971   : > { %v6204_v27 = vadd.f32 %v9980_v58, %v6203_v3  ;;  %v9994_v60 = vpop.eup %9993 }
 0x972   : > { %v6353_v15 = vrot.slane %v6328_v35, 4  ;;  %v9996_v25 = vpop.eup %9995 }
 0x973   : > { %v6208_v36 = vsel %vm6207_vm2, %v9980_v58, %v6204_v27 }
 0x974   : > { %v6213_v62 = vsel %vm6210_vm3, %v6212_v11, %v6208_v36 }
 0x975   : > { %v6329_v14 = vrot.slane %v6213_v62, 4  ;;  %v6334_v34 = vperm.slane %v6213_v62, %v11637_v59 }
 0x977   : > { %v6330_v2 = vsel %vm3409_vm11, 0.0, %v6329_v14  ;;  %v6339_v0 = vrot.slane %v6334_v34, 4  ;;  %v6342_v32 = vsel %vm3409_vm11, %v6334_v34, %v6341_v18 }
 0x978   : > { %v6338_v31 = vperm.slane %v6330_v2, %v11637_v59  ;;  %v6350_v7 = vperm.slane %v6342_v32, %v11720_v61 }
 0x979   : > { %v6340_v41 = vsel %vm3409_vm11, %v6339_v0, %v6324_v19 }
 0x97a   : > { %v6346_v24 = vperm.slane %v6340_v41, %v11720_v61  ;;  %v6351_v1 = vrot.slane %v6338_v31, 4  ;;  %v6354_v57 = vsel %vm3409_vm11, %v6338_v31, %v6353_v15  ;;  %v6365_v48 = vrot.slane %v6350_v7, 4 }
 0x97b   : > { %v6362_v59 = vperm.slane %v6354_v57, %v11720_v61  ;;  %v6483_v52 = vmul.f32 %v9986_v38, %v6350_v7 }
 0x97c   : > { %v6352_v16 = vsel %vm3409_vm11, %v6351_v1, %v6328_v35  ;;  %v6363_v21 = vrot.slane %v6346_v24, 4  ;;  %v6366_v53 = vsel %vm3409_vm11, 0.0, %v6365_v48  ;;  %v6481_v13 = vmul.f32 %v9982_v42, %v6346_v24 }
 0x97d   : > { %v6358_v39 = vperm.slane %v6352_v16, %v11720_v61  ;;  %v6369_v45 = vrot.slane %v6362_v59, 4  ;;  %v6484_v6 = vmul.f32 %v9988_v4, %v6366_v53  ;;  %v6487_v23 = vmul.f32 %v9992_v33, %v6362_v59 }
 0x97e   : > { %v6364_v22 = vsel %vm3409_vm11, 0.0, %v6363_v21  ;;  %v6553_v8 = vsel %vm3683_vm0, %v6481_v13, 0.0  ;;  %v6567_v12 = vsel %vm3683_vm0, %v6483_v52, 0.0 }
 0x97f   : > { %v6367_v5 = vrot.slane %v6358_v39, 4  ;;  %v6370_v17 = vsel %vm3409_vm11, 0.0, %v6369_v45  ;;  %v6482_v9 = vmul.f32 %v9984_v54, %v6364_v22  ;;  %v6485_v28 = vmul.f32 %v9990_v46, %v6358_v39 }
 0x980   : > { %v6488_v56 = vmul.f32 %v9994_v60, %v6370_v17  ;;  %v6554_v30 = vrot.slane %v6553_v8, 4  ;;  %v6568_v29 = vrot.slane %v6567_v12, 4  ;;  %v6574_v61 = vsel %vm3683_vm0, %v6484_v6, 0.0 }
 0x981   : > { %v6368_v51 = vsel %vm3409_vm11, 0.0, %v6367_v5  ;;  %v6560_v58 = vsel %vm3683_vm0, %v6482_v9, 0.0  ;;  %v6575_v50 = vrot.slane %v6574_v61, 4  ;;  %v6581_v44 = vsel %vm3683_vm0, %v6485_v28, 0.0 }
 0x982   : > { %v6486_v10 = vmul.f32 %v9996_v25, %v6368_v51  ;;  %v6555_v63 = vadd.f32 %v6554_v30, %v6553_v8  ;;  %v6561_v55 = vrot.slane %v6560_v58, 4  ;;  %v6569_v37 = vadd.f32 %v6568_v29, %v6567_v12 }
 0x983   : > { %v6576_v43 = vadd.f32 %v6575_v50, %v6574_v61  ;;  %v6582_v49 = vrot.slane %v6581_v44, 4  ;;  %v6595_v19 = vsel %vm3683_vm0, %v6487_v23, 0.0  ;;  %v6602_v3 = vsel %vm3683_vm0, %v6488_v56, 0.0 }
 0x984   : > { %v6556_v20 = vrot.slane %v6555_v63, 2  ;;  %v6562_v47 = vadd.f32 %v6561_v55, %v6560_v58  ;;  %v6570_v27 = vrot.slane %v6569_v37, 2  ;;  %v6588_v35 = vsel %vm3683_vm0, %v6486_v10, 0.0 }
 0x985   : > { %v6577_v11 = vrot.slane %v6576_v43, 2  ;;  %v6583_v18 = vadd.f32 %v6582_v49, %v6581_v44  ;;  %v6589_v36 = vrot.slane %v6588_v35, 4  ;;  %v6596_v62 = vrot.slane %v6595_v19, 4 }
 0x986   : > { %v6557_v14 = vadd.f32 %v6556_v20, %v6555_v63  ;;  %v6563_v34 = vrot.slane %v6562_v47, 2  ;;  %v6571_v15 = vadd.f32 %v6570_v27, %v6569_v37  ;;  %v6603_v42 = vrot.slane %v6602_v3, 4 }
 0x987   : > { %v6578_v2 = vadd.f32 %v6577_v11, %v6576_v43  ;;  %v6584_v0 = vrot.slane %v6583_v18, 2  ;;  %v6590_v32 = vadd.f32 %v6589_v36, %v6588_v35  ;;  %v6597_v54 = vadd.f32 %v6596_v62, %v6595_v19 }
 0x988   : > { %v6558_v31 = vrot.slane %v6557_v14, 1  ;;  %v6564_v7 = vadd.f32 %v6563_v34, %v6562_v47  ;;  %v6572_v38 = vrot.slane %v6571_v15, 1  ;;  %v6604_v41 = vadd.f32 %v6603_v42, %v6602_v3 }
 0x989   : > { %v6579_v26 = vrot.slane %v6578_v2, 1  ;;  %v6585_v4 = vadd.f32 %v6584_v0, %v6583_v18  ;;  %v6591_v24 = vrot.slane %v6590_v32, 2  ;;  %v6598_v1 = vrot.slane %v6597_v54, 2 }
 0x98a   : > { %v6559_v57 = vadd.f32 %v6558_v31, %v6557_v14  ;;  %v6565_v48 = vrot.slane %v6564_v7, 1  ;;  %v6605_v40 = vrot.slane %v6604_v41, 2  ;;  %v6573_v46 = vadd.f32 %v6572_v38, %v6571_v15 }
 0x98b   : > { %v6586_v59 = vrot.slane %v6585_v4, 1  ;;  %v6592_v52 = vadd.f32 %v6591_v24, %v6590_v32  ;;  %v6599_v33 = vadd.f32 %v6598_v1, %v6597_v54  ;;  %v6580_v21 = vadd.f32 %v6579_v26, %v6578_v2 }
 0x98c   : > { %v6566_v16 = vadd.f32 %v6565_v48, %v6564_v7  ;;  %v6606_v53 = vadd.f32 %v6605_v40, %v6604_v41  ;;  %v6609_v23 = vmul.f32 0.5, %v6559_v57  ;;  %v6611_v60 = vmul.f32 0.5, %v6573_v46 }
 0x98d   : > { %v6587_v13 = vadd.f32 %v6586_v59, %v6585_v4  ;;  %v6593_v39 = vrot.slane %v6592_v52, 1  ;;  %v6600_v45 = vrot.slane %v6599_v33, 1  ;;  %v6612_v17 = vmul.f32 0.5, %v6580_v21 }
 0x98e   : > { %v6607_v6 = vrot.slane %v6606_v53, 1  ;;  %v6610_v22 = vmul.f32 0.5, %v6566_v16  ;;  %vm13062_vm11 = vcmask 1041409   ;;  %vm13063_vm0 = vcmask 1042434  }
 0x98f   : > { %v6594_v8 = vadd.f32 %v6593_v39, %v6592_v52  ;;  %v6601_v12 = vadd.f32 %v6600_v45, %v6599_v33  ;;  %v6613_v28 = vmul.f32 0.5, %v6587_v13 }
 0x990   : > { %v6608_v5 = vadd.f32 %v6607_v6, %v6606_v53  ;;  %v6643_v9 = vsel %vm13062_vm11, %v6610_v22, %v6609_v23 }
 0x991   : > { %v6614_v56 = vmul.f32 0.5, %v6594_v8  ;;  %v6644_v30 = vsel %vm13063_vm0, %v6611_v60, %v6643_v9  ;;  %v6615_v61 = vmul.f32 0.5, %v6601_v12 }
 0x992   : > { %v6645_v29 = vsel %vm13057_vm5, %v6612_v17, %v6644_v30  ;;  %v6616_v51 = vmul.f32 0.5, %v6608_v5 }
 0x993   : > { %v6646_v25 = vsel %vm13058_vm6, %v6613_v28, %v6645_v29 }
 0x994   : > { %v6647_v58 = vsel %vm13059_vm7, %v6614_v56, %v6646_v25 }
 0x995   : > { %v6648_v50 = vsel %vm13060_vm14, %v6615_v61, %v6647_v58 }
 0x996   : > { %v6649_v44 = vsel %vm13061_vm9, %v6616_v51, %v6648_v50 }
 0x997   : > { %9047 = vst [vmem:[%s11006_s26 + $0x8] sm:$0xff] %v6649_v44 }
 0x998 PF: > { %v9538_v10 = vld [vmem:[%s10969_s23 + $0x38] sm:$0xff]  ;;  %v9537_v63 = vld [vmem:[%s10969_s23 + $0x30] sm:$0xff]  ;;  %v9536_v43 = vld [vmem:[%s10969_s23 + $0x28] sm:$0xff]  ;;  %s13064_s12 = scalar_lea.vmem [#allocation21], %s10955_s7  ;;  %s13066_s19 = scalar_lea.vmem [#allocation19], %s10955_s7  ;;  %v10549_v45 = vmov 0  }
 0x999   : > { %6730 = vmatpush.bf16.msra.mxu0 %v9538_v10  ;;  %v9546_v55 = vld [vmem:[%s10958_s10 + $0x38] sm:$0xff]  ;;  %v9545_v37 = vld [vmem:[%s10958_s10 + $0x30] sm:$0xff]  ;;  %v9544_v49 = vld [vmem:[%s10958_s10 + $0x28] sm:$0xff]  ;;  %10014 = vset.pattern.permute.xlu0 %v10549_v45  ;;  %vm6869_vm13 = vcmask 7168  }
 0x99a   : > { %6831 = vmatpush.bf16.msra.mxu1 %v9546_v55  ;;  %v9535_v19 = vld [vmem:[%s10969_s23 + $0x20] sm:$0xff]  ;;  %v9534_v20 = vld [vmem:[%s10969_s23 + $0x18] sm:$0xff]  ;;  %v9533_v27 = vld [vmem:[%s10969_s23 + $0x10] sm:$0xff] }
 0x99b   : > { %v9543_v3 = vld [vmem:[%s10958_s10 + $0x20] sm:$0xff]  ;;  %v9542_v47 = vld [vmem:[%s10958_s10 + $0x18] sm:$0xff]  ;;  %v9541_v35 = vld [vmem:[%s10958_s10 + $0x10] sm:$0xff] }
 0x99c   : > { %v9532_v11 = vld [vmem:[%s10969_s23 + $0x8] sm:$0xff]  ;;  %v6659_v36 = vld [vmem:[%s11000_s27] sm:$0xff]  ;;  %v6853_v56 = vld [vmem:[#allocation4] sm:$0xff] }
 0x99d   : > { %6731 = vmatpush.bf16.msra.mxu0 %v9537_v63  ;;  %v6658_v18 = vld [vmem:[%s10924_s4] sm:$0xff]  ;;  %s13065_s4 = sld [smem:[#allocation44_spill]]  ;;  %v6849_v6 = vld [vmem:[#allocation3] sm:$0xff] }
 0x99e   : > { %6832 = vmatpush.bf16.msra.mxu1 %v9545_v37  ;;  %v9540_v62 = vld [vmem:[%s10958_s10 + $0x8] sm:$0xff]  ;;  %v6660_v14 = vadd.f32 %v6659_v36, %v6658_v18  ;;  %v9539_v15 = vld [vmem:[%s10958_s10] sm:$0xff]  ;;  %v10015_v32 = vld [vmem:[%s13064_s12] ss:$0 sm:$0xff] }
 0x99f   : > { %v9531_v34 = vld [vmem:[%s10969_s23] sm:$0xff]  ;;  %v10016_v40 = vld [vmem:[%s13066_s19] ss:$0 sm:$0xff] }
 0x9a0   : > { %v9048_v42 = vld [vmem:[%s11006_s26 + $0x8] sm:$0xff]  ;;  %v6677_v2 = vpack.c.bf16 %v6660_v14, %v6660_v14 }
 0x9a1   : > { %6732 = vmatpush.bf16.msra.mxu0 %v9536_v43  ;;  %v6778_v0 = vpack.c.bf16 %v9048_v42, %v9048_v42 }
 0x9a2   : > { %6833 = vmatpush.bf16.msra.mxu1 %v9544_v49 }
 0x9a3   : > { %s9114_s10 = sshll.u32 %s13065_s4, 3  ;;  %p9115_p6 = scmp.ne.s32.totalorder %s13065_s4, 1 }
 0x9a4   : > { %s6847_s23 = scalar_lea.vmem [#allocation2], %s9114_s10 }
 0x9a5   : > { %6733 = vmatpush.bf16.msra.mxu0 %v9535_v19 }
 0x9a6   : > { %6834 = vmatpush.bf16.msra.mxu1 %v9543_v3 }
 0x9a9   : > { %6734 = vmatpush.bf16.msra.mxu0 %v9534_v20 }
 0x9aa   : > { %6835 = vmatpush.bf16.msra.mxu1 %v9542_v47 }
 0x9ad   : > { %6735 = vmatpush.bf16.msra.mxu0 %v9533_v27 }
 0x9ae   : > { %6836 = vmatpush.bf16.msra.mxu1 %v9541_v35 }
 0x9b1   : > { %6736 = vmatpush.bf16.msra.mxu0 %v9532_v11 }
 0x9b2   : > { %6837 = vmatpush.bf16.msra.mxu1 %v9540_v62 }
 0x9b5   : > { %6737 = vmatpush.bf16.msra.mxu0 %v9531_v34 }
 0x9b6   : > { %6838 = vmatpush.bf16.msra.mxu1 %v9539_v15 }
 0x9b8   : > { %6738 = vmatmul.bf16.vlgmr.msra.gmra.mxu0 %v6677_v2 }
 0x9b9   : > { %6839 = vmatmul.bf16.vlgmr.msra.gmra.mxu1 %v6778_v0 }
 0xa35   : > { %v6739_v54 = vpop.f32.mrf.mxu0 }
 0xa36   : > { %v6740_v31 = vadd.f32 %v10015_v32, %v6739_v54  ;;  %v6840_v7 = vpop.f32.mrf.mxu1 }
 0xa37   : > { %v6841_v16 = vadd.f32 %v10016_v40, %v6840_v7 }
 0xa38   : > { %v9081_v38 = vmul.f32 -1.442695, %v6740_v31 }
 0xa3a   : > { %10017 = vpow2.f32 %v9081_v38 }
 0xa3d   : > { %v6741_v41 = vpop.f32.mrf.mxu0 }
 0xa3e   : > { %v6842_v26 = vpop.f32.mrf.mxu1 }
 0xa40   : > { %v10018_v4 = vpop.eup %10017 }
 0xa41   : > { %v6746_v24 = vadd.f32 1.0, %v10018_v4 }
 0xa43   : > { %10019 = vrcp.f32 %v6746_v24  ;;  %v6758_v46 = vand.u32 2147483648, %v6746_v24  ;;  %v6756_v52 = vand.u32 2147483647, %v6746_v24  ;;  %vm6752_vm8 = vweird.f32 %v6746_v24 }
 0xa45   : > { %v6759_v21 = vor.u32 1.1754944e-38, %v6758_v46  ;;  %vm6757_vm10 = vcmp.eq.f32.partialorder %v6756_v52, 8.507059e+37 }
 0xa49   : > { %v10020_v1 = vpop.eup %10019 }
 0xa4a   : > { %v6748_v57 = vmul.f32 %v10020_v1, %v6746_v24  ;;  %vm6753_vm12 = vweird.f32 %v10020_v1 }
 0xa4b   : > { %vm6754_vm15 = vmor %vm6752_vm8, %vm6753_vm12 }
 0xa4c   : > { %v6749_v48 = vsub.f32 1.0, %v6748_v57 }
 0xa4e   : > { %v6750_v59 = vmul.f32 %v10020_v1, %v6749_v48 }
 0xa50   : > { %v6751_v33 = vadd.f32 %v10020_v1, %v6750_v59 }
 0xa52   : > { %v6755_v53 = vsel %vm6754_vm15, %v10020_v1, %v6751_v33 }
 0xa53   : > { %v6760_v13 = vsel %vm6757_vm10, %v6759_v21, %v6755_v53 }
 0xa54   : > { %v6844_v39 = vmul.f32 %v6841_v16, %v6760_v13  ;;  %6845 = vst [vmem:[%s1000_s14] sm:$0xff] %v6760_v13 }
 0xa56   : > { %6848 = vst [vmem:[%s6847_s23] sm:$0xff] %v6844_v39  ;;  %6850 = vmax.xlane.f32.xlu0 %v6844_v39 }
 0xac9   : > { %v6851_v23 = vpop.xlane.xlu0 %6850 }
 0xaca   : > { %v6852_v22 = vmax.f32 %v6849_v6, %v6851_v23 }
 0xacc   : > { %v6854_v8 = vsub.f32 %v6849_v6, %v6852_v22  ;;  %6871 = vst.msk [vmem:[#allocation3] sm:$0xff] %vm6869_vm13, %v6852_v22  ;;  %6860 = vperm.xlu0 %10014, %v6852_v22  }
 0xace   : > { %v6855_v9 = vmul.f32 1.442695, %v6854_v8 }
 0xb3e   : > { %v6861_v12 = vpop.permute.xlu0 %6860 }
 0xb3f   : > { %v6863_v60 = vsub.f32 %v6844_v39, %v6861_v12 }
 0xb41   : > { %v6864_v5 = vmul.f32 1.442695, %v6863_v60 }
 0xb43   : > { %10021 = vpow2.f32 %v6864_v5 }
 0xb44   : > { %10023 = vpow2.f32 %v6855_v9 }
 0xb49   : > { %v10022_v17 = vpop.eup %10021 }
 0xb4a   : > { %6866 = vadd.xlane.f32.xlu1 %v10022_v17  ;;  %v10024_v28 = vpop.eup %10023 }
 0xb4b   : > { %v6857_v30 = vmul.f32 %v10024_v28, %v6853_v56 }
 0xbbc   : > { %6875 = sbr.rel (%p9115_p6) target bundleno = 3146 (0xc4a), region = 200 }
 0xbbd   : > { %v6867_v29 = vpop.xlane.xlu1 %6866 }
 0xbbe   : > { %v6868_v61 = vadd.f32 %v6867_v29, %v6857_v30 }
 0xbc0   : > { %6870 = vst.msk [vmem:[#allocation4] sm:$0xff] %vm6869_vm13, %v6868_v61 }
 0xbc1   : > { %v10550_v51 = vmov 0   ;;  %v6876_v50 = vld [vmem:[#allocation3] sm:$0xff]  ;;  %v6881_v63 = vld [vmem:[#allocation2] sm:$0xff]  ;;  %v6890_v55 = vld [vmem:[#allocation2 + $0x8] sm:$0xff] }
 0xbc2   : > { %10025 = vset.pattern.permute.xlu0 %v10550_v51 }
 0xbc7   : > { %v6877_v25 = vld [vmem:[#allocation4] sm:$0xff] }
 0xbc8   : > { %10026 = vlog2.f32 %v6877_v25 }
 0xbce   : > { %v10027_v58 = vpop.eup %10026 }
 0xbcf   : > { %v6879_v44 = vmul.f32 0.6931472, %v10027_v58 }
 0xbd1   : > { %v6880_v10 = vadd.f32 %v6879_v44, %v6876_v50 }
 0xbd3   : > { %6884 = vperm.xlu0 %10025, %v6880_v10  }
 0xc45   : > { %v6885_v37 = vpop.permute.xlu0 %6884 }
 0xc46   : > { %v6887_v43 = vsub.f32 %v6881_v63, %v6885_v37  ;;  %v6891_v49 = vsub.f32 %v6890_v55, %v6885_v37 }
 0xc48   : > { %6888 = vst [vmem:[%s11009_s0] sm:$0xff] %v6887_v43 }
 0xc49   : > { %6892 = vst [vmem:[%s11009_s0 + $0x8] sm:$0xff] %v6891_v49 }
 0xc4a PF: > { %s13067_s7 = sld [smem:[#allocation39_spill]]  ;;  %s6902_s2 = scalar_lea.sflag [#allocation7], %s10921_s18 }
 0xc4b   : > { %s13069_s5 = sld [smem:[#allocation53_spill]] }
 0xc50   : > { %s13068_s3 = sand.u32 1, %s13067_s7  }
 0xc51   : > { %s12755_s8 = scalar_lea.sflag [#allocation26], %s13068_s3  ;;  %p13070_p3 = scmp.ne.s32.totalorder %s13069_s5, 0 }
 0xc52   : > { %s13071_s21 = sld [smem:[#allocation72_spill]] (%p13070_p3)  ;;  %v6946_v19 = vld [vmem:[%s11003_s11] sm:$0xff] (%p13070_p3)  ;;  %v6948_v3 = vld [vmem:[%s11003_s11 + $0x8] sm:$0xff] (%p13070_p3) }
 0xc53   : > { %6913 = sbr.rel (!%p13070_p3) target bundleno = 3163 (0xc5b), region = 204 }
 0xc58   : > { %s6915_s17 = scalar_lea.vmem %s13071_s21, %s10986_s25 }
 0xc59   : > { %6947 = vst [vmem:[%s6915_s17] sm:$0xff] %v6946_v19 }
 0xc5a   : > { %6949 = vst [vmem:[%s6915_s17 + $0x10] sm:$0xff] %v6948_v3 }
 0xc5b PF: > { %s13072_s1 = sld [smem:[#allocation53_spill]] }
 0xc61   : > { %p13073_p12 = scmp.ne.s32.totalorder %s13072_s1, 0 }
 0xc62   : > { %s13074_s27 = sld [smem:[#allocation73_spill]] (%p13073_p12)  ;;  %v6988_v20 = vld [vmem:[%s11006_s26] sm:$0xff] (%p13073_p12)  ;;  %v6990_v47 = vld [vmem:[%s11006_s26 + $0x8] sm:$0xff] (%p13073_p12) }
 0xc63   : > { %6955 = sbr.rel (!%p13073_p12) target bundleno = 3179 (0xc6b), region = 242 }
 0xc68   : > { %s6957_s24 = scalar_lea.vmem %s13074_s27, %s10986_s25 }
 0xc69   : > { %6989 = vst [vmem:[%s6957_s24] sm:$0xff] %v6988_v20 }
 0xc6a   : > { %6991 = vst [vmem:[%s6957_s24 + $0x10] sm:$0xff] %v6990_v47 }
 0xc6b PF: > { %s13075_s13 = sld [smem:[#allocation45_spill]]  ;;  %s7004_s19 = sshll.u32 %s11009_s0, 4  ;;  %s7005_s19 = int_to_ptr.vmem [resolvable:$true] %s7004_s19 }
 0xc6c   : > { %s13076_s11 = sld [smem:[#allocation44_spill]] }
 0xc6d   : > { %s13077_s12 = sld [smem:[#allocation53_spill]] }
 0xc6e   : > { %s13078_s7 = sld [smem:[#allocation74_spill]] }
 0xc71   : > { %s9547_s4 = sshll.u32 %s13075_s13, 4  ;;  %s9124_s9 = sshll.u32 %s13075_s13, 1 }
 0xc72   : > { %s7016_s25 = sadd.s32 %s13076_s11, %s9124_s9 }
 0xc73   : > { %p13079_p9 = scmp.ne.s32.totalorder %s13077_s12, 0 }
 0xc74   : > { %s7002_s3 = scalar_lea.hbm %s13078_s7, %s9547_s4  ;;  %s10336_s0 = scalar_lea.hbm %s13078_s7, 32 }
 0xc75   : > { %s7006_s5 = sshll.u32 %s7002_s3, 4  ;;  %s7007_s5 = int_to_ptr.hbm [resolvable:$true] %s7006_s5 }
 0xc76   : > { %s10330_s26 = sshra.s32 %s7007_s5, 4  ;;  %s10331_s26 = int_to_ptr.hbm [resolvable:$true] %s10330_s26 }
 0xc77   : > { %s10332_s29 = scalar_lea.hbm %s10331_s26, 16  ;;  %p10337_p7 = scmp.lt.s32.totalorder %s10331_s26, %s13078_s7 }
 0xc78   : > { %p10333_p8 = scmp.ne.s32.totalorder %s10331_s26, %s10332_s29  ;;  %p10338_p0 = scmp.lt.s32.totalorder %s10336_s0, %s10332_s29 }
 0xc7a   : > { %p10334_p11 = pnand %p10333_p8, %p13079_p9  ;;  %p10339_p5 = por %p10338_p0, %p10337_p7 }
 0xc7c   : > { %p10335_p4 = pneg %p10334_p11 }
 0xc7e   : > { %p10340_p2 = pnand %p10339_p5, %p10335_p4 }
 0xc80   : > { %10343 = shalt.err (!%p10340_p2)
}
 0xc81   : > { %9576 = dma.vmem_to_hbm [thread:$0]  (%p13079_p9), %s7005_s19, 256, %s7007_s5, %s6902_s2  }
 0xc82   : > { %s9125_s27 = sshll.u32 %s7016_s25, 3  ;;  %s7020_s24 = sshll.u32 %s1000_s14, 4  ;;  %s7021_s24 = int_to_ptr.vmem [resolvable:$true] %s7020_s24 }
 0xc83   : > { %s13081_s4 = sld [smem:[#allocation75_spill]] }
 0xc89   : > { %s7018_s10 = scalar_lea.hbm %s13081_s4, %s9125_s27  ;;  %s10364_s2 = scalar_lea.hbm %s13081_s4, 32 }
 0xc8a   : > { %s7022_s23 = sshll.u32 %s7018_s10, 4  ;;  %s7023_s23 = int_to_ptr.hbm [resolvable:$true] %s7022_s23 }
 0xc8b   : > { %s10358_s3 = sshra.s32 %s7023_s23, 4  ;;  %s10359_s3 = int_to_ptr.hbm [resolvable:$true] %s10358_s3 }
 0xc8c   : > { %s10360_s9 = scalar_lea.hbm %s10359_s3, 8  ;;  %p10365_p8 = scmp.lt.s32.totalorder %s10359_s3, %s13081_s4 }
 0xc8d   : > { %p10361_p6 = scmp.ne.s32.totalorder %s10359_s3, %s10360_s9  ;;  %p10366_p9 = scmp.lt.s32.totalorder %s10364_s2, %s10360_s9 }
 0xc8f   : > { %p10362_p3 = pnand %p10361_p6, %p10798_p13  ;;  %p10367_p11 = por %p10366_p9, %p10365_p8 }
 0xc91   : > { %p10363_p12 = pneg %p10362_p3 }
 0xc93   : > { %p10368_p4 = pnand %p10367_p11, %p10363_p12 }
 0xc95   : > { %10371 = shalt.err (!%p10368_p4)
}
 0xc96   : > { %9577 = dma.vmem_to_hbm [thread:$0]  (%p10798_p13), %s7021_s24, 128, %s7023_s23, %s12755_s8  }
 0xc97 PF: > { %s13082_s19 = sld [smem:[#allocation42_spill]]  ;;  %p9608_p7 = scmp.ge.s32.totalorder %s10526_s22, 2 }
 0xc99   : > { %p9594_p0 = pnand %p9608_p7, %p10786_p10 }
 0xc9b   : > { %p9595_p5 = pneg %p9594_p0 }
 0xc9d   : > { %s7048_s25 = sand.u32 1, %s13082_s19  }
 0xc9e   : > { %s7049_s26 = scalar_lea.sflag [#allocation7], %s7048_s25 }
 0xc9f   : > { %10465 = dma.done.wait (%p9595_p5), %s7049_s26, 256  }
 0xca0   : > { %10467 = vsyncadd (%p9595_p5), %s7049_s26, 4294967040  ;;  %s13084_s29 = sld [smem:[#allocation38_spill]]  ;;  %p9597_p2 = pnand %p9608_p7, %p10802_p1 }
 0xca2   : > { %p9598_p6 = pneg %p9597_p2 }
 0xca6   : > { %s7058_s17 = sand.u32 1, %s13084_s29  }
 0xca7   : > { %s7059_s0 = scalar_lea.sflag [#allocation26], %s7058_s17 }
 0xca8   : > { %10469 = dma.done.wait (%p9598_p6), %s7059_s0, 128  }
 0xca9   : > { %10471 = vsyncadd (%p9598_p6), %s7059_s0, 4294967168  ;;  %s42_s22 = sadd.s32 1, %s10526_s22   ;;  %s13087_s24 = sld [smem:[#allocation39_spill]] }
 0xcaa   : > { %p12816_p13 = scmp.ge.s32.totalorder %s42_s22, 6   ;;  %s13088_s25 = sld [smem:[#allocation40_spill]] }
 0xcab   : > { %s13089_s26 = sld [smem:[#allocation55_spill]]  ;;  %s13097_s27 = smov %s10490_s28 }
 0xcac   : > { %s13090_s1 = sld [smem:[#allocation41_spill]]  ;;  %s13099_s0 = smov %s10502_s30 }
 0xcad   : > { %s13091_s29 = sld [smem:[#allocation50_spill]]  ;;  %s13101_s19 = smov %s10518_s20 }
 0xcae   : > { %s13092_s15 = sld [smem:[#allocation43_spill]] }
 0xcaf   : > { %s13093_s18 = sld [smem:[#allocation51_spill]] }
 0xcb0   : > { %s13094_s6 = sld [smem:[#allocation46_spill]] }
 0xcb1   : > { %s13095_s13 = sld [smem:[#allocation47_spill]] }
 0xcb2   : > { %s13096_s21 = sld [smem:[#allocation48_spill]]  ;;  %s13098_s28 = smov %s13090_s1 }
 0xcb3   :  { %41 = sbr.rel (!%p12816_p13) target bundleno = 35 (0x23), region = 428 }
 0xcb4   : > { %s13100_s30 = smov %s13092_s15 }
 0xcb6   : > { %s13102_s1 = smov %s13094_s6 }
 0xcb7   : > { %s13103_s20 = smov %s13095_s13 }
 0xcb8   :  { %7065 = vsyncpa [#allocation6], 1 }
 0xcb9   :  { %7067 = vsyncpa [#allocation6 + $0x1], 1 }
 0xcba   :  { %7068 = vsyncpa [#allocation11], 1 }
 0xcbb   :  { %7070 = vsyncpa [#allocation11 + $0x1], 1 }
 0xcbc   :  { %7071 = vsyncpa [#allocation14], 1 }
 0xcbd   :  { %7072 = vsyncpa [#allocation17], 1 }
 0xcbe   :  { %7073 = vsyncpa [#allocation7], 1 }
 0xcbf   :  { %7075 = vsyncpa [#allocation7 + $0x1], 1 }
 0xcc0   :  { %7076 = vsyncpa [#allocation26], 1 }
 0xcc1   :  { %7078 = vsyncpa [#allocation26 + $0x1], 1 }

</bundles_post_ra>
